<compile_context>
chip_gen: v7x
topology: tpu7x:2x2x1
jax: 0.10.0
libtpu: 0.0.40
codegen_flags: <defaults>
</compile_context>

<pallas_src>
import functools

import jax
import jax.numpy as jnp
import numpy as np
from jax.experimental import pallas as pl
from jax.experimental.pallas import tpu as pltpu


# ---------------------------------------------------------------------------
# Kernel: [opt ReLU] -> KxK conv (stride 1, zero pad handled in-kernel) ->
#         +bias -> [opt 2x2 MaxPool] for one (batch element, cout tile).
# Conv = K*K shifted (H*W, Cin)x(Cin, Ct) bf16 matmuls accumulated in f32.
# ---------------------------------------------------------------------------
def _conv_kernel(x_ref, w_ref, b_ref, o_ref, acc_ref, *scratch,
                 hin, win, hout, wout, ksize, pad, relu_in, pool):
    cs = pl.program_id(1)                         # cout-tile index
    wpad = win + 2 * pad                          # width of the (padded) input view

    if pad:
        xpad_ref = scratch[0]                     # (hin+2p, win+2p, cin) f32 scratch

        @pl.when(cs == 0)                         # fill once per batch element
        def _():
            xpad_ref[...] = jnp.zeros_like(xpad_ref)
            xin = x_ref[0]
            if relu_in:
                xin = jnp.maximum(xin, 0.0)       # relu(pad(x)) == pad(relu(x))
            xpad_ref[pad:pad + hin, pad:pad + win, :] = xin

        xv = xpad_ref[...]
    else:
        xv = x_ref[0]
        if relu_in:
            xv = jnp.maximum(xv, 0.0)

    wv = w_ref[...]                               # (K, K, cin, ct) bf16

    first = True
    for kw in range(ksize):
        # Shift the W (sublane) axis once per kw on the XLU; all subsequent
        # slices start at offset 0 (no per-tap sublane relayout).
        xk = xv if kw == 0 else pltpu.roll(xv, wpad - kw, axis=1)
        xk = xk[:, :wout, :].astype(jnp.bfloat16)         # offset-0 slice + bf16 cast
        for kh in range(ksize):
            contrib = jnp.einsum(
                "hwc,co->hwo", xk[kh:kh + hout], wv[kh, kw],
                preferred_element_type=jnp.float32)
            if first:
                acc_ref[...] = contrib
                first = False
            else:
                acc_ref[...] += contrib

    acc = acc_ref[...]
    if pool:                                      # 2x2 maxpool, stride 2
        oh, ow = hout // 2, wout // 2
        # H pool: splits only the leading (untiled) axis -> no relayout, pure VPU max.
        acc = acc.reshape(oh, 2, wout, -1).max(axis=1)
        # W pool on the already halved tensor.
        acc = acc.reshape(oh, ow, 2, -1).max(axis=2)
    # bias commutes exactly with maxpool -> add after pooling (fewer elements).
    acc = acc + b_ref[0].reshape(1, 1, -1)
    o_ref[0] = acc.astype(o_ref.dtype)


def _ceil_to(x, m):
    return -(-x // m) * m


def _vmem_bytes(shape, dtype):
    """Approximate VMEM footprint of a block incl. (8,128) layout padding."""
    s = list(shape)
    if len(s) >= 1:
        s[-1] = _ceil_to(s[-1], 128)
    if len(s) >= 2:
        s[-2] = _ceil_to(s[-2], 8)
    return int(np.prod(s)) * jnp.dtype(dtype).itemsize


def conv2d_pallas(x, w, b, *, padding=0, relu_in=False, pool=False):
    """x: (B,H,W,Cin) f32 NHWC; w: (K,K,Cin,Cout) bf16 HWIO; b: (Cout,) f32."""
    ksize, _, cin, cout = w.shape
    B, hin, win, _ = x.shape
    hpad, wpad = hin + 2 * padding, win + 2 * padding
    hout, wout = hpad - ksize + 1, wpad - ksize + 1
    oh, ow = (hout // 2, wout // 2) if pool else (hout, wout)

    # Cout tiling: keeps accumulator / weight / output blocks small and adds grid points.
    ct = 256 if (cout > 256 and cout % 256 == 0) else cout
    n_cs = cout // ct

    b2 = b.reshape(1, cout).astype(jnp.float32)

    in_specs = [
        pl.BlockSpec((1, hin, win, cin), lambda bi, ci: (bi, 0, 0, 0)),
        pl.BlockSpec((ksize, ksize, cin, ct), lambda bi, ci: (0, 0, 0, ci)),
        pl.BlockSpec((1, ct), lambda bi, ci: (0, ci)),
    ]
    out_spec = pl.BlockSpec((1, oh, ow, ct), lambda bi, ci: (bi, 0, 0, ci))

    scratch_shapes = [pltpu.VMEM((hout, wout, ct), jnp.float32)]   # f32 accumulator
    if padding:
        scratch_shapes.append(pltpu.VMEM((hpad, wpad, cin), jnp.float32))  # padded input

    # Explicit VMEM budget: double-buffered in/out blocks + scratch + in-kernel temporaries.
    vmem = 2 * (_vmem_bytes((hin, win, cin), x.dtype)
                + _vmem_bytes((ksize * ksize, cin, ct), w.dtype)
                + _vmem_bytes((1, ct), jnp.float32)
                + _vmem_bytes((oh, ow, ct), x.dtype))
    vmem += _vmem_bytes((hout, wout, ct), jnp.float32)
    if padding:
        vmem += _vmem_bytes((hpad, wpad, cin), jnp.float32)
    vmem += 2 * _vmem_bytes((hpad, wpad, cin), jnp.bfloat16)       # rolled/cast input copies
    vmem_limit = int(min(max(int(vmem * 1.5) + (8 << 20), 32 << 20), 100 << 20))

    kernel = functools.partial(
        _conv_kernel, hin=hin, win=win, hout=hout, wout=wout, ksize=ksize,
        pad=padding, relu_in=relu_in, pool=pool)

    return pl.pallas_call(
        kernel,
        out_shape=jax.ShapeDtypeStruct((B, oh, ow, cout), x.dtype),
        grid=(B, n_cs),
        in_specs=in_specs,
        out_specs=out_spec,
        scratch_shapes=scratch_shapes,
        compiler_params=pltpu.CompilerParams(
            dimension_semantics=("parallel", "arbitrary"),
            vmem_limit_bytes=vmem_limit),
    )(x, w, b2)


# ---------------------------------------------------------------------------
# Model construction: mirrors Classifier3.__init__ exactly; each cfg entry is
# (cin, cout, ksize, pad, relu_in, pool).  Weights stored bf16, biases f32.
# ---------------------------------------------------------------------------
def build_classifier3(key, img_size=256, num_branches=2, img_channels=3,
                      num_domains=2, max_conv_dim=512):
    dim_in = num_branches * 2 ** 14 // img_size
    max_cd = num_branches * max_conv_dim
    repeat_num = int(np.log2(img_size)) - 2

    cfg = [(img_channels, dim_in, 3, 1, False, False)]
    curr = img_size
    dim_out = dim_in
    for _ in range(repeat_num):
        dim_out = min(dim_in * 2, max_cd)
        cfg.append((dim_in, dim_out, 3, 1, True, True))       # ReLU, Conv3x3(p=1), Pool2
        dim_in = dim_out
        curr //= 2
    cfg.append((dim_out, dim_out, 4, 0, True, False))         # ReLU, Conv4x4
    curr = curr - 4 + 1
    if curr > 1:
        cfg.append((dim_out, dim_out, curr, 0, True, False))  # ReLU, ConvKxK
    cfg.append((dim_out, num_domains, 1, 0, True, False))     # ReLU, Conv1x1

    params = []
    for (cin, cout, k, *_rest) in cfg:
        key, kw_, kb_ = jax.random.split(key, 3)
        fan_in = cin * k * k
        w = (jax.random.normal(kw_, (k, k, cin, cout), jnp.float32)
             / np.sqrt(fan_in)).astype(jnp.bfloat16)
        b = jax.random.normal(kb_, (cout,), jnp.float32) * 0.01
        params.append((w, b))
    return cfg, params, num_domains


def classifier3_forward(x_nchw, cfg, params, num_domains):
    x = jnp.transpose(x_nchw, (0, 2, 3, 1)).astype(jnp.float32)   # NCHW -> NHWC
    for (cin, cout, k, pad, relu_in, pool), (w, b) in zip(cfg, params):
        x = conv2d_pallas(x, w, b, padding=pad, relu_in=relu_in, pool=pool)
    out = x.reshape(x.shape[0], -1)
    assert out.shape[1] == num_domains
    return out


# Pure-JAX reference with matched precision (bf16 matmul operands, f32 accumulation).
def classifier3_ref(x_nchw, cfg, params):
    x = jnp.transpose(x_nchw, (0, 2, 3, 1)).astype(jnp.float32)
    for (cin, cout, k, pad, relu_in, pool), (w, b) in zip(cfg, params):
        if relu_in:
            x = jnp.maximum(x, 0.0)
        y = jax.lax.conv_general_dilated(
            x.astype(jnp.bfloat16), w, (1, 1), [(pad, pad), (pad, pad)],
            dimension_numbers=("NHWC", "HWIO", "NHWC"),
            preferred_element_type=jnp.float32) + b
        if pool:
            B, H, W, C = y.shape
            y = y.reshape(B, H // 2, 2, W // 2, 2, C).max(axis=(2, 4))
        x = y
    return x.reshape(x.shape[0], -1)


if __name__ == "__main__":
    # Small but structure-preserving constructor args:
    #   dim_in = 1 * 2**14 // 32 = 512, max_conv_dim = 64, repeat_num = 3
    IMG_SIZE, NUM_BRANCHES, IMG_CH, NUM_DOMAINS, MAX_CONV = 32, 1, 3, 2, 64

    key = jax.random.PRNGKey(0)
    kx, kp = jax.random.split(key)
    cfg, params, num_domains = build_classifier3(
        kp, img_size=IMG_SIZE, num_branches=NUM_BRANCHES,
        img_channels=IMG_CH, num_domains=NUM_DOMAINS, max_conv_dim=MAX_CONV)

    x = jax.random.normal(kx, (2, IMG_CH, IMG_SIZE, IMG_SIZE), jnp.float32)

    out = jax.block_until_ready(classifier3_forward(x, cfg, params, num_domains))
    ref = jax.block_until_ready(classifier3_ref(x, cfg, params))

    np.testing.assert_allclose(np.asarray(out), np.asarray(ref),
                               rtol=1e-2, atol=1e-2)
    assert out.shape == (2, NUM_DOMAINS)
    print("KERNEL_OK")
</pallas_src>

<mosaic_0001>
module attributes {stable_mosaic.version = 11 : i64} {
  func.func @_conv_kernel(%arg0: i32, %arg1: i32, %arg2: memref<1x32x32x3xf32, #tpu.memory_space<vmem>>, %arg3: memref<3x3x3x256xbf16, #tpu.memory_space<vmem>>, %arg4: memref<1x256xf32, #tpu.memory_space<vmem>>, %arg5: memref<1x32x32x256xf32, #tpu.memory_space<vmem>>, %arg6: memref<32x32x256xf32, #tpu.memory_space<vmem>>, %arg7: memref<34x34x3xf32, #tpu.memory_space<vmem>>) attributes {dimension_semantics = [#tpu.dimension_semantics<parallel>, #tpu.dimension_semantics<arbitrary>], iteration_bounds = array<i64: 2, 2>, scalar_prefetch = 0 : i64, scratch_operands = 2 : i64, tpu.core_type = #tpu.core_type<tc>, window_params = [{transform_indices = @transform_0, window_bounds = array<i64: 1, 32, 32, 3>}, {transform_indices = @transform_1, window_bounds = array<i64: 3, 3, 3, 256>}, {transform_indices = @transform_2, window_bounds = array<i64: 1, 256>}, {transform_indices = @transform_3, window_bounds = array<i64: 1, 32, 32, 256>}]} {
    %c0_i32 = arith.constant 0 : i32
    %0 = arith.cmpi eq, %arg1, %c0_i32 : i32
    %1 = arith.extui %0 : i1 to i32
    %c0_i32_0 = arith.constant 0 : i32
    %2 = arith.cmpi ne, %1, %c0_i32_0 : i32
    scf.if %2 {
      %cst_75 = arith.constant 0.000000e+00 : f32
      %83 = vector.broadcast %cst_75 : f32 to vector<34x34x3xf32>
      %c0_76 = arith.constant 0 : index
      %c0_77 = arith.constant 0 : index
      %c0_78 = arith.constant 0 : index
      %84 = vector.load %arg7[%c0_76, %c0_77, %c0_78] : memref<34x34x3xf32, #tpu.memory_space<vmem>>, vector<34x34x3xf32>
      tpu.vector_store %arg7[%c0_76, %c0_77, %c0_78], %83 {strides = array<i32>} : memref<34x34x3xf32, #tpu.memory_space<vmem>>, vector<34x34x3xf32>,
      %c0_79 = arith.constant 0 : index
      %c0_80 = arith.constant 0 : index
      %c0_81 = arith.constant 0 : index
      %c0_82 = arith.constant 0 : index
      %85 = vector.load %arg2[%c0_79, %c0_80, %c0_81, %c0_82] : memref<1x32x32x3xf32, #tpu.memory_space<vmem>>, vector<1x32x32x3xf32>
      %86 = vector.shape_cast %85 : vector<1x32x32x3xf32> to vector<32x32x3xf32>
      %c1 = arith.constant 1 : index
      %c1_83 = arith.constant 1 : index
      %c0_84 = arith.constant 0 : index
      %87 = vector.load %arg7[%c1, %c1_83, %c0_84] : memref<34x34x3xf32, #tpu.memory_space<vmem>>, vector<32x32x3xf32>
      tpu.vector_store %arg7[%c1, %c1_83, %c0_84], %86 {strides = array<i32>} : memref<34x34x3xf32, #tpu.memory_space<vmem>>, vector<32x32x3xf32>,
    } else {
    }
    %c0 = arith.constant 0 : index
    %c0_1 = arith.constant 0 : index
    %c0_2 = arith.constant 0 : index
    %3 = vector.load %arg7[%c0, %c0_1, %c0_2] : memref<34x34x3xf32, #tpu.memory_space<vmem>>, vector<34x34x3xf32>
    %c0_3 = arith.constant 0 : index
    %c0_4 = arith.constant 0 : index
    %c0_5 = arith.constant 0 : index
    %c0_6 = arith.constant 0 : index
    %4 = vector.load %arg3[%c0_3, %c0_4, %c0_5, %c0_6] : memref<3x3x3x256xbf16, #tpu.memory_space<vmem>>, vector<3x3x3x256xbf16>
    %5 = vector.extract_strided_slice %3 {offsets = [0, 0, 0], sizes = [34, 32, 3], strides = [1, 1, 1]} : vector<34x34x3xf32> to vector<34x32x3xf32>
    %6 = arith.truncf %5 : vector<34x32x3xf32> to vector<34x32x3xbf16>
    %7 = vector.extract_strided_slice %6 {offsets = [0, 0, 0], sizes = [32, 32, 3], strides = [1, 1, 1]} : vector<34x32x3xbf16> to vector<32x32x3xbf16>
    %8 = vector.extract_strided_slice %4 {offsets = [0, 0, 0, 0], sizes = [1, 1, 3, 256], strides = [1, 1, 1, 1]} : vector<3x3x3x256xbf16> to vector<1x1x3x256xbf16>
    %9 = vector.shape_cast %8 : vector<1x1x3x256xbf16> to vector<3x256xbf16>
    "tpu.trace_start"() <{level = 10 : i32, message = "hwc,co->hwo"}> : () -> ()
    %cst = arith.constant dense<0.000000e+00> : vector<32x32x256xf32>
    %10 = tpu.matmul %7, %9, %cst {dimension_numbers = #tpu.dot_dimension_numbers<[2], [0], [0, 1], [1], [0, 0, 0, 1, 1, 1], [], []>} : vector<32x32x3xbf16>, vector<3x256xbf16>, vector<32x32x256xf32> -> vector<32x32x256xf32>
    "tpu.trace_stop"() : () -> ()
    %c0_7 = arith.constant 0 : index
    %c0_8 = arith.constant 0 : index
    %c0_9 = arith.constant 0 : index
    %11 = vector.load %arg6[%c0_7, %c0_8, %c0_9] : memref<32x32x256xf32, #tpu.memory_space<vmem>>, vector<32x32x256xf32>
    tpu.vector_store %arg6[%c0_7, %c0_8, %c0_9], %10 {strides = array<i32>} : memref<32x32x256xf32, #tpu.memory_space<vmem>>, vector<32x32x256xf32>,
    %12 = vector.extract_strided_slice %6 {offsets = [1, 0, 0], sizes = [32, 32, 3], strides = [1, 1, 1]} : vector<34x32x3xbf16> to vector<32x32x3xbf16>
    %13 = vector.extract_strided_slice %4 {offsets = [1, 0, 0, 0], sizes = [1, 1, 3, 256], strides = [1, 1, 1, 1]} : vector<3x3x3x256xbf16> to vector<1x1x3x256xbf16>
    %14 = vector.shape_cast %13 : vector<1x1x3x256xbf16> to vector<3x256xbf16>
    "tpu.trace_start"() <{level = 10 : i32, message = "hwc,co->hwo"}> : () -> ()
    %cst_10 = arith.constant dense<0.000000e+00> : vector<32x32x256xf32>
    %15 = tpu.matmul %12, %14, %cst_10 {dimension_numbers = #tpu.dot_dimension_numbers<[2], [0], [0, 1], [1], [0, 0, 0, 1, 1, 1], [], []>} : vector<32x32x3xbf16>, vector<3x256xbf16>, vector<32x32x256xf32> -> vector<32x32x256xf32>
    "tpu.trace_stop"() : () -> ()
    %c0_11 = arith.constant 0 : index
    %c0_12 = arith.constant 0 : index
    %c0_13 = arith.constant 0 : index
    %16 = vector.load %arg6[%c0_11, %c0_12, %c0_13] : memref<32x32x256xf32, #tpu.memory_space<vmem>>, vector<32x32x256xf32>
    %17 = arith.addf %16, %15 : vector<32x32x256xf32>
    %c0_14 = arith.constant 0 : index
    %c0_15 = arith.constant 0 : index
    %c0_16 = arith.constant 0 : index
    %18 = vector.load %arg6[%c0_14, %c0_15, %c0_16] : memref<32x32x256xf32, #tpu.memory_space<vmem>>, vector<32x32x256xf32>
    tpu.vector_store %arg6[%c0_14, %c0_15, %c0_16], %17 {strides = array<i32>} : memref<32x32x256xf32, #tpu.memory_space<vmem>>, vector<32x32x256xf32>,
    %19 = vector.extract_strided_slice %6 {offsets = [2, 0, 0], sizes = [32, 32, 3], strides = [1, 1, 1]} : vector<34x32x3xbf16> to vector<32x32x3xbf16>
    %20 = vector.extract_strided_slice %4 {offsets = [2, 0, 0, 0], sizes = [1, 1, 3, 256], strides = [1, 1, 1, 1]} : vector<3x3x3x256xbf16> to vector<1x1x3x256xbf16>
    %21 = vector.shape_cast %20 : vector<1x1x3x256xbf16> to vector<3x256xbf16>
    "tpu.trace_start"() <{level = 10 : i32, message = "hwc,co->hwo"}> : () -> ()
    %cst_17 = arith.constant dense<0.000000e+00> : vector<32x32x256xf32>
    %22 = tpu.matmul %19, %21, %cst_17 {dimension_numbers = #tpu.dot_dimension_numbers<[2], [0], [0, 1], [1], [0, 0, 0, 1, 1, 1], [], []>} : vector<32x32x3xbf16>, vector<3x256xbf16>, vector<32x32x256xf32> -> vector<32x32x256xf32>
    "tpu.trace_stop"() : () -> ()
    %c0_18 = arith.constant 0 : index
    %c0_19 = arith.constant 0 : index
    %c0_20 = arith.constant 0 : index
    %23 = vector.load %arg6[%c0_18, %c0_19, %c0_20] : memref<32x32x256xf32, #tpu.memory_space<vmem>>, vector<32x32x256xf32>
    %24 = arith.addf %23, %22 : vector<32x32x256xf32>
    %c0_21 = arith.constant 0 : index
    %c0_22 = arith.constant 0 : index
    %c0_23 = arith.constant 0 : index
    %25 = vector.load %arg6[%c0_21, %c0_22, %c0_23] : memref<32x32x256xf32, #tpu.memory_space<vmem>>, vector<32x32x256xf32>
    tpu.vector_store %arg6[%c0_21, %c0_22, %c0_23], %24 {strides = array<i32>} : memref<32x32x256xf32, #tpu.memory_space<vmem>>, vector<32x32x256xf32>,
    %c33_i32 = arith.constant 33 : i32
    %26 = tpu.dynamic_rotate %3 by %c33_i32 dim 1 : vector<34x34x3xf32>, i32 -> vector<34x34x3xf32>
    %27 = vector.extract_strided_slice %26 {offsets = [0, 0, 0], sizes = [34, 32, 3], strides = [1, 1, 1]} : vector<34x34x3xf32> to vector<34x32x3xf32>
    %28 = arith.truncf %27 : vector<34x32x3xf32> to vector<34x32x3xbf16>
    %29 = vector.extract_strided_slice %28 {offsets = [0, 0, 0], sizes = [32, 32, 3], strides = [1, 1, 1]} : vector<34x32x3xbf16> to vector<32x32x3xbf16>
    %30 = vector.extract_strided_slice %4 {offsets = [0, 1, 0, 0], sizes = [1, 1, 3, 256], strides = [1, 1, 1, 1]} : vector<3x3x3x256xbf16> to vector<1x1x3x256xbf16>
    %31 = vector.shape_cast %30 : vector<1x1x3x256xbf16> to vector<3x256xbf16>
    "tpu.trace_start"() <{level = 10 : i32, message = "hwc,co->hwo"}> : () -> ()
    %cst_24 = arith.constant dense<0.000000e+00> : vector<32x32x256xf32>
    %32 = tpu.matmul %29, %31, %cst_24 {dimension_numbers = #tpu.dot_dimension_numbers<[2], [0], [0, 1], [1], [0, 0, 0, 1, 1, 1], [], []>} : vector<32x32x3xbf16>, vector<3x256xbf16>, vector<32x32x256xf32> -> vector<32x32x256xf32>
    "tpu.trace_stop"() : () -> ()
    %c0_25 = arith.constant 0 : index
    %c0_26 = arith.constant 0 : index
    %c0_27 = arith.constant 0 : index
    %33 = vector.load %arg6[%c0_25, %c0_26, %c0_27] : memref<32x32x256xf32, #tpu.memory_space<vmem>>, vector<32x32x256xf32>
    %34 = arith.addf %33, %32 : vector<32x32x256xf32>
    %c0_28 = arith.constant 0 : index
    %c0_29 = arith.constant 0 : index
    %c0_30 = arith.constant 0 : index
    %35 = vector.load %arg6[%c0_28, %c0_29, %c0_30] : memref<32x32x256xf32, #tpu.memory_space<vmem>>, vector<32x32x256xf32>
    tpu.vector_store %arg6[%c0_28, %c0_29, %c0_30], %34 {strides = array<i32>} : memref<32x32x256xf32, #tpu.memory_space<vmem>>, vector<32x32x256xf32>,
    %36 = vector.extract_strided_slice %28 {offsets = [1, 0, 0], sizes = [32, 32, 3], strides = [1, 1, 1]} : vector<34x32x3xbf16> to vector<32x32x3xbf16>
    %37 = vector.extract_strided_slice %4 {offsets = [1, 1, 0, 0], sizes = [1, 1, 3, 256], strides = [1, 1, 1, 1]} : vector<3x3x3x256xbf16> to vector<1x1x3x256xbf16>
    %38 = vector.shape_cast %37 : vector<1x1x3x256xbf16> to vector<3x256xbf16>
    "tpu.trace_start"() <{level = 10 : i32, message = "hwc,co->hwo"}> : () -> ()
    %cst_31 = arith.constant dense<0.000000e+00> : vector<32x32x256xf32>
    %39 = tpu.matmul %36, %38, %cst_31 {dimension_numbers = #tpu.dot_dimension_numbers<[2], [0], [0, 1], [1], [0, 0, 0, 1, 1, 1], [], []>} : vector<32x32x3xbf16>, vector<3x256xbf16>, vector<32x32x256xf32> -> vector<32x32x256xf32>
    "tpu.trace_stop"() : () -> ()
    %c0_32 = arith.constant 0 : index
    %c0_33 = arith.constant 0 : index
    %c0_34 = arith.constant 0 : index
    %40 = vector.load %arg6[%c0_32, %c0_33, %c0_34] : memref<32x32x256xf32, #tpu.memory_space<vmem>>, vector<32x32x256xf32>
    %41 = arith.addf %40, %39 : vector<32x32x256xf32>
    %c0_35 = arith.constant 0 : index
    %c0_36 = arith.constant 0 : index
    %c0_37 = arith.constant 0 : index
    %42 = vector.load %arg6[%c0_35, %c0_36, %c0_37] : memref<32x32x256xf32, #tpu.memory_space<vmem>>, vector<32x32x256xf32>
    tpu.vector_store %arg6[%c0_35, %c0_36, %c0_37], %41 {strides = array<i32>} : memref<32x32x256xf32, #tpu.memory_space<vmem>>, vector<32x32x256xf32>,
    %43 = vector.extract_strided_slice %28 {offsets = [2, 0, 0], sizes = [32, 32, 3], strides = [1, 1, 1]} : vector<34x32x3xbf16> to vector<32x32x3xbf16>
    %44 = vector.extract_strided_slice %4 {offsets = [2, 1, 0, 0], sizes = [1, 1, 3, 256], strides = [1, 1, 1, 1]} : vector<3x3x3x256xbf16> to vector<1x1x3x256xbf16>
    %45 = vector.shape_cast %44 : vector<1x1x3x256xbf16> to vector<3x256xbf16>
    "tpu.trace_start"() <{level = 10 : i32, message = "hwc,co->hwo"}> : () -> ()
    %cst_38 = arith.constant dense<0.000000e+00> : vector<32x32x256xf32>
    %46 = tpu.matmul %43, %45, %cst_38 {dimension_numbers = #tpu.dot_dimension_numbers<[2], [0], [0, 1], [1], [0, 0, 0, 1, 1, 1], [], []>} : vector<32x32x3xbf16>, vector<3x256xbf16>, vector<32x32x256xf32> -> vector<32x32x256xf32>
    "tpu.trace_stop"() : () -> ()
    %c0_39 = arith.constant 0 : index
    %c0_40 = arith.constant 0 : index
    %c0_41 = arith.constant 0 : index
    %47 = vector.load %arg6[%c0_39, %c0_40, %c0_41] : memref<32x32x256xf32, #tpu.memory_space<vmem>>, vector<32x32x256xf32>
    %48 = arith.addf %47, %46 : vector<32x32x256xf32>
    %c0_42 = arith.constant 0 : index
    %c0_43 = arith.constant 0 : index
    %c0_44 = arith.constant 0 : index
    %49 = vector.load %arg6[%c0_42, %c0_43, %c0_44] : memref<32x32x256xf32, #tpu.memory_space<vmem>>, vector<32x32x256xf32>
    tpu.vector_store %arg6[%c0_42, %c0_43, %c0_44], %48 {strides = array<i32>} : memref<32x32x256xf32, #tpu.memory_space<vmem>>, vector<32x32x256xf32>,
    %c32_i32 = arith.constant 32 : i32
    %50 = tpu.dynamic_rotate %3 by %c32_i32 dim 1 : vector<34x34x3xf32>, i32 -> vector<34x34x3xf32>
    %51 = vector.extract_strided_slice %50 {offsets = [0, 0, 0], sizes = [34, 32, 3], strides = [1, 1, 1]} : vector<34x34x3xf32> to vector<34x32x3xf32>
    %52 = arith.truncf %51 : vector<34x32x3xf32> to vector<34x32x3xbf16>
    %53 = vector.extract_strided_slice %52 {offsets = [0, 0, 0], sizes = [32, 32, 3], strides = [1, 1, 1]} : vector<34x32x3xbf16> to vector<32x32x3xbf16>
    %54 = vector.extract_strided_slice %4 {offsets = [0, 2, 0, 0], sizes = [1, 1, 3, 256], strides = [1, 1, 1, 1]} : vector<3x3x3x256xbf16> to vector<1x1x3x256xbf16>
    %55 = vector.shape_cast %54 : vector<1x1x3x256xbf16> to vector<3x256xbf16>
    "tpu.trace_start"() <{level = 10 : i32, message = "hwc,co->hwo"}> : () -> ()
    %cst_45 = arith.constant dense<0.000000e+00> : vector<32x32x256xf32>
    %56 = tpu.matmul %53, %55, %cst_45 {dimension_numbers = #tpu.dot_dimension_numbers<[2], [0], [0, 1], [1], [0, 0, 0, 1, 1, 1], [], []>} : vector<32x32x3xbf16>, vector<3x256xbf16>, vector<32x32x256xf32> -> vector<32x32x256xf32>
    "tpu.trace_stop"() : () -> ()
    %c0_46 = arith.constant 0 : index
    %c0_47 = arith.constant 0 : index
    %c0_48 = arith.constant 0 : index
    %57 = vector.load %arg6[%c0_46, %c0_47, %c0_48] : memref<32x32x256xf32, #tpu.memory_space<vmem>>, vector<32x32x256xf32>
    %58 = arith.addf %57, %56 : vector<32x32x256xf32>
    %c0_49 = arith.constant 0 : index
    %c0_50 = arith.constant 0 : index
    %c0_51 = arith.constant 0 : index
    %59 = vector.load %arg6[%c0_49, %c0_50, %c0_51] : memref<32x32x256xf32, #tpu.memory_space<vmem>>, vector<32x32x256xf32>
    tpu.vector_store %arg6[%c0_49, %c0_50, %c0_51], %58 {strides = array<i32>} : memref<32x32x256xf32, #tpu.memory_space<vmem>>, vector<32x32x256xf32>,
    %60 = vector.extract_strided_slice %52 {offsets = [1, 0, 0], sizes = [32, 32, 3], strides = [1, 1, 1]} : vector<34x32x3xbf16> to vector<32x32x3xbf16>
    %61 = vector.extract_strided_slice %4 {offsets = [1, 2, 0, 0], sizes = [1, 1, 3, 256], strides = [1, 1, 1, 1]} : vector<3x3x3x256xbf16> to vector<1x1x3x256xbf16>
    %62 = vector.shape_cast %61 : vector<1x1x3x256xbf16> to vector<3x256xbf16>
    "tpu.trace_start"() <{level = 10 : i32, message = "hwc,co->hwo"}> : () -> ()
    %cst_52 = arith.constant dense<0.000000e+00> : vector<32x32x256xf32>
    %63 = tpu.matmul %60, %62, %cst_52 {dimension_numbers = #tpu.dot_dimension_numbers<[2], [0], [0, 1], [1], [0, 0, 0, 1, 1, 1], [], []>} : vector<32x32x3xbf16>, vector<3x256xbf16>, vector<32x32x256xf32> -> vector<32x32x256xf32>
    "tpu.trace_stop"() : () -> ()
    %c0_53 = arith.constant 0 : index
    %c0_54 = arith.constant 0 : index
    %c0_55 = arith.constant 0 : index
    %64 = vector.load %arg6[%c0_53, %c0_54, %c0_55] : memref<32x32x256xf32, #tpu.memory_space<vmem>>, vector<32x32x256xf32>
    %65 = arith.addf %64, %63 : vector<32x32x256xf32>
    %c0_56 = arith.constant 0 : index
    %c0_57 = arith.constant 0 : index
    %c0_58 = arith.constant 0 : index
    %66 = vector.load %arg6[%c0_56, %c0_57, %c0_58] : memref<32x32x256xf32, #tpu.memory_space<vmem>>, vector<32x32x256xf32>
    tpu.vector_store %arg6[%c0_56, %c0_57, %c0_58], %65 {strides = array<i32>} : memref<32x32x256xf32, #tpu.memory_space<vmem>>, vector<32x32x256xf32>,
    %67 = vector.extract_strided_slice %52 {offsets = [2, 0, 0], sizes = [32, 32, 3], strides = [1, 1, 1]} : vector<34x32x3xbf16> to vector<32x32x3xbf16>
    %68 = vector.extract_strided_slice %4 {offsets = [2, 2, 0, 0], sizes = [1, 1, 3, 256], strides = [1, 1, 1, 1]} : vector<3x3x3x256xbf16> to vector<1x1x3x256xbf16>
    %69 = vector.shape_cast %68 : vector<1x1x3x256xbf16> to vector<3x256xbf16>
    "tpu.trace_start"() <{level = 10 : i32, message = "hwc,co->hwo"}> : () -> ()
    %cst_59 = arith.constant dense<0.000000e+00> : vector<32x32x256xf32>
    %70 = tpu.matmul %67, %69, %cst_59 {dimension_numbers = #tpu.dot_dimension_numbers<[2], [0], [0, 1], [1], [0, 0, 0, 1, 1, 1], [], []>} : vector<32x32x3xbf16>, vector<3x256xbf16>, vector<32x32x256xf32> -> vector<32x32x256xf32>
    "tpu.trace_stop"() : () -> ()
    %c0_60 = arith.constant 0 : index
    %c0_61 = arith.constant 0 : index
    %c0_62 = arith.constant 0 : index
    %71 = vector.load %arg6[%c0_60, %c0_61, %c0_62] : memref<32x32x256xf32, #tpu.memory_space<vmem>>, vector<32x32x256xf32>
    %72 = arith.addf %71, %70 : vector<32x32x256xf32>
    %c0_63 = arith.constant 0 : index
    %c0_64 = arith.constant 0 : index
    %c0_65 = arith.constant 0 : index
    %73 = vector.load %arg6[%c0_63, %c0_64, %c0_65] : memref<32x32x256xf32, #tpu.memory_space<vmem>>, vector<32x32x256xf32>
    tpu.vector_store %arg6[%c0_63, %c0_64, %c0_65], %72 {strides = array<i32>} : memref<32x32x256xf32, #tpu.memory_space<vmem>>, vector<32x32x256xf32>,
    %c0_66 = arith.constant 0 : index
    %c0_67 = arith.constant 0 : index
    %c0_68 = arith.constant 0 : index
    %74 = vector.load %arg6[%c0_66, %c0_67, %c0_68] : memref<32x32x256xf32, #tpu.memory_space<vmem>>, vector<32x32x256xf32>
    %c0_69 = arith.constant 0 : index
    %c0_70 = arith.constant 0 : index
    %75 = vector.load %arg4[%c0_69, %c0_70] : memref<1x256xf32, #tpu.memory_space<vmem>>, vector<1x256xf32>
    %76 = vector.shape_cast %75 : vector<1x256xf32> to vector<256xf32>
    %77 = vector.shape_cast %76 : vector<256xf32> to vector<1x1x256xf32>
    %78 = vector.broadcast %77 : vector<1x1x256xf32> to vector<32x32x256xf32>
    %79 = arith.addf %74, %78 : vector<32x32x256xf32>
    %c0_71 = arith.constant 0 : index
    %c0_72 = arith.constant 0 : index
    %c0_73 = arith.constant 0 : index
    %c0_74 = arith.constant 0 : index
    %80 = vector.load %arg5[%c0_71, %c0_72, %c0_73, %c0_74] : memref<1x32x32x256xf32, #tpu.memory_space<vmem>>, vector<1x32x32x256xf32>
    %81 = vector.shape_cast %80 : vector<1x32x32x256xf32> to vector<32x32x256xf32>
    %82 = vector.shape_cast %79 : vector<32x32x256xf32> to vector<1x32x32x256xf32>
    tpu.vector_store %arg5[%c0_71, %c0_72, %c0_73, %c0_74], %82 {strides = array<i32>} : memref<1x32x32x256xf32, #tpu.memory_space<vmem>>, vector<1x32x32x256xf32>,
    return
  }
  func.func @transform_0(%arg0: i32, %arg1: i32) -> (i32, i32, i32, i32) {
    %c0_i32 = arith.constant 0 : i32
    %c0_i32_0 = arith.constant 0 : i32
    %c0_i32_1 = arith.constant 0 : i32
    %c0_i32_2 = arith.constant 0 : i32
    return %arg0, %c0_i32, %c0_i32_0, %c0_i32_1 : i32, i32, i32, i32
  }
  func.func @transform_1(%arg0: i32, %arg1: i32) -> (i32, i32, i32, i32) {
    %c0_i32 = arith.constant 0 : i32
    %c0_i32_0 = arith.constant 0 : i32
    %c0_i32_1 = arith.constant 0 : i32
    %c0_i32_2 = arith.constant 0 : i32
    return %c0_i32, %c0_i32_0, %c0_i32_1, %arg1 : i32, i32, i32, i32
  }
  func.func @transform_2(%arg0: i32, %arg1: i32) -> (i32, i32) {
    %c0_i32 = arith.constant 0 : i32
    %c0_i32_0 = arith.constant 0 : i32
    return %c0_i32, %arg1 : i32, i32
  }
  func.func @transform_3(%arg0: i32, %arg1: i32) -> (i32, i32, i32, i32) {
    %c0_i32 = arith.constant 0 : i32
    %c0_i32_0 = arith.constant 0 : i32
    %c0_i32_1 = arith.constant 0 : i32
    return %arg0, %c0_i32, %c0_i32_0, %arg1 : i32, i32, i32, i32
  }
}

</mosaic_0001>

<bundles_post_ra>
// kernel: tpu_custom_call.1
= control target key start
LH: loop header
LB: loop body
LE: loop exit
PB: predicated region body
PF: predicated region fallthrough
CT: control target
= control target key end

     0   :  { %s23588_s0 = inlined_call_operand.vmem [shape: f32[2,32,32,3], index: 0, kind: input, shape index: {}]   ;;  %s23589_s1 = inlined_call_operand.hbm [shape: bf16[3,3,3,512], index: 1, kind: input, shape index: {}]   ;;  %s23590_s2 = inlined_call_operand.hbm [shape: f32[1,512], index: 2, kind: input, shape index: {}]   ;;  %s23591_s3 = inlined_call_operand.hbm [shape: f32[2,32,32,512], index: 3, kind: output, shape index: {}]  }
   0x1   :  { %23897 = sst [smem:[#allocation167_spill]] %s23589_s1 }
   0x2   :  { %8 = vsyncpa [#allocation5], 0 }
   0x3   :  { %10 = vsyncpa [#allocation5 + $0x1], 0 }
   0x4   :  { %11 = vsyncpa [#allocation8], 0 }
   0x5   :  { %13 = vsyncpa [#allocation8 + $0x1], 0 }
   0x6   :  { %14 = vsyncpa [#allocation6], 0 }
   0x7   :  { %16 = vsyncpa [#allocation6 + $0x1], 0  ;;  %s19059_s12 = smov 0   ;;  %s19061_s13 = smov 0  }
   0x8   :  { %s19063_s14 = smov 0   ;;  %s19065_s15 = smov 0  }
   0x9   :  { %s19067_s16 = smov 0   ;;  %s19069_s17 = smov 0  }
   0xa   :  { %s19071_s18 = smov 0   ;;  %s19073_s19 = smov 0  }
   0xb   :  { %s19075_s20 = smov 0   ;;  %s19077_s21 = smov 0  }
   0xc   :  { %s19079_s22 = smov 0  }
   0xd LB: > { %23898 = sst [smem:[#allocation13_spill]] %s19005_s17  ;;  %s16061_s23 = sadd.s32 4294967295, %s19025_s22   ;;  %s19025_s22 = sphi %s19079_s22, %s22_s22   ;;  %s19021_s21 = sphi %s19077_s21, %s24548_s21   ;;  %s19017_s20 = sphi %s19075_s20, %s24555_s20   ;;  %s19013_s19 = sphi %s19073_s19, %s24546_s19   ;;  %s19009_s18 = sphi %s19071_s18, %s24554_s18   ;;  %s19005_s17 = sphi %s19069_s17, %s24545_s17   ;;  %s19001_s16 = sphi %s19067_s16, %s24553_s16   ;;  %s18997_s15 = sphi %s19065_s15, %s24552_s15   ;;  %s18993_s14 = sphi %s19063_s14, %s24551_s14   ;;  %s18989_s13 = sphi %s19061_s13, %s24550_s13   ;;  %s18985_s12 = sphi %s19059_s12, %s24549_s12  }
   0xe   : > { %23899 = sst [smem:[#allocation14_spill]] %s19021_s21  ;;  %s16062_s24 = sadd.s32 4294967294, %s19025_s22  }
   0xf   : > { %s31_s25 = sadd.s32 1, %s19017_s20  ;;  %s34_s26 = sadd.s32 1, %s19021_s21 }
  0x10   : > { %p32_p0 = scmp.ge.s32.totalorder %s31_s25, 2  ;;  %s67_s27 = sadd.s32 1, %s19005_s17 }
  0x11   : > { %p74_p1 = scmp.ne.s32.totalorder %s19005_s17, %s19001_s16  ;;  %p75_p2 = scmp.eq.s32.totalorder %s19025_s22, 0 }
  0x12   : > { %s24557_s25 = smov (%p32_p0, %s31_s25), 0  ;;  %s24559_s26 = smov (!%p32_p0, %s34_s26), %s19021_s21 }
  0x13   : > { %23900 = sst [smem:[#allocation15_spill]] %s24557_s25  ;;  %s64_s28 = ssub.s32 %s19017_s20, %s24557_s25 }
  0x14   : > { %p19125_p3 = por %p75_p2, %p74_p1  ;;  %p36_p4 = scmp.ge.s32.totalorder %s24559_s26, 2 }
  0x15   : > { %p65_p5 = scmp.eq.s32.totalorder %s64_s28, 0  ;;  %p80_p6 = scmp.ne.s32.totalorder %s19001_s16, %s18997_s15 }
  0x16   : > { %p81_p7 = scmp.eq.s32.totalorder %s16061_s23, 0  ;;  %s24561_s26 = smov (%p36_p4, %s24559_s26), 0 }
  0x17   : > { %23902 = sst [smem:[#allocation16_spill]] %s24561_s26  ;;  %s116_s5 = ssub.s32 %s19021_s21, %s24561_s26 }
  0x18   : > { %s19133_s30 = scalar_select %p65_p5, %s19005_s17, %s67_s27  }
  0x19   : > { %p19135_p8 = por %p81_p7, %p80_p6  ;;  %s118_s6 = sor.u32 %s116_s5, %s64_s28 }
  0x1a   : > { %23903 = sst [smem:[#allocation17_spill]] %s19133_s30  ;;  %s121_s7 = sadd.s32 1, %s18993_s14 }
  0x1b   : > { %s23904_s4 = scalar_select %p19135_p8, 1, 0 }
  0x1c   : > { %p119_p9 = scmp.eq.s32.totalorder %s118_s6, 0  ;;  %p131_p10 = scmp.ne.s32.totalorder %s18993_s14, %s18989_s13 }
  0x1d   : > { %p132_p11 = scmp.eq.s32.totalorder %s16061_s23, 3  ;;  %p137_p12 = scmp.ne.s32.totalorder %s18989_s13, %s18985_s12 }
  0x1e   : > { %s19147_s8 = scalar_select %p119_p9, %s18993_s14, %s121_s7  }
  0x1f   : > { %p19149_p13 = por %p132_p11, %p131_p10  ;;  %p138_p0 = scmp.eq.s32.totalorder %s16062_s24, 3 }
  0x20   : > { %p18739_p1 = scmp.lt.s32.totalorder %s19025_s22, 4  ;;  %s19159_s11 = sand.u32 1, %s19005_s17  }
  0x21   : > { %s23905_s9 = scalar_select %p19149_p13, 1, 0 }
  0x22   : > { %p19154_p2 = por %p138_p0, %p137_p12  ;;  %s18720_s15 = smul.u32 36, %s19159_s11 }
  0x23   : > { %s16667_s27 = sshll.u32 %s19017_s20, 6  ;;  %p19165_p4 = pnand %p18739_p1, %p19125_p3 }
  0x24   : > { %s23906_s10 = scalar_select %p19154_p2, 1, 0 }
  0x25   : > { %s23908_s1 = sld [smem:[#allocation167_spill]]  ;;  %s170_s6 = scalar_lea.vmem [#allocation4], %s18720_s15 }
  0x26   : > { %s177_s7 = sshll.u32 %s170_s6, 4  ;;  %s167_s29 = scalar_lea.sflag [#allocation5], %s19159_s11  ;;  %s19174_s7 = int_to_ptr.vmem [resolvable:$true] %s177_s7 }
  0x27   : > { %p18841_p5 = pneg %p19165_p4 }
  0x2b   : > { %s19172_s24 = scalar_lea.hbm %s23908_s1, %s16667_s27  ;;  %s18844_s5 = scalar_lea.hbm %s23908_s1, 1152 }
  0x2c   : > { %s18839_s26 = scalar_lea.hbm %s19172_s24, 576  ;;  %p18845_p9 = scmp.lt.u32.totalorder %s19172_s24, %s23908_s1 }
  0x2d   : > { %p18840_p3 = scmp.ne.s32.totalorder %s19172_s24, %s18839_s26  ;;  %p18846_p10 = scmp.lt.u32.totalorder %s18844_s5, %s18839_s26 }
  0x2e   : > { %p18848_p12 = scmp.lt.u32.totalorder %s18839_s26, %s19172_s24 }
  0x2f   : > { %p18842_p6 = pnand %p18841_p5, %p18840_p3  ;;  %p18847_p11 = por %p18846_p10, %p18845_p9 }
  0x31   : > { %p18843_p7 = pneg %p18842_p6  ;;  %p18849_p0 = por %p18848_p12, %p18847_p11 }
  0x33   : > { %p18850_p1 = pnand %p18849_p0, %p18843_p7 }
  0x35   : > { %18853 = shalt.err (!%p18850_p1)
}
  0x36   : > { %s18854_s15 = scalar_lea.vmem %s19174_s7, 576  ;;  %s19027_s6 = smov [#allocation4]  }
  0x37   : > { %p18855_p3 = scmp.ne.s32.totalorder %s19174_s7, %s18854_s15  ;;  %s18859_s28 = sshll.u32 %s19027_s6, 4  ;;  %s18860_s28 = int_to_ptr.vmem [resolvable:$false] %s18859_s28 }
  0x38   : > { %s18861_s21 = scalar_lea.vmem %s18860_s28, 1152  ;;  %p18862_p13 = scmp.lt.s32.totalorder %s19174_s7, %s18860_s28 }
  0x39   : > { %p18857_p6 = pnand %p18855_p3, %p18841_p5  ;;  %p18863_p9 = scmp.lt.s32.totalorder %s18861_s21, %s18854_s15 }
  0x3b   : > { %p18858_p2 = pneg %p18857_p6  ;;  %p18864_p10 = por %p18863_p9, %p18862_p13 }
  0x3d   : > { %p18865_p11 = pnand %p18864_p10, %p18858_p2 }
  0x3f   : > { %18868 = shalt.err (!%p18865_p11)
}
  0x40   : > { %s19028_s25 = smov 128   ;;  %s19029_s26 = smov 64  }
  0x41   : > { %s19030_s27 = smov 4   ;;  %p16070_p7 = scmp.ge.s32.totalorder %s19025_s22, 1 }
  0x42   : > { %18731 = dma.hbm_to_vmem [thread:$0]  (!%p19165_p4), %s19172_s24, 576, %s19174_s7, %s167_s29, %s19028_s25, %s19029_s26, %s19030_s27  }
  0x43   : > { %p204_p13 = scmp.lt.s32.totalorder %s19025_s22, 5  ;;  %s16067_s5 = sshll.u32 %s19159_s11, 1 }
  0x44   : > { %s16668_s6 = sshll.u32 %s19017_s20, 5  ;;  %s191_s28 = scalar_lea.vmem [#allocation7], %s16067_s5 }
  0x45   : > { %p19207_p2 = pnand %p16070_p7, %p204_p13  ;;  %s199_s21 = sshll.u32 %s191_s28, 4  ;;  %s200_s21 = int_to_ptr.vmem [resolvable:$true] %s199_s21 }
  0x46   : > { %s19215_s17 = scalar_lea.hbm %s23590_s2, %s16668_s6  ;;  %s188_s24 = scalar_lea.sflag [#allocation8], %s19159_s11 }
  0x47   : > { %s23909_s15 = scalar_select %p19207_p2, 1, 0 }
  0x48   : > { %s18869_s7 = scalar_lea.hbm %s19215_s17, 32  ;;  %s18874_s26 = scalar_lea.hbm %s23590_s2, 64 }
  0x49   : > { %p18870_p12 = scmp.ne.s32.totalorder %s19215_s17, %s18869_s7  ;;  %p18875_p3 = scmp.lt.u32.totalorder %s19215_s17, %s23590_s2 }
  0x4a   : > { %p18876_p6 = scmp.lt.u32.totalorder %s18874_s26, %s18869_s7  ;;  %p18878_p10 = scmp.lt.u32.totalorder %s18869_s7, %s19215_s17 }
  0x4b   : > { %p18872_p0 = pnand %p18870_p12, %p18841_p5 }
  0x4c   : > { %p18877_p9 = por %p18876_p6, %p18875_p3 }
  0x4d   : > { %p18873_p1 = pneg %p18872_p0 }
  0x4e   : > { %p18879_p11 = por %p18878_p10, %p18877_p9 }
  0x50   : > { %p18880_p7 = pnand %p18879_p11, %p18873_p1 }
  0x52   : > { %18883 = shalt.err (!%p18880_p7)
}
  0x53   : > { %s18884_s30 = scalar_lea.vmem %s200_s21, 32  ;;  %s19031_s11 = smov [#allocation7]  }
  0x54   : > { %p18885_p13 = scmp.ne.s32.totalorder %s200_s21, %s18884_s30  ;;  %s18889_s5 = sshll.u32 %s19031_s11, 4  ;;  %s18890_s5 = int_to_ptr.vmem [resolvable:$false] %s18889_s5 }
  0x55   : > { %s18891_s6 = scalar_lea.vmem %s18890_s5, 64  ;;  %p18892_p8 = scmp.lt.s32.totalorder %s200_s21, %s18890_s5 }
  0x56   : > { %p18887_p12 = pnand %p18885_p13, %p18841_p5  ;;  %p18893_p2 = scmp.lt.s32.totalorder %s18891_s6, %s18884_s30 }
  0x58   : > { %p18888_p0 = pneg %p18887_p12  ;;  %p18894_p3 = por %p18893_p2, %p18892_p8 }
  0x5a   : > { %p18895_p6 = pnand %p18894_p3, %p18888_p0 }
  0x5c   : > { %18898 = shalt.err (!%p18895_p6)
}
  0x5d   : > { %18734 = dma.hbm_to_vmem [thread:$0]  (!%p19165_p4), %s19215_s17, 32, %s200_s21, %s188_s24  }
  0x5e   : > { %p23910_p1 = scmp.ne.s32.totalorder %s23909_s15, 0 }
  0x60   : > { %208 = sbr.rel (%p23910_p1) target bundleno = 2811 (0xafb), region = 32 }
  0x67   : > { %s210_s28 = sand.u32 1, %s19001_s16   ;;  %p23911_p5 = scmp.ne.s32.totalorder %s23904_s4, 0 }
  0x68   : > { %s18721_s7 = smul.u32 36, %s210_s28  ;;  %s211_s29 = scalar_lea.sflag [#allocation5], %s210_s28 }
  0x6a   : > { %s19240_s25 = scalar_lea.vmem [#allocation4], %s18721_s7 }
  0x6b   : > { %18972 = dma.done.wait (%p23911_p5), %s211_s29, 576  }
  0x6c   : > { %18974 = vsyncadd (%p23911_p5), %s211_s29, 4294966720  ;;  %s16071_s26 = sshll.u32 %s210_s28, 1  ;;  %s220_s23 = scalar_lea.sflag [#allocation8], %s210_s28 }
  0x6d   : > { %s19246_s27 = scalar_lea.vmem [#allocation7], %s16071_s26 }
  0x6e   : > { %18976 = dma.done.wait (%p23911_p5), %s220_s23, 32  }
  0x6f   : > { %18978 = vsyncadd (%p23911_p5), %s220_s23, 4294967264  ;;  %s253_s17 = sand.u32 1, %s18989_s13   ;;  %p256_p8 = scmp.lt.s32.totalorder %s19013_s19, 1 }
  0x70   : > { %s16072_s15 = sshll.u32 %s253_s17, 11  ;;  %p16075_p4 = scmp.ne.s32.totalorder %s19009_s18, 0 }
  0x71   : > { %s257_s21 = scalar_select %p256_p8, %s19013_s19, 1 }
  0x72   : > { %s19262_s5 = scalar_lea.vmem [#allocation9], %s16072_s15  ;;  %268 = sbr.rel (%p16075_p4) target bundleno = 265 (0x109), region = 44  ;;  %vm269_vm0 = vcmask (!%p16075_p4), 23552   ;;  %vm274_vm1 = vcmask (!%p16075_p4), 17408   ;;  %v19032_v3 = vmov (!%p16075_p4), 0.0  }
  0x73   : > { %s16669_s24 = sshll.u32 %s257_s21, 10  ;;  %276 = vst.msk [vmem:[#allocation3 + $0x28] sm:$0xff] (!%p16075_p4), %vm269_vm0, %v19032_v3  ;;  %270 = vst.msk [vmem:[#allocation3] sm:$0xff] (!%p16075_p4), %vm269_vm0, %v19032_v3 }
  0x74   : > { %s19260_s11 = scalar_lea.vmem %s23588_s0, %s16669_s24  ;;  %271 = vst.msk [vmem:[#allocation3 + $0x8] sm:$0xff] (!%p16075_p4), %vm269_vm0, %v19032_v3  ;;  %272 = vst.msk [vmem:[#allocation3 + $0x10] sm:$0xff] (!%p16075_p4), %vm269_vm0, %v19032_v3 }
  0x75   : > { %v19266_v0 = vld [vmem:[%s19260_s11] sm:$0xff] (!%p16075_p4)  ;;  %v19269_v1 = vld [vmem:[%s19260_s11 + $0x8] sm:$0xff] (!%p16075_p4)  ;;  %v19272_v2 = vld [vmem:[%s19260_s11 + $0x10] sm:$0xff] (!%p16075_p4)  ;;  %273 = vst.msk [vmem:[#allocation3 + $0x18] sm:$0xff] (!%p16075_p4), %vm269_vm0, %v19032_v3 }
  0x76   : > { %277 = vst.msk [vmem:[#allocation3 + $0x30] sm:$0xff] (!%p16075_p4), %vm269_vm0, %v19032_v3  ;;  %278 = vst.msk [vmem:[#allocation3 + $0x38] sm:$0xff] (!%p16075_p4), %vm269_vm0, %v19032_v3  ;;  %v444_v4 = vld [vmem:[%s19260_s11 + $0x18] sm:$0xff] (!%p16075_p4)  ;;  %v445_v5 = vld [vmem:[%s19260_s11 + $0x20] sm:$0xff] (!%p16075_p4) }
  0x77   : > { %279 = vst.msk [vmem:[#allocation3 + $0x40] sm:$0xff] (!%p16075_p4), %vm269_vm0, %v19032_v3  ;;  %281 = vst.msk [vmem:[#allocation3 + $0x50] sm:$0xff] (!%p16075_p4), %vm269_vm0, %v19032_v3  ;;  %v446_v6 = vld [vmem:[%s19260_s11 + $0x28] sm:$0xff] (!%p16075_p4)  ;;  %v447_v7 = vld [vmem:[%s19260_s11 + $0x30] sm:$0xff] (!%p16075_p4) }
  0x78   : > { %282 = vst.msk [vmem:[#allocation3 + $0x58] sm:$0xff] (!%p16075_p4), %vm269_vm0, %v19032_v3  ;;  %283 = vst.msk [vmem:[#allocation3 + $0x60] sm:$0xff] (!%p16075_p4), %vm269_vm0, %v19032_v3  ;;  %v448_v8 = vld [vmem:[%s19260_s11 + $0x38] sm:$0xff] (!%p16075_p4)  ;;  %v449_v9 = vld [vmem:[%s19260_s11 + $0x40] sm:$0xff] (!%p16075_p4) }
  0x79   : > { %284 = vst.msk [vmem:[#allocation3 + $0x68] sm:$0xff] %vm269_vm0, %v19032_v3  ;;  %286 = vst.msk [vmem:[#allocation3 + $0x78] sm:$0xff] %vm269_vm0, %v19032_v3  ;;  %v450_v10 = vld [vmem:[%s19260_s11 + $0x48] sm:$0xff]  ;;  %v451_v11 = vld [vmem:[%s19260_s11 + $0x50] sm:$0xff] }
  0x7a   : > { %287 = vst.msk [vmem:[#allocation3 + $0x80] sm:$0xff] %vm269_vm0, %v19032_v3  ;;  %288 = vst.msk [vmem:[#allocation3 + $0x88] sm:$0xff] %vm269_vm0, %v19032_v3  ;;  %v452_v12 = vld [vmem:[%s19260_s11 + $0x58] sm:$0xff]  ;;  %v453_v13 = vld [vmem:[%s19260_s11 + $0x60] sm:$0xff] }
  0x7b   : > { %289 = vst.msk [vmem:[#allocation3 + $0x90] sm:$0xff] %vm269_vm0, %v19032_v3  ;;  %291 = vst.msk [vmem:[#allocation3 + $0xa0] sm:$0xff] %vm269_vm0, %v19032_v3  ;;  %v454_v14 = vld [vmem:[%s19260_s11 + $0x68] sm:$0xff]  ;;  %v455_v15 = vld [vmem:[%s19260_s11 + $0x70] sm:$0xff] }
  0x7c   : > { %292 = vst.msk [vmem:[#allocation3 + $0xa8] sm:$0xff] %vm269_vm0, %v19032_v3  ;;  %293 = vst.msk [vmem:[#allocation3 + $0xb0] sm:$0xff] %vm269_vm0, %v19032_v3  ;;  %v456_v16 = vld [vmem:[%s19260_s11 + $0x78] sm:$0xff]  ;;  %v457_v17 = vld [vmem:[%s19260_s11 + $0x80] sm:$0xff] }
  0x7d   : > { %294 = vst.msk [vmem:[#allocation3 + $0xb8] sm:$0xff] %vm269_vm0, %v19032_v3  ;;  %296 = vst.msk [vmem:[#allocation3 + $0xc8] sm:$0xff] %vm269_vm0, %v19032_v3  ;;  %v458_v18 = vld [vmem:[%s19260_s11 + $0x88] sm:$0xff]  ;;  %v459_v19 = vld [vmem:[%s19260_s11 + $0x90] sm:$0xff] }
  0x7e   : > { %297 = vst.msk [vmem:[#allocation3 + $0xd0] sm:$0xff] %vm269_vm0, %v19032_v3  ;;  %298 = vst.msk [vmem:[#allocation3 + $0xd8] sm:$0xff] %vm269_vm0, %v19032_v3  ;;  %v460_v20 = vld [vmem:[%s19260_s11 + $0x98] sm:$0xff]  ;;  %v461_v21 = vld [vmem:[%s19260_s11 + $0xa0] sm:$0xff] }
  0x7f   : > { %299 = vst.msk [vmem:[#allocation3 + $0xe0] sm:$0xff] %vm269_vm0, %v19032_v3  ;;  %301 = vst.msk [vmem:[#allocation3 + $0xf0] sm:$0xff] %vm269_vm0, %v19032_v3  ;;  %v462_v22 = vld [vmem:[%s19260_s11 + $0xa8] sm:$0xff]  ;;  %v463_v23 = vld [vmem:[%s19260_s11 + $0xb0] sm:$0xff] }
  0x80   : > { %302 = vst.msk [vmem:[#allocation3 + $0xf8] sm:$0xff] %vm269_vm0, %v19032_v3  ;;  %303 = vst.msk [vmem:[#allocation3 + $0x100] sm:$0xff] %vm269_vm0, %v19032_v3  ;;  %v464_v24 = vld [vmem:[%s19260_s11 + $0xb8] sm:$0xff]  ;;  %v465_v25 = vld [vmem:[%s19260_s11 + $0xc0] sm:$0xff] }
  0x81   : > { %304 = vst.msk [vmem:[#allocation3 + $0x108] sm:$0xff] %vm269_vm0, %v19032_v3  ;;  %306 = vst.msk [vmem:[#allocation3 + $0x118] sm:$0xff] %vm269_vm0, %v19032_v3  ;;  %v466_v26 = vld [vmem:[%s19260_s11 + $0xc8] sm:$0xff]  ;;  %v467_v27 = vld [vmem:[%s19260_s11 + $0xd0] sm:$0xff] }
  0x82   : > { %307 = vst.msk [vmem:[#allocation3 + $0x120] sm:$0xff] %vm269_vm0, %v19032_v3  ;;  %308 = vst.msk [vmem:[#allocation3 + $0x128] sm:$0xff] %vm269_vm0, %v19032_v3  ;;  %v468_v28 = vld [vmem:[%s19260_s11 + $0xd8] sm:$0xff]  ;;  %v469_v29 = vld [vmem:[%s19260_s11 + $0xe0] sm:$0xff] }
  0x83   : > { %309 = vst.msk [vmem:[#allocation3 + $0x130] sm:$0xff] %vm269_vm0, %v19032_v3  ;;  %311 = vst.msk [vmem:[#allocation3 + $0x140] sm:$0xff] %vm269_vm0, %v19032_v3  ;;  %v470_v30 = vld [vmem:[%s19260_s11 + $0xe8] sm:$0xff]  ;;  %v471_v31 = vld [vmem:[%s19260_s11 + $0xf0] sm:$0xff] }
  0x84   : > { %312 = vst.msk [vmem:[#allocation3 + $0x148] sm:$0xff] %vm269_vm0, %v19032_v3  ;;  %313 = vst.msk [vmem:[#allocation3 + $0x150] sm:$0xff] %vm269_vm0, %v19032_v3  ;;  %v472_v32 = vld [vmem:[%s19260_s11 + $0xf8] sm:$0xff]  ;;  %v473_v33 = vld [vmem:[%s19260_s11 + $0x100] sm:$0xff] }
  0x85   : > { %314 = vst.msk [vmem:[#allocation3 + $0x158] sm:$0xff] %vm269_vm0, %v19032_v3  ;;  %316 = vst.msk [vmem:[#allocation3 + $0x168] sm:$0xff] %vm269_vm0, %v19032_v3  ;;  %v474_v34 = vld [vmem:[%s19260_s11 + $0x108] sm:$0xff]  ;;  %v475_v35 = vld [vmem:[%s19260_s11 + $0x110] sm:$0xff] }
  0x86   : > { %317 = vst.msk [vmem:[#allocation3 + $0x170] sm:$0xff] %vm269_vm0, %v19032_v3  ;;  %318 = vst.msk [vmem:[#allocation3 + $0x178] sm:$0xff] %vm269_vm0, %v19032_v3  ;;  %v476_v36 = vld [vmem:[%s19260_s11 + $0x118] sm:$0xff]  ;;  %v477_v37 = vld [vmem:[%s19260_s11 + $0x120] sm:$0xff] }
  0x87   : > { %319 = vst.msk [vmem:[#allocation3 + $0x180] sm:$0xff] %vm269_vm0, %v19032_v3  ;;  %321 = vst.msk [vmem:[#allocation3 + $0x190] sm:$0xff] %vm269_vm0, %v19032_v3  ;;  %v478_v38 = vld [vmem:[%s19260_s11 + $0x128] sm:$0xff]  ;;  %v479_v39 = vld [vmem:[%s19260_s11 + $0x130] sm:$0xff] }
  0x88   : > { %322 = vst.msk [vmem:[#allocation3 + $0x198] sm:$0xff] %vm269_vm0, %v19032_v3  ;;  %323 = vst.msk [vmem:[#allocation3 + $0x1a0] sm:$0xff] %vm269_vm0, %v19032_v3  ;;  %v480_v40 = vld [vmem:[%s19260_s11 + $0x138] sm:$0xff]  ;;  %v481_v41 = vld [vmem:[%s19260_s11 + $0x140] sm:$0xff] }
  0x89   : > { %324 = vst.msk [vmem:[#allocation3 + $0x1a8] sm:$0xff] %vm269_vm0, %v19032_v3  ;;  %326 = vst.msk [vmem:[#allocation3 + $0x1b8] sm:$0xff] %vm269_vm0, %v19032_v3  ;;  %v482_v42 = vld [vmem:[%s19260_s11 + $0x148] sm:$0xff]  ;;  %v483_v43 = vld [vmem:[%s19260_s11 + $0x150] sm:$0xff] }
  0x8a   : > { %327 = vst.msk [vmem:[#allocation3 + $0x1c0] sm:$0xff] %vm269_vm0, %v19032_v3  ;;  %328 = vst.msk [vmem:[#allocation3 + $0x1c8] sm:$0xff] %vm269_vm0, %v19032_v3  ;;  %v484_v44 = vld [vmem:[%s19260_s11 + $0x158] sm:$0xff]  ;;  %v485_v45 = vld [vmem:[%s19260_s11 + $0x160] sm:$0xff] }
  0x8b   : > { %329 = vst.msk [vmem:[#allocation3 + $0x1d0] sm:$0xff] %vm269_vm0, %v19032_v3  ;;  %331 = vst.msk [vmem:[#allocation3 + $0x1e0] sm:$0xff] %vm269_vm0, %v19032_v3  ;;  %v486_v46 = vld [vmem:[%s19260_s11 + $0x168] sm:$0xff]  ;;  %v487_v47 = vld [vmem:[%s19260_s11 + $0x170] sm:$0xff] }
  0x8c   : > { %332 = vst.msk [vmem:[#allocation3 + $0x1e8] sm:$0xff] %vm269_vm0, %v19032_v3  ;;  %333 = vst.msk [vmem:[#allocation3 + $0x1f0] sm:$0xff] %vm269_vm0, %v19032_v3  ;;  %v488_v48 = vld [vmem:[%s19260_s11 + $0x178] sm:$0xff]  ;;  %v489_v49 = vld [vmem:[%s19260_s11 + $0x180] sm:$0xff] }
  0x8d   : > { %334 = vst.msk [vmem:[#allocation3 + $0x1f8] sm:$0xff] %vm269_vm0, %v19032_v3  ;;  %336 = vst.msk [vmem:[#allocation3 + $0x208] sm:$0xff] %vm269_vm0, %v19032_v3  ;;  %v490_v50 = vld [vmem:[%s19260_s11 + $0x188] sm:$0xff]  ;;  %v491_v51 = vld [vmem:[%s19260_s11 + $0x190] sm:$0xff] }
  0x8e   : > { %337 = vst.msk [vmem:[#allocation3 + $0x210] sm:$0xff] %vm269_vm0, %v19032_v3  ;;  %338 = vst.msk [vmem:[#allocation3 + $0x218] sm:$0xff] %vm269_vm0, %v19032_v3  ;;  %v492_v52 = vld [vmem:[%s19260_s11 + $0x198] sm:$0xff]  ;;  %v493_v53 = vld [vmem:[%s19260_s11 + $0x1a0] sm:$0xff] }
  0x8f   : > { %339 = vst.msk [vmem:[#allocation3 + $0x220] sm:$0xff] %vm269_vm0, %v19032_v3  ;;  %341 = vst.msk [vmem:[#allocation3 + $0x230] sm:$0xff] %vm269_vm0, %v19032_v3  ;;  %v494_v54 = vld [vmem:[%s19260_s11 + $0x1a8] sm:$0xff]  ;;  %v495_v55 = vld [vmem:[%s19260_s11 + $0x1b0] sm:$0xff] }
  0x90   : > { %342 = vst.msk [vmem:[#allocation3 + $0x238] sm:$0xff] %vm269_vm0, %v19032_v3  ;;  %343 = vst.msk [vmem:[#allocation3 + $0x240] sm:$0xff] %vm269_vm0, %v19032_v3  ;;  %v496_v56 = vld [vmem:[%s19260_s11 + $0x1b8] sm:$0xff]  ;;  %v497_v57 = vld [vmem:[%s19260_s11 + $0x1c0] sm:$0xff] }
  0x91   : > { %344 = vst.msk [vmem:[#allocation3 + $0x248] sm:$0xff] %vm269_vm0, %v19032_v3  ;;  %346 = vst.msk [vmem:[#allocation3 + $0x258] sm:$0xff] %vm269_vm0, %v19032_v3  ;;  %v498_v58 = vld [vmem:[%s19260_s11 + $0x1c8] sm:$0xff]  ;;  %v499_v59 = vld [vmem:[%s19260_s11 + $0x1d0] sm:$0xff] }
  0x92   : > { %347 = vst.msk [vmem:[#allocation3 + $0x260] sm:$0xff] %vm269_vm0, %v19032_v3  ;;  %348 = vst.msk [vmem:[#allocation3 + $0x268] sm:$0xff] %vm269_vm0, %v19032_v3  ;;  %v500_v60 = vld [vmem:[%s19260_s11 + $0x1d8] sm:$0xff]  ;;  %v501_v61 = vld [vmem:[%s19260_s11 + $0x1e0] sm:$0xff] }
  0x93   : > { %349 = vst.msk [vmem:[#allocation3 + $0x270] sm:$0xff] %vm269_vm0, %v19032_v3  ;;  %351 = vst.msk [vmem:[#allocation3 + $0x280] sm:$0xff] %vm269_vm0, %v19032_v3  ;;  %v502_v62 = vld [vmem:[%s19260_s11 + $0x1e8] sm:$0xff]  ;;  %v503_v63 = vld [vmem:[%s19260_s11 + $0x1f0] sm:$0xff] }
  0x94   : > { %352 = vst.msk [vmem:[#allocation3 + $0x288] sm:$0xff] %vm269_vm0, %v19032_v3  ;;  %353 = vst.msk [vmem:[#allocation3 + $0x290] sm:$0xff] %vm269_vm0, %v19032_v3 }
  0x95   : > { %354 = vst.msk [vmem:[#allocation3 + $0x298] sm:$0xff] %vm269_vm0, %v19032_v3  ;;  %356 = vst.msk [vmem:[#allocation3 + $0x2a8] sm:$0xff] %vm269_vm0, %v19032_v3 }
  0x96   : > { %357 = vst.msk [vmem:[#allocation3 + $0x2b0] sm:$0xff] %vm269_vm0, %v19032_v3  ;;  %358 = vst.msk [vmem:[#allocation3 + $0x2b8] sm:$0xff] %vm269_vm0, %v19032_v3 }
  0x97   : > { %359 = vst.msk [vmem:[#allocation3 + $0x2c0] sm:$0xff] %vm269_vm0, %v19032_v3  ;;  %361 = vst.msk [vmem:[#allocation3 + $0x2d0] sm:$0xff] %vm269_vm0, %v19032_v3 }
  0x98   : > { %362 = vst.msk [vmem:[#allocation3 + $0x2d8] sm:$0xff] %vm269_vm0, %v19032_v3  ;;  %363 = vst.msk [vmem:[#allocation3 + $0x2e0] sm:$0xff] %vm269_vm0, %v19032_v3 }
  0x99   : > { %364 = vst.msk [vmem:[#allocation3 + $0x2e8] sm:$0xff] %vm269_vm0, %v19032_v3  ;;  %366 = vst.msk [vmem:[#allocation3 + $0x2f8] sm:$0xff] %vm269_vm0, %v19032_v3 }
  0x9a   : > { %367 = vst.msk [vmem:[#allocation3 + $0x300] sm:$0xff] %vm269_vm0, %v19032_v3  ;;  %368 = vst.msk [vmem:[#allocation3 + $0x308] sm:$0xff] %vm269_vm0, %v19032_v3 }
  0x9b   : > { %369 = vst.msk [vmem:[#allocation3 + $0x310] sm:$0xff] %vm269_vm0, %v19032_v3  ;;  %371 = vst.msk [vmem:[#allocation3 + $0x320] sm:$0xff] %vm269_vm0, %v19032_v3 }
  0x9c   : > { %372 = vst.msk [vmem:[#allocation3 + $0x328] sm:$0xff] %vm269_vm0, %v19032_v3  ;;  %373 = vst.msk [vmem:[#allocation3 + $0x330] sm:$0xff] %vm269_vm0, %v19032_v3 }
  0x9d   : > { %374 = vst.msk [vmem:[#allocation3 + $0x338] sm:$0xff] %vm269_vm0, %v19032_v3  ;;  %376 = vst.msk [vmem:[#allocation3 + $0x348] sm:$0xff] %vm269_vm0, %v19032_v3 }
  0x9e   : > { %377 = vst.msk [vmem:[#allocation3 + $0x350] sm:$0xff] %vm269_vm0, %v19032_v3  ;;  %378 = vst.msk [vmem:[#allocation3 + $0x358] sm:$0xff] %vm269_vm0, %v19032_v3 }
  0x9f   : > { %379 = vst.msk [vmem:[#allocation3 + $0x360] sm:$0xff] %vm269_vm0, %v19032_v3  ;;  %381 = vst.msk [vmem:[#allocation3 + $0x370] sm:$0xff] %vm269_vm0, %v19032_v3 }
  0xa0   : > { %382 = vst.msk [vmem:[#allocation3 + $0x378] sm:$0xff] %vm269_vm0, %v19032_v3  ;;  %383 = vst.msk [vmem:[#allocation3 + $0x380] sm:$0xff] %vm269_vm0, %v19032_v3 }
  0xa1   : > { %384 = vst.msk [vmem:[#allocation3 + $0x388] sm:$0xff] %vm269_vm0, %v19032_v3  ;;  %386 = vst.msk [vmem:[#allocation3 + $0x398] sm:$0xff] %vm269_vm0, %v19032_v3 }
  0xa2   : > { %387 = vst.msk [vmem:[#allocation3 + $0x3a0] sm:$0xff] %vm269_vm0, %v19032_v3  ;;  %388 = vst.msk [vmem:[#allocation3 + $0x3a8] sm:$0xff] %vm269_vm0, %v19032_v3 }
  0xa3   : > { %389 = vst.msk [vmem:[#allocation3 + $0x3b0] sm:$0xff] %vm269_vm0, %v19032_v3  ;;  %391 = vst.msk [vmem:[#allocation3 + $0x3c0] sm:$0xff] %vm269_vm0, %v19032_v3 }
  0xa4   : > { %392 = vst.msk [vmem:[#allocation3 + $0x3c8] sm:$0xff] %vm269_vm0, %v19032_v3  ;;  %393 = vst.msk [vmem:[#allocation3 + $0x3d0] sm:$0xff] %vm269_vm0, %v19032_v3 }
  0xa5   : > { %394 = vst.msk [vmem:[#allocation3 + $0x3d8] sm:$0xff] %vm269_vm0, %v19032_v3  ;;  %396 = vst.msk [vmem:[#allocation3 + $0x3e8] sm:$0xff] %vm269_vm0, %v19032_v3 }
  0xa6   : > { %397 = vst.msk [vmem:[#allocation3 + $0x3f0] sm:$0xff] %vm269_vm0, %v19032_v3  ;;  %398 = vst.msk [vmem:[#allocation3 + $0x3f8] sm:$0xff] %vm269_vm0, %v19032_v3 }
  0xa7   : > { %399 = vst.msk [vmem:[#allocation3 + $0x400] sm:$0xff] %vm269_vm0, %v19032_v3  ;;  %401 = vst.msk [vmem:[#allocation3 + $0x410] sm:$0xff] %vm269_vm0, %v19032_v3 }
  0xa8   : > { %402 = vst.msk [vmem:[#allocation3 + $0x418] sm:$0xff] %vm269_vm0, %v19032_v3  ;;  %403 = vst.msk [vmem:[#allocation3 + $0x420] sm:$0xff] %vm269_vm0, %v19032_v3 }
  0xa9   : > { %404 = vst.msk [vmem:[#allocation3 + $0x428] sm:$0xff] %vm269_vm0, %v19032_v3  ;;  %406 = vst.msk [vmem:[#allocation3 + $0x438] sm:$0xff] %vm269_vm0, %v19032_v3 }
  0xaa   : > { %407 = vst.msk [vmem:[#allocation3 + $0x440] sm:$0xff] %vm269_vm0, %v19032_v3  ;;  %408 = vst.msk [vmem:[#allocation3 + $0x448] sm:$0xff] %vm269_vm0, %v19032_v3 }
  0xab   : > { %409 = vst.msk [vmem:[#allocation3 + $0x450] sm:$0xff] %vm269_vm0, %v19032_v3  ;;  %411 = vst.msk [vmem:[#allocation3 + $0x460] sm:$0xff] %vm269_vm0, %v19032_v3 }
  0xac   : > { %412 = vst.msk [vmem:[#allocation3 + $0x468] sm:$0xff] %vm269_vm0, %v19032_v3  ;;  %413 = vst.msk [vmem:[#allocation3 + $0x470] sm:$0xff] %vm269_vm0, %v19032_v3 }
  0xad   : > { %414 = vst.msk [vmem:[#allocation3 + $0x478] sm:$0xff] %vm269_vm0, %v19032_v3  ;;  %416 = vst.msk [vmem:[#allocation3 + $0x488] sm:$0xff] %vm269_vm0, %v19032_v3 }
  0xae   : > { %417 = vst.msk [vmem:[#allocation3 + $0x490] sm:$0xff] %vm269_vm0, %v19032_v3  ;;  %418 = vst.msk [vmem:[#allocation3 + $0x498] sm:$0xff] %vm269_vm0, %v19032_v3 }
  0xaf   : > { %419 = vst.msk [vmem:[#allocation3 + $0x4a0] sm:$0xff] %vm269_vm0, %v19032_v3  ;;  %421 = vst.msk [vmem:[#allocation3 + $0x4b0] sm:$0xff] %vm269_vm0, %v19032_v3 }
  0xb0   : > { %422 = vst.msk [vmem:[#allocation3 + $0x4b8] sm:$0xff] %vm269_vm0, %v19032_v3  ;;  %423 = vst.msk [vmem:[#allocation3 + $0x4c0] sm:$0xff] %vm269_vm0, %v19032_v3 }
  0xb1   : > { %424 = vst.msk [vmem:[#allocation3 + $0x4c8] sm:$0xff] %vm269_vm0, %v19032_v3  ;;  %426 = vst.msk [vmem:[#allocation3 + $0x4d8] sm:$0xff] %vm269_vm0, %v19032_v3 }
  0xb2   : > { %427 = vst.msk [vmem:[#allocation3 + $0x4e0] sm:$0xff] %vm269_vm0, %v19032_v3  ;;  %428 = vst.msk [vmem:[#allocation3 + $0x4e8] sm:$0xff] %vm269_vm0, %v19032_v3 }
  0xb3   : > { %429 = vst.msk [vmem:[#allocation3 + $0x4f0] sm:$0xff] %vm269_vm0, %v19032_v3  ;;  %431 = vst.msk [vmem:[#allocation3 + $0x500] sm:$0xff] %vm269_vm0, %v19032_v3 }
  0xb4   : > { %432 = vst.msk [vmem:[#allocation3 + $0x508] sm:$0xff] %vm269_vm0, %v19032_v3  ;;  %433 = vst.msk [vmem:[#allocation3 + $0x510] sm:$0xff] %vm269_vm0, %v19032_v3 }
  0xb5   : > { %434 = vst.msk [vmem:[#allocation3 + $0x518] sm:$0xff] %vm269_vm0, %v19032_v3  ;;  %436 = vst.msk [vmem:[#allocation3 + $0x528] sm:$0xff] %vm269_vm0, %v19032_v3 }
  0xb6   : > { %437 = vst.msk [vmem:[#allocation3 + $0x530] sm:$0xff] %vm269_vm0, %v19032_v3  ;;  %438 = vst.msk [vmem:[#allocation3 + $0x538] sm:$0xff] %vm269_vm0, %v19032_v3 }
  0xb7   : > { %439 = vst.msk [vmem:[#allocation3 + $0x540] sm:$0xff] %vm269_vm0, %v19032_v3  ;;  %570 = vst.msk [vmem:[#allocation3 + $0x29] sm:$0xff] %vm269_vm0, %v19266_v0  ;;  %v504_v0 = vld [vmem:[%s19260_s11 + $0x1f8] sm:$0xff] }
  0xb8   : > { %280 = vst.msk [vmem:[#allocation3 + $0x48] sm:$0x3] %vm274_vm1, %v19032_v3  ;;  %275 = vst.msk [vmem:[#allocation3 + $0x20] sm:$0x3] %vm274_vm1, %v19032_v3 }
  0xb9   : > { %285 = vst.msk [vmem:[#allocation3 + $0x70] sm:$0x3] %vm274_vm1, %v19032_v3  ;;  %290 = vst.msk [vmem:[#allocation3 + $0x98] sm:$0x3] %vm274_vm1, %v19032_v3 }
  0xba   : > { %295 = vst.msk [vmem:[#allocation3 + $0xc0] sm:$0x3] %vm274_vm1, %v19032_v3  ;;  %300 = vst.msk [vmem:[#allocation3 + $0xe8] sm:$0x3] %vm274_vm1, %v19032_v3 }
  0xbb   : > { %305 = vst.msk [vmem:[#allocation3 + $0x110] sm:$0x3] %vm274_vm1, %v19032_v3  ;;  %310 = vst.msk [vmem:[#allocation3 + $0x138] sm:$0x3] %vm274_vm1, %v19032_v3 }
  0xbc   : > { %315 = vst.msk [vmem:[#allocation3 + $0x160] sm:$0x3] %vm274_vm1, %v19032_v3  ;;  %320 = vst.msk [vmem:[#allocation3 + $0x188] sm:$0x3] %vm274_vm1, %v19032_v3 }
  0xbd   : > { %325 = vst.msk [vmem:[#allocation3 + $0x1b0] sm:$0x3] %vm274_vm1, %v19032_v3  ;;  %330 = vst.msk [vmem:[#allocation3 + $0x1d8] sm:$0x3] %vm274_vm1, %v19032_v3 }
  0xbe   : > { %335 = vst.msk [vmem:[#allocation3 + $0x200] sm:$0x3] %vm274_vm1, %v19032_v3  ;;  %340 = vst.msk [vmem:[#allocation3 + $0x228] sm:$0x3] %vm274_vm1, %v19032_v3 }
  0xbf   : > { %345 = vst.msk [vmem:[#allocation3 + $0x250] sm:$0x3] %vm274_vm1, %v19032_v3  ;;  %350 = vst.msk [vmem:[#allocation3 + $0x278] sm:$0x3] %vm274_vm1, %v19032_v3 }
  0xc0   : > { %355 = vst.msk [vmem:[#allocation3 + $0x2a0] sm:$0x3] %vm274_vm1, %v19032_v3  ;;  %360 = vst.msk [vmem:[#allocation3 + $0x2c8] sm:$0x3] %vm274_vm1, %v19032_v3 }
  0xc1   : > { %365 = vst.msk [vmem:[#allocation3 + $0x2f0] sm:$0x3] %vm274_vm1, %v19032_v3  ;;  %370 = vst.msk [vmem:[#allocation3 + $0x318] sm:$0x3] %vm274_vm1, %v19032_v3 }
  0xc2   : > { %375 = vst.msk [vmem:[#allocation3 + $0x340] sm:$0x3] %vm274_vm1, %v19032_v3  ;;  %380 = vst.msk [vmem:[#allocation3 + $0x368] sm:$0x3] %vm274_vm1, %v19032_v3 }
  0xc3   : > { %385 = vst.msk [vmem:[#allocation3 + $0x390] sm:$0x3] %vm274_vm1, %v19032_v3  ;;  %390 = vst.msk [vmem:[#allocation3 + $0x3b8] sm:$0x3] %vm274_vm1, %v19032_v3 }
  0xc4   : > { %395 = vst.msk [vmem:[#allocation3 + $0x3e0] sm:$0x3] %vm274_vm1, %v19032_v3  ;;  %400 = vst.msk [vmem:[#allocation3 + $0x408] sm:$0x3] %vm274_vm1, %v19032_v3 }
  0xc5   : > { %405 = vst.msk [vmem:[#allocation3 + $0x430] sm:$0x3] %vm274_vm1, %v19032_v3  ;;  %410 = vst.msk [vmem:[#allocation3 + $0x458] sm:$0x3] %vm274_vm1, %v19032_v3 }
  0xc6   : > { %415 = vst.msk [vmem:[#allocation3 + $0x480] sm:$0x3] %vm274_vm1, %v19032_v3  ;;  %420 = vst.msk [vmem:[#allocation3 + $0x4a8] sm:$0x3] %vm274_vm1, %v19032_v3 }
  0xc7   : > { %425 = vst.msk [vmem:[#allocation3 + $0x4d0] sm:$0x3] %vm274_vm1, %v19032_v3  ;;  %430 = vst.msk [vmem:[#allocation3 + $0x4f8] sm:$0x3] %vm274_vm1, %v19032_v3 }
  0xc8   : > { %435 = vst.msk [vmem:[#allocation3 + $0x520] sm:$0x3] %vm274_vm1, %v19032_v3  ;;  %440 = vst.msk [vmem:[#allocation3 + $0x548] sm:$0x3] %vm274_vm1, %v19032_v3  ;;  %v507_v3 = vld [vmem:[%s19260_s11 + $0x210] sm:$0xff] }
  0xc9   : > { %571 = vst.msk [vmem:[#allocation3 + $0x31] sm:$0xff] %vm269_vm0, %v19269_v1  ;;  %572 = vst.msk [vmem:[#allocation3 + $0x39] sm:$0xff] %vm269_vm0, %v19272_v2  ;;  %v505_v1 = vld [vmem:[%s19260_s11 + $0x200] sm:$0xff]  ;;  %v506_v2 = vld [vmem:[%s19260_s11 + $0x208] sm:$0xff] }
  0xca   : > { %573 = vst.msk [vmem:[#allocation3 + $0x41] sm:$0xff] %vm269_vm0, %v444_v4  ;;  %574 = vst.msk [vmem:[#allocation3 + $0x51] sm:$0xff] %vm269_vm0, %v445_v5  ;;  %v508_v4 = vld [vmem:[%s19260_s11 + $0x218] sm:$0xff]  ;;  %v509_v5 = vld [vmem:[%s19260_s11 + $0x220] sm:$0xff] }
  0xcb   : > { %575 = vst.msk [vmem:[#allocation3 + $0x59] sm:$0xff] %vm269_vm0, %v446_v6  ;;  %576 = vst.msk [vmem:[#allocation3 + $0x61] sm:$0xff] %vm269_vm0, %v447_v7  ;;  %v510_v6 = vld [vmem:[%s19260_s11 + $0x228] sm:$0xff]  ;;  %v511_v7 = vld [vmem:[%s19260_s11 + $0x230] sm:$0xff] }
  0xcc   : > { %577 = vst.msk [vmem:[#allocation3 + $0x69] sm:$0xff] %vm269_vm0, %v448_v8  ;;  %578 = vst.msk [vmem:[#allocation3 + $0x79] sm:$0xff] %vm269_vm0, %v449_v9  ;;  %v512_v8 = vld [vmem:[%s19260_s11 + $0x238] sm:$0xff]  ;;  %v513_v9 = vld [vmem:[%s19260_s11 + $0x240] sm:$0xff] }
  0xcd   : > { %579 = vst.msk [vmem:[#allocation3 + $0x81] sm:$0xff] %vm269_vm0, %v450_v10  ;;  %580 = vst.msk [vmem:[#allocation3 + $0x89] sm:$0xff] %vm269_vm0, %v451_v11  ;;  %v514_v10 = vld [vmem:[%s19260_s11 + $0x248] sm:$0xff]  ;;  %v515_v11 = vld [vmem:[%s19260_s11 + $0x250] sm:$0xff] }
  0xce   : > { %581 = vst.msk [vmem:[#allocation3 + $0x91] sm:$0xff] %vm269_vm0, %v452_v12  ;;  %582 = vst.msk [vmem:[#allocation3 + $0xa1] sm:$0xff] %vm269_vm0, %v453_v13  ;;  %v516_v12 = vld [vmem:[%s19260_s11 + $0x258] sm:$0xff]  ;;  %v517_v13 = vld [vmem:[%s19260_s11 + $0x260] sm:$0xff] }
  0xcf   : > { %583 = vst.msk [vmem:[#allocation3 + $0xa9] sm:$0xff] %vm269_vm0, %v454_v14  ;;  %584 = vst.msk [vmem:[#allocation3 + $0xb1] sm:$0xff] %vm269_vm0, %v455_v15  ;;  %v518_v14 = vld [vmem:[%s19260_s11 + $0x268] sm:$0xff]  ;;  %v519_v15 = vld [vmem:[%s19260_s11 + $0x270] sm:$0xff] }
  0xd0   : > { %585 = vst.msk [vmem:[#allocation3 + $0xb9] sm:$0xff] %vm269_vm0, %v456_v16  ;;  %586 = vst.msk [vmem:[#allocation3 + $0xc9] sm:$0xff] %vm269_vm0, %v457_v17  ;;  %v520_v16 = vld [vmem:[%s19260_s11 + $0x278] sm:$0xff]  ;;  %v521_v17 = vld [vmem:[%s19260_s11 + $0x280] sm:$0xff] }
  0xd1   : > { %587 = vst.msk [vmem:[#allocation3 + $0xd1] sm:$0xff] %vm269_vm0, %v458_v18  ;;  %588 = vst.msk [vmem:[#allocation3 + $0xd9] sm:$0xff] %vm269_vm0, %v459_v19  ;;  %v522_v18 = vld [vmem:[%s19260_s11 + $0x288] sm:$0xff]  ;;  %v523_v19 = vld [vmem:[%s19260_s11 + $0x290] sm:$0xff] }
  0xd2   : > { %589 = vst.msk [vmem:[#allocation3 + $0xe1] sm:$0xff] %vm269_vm0, %v460_v20  ;;  %590 = vst.msk [vmem:[#allocation3 + $0xf1] sm:$0xff] %vm269_vm0, %v461_v21  ;;  %v524_v20 = vld [vmem:[%s19260_s11 + $0x298] sm:$0xff]  ;;  %v525_v21 = vld [vmem:[%s19260_s11 + $0x2a0] sm:$0xff] }
  0xd3   : > { %591 = vst.msk [vmem:[#allocation3 + $0xf9] sm:$0xff] %vm269_vm0, %v462_v22  ;;  %592 = vst.msk [vmem:[#allocation3 + $0x101] sm:$0xff] %vm269_vm0, %v463_v23  ;;  %v526_v22 = vld [vmem:[%s19260_s11 + $0x2a8] sm:$0xff]  ;;  %v527_v23 = vld [vmem:[%s19260_s11 + $0x2b0] sm:$0xff] }
  0xd4   : > { %593 = vst.msk [vmem:[#allocation3 + $0x109] sm:$0xff] %vm269_vm0, %v464_v24  ;;  %594 = vst.msk [vmem:[#allocation3 + $0x119] sm:$0xff] %vm269_vm0, %v465_v25  ;;  %v528_v24 = vld [vmem:[%s19260_s11 + $0x2b8] sm:$0xff]  ;;  %v529_v25 = vld [vmem:[%s19260_s11 + $0x2c0] sm:$0xff] }
  0xd5   : > { %595 = vst.msk [vmem:[#allocation3 + $0x121] sm:$0xff] %vm269_vm0, %v466_v26  ;;  %596 = vst.msk [vmem:[#allocation3 + $0x129] sm:$0xff] %vm269_vm0, %v467_v27  ;;  %v530_v26 = vld [vmem:[%s19260_s11 + $0x2c8] sm:$0xff]  ;;  %v531_v27 = vld [vmem:[%s19260_s11 + $0x2d0] sm:$0xff] }
  0xd6   : > { %597 = vst.msk [vmem:[#allocation3 + $0x131] sm:$0xff] %vm269_vm0, %v468_v28  ;;  %598 = vst.msk [vmem:[#allocation3 + $0x141] sm:$0xff] %vm269_vm0, %v469_v29  ;;  %v532_v28 = vld [vmem:[%s19260_s11 + $0x2d8] sm:$0xff]  ;;  %v533_v29 = vld [vmem:[%s19260_s11 + $0x2e0] sm:$0xff] }
  0xd7   : > { %599 = vst.msk [vmem:[#allocation3 + $0x149] sm:$0xff] %vm269_vm0, %v470_v30  ;;  %600 = vst.msk [vmem:[#allocation3 + $0x151] sm:$0xff] %vm269_vm0, %v471_v31  ;;  %v534_v30 = vld [vmem:[%s19260_s11 + $0x2e8] sm:$0xff]  ;;  %v535_v31 = vld [vmem:[%s19260_s11 + $0x2f0] sm:$0xff] }
  0xd8   : > { %601 = vst.msk [vmem:[#allocation3 + $0x159] sm:$0xff] %vm269_vm0, %v472_v32  ;;  %602 = vst.msk [vmem:[#allocation3 + $0x169] sm:$0xff] %vm269_vm0, %v473_v33  ;;  %v536_v32 = vld [vmem:[%s19260_s11 + $0x2f8] sm:$0xff]  ;;  %v537_v33 = vld [vmem:[%s19260_s11 + $0x300] sm:$0xff] }
  0xd9   : > { %603 = vst.msk [vmem:[#allocation3 + $0x171] sm:$0xff] %vm269_vm0, %v474_v34  ;;  %604 = vst.msk [vmem:[#allocation3 + $0x179] sm:$0xff] %vm269_vm0, %v475_v35  ;;  %v538_v34 = vld [vmem:[%s19260_s11 + $0x308] sm:$0xff]  ;;  %v539_v35 = vld [vmem:[%s19260_s11 + $0x310] sm:$0xff] }
  0xda   : > { %605 = vst.msk [vmem:[#allocation3 + $0x181] sm:$0xff] %vm269_vm0, %v476_v36  ;;  %606 = vst.msk [vmem:[#allocation3 + $0x191] sm:$0xff] %vm269_vm0, %v477_v37  ;;  %v540_v36 = vld [vmem:[%s19260_s11 + $0x318] sm:$0xff]  ;;  %v541_v37 = vld [vmem:[%s19260_s11 + $0x320] sm:$0xff] }
  0xdb   : > { %607 = vst.msk [vmem:[#allocation3 + $0x199] sm:$0xff] %vm269_vm0, %v478_v38  ;;  %608 = vst.msk [vmem:[#allocation3 + $0x1a1] sm:$0xff] %vm269_vm0, %v479_v39  ;;  %v542_v38 = vld [vmem:[%s19260_s11 + $0x328] sm:$0xff]  ;;  %v543_v39 = vld [vmem:[%s19260_s11 + $0x330] sm:$0xff] }
  0xdc   : > { %609 = vst.msk [vmem:[#allocation3 + $0x1a9] sm:$0xff] %vm269_vm0, %v480_v40  ;;  %610 = vst.msk [vmem:[#allocation3 + $0x1b9] sm:$0xff] %vm269_vm0, %v481_v41  ;;  %v544_v40 = vld [vmem:[%s19260_s11 + $0x338] sm:$0xff]  ;;  %v545_v41 = vld [vmem:[%s19260_s11 + $0x340] sm:$0xff] }
  0xdd   : > { %611 = vst.msk [vmem:[#allocation3 + $0x1c1] sm:$0xff] %vm269_vm0, %v482_v42  ;;  %612 = vst.msk [vmem:[#allocation3 + $0x1c9] sm:$0xff] %vm269_vm0, %v483_v43  ;;  %v546_v42 = vld [vmem:[%s19260_s11 + $0x348] sm:$0xff]  ;;  %v547_v43 = vld [vmem:[%s19260_s11 + $0x350] sm:$0xff] }
  0xde   : > { %613 = vst.msk [vmem:[#allocation3 + $0x1d1] sm:$0xff] %vm269_vm0, %v484_v44  ;;  %614 = vst.msk [vmem:[#allocation3 + $0x1e1] sm:$0xff] %vm269_vm0, %v485_v45  ;;  %v548_v44 = vld [vmem:[%s19260_s11 + $0x358] sm:$0xff]  ;;  %v549_v45 = vld [vmem:[%s19260_s11 + $0x360] sm:$0xff] }
  0xdf   : > { %615 = vst.msk [vmem:[#allocation3 + $0x1e9] sm:$0xff] %vm269_vm0, %v486_v46  ;;  %616 = vst.msk [vmem:[#allocation3 + $0x1f1] sm:$0xff] %vm269_vm0, %v487_v47  ;;  %v550_v46 = vld [vmem:[%s19260_s11 + $0x368] sm:$0xff]  ;;  %v551_v47 = vld [vmem:[%s19260_s11 + $0x370] sm:$0xff] }
  0xe0   : > { %617 = vst.msk [vmem:[#allocation3 + $0x1f9] sm:$0xff] %vm269_vm0, %v488_v48  ;;  %618 = vst.msk [vmem:[#allocation3 + $0x209] sm:$0xff] %vm269_vm0, %v489_v49  ;;  %v552_v48 = vld [vmem:[%s19260_s11 + $0x378] sm:$0xff]  ;;  %v553_v49 = vld [vmem:[%s19260_s11 + $0x380] sm:$0xff] }
  0xe1   : > { %619 = vst.msk [vmem:[#allocation3 + $0x211] sm:$0xff] %vm269_vm0, %v490_v50  ;;  %620 = vst.msk [vmem:[#allocation3 + $0x219] sm:$0xff] %vm269_vm0, %v491_v51  ;;  %v554_v50 = vld [vmem:[%s19260_s11 + $0x388] sm:$0xff]  ;;  %v555_v51 = vld [vmem:[%s19260_s11 + $0x390] sm:$0xff] }
  0xe2   : > { %621 = vst.msk [vmem:[#allocation3 + $0x221] sm:$0xff] %vm269_vm0, %v492_v52  ;;  %622 = vst.msk [vmem:[#allocation3 + $0x231] sm:$0xff] %vm269_vm0, %v493_v53  ;;  %v556_v52 = vld [vmem:[%s19260_s11 + $0x398] sm:$0xff]  ;;  %v557_v53 = vld [vmem:[%s19260_s11 + $0x3a0] sm:$0xff] }
  0xe3   : > { %623 = vst.msk [vmem:[#allocation3 + $0x239] sm:$0xff] %vm269_vm0, %v494_v54  ;;  %624 = vst.msk [vmem:[#allocation3 + $0x241] sm:$0xff] %vm269_vm0, %v495_v55  ;;  %v558_v54 = vld [vmem:[%s19260_s11 + $0x3a8] sm:$0xff]  ;;  %v559_v55 = vld [vmem:[%s19260_s11 + $0x3b0] sm:$0xff] }
  0xe4   : > { %625 = vst.msk [vmem:[#allocation3 + $0x249] sm:$0xff] %vm269_vm0, %v496_v56  ;;  %626 = vst.msk [vmem:[#allocation3 + $0x259] sm:$0xff] %vm269_vm0, %v497_v57  ;;  %v560_v56 = vld [vmem:[%s19260_s11 + $0x3b8] sm:$0xff]  ;;  %v561_v57 = vld [vmem:[%s19260_s11 + $0x3c0] sm:$0xff] }
  0xe5   : > { %627 = vst.msk [vmem:[#allocation3 + $0x261] sm:$0xff] %vm269_vm0, %v498_v58  ;;  %628 = vst.msk [vmem:[#allocation3 + $0x269] sm:$0xff] %vm269_vm0, %v499_v59  ;;  %v562_v58 = vld [vmem:[%s19260_s11 + $0x3c8] sm:$0xff]  ;;  %v563_v59 = vld [vmem:[%s19260_s11 + $0x3d0] sm:$0xff] }
  0xe6   : > { %629 = vst.msk [vmem:[#allocation3 + $0x271] sm:$0xff] %vm269_vm0, %v500_v60  ;;  %630 = vst.msk [vmem:[#allocation3 + $0x281] sm:$0xff] %vm269_vm0, %v501_v61  ;;  %v564_v60 = vld [vmem:[%s19260_s11 + $0x3d8] sm:$0xff]  ;;  %v565_v61 = vld [vmem:[%s19260_s11 + $0x3e0] sm:$0xff] }
  0xe7   : > { %631 = vst.msk [vmem:[#allocation3 + $0x289] sm:$0xff] %vm269_vm0, %v502_v62  ;;  %632 = vst.msk [vmem:[#allocation3 + $0x291] sm:$0xff] %vm269_vm0, %v503_v63  ;;  %v566_v62 = vld [vmem:[%s19260_s11 + $0x3e8] sm:$0xff]  ;;  %v567_v63 = vld [vmem:[%s19260_s11 + $0x3f0] sm:$0xff] }
  0xe8   : > { %633 = vst.msk [vmem:[#allocation3 + $0x299] sm:$0xff] %vm269_vm0, %v504_v0  ;;  %634 = vst.msk [vmem:[#allocation3 + $0x2a9] sm:$0xff] %vm269_vm0, %v505_v1  ;;  %v568_v0 = vld [vmem:[%s19260_s11 + $0x3f8] sm:$0xff] }
  0xe9   : > { %635 = vst.msk [vmem:[#allocation3 + $0x2b1] sm:$0xff] %vm269_vm0, %v506_v2  ;;  %636 = vst.msk [vmem:[#allocation3 + $0x2b9] sm:$0xff] %vm269_vm0, %v507_v3 }
  0xea   : > { %637 = vst.msk [vmem:[#allocation3 + $0x2c1] sm:$0xff] %vm269_vm0, %v508_v4  ;;  %638 = vst.msk [vmem:[#allocation3 + $0x2d1] sm:$0xff] %vm269_vm0, %v509_v5 }
  0xeb   : > { %639 = vst.msk [vmem:[#allocation3 + $0x2d9] sm:$0xff] %vm269_vm0, %v510_v6  ;;  %640 = vst.msk [vmem:[#allocation3 + $0x2e1] sm:$0xff] %vm269_vm0, %v511_v7 }
  0xec   : > { %641 = vst.msk [vmem:[#allocation3 + $0x2e9] sm:$0xff] %vm269_vm0, %v512_v8  ;;  %642 = vst.msk [vmem:[#allocation3 + $0x2f9] sm:$0xff] %vm269_vm0, %v513_v9 }
  0xed   : > { %643 = vst.msk [vmem:[#allocation3 + $0x301] sm:$0xff] %vm269_vm0, %v514_v10  ;;  %644 = vst.msk [vmem:[#allocation3 + $0x309] sm:$0xff] %vm269_vm0, %v515_v11 }
  0xee   : > { %645 = vst.msk [vmem:[#allocation3 + $0x311] sm:$0xff] %vm269_vm0, %v516_v12  ;;  %646 = vst.msk [vmem:[#allocation3 + $0x321] sm:$0xff] %vm269_vm0, %v517_v13 }
  0xef   : > { %647 = vst.msk [vmem:[#allocation3 + $0x329] sm:$0xff] %vm269_vm0, %v518_v14  ;;  %648 = vst.msk [vmem:[#allocation3 + $0x331] sm:$0xff] %vm269_vm0, %v519_v15 }
  0xf0   : > { %649 = vst.msk [vmem:[#allocation3 + $0x339] sm:$0xff] %vm269_vm0, %v520_v16  ;;  %650 = vst.msk [vmem:[#allocation3 + $0x349] sm:$0xff] %vm269_vm0, %v521_v17 }
  0xf1   : > { %651 = vst.msk [vmem:[#allocation3 + $0x351] sm:$0xff] %vm269_vm0, %v522_v18  ;;  %652 = vst.msk [vmem:[#allocation3 + $0x359] sm:$0xff] %vm269_vm0, %v523_v19 }
  0xf2   : > { %653 = vst.msk [vmem:[#allocation3 + $0x361] sm:$0xff] %vm269_vm0, %v524_v20  ;;  %654 = vst.msk [vmem:[#allocation3 + $0x371] sm:$0xff] %vm269_vm0, %v525_v21 }
  0xf3   : > { %655 = vst.msk [vmem:[#allocation3 + $0x379] sm:$0xff] %vm269_vm0, %v526_v22  ;;  %656 = vst.msk [vmem:[#allocation3 + $0x381] sm:$0xff] %vm269_vm0, %v527_v23 }
  0xf4   : > { %657 = vst.msk [vmem:[#allocation3 + $0x389] sm:$0xff] %vm269_vm0, %v528_v24  ;;  %658 = vst.msk [vmem:[#allocation3 + $0x399] sm:$0xff] %vm269_vm0, %v529_v25 }
  0xf5   : > { %659 = vst.msk [vmem:[#allocation3 + $0x3a1] sm:$0xff] %vm269_vm0, %v530_v26  ;;  %660 = vst.msk [vmem:[#allocation3 + $0x3a9] sm:$0xff] %vm269_vm0, %v531_v27 }
  0xf6   : > { %661 = vst.msk [vmem:[#allocation3 + $0x3b1] sm:$0xff] %vm269_vm0, %v532_v28  ;;  %662 = vst.msk [vmem:[#allocation3 + $0x3c1] sm:$0xff] %vm269_vm0, %v533_v29 }
  0xf7   : > { %663 = vst.msk [vmem:[#allocation3 + $0x3c9] sm:$0xff] %vm269_vm0, %v534_v30  ;;  %664 = vst.msk [vmem:[#allocation3 + $0x3d1] sm:$0xff] %vm269_vm0, %v535_v31 }
  0xf8   : > { %665 = vst.msk [vmem:[#allocation3 + $0x3d9] sm:$0xff] %vm269_vm0, %v536_v32  ;;  %666 = vst.msk [vmem:[#allocation3 + $0x3e9] sm:$0xff] %vm269_vm0, %v537_v33 }
  0xf9   : > { %667 = vst.msk [vmem:[#allocation3 + $0x3f1] sm:$0xff] %vm269_vm0, %v538_v34  ;;  %668 = vst.msk [vmem:[#allocation3 + $0x3f9] sm:$0xff] %vm269_vm0, %v539_v35 }
  0xfa   : > { %669 = vst.msk [vmem:[#allocation3 + $0x401] sm:$0xff] %vm269_vm0, %v540_v36  ;;  %670 = vst.msk [vmem:[#allocation3 + $0x411] sm:$0xff] %vm269_vm0, %v541_v37 }
  0xfb   : > { %671 = vst.msk [vmem:[#allocation3 + $0x419] sm:$0xff] %vm269_vm0, %v542_v38  ;;  %672 = vst.msk [vmem:[#allocation3 + $0x421] sm:$0xff] %vm269_vm0, %v543_v39 }
  0xfc   : > { %673 = vst.msk [vmem:[#allocation3 + $0x429] sm:$0xff] %vm269_vm0, %v544_v40  ;;  %674 = vst.msk [vmem:[#allocation3 + $0x439] sm:$0xff] %vm269_vm0, %v545_v41 }
  0xfd   : > { %675 = vst.msk [vmem:[#allocation3 + $0x441] sm:$0xff] %vm269_vm0, %v546_v42  ;;  %676 = vst.msk [vmem:[#allocation3 + $0x449] sm:$0xff] %vm269_vm0, %v547_v43 }
  0xfe   : > { %677 = vst.msk [vmem:[#allocation3 + $0x451] sm:$0xff] %vm269_vm0, %v548_v44  ;;  %678 = vst.msk [vmem:[#allocation3 + $0x461] sm:$0xff] %vm269_vm0, %v549_v45 }
  0xff   : > { %679 = vst.msk [vmem:[#allocation3 + $0x469] sm:$0xff] %vm269_vm0, %v550_v46  ;;  %680 = vst.msk [vmem:[#allocation3 + $0x471] sm:$0xff] %vm269_vm0, %v551_v47 }
 0x100   : > { %681 = vst.msk [vmem:[#allocation3 + $0x479] sm:$0xff] %vm269_vm0, %v552_v48  ;;  %682 = vst.msk [vmem:[#allocation3 + $0x489] sm:$0xff] %vm269_vm0, %v553_v49 }
 0x101   : > { %683 = vst.msk [vmem:[#allocation3 + $0x491] sm:$0xff] %vm269_vm0, %v554_v50  ;;  %684 = vst.msk [vmem:[#allocation3 + $0x499] sm:$0xff] %vm269_vm0, %v555_v51 }
 0x102   : > { %685 = vst.msk [vmem:[#allocation3 + $0x4a1] sm:$0xff] %vm269_vm0, %v556_v52  ;;  %686 = vst.msk [vmem:[#allocation3 + $0x4b1] sm:$0xff] %vm269_vm0, %v557_v53 }
 0x103   : > { %687 = vst.msk [vmem:[#allocation3 + $0x4b9] sm:$0xff] %vm269_vm0, %v558_v54  ;;  %688 = vst.msk [vmem:[#allocation3 + $0x4c1] sm:$0xff] %vm269_vm0, %v559_v55 }
 0x104   : > { %689 = vst.msk [vmem:[#allocation3 + $0x4c9] sm:$0xff] %vm269_vm0, %v560_v56  ;;  %690 = vst.msk [vmem:[#allocation3 + $0x4d9] sm:$0xff] %vm269_vm0, %v561_v57 }
 0x105   : > { %691 = vst.msk [vmem:[#allocation3 + $0x4e1] sm:$0xff] %vm269_vm0, %v562_v58  ;;  %692 = vst.msk [vmem:[#allocation3 + $0x4e9] sm:$0xff] %vm269_vm0, %v563_v59 }
 0x106   : > { %693 = vst.msk [vmem:[#allocation3 + $0x4f1] sm:$0xff] %vm269_vm0, %v564_v60  ;;  %694 = vst.msk [vmem:[#allocation3 + $0x501] sm:$0xff] %vm269_vm0, %v565_v61 }
 0x107   : > { %695 = vst.msk [vmem:[#allocation3 + $0x509] sm:$0xff] %vm269_vm0, %v566_v62  ;;  %696 = vst.msk [vmem:[#allocation3 + $0x511] sm:$0xff] %vm269_vm0, %v567_v63 }
 0x108   : > { %697 = vst.msk [vmem:[#allocation3 + $0x519] sm:$0xff] %vm269_vm0, %v568_v0 }
 0x109 PF: > { %v16076_v1 = vld.sshfl [vmem:[%s19240_s25] sm:$0x33 pattern:$0x76325410]  ;;  %vm1147_vm2 = vcmask 1040384   ;;  %vm1148_vm3 = vcmask 1041408  }
 0x10a   : > { %v953_v2 = vcombine.high %v16076_v1, %v16076_v1  ;;  %v16336_v3 = vld.sshfl [vmem:[%s19240_s25 + $0x10] sm:$0x33 pattern:$0x76325410]  ;;  %v19033_v4 = vmov 65535   ;;  %v19034_v7 = vmov 0  }
 0x10b   : > { %v1149_v5 = vsel %vm1147_vm2, 4294967295, %v19033_v4  ;;  %v7364_v6 = vcombine.high %v16336_v3, %v16336_v3  ;;  %1189 = vmatprep.mubr.bf16.mxu1 %v19034_v7  ;;  %v698_v8 = vld [vmem:[#allocation3] sm:$0xff]  ;;  %7409 = vmatprep.mubr.bf16.mxu0 %v19034_v7  ;;  %v703_v9 = vld [vmem:[#allocation3 + $0x28] sm:$0xff]  ;;  %vm954_vm4 = vcmask 23552   ;;  %vm5010_vm5 = vcmask 1047554   ;;  %v700_v41 = vld [vmem:[#allocation3 + $0x10] sm:$0xff] }
 0x10c   : > { %v19874_v10 = vsel %vm1148_vm3, %v1149_v5, 0  ;;  %v699_v11 = vld [vmem:[#allocation3 + $0x8] sm:$0xff]  ;;  %v16141_v12 = vld.sshfl [vmem:[%s19240_s25 + $0xc] sm:$0x33 pattern:$0x76325410] }
 0x10d   : > { %v1155_v13 = vand.u32 %v19874_v10, %v953_v2  ;;  %v19879_v14 = vand.u32 %v7364_v6, %v19874_v10  ;;  %v1152_v15 = vand.u32 %v16076_v1, %v19874_v10  ;;  %v19883_v16 = vand.u32 %v16336_v3, %v19874_v10  ;;  %v16401_v17 = vld.sshfl [vmem:[%s19240_s25 + $0x1c] sm:$0x33 pattern:$0x76325410]  ;;  %v705_v19 = vld [vmem:[#allocation3 + $0x38] sm:$0xff]  ;;  %v714_v2 = vld [vmem:[#allocation3 + $0x80] sm:$0xff] }
 0x10e   : > { %v704_v18 = vld [vmem:[#allocation3 + $0x30] sm:$0xff]  ;;  %v2094_v20 = vcombine.high %v16141_v12, %v16141_v12  ;;  %v8844_v21 = vcombine.high %v16401_v17, %v16401_v17  ;;  %v706_v22 = vld [vmem:[#allocation3 + $0x40] sm:$0xff]  ;;  %v19889_v24 = vpack.c.bf16 %v699_v11, %v698_v8  ;;  %v2102_v25 = vand.u32 %v16141_v12, %v19874_v10  ;;  %v707_v31 = vld [vmem:[#allocation3 + $0x48] sm:$0x3]  ;;  %s16662_s4 = sshll.u32 %s19009_s18, 1  ;;  %s16663_s6 = sshll.u32 %s19013_s19, 9 }
 0x10f   : > { %23912 = vst [vmem:[#allocation18_spill] sm:$0xff] %v19879_v14  ;;  %23913 = vst [vmem:[#allocation19_spill] sm:$0xff] %v19883_v16  ;;  %v19886_v23 = vpack.c.bf16 %v704_v18, %v703_v9  ;;  %1157 = vmatprep.subr.bf16.mxu1 %v1155_v13  ;;  %7377 = vmatprep.subr.bf16.mxu0 %v19879_v14  ;;  %v19892_v26 = vpack.c.bf16 %v706_v22, %v705_v19  ;;  %v5012_v33 = vrot.slane %v703_v9, 6  ;;  %v708_v34 = vld [vmem:[#allocation3 + $0x50] sm:$0xff]  ;;  %v709_v35 = vld [vmem:[#allocation3 + $0x58] sm:$0xff]  ;;  %vm10394_vm7 = vcmask 1046528   ;;  %s15936_s28 = sadd.s32 %s16663_s6, %s16662_s4 }
 0x110   : > { %23914 = vst [vmem:[#allocation20_spill] sm:$0xff] %v19889_v24  ;;  %1158 = vmatpush1.bf16.msra.mxu1 %v1152_v15  ;;  %7378 = vmatpush1.bf16.msra.mxu0 %v19883_v16  ;;  %v2105_v27 = vand.u32 %v2094_v20, %v19874_v10  ;;  %v8855_v28 = vand.u32 %v8844_v21, %v19874_v10  ;;  %vm5113_vm6 = vsmask.f32 7424  ;;  %v701_v42 = vld [vmem:[#allocation3 + $0x18] sm:$0xff]  ;;  %v710_v46 = vld [vmem:[#allocation3 + $0x60] sm:$0xff]  ;;  %v711_v47 = vld [vmem:[#allocation3 + $0x68] sm:$0xff] }
 0x111   : > { %v5132_v29 = vshrl.u32 %v19886_v23, 16  ;;  %v5134_v30 = vshll.u32 %v19886_v23, 16  ;;  %v5138_v32 = vshll.u32 %v19892_v26, 16  ;;  %v8852_v38 = vand.u32 %v16401_v17, %v19874_v10  ;;  %v712_v56 = vld [vmem:[#allocation3 + $0x70] sm:$0x3]  ;;  %v713_v1 = vld [vmem:[#allocation3 + $0x78] sm:$0xff] }
 0x112   : > { %2107 = vmatprep.subr.bf16.mxu1 %v2105_v27  ;;  %8857 = vmatprep.subr.bf16.mxu0 %v8855_v28  ;;  %v5046_v39 = vsel %vm5010_vm5, %v5012_v33, %v707_v31  ;;  %v5142_v44 = vshrl.u32 %v19892_v26, 16  ;;  %v19908_v45 = vpack.c.bf16 %v709_v35, %v708_v34  ;;  %v19916_v50 = vpack.c.bf16 %v701_v42, %v700_v41  ;;  %v715_v8 = vld [vmem:[#allocation3 + $0x88] sm:$0xff]  ;;  %v716_v9 = vld [vmem:[#allocation3 + $0x90] sm:$0xff]  ;;  %v717_v18 = vld [vmem:[#allocation3 + $0x98] sm:$0x3]  ;;  %s16664_s18 = sshll.u32 %s15936_s28, 7 }
 0x113   : > { %v5136_v36 = vrot.slane %v5134_v30, 1  ;;  %16077 = vmatmul.mubr.msk.bf16.vlgmr.msra.gmra.mrb[0].mxu1 %vm954_vm4, %v19889_v24  ;;  %v5140_v37 = vrot.slane %v5138_v32, 1  ;;  %v19905_v43 = vpack.c.bf16 %v5046_v39, %v5046_v39  ;;  %v19919_v53 = vpack.c.bf16 %v711_v47, %v710_v46  ;;  %v718_v30 = vld [vmem:[#allocation3 + $0xa0] sm:$0xff]  ;;  %v719_v31 = vld [vmem:[#allocation3 + $0xa8] sm:$0xff]  ;;  %s15939_s19 = sshll.u32 %s19262_s5, 4  ;;  %s23527_s26 = scalar_lea.sflag [#allocation6], %s253_s17  ;;  %s23519_s19 = int_to_ptr.vmem [resolvable:$true] %s15939_s19 }
 0x114   : > { %2108 = vmatpush1.bf16.msra.mxu1 %v2102_v25  ;;  %1199 = vmatprep.mubr.bf16.mxu1 %v19034_v7  ;;  %23917 = vst [vmem:[#allocation23_spill] sm:$0xff] %v19916_v50  ;;  %v5152_v54 = vshll.u32 %v19908_v45, 16  ;;  %v5013_v55 = vrot.slane %v708_v34, 6  ;;  %v5150_v58 = vshrl.u32 %v19908_v45, 16  ;;  %v19944_v6 = vpack.c.bf16 %v714_v2, %v713_v1  ;;  %v726_v2 = vld [vmem:[#allocation3 + $0xe0] sm:$0xff]  ;;  %s18899_s23 = scalar_lea.vmem %s23519_s19, 32768 }
 0x115   : > { %v5137_v40 = vor.u32 %v5136_v36, %v5132_v29  ;;  %23915 = vst [vmem:[#allocation21_spill] sm:$0xff] %v19905_v43  ;;  %v5146_v49 = vshll.u32 %v19905_v43, 16  ;;  %v5144_v51 = vor.u32 %v5142_v44, %v5140_v37  ;;  %v5156_v60 = vshll.u32 %v19919_v53, 16  ;;  %v720_v36 = vld [vmem:[#allocation3 + $0xb0] sm:$0xff]  ;;  %v722_v44 = vld [vmem:[#allocation3 + $0xc0] sm:$0x3]  ;;  %p18900_p2 = scmp.ne.s32.totalorder %s23519_s19, %s18899_s23 }
 0x116   : > { %v5154_v59 = vrot.slane %v5152_v54, 1  ;;  %v5047_v61 = vsel %vm5010_vm5, %v5013_v55, %v712_v56  ;;  %v5160_v4 = vshrl.u32 %v19919_v53, 16  ;;  %v19949_v13 = vpack.c.bf16 %v716_v9, %v715_v8  ;;  %p24542_p9 = scmp.ne.s32.totalorder %s23905_s9, 0 }
 0x117   : > { %v19911_v48 = vsel %vm5113_vm6, %v5137_v40, %v5140_v37  ;;  %v5148_v52 = vrot.slane %v5146_v49, 1  ;;  %v5158_v63 = vrot.slane %v5156_v60, 1  ;;  %v19934_v0 = vpack.c.bf16 %v5047_v61, %v5047_v61  ;;  %v721_v37 = vld [vmem:[#allocation3 + $0xb8] sm:$0xff] }
 0x118   : > { %23916 = vst [vmem:[#allocation22_spill] sm:$0xff] %v19911_v48  ;;  %16337 = vmatmul.mubr.msk.bf16.vlgmr.msra.gmra.mrb[0].mxu0 %vm954_vm4, %v19911_v48  ;;  %v5155_v62 = vor.u32 %v5154_v59, %v5150_v58  ;;  %v5170_v15 = vshll.u32 %v19944_v6, 16  ;;  %v5014_v17 = vrot.slane %v713_v1, 6  ;;  %v5168_v20 = vshrl.u32 %v19944_v6, 16  ;;  %v723_v58 = vld [vmem:[#allocation3 + $0xc8] sm:$0xff]  ;;  %v724_v59 = vld [vmem:[#allocation3 + $0xd0] sm:$0xff]  ;;  %p18901_p10 = pnand %p18900_p2, %p24542_p9 }
 0x119   : > { %8858 = vmatpush1.bf16.msra.mxu0 %v8852_v38  ;;  %7419 = vmatprep.mubr.bf16.mxu0 %v19034_v7  ;;  %v19925_v57 = vsel %vm5113_vm6, %v5144_v51, %v5148_v52  ;;  %23919 = vst [vmem:[#allocation25_spill] sm:$0xff] %v19934_v0  ;;  %v5164_v5 = vshll.u32 %v19934_v0, 16  ;;  %v5162_v11 = vor.u32 %v5160_v4, %v5158_v63  ;;  %v5174_v22 = vshll.u32 %v19949_v13, 16  ;;  %v725_v1 = vld [vmem:[#allocation3 + $0xd8] sm:$0xff]  ;;  %v752_v48 = vld [vmem:[#allocation3 + $0x1b0] sm:$0x3] }
 0x11a   : > { %23918 = vst [vmem:[#allocation24_spill] sm:$0xff] %v19925_v57  ;;  %v19939_v3 = vsel %vm5113_vm6, %v5155_v62, %v5158_v63  ;;  %v5172_v21 = vrot.slane %v5170_v15, 1  ;;  %v5048_v25 = vsel %vm5010_vm5, %v5014_v17, %v717_v18  ;;  %v5178_v33 = vshrl.u32 %v19949_v13, 16  ;;  %p18902_p11 = pneg %p18901_p10 }
 0x11b   : > { %16078 = vmatmul.mubr.msk.bf16.gmra.mrb[4].mxu1 %vm954_vm4, %v19916_v50  ;;  %23920 = vst [vmem:[#allocation26_spill] sm:$0xff] %v19939_v3  ;;  %v5166_v12 = vrot.slane %v5164_v5, 1  ;;  %v5176_v28 = vrot.slane %v5174_v22, 1  ;;  %v19964_v29 = vpack.c.bf16 %v5048_v25, %v5048_v25  ;;  %v19974_v35 = vpack.c.bf16 %v719_v31, %v718_v30  ;;  %v767_v50 = vld [vmem:[#allocation3 + $0x228] sm:$0x3] }
 0x11c   : > { %1209 = vmatprep.mubr.bf16.mxu1 %v19034_v7  ;;  %v5173_v27 = vor.u32 %v5172_v21, %v5168_v20  ;;  %v19979_v40 = vpack.c.bf16 %v721_v37, %v720_v36  ;;  %v5015_v42 = vrot.slane %v718_v30, 6  ;;  %v20004_v63 = vpack.c.bf16 %v724_v59, %v723_v58  ;;  %v729_v30 = vld [vmem:[#allocation3 + $0xf8] sm:$0xff]  ;;  %v730_v37 = vld [vmem:[#allocation3 + $0x100] sm:$0xff] }
 0x11d   : > { %v19955_v19 = vsel %vm5113_vm6, %v5162_v11, %v5166_v12  ;;  %23922 = vst [vmem:[#allocation28_spill] sm:$0xff] %v19964_v29  ;;  %v5182_v34 = vshll.u32 %v19964_v29, 16  ;;  %v5180_v38 = vor.u32 %v5178_v33, %v5176_v28  ;;  %v5188_v41 = vshll.u32 %v19974_v35, 16  ;;  %v727_v12 = vld [vmem:[#allocation3 + $0xe8] sm:$0x3] }
 0x11e   : > { %23921 = vst [vmem:[#allocation27_spill] sm:$0xff] %v19955_v19  ;;  %v19969_v32 = vsel %vm5113_vm6, %v5173_v27, %v5176_v28  ;;  %v5186_v47 = vshrl.u32 %v19974_v35, 16  ;;  %v5192_v51 = vshll.u32 %v19979_v40, 16  ;;  %v5049_v52 = vsel %vm5010_vm5, %v5015_v42, %v722_v44  ;;  %v728_v28 = vld [vmem:[#allocation3 + $0xf0] sm:$0xff] }
 0x11f   : > { %23923 = vst [vmem:[#allocation29_spill] sm:$0xff] %v19969_v32  ;;  %v5184_v39 = vrot.slane %v5182_v34, 1  ;;  %v5190_v49 = vrot.slane %v5188_v41, 1  ;;  %v19994_v56 = vpack.c.bf16 %v5049_v52, %v5049_v52  ;;  %v5196_v61 = vshrl.u32 %v19979_v40, 16 }
 0x120   : > { %16338 = vmatmul.mubr.msk.bf16.gmra.mrb[4].mxu0 %vm954_vm4, %v19925_v57  ;;  %v5194_v55 = vrot.slane %v5192_v51, 1  ;;  %v20009_v8 = vpack.c.bf16 %v726_v2, %v725_v1  ;;  %v5206_v9 = vshll.u32 %v20004_v63, 16  ;;  %v5016_v11 = vrot.slane %v723_v58, 6  ;;  %v733_v1 = vld [vmem:[#allocation3 + $0x118] sm:$0xff]  ;;  %v734_v2 = vld [vmem:[#allocation3 + $0x120] sm:$0xff] }
 0x121   : > { %7429 = vmatprep.mubr.bf16.mxu0 %v19034_v7  ;;  %v19985_v46 = vsel %vm5113_vm6, %v5180_v38, %v5184_v39  ;;  %v5191_v54 = vor.u32 %v5190_v49, %v5186_v47  ;;  %23925 = vst [vmem:[#allocation31_spill] sm:$0xff] %v19994_v56  ;;  %v5200_v62 = vshll.u32 %v19994_v56, 16  ;;  %v5204_v17 = vshrl.u32 %v20004_v63, 16  ;;  %v731_v38 = vld [vmem:[#allocation3 + $0x108] sm:$0xff]  ;;  %v732_v49 = vld [vmem:[#allocation3 + $0x110] sm:$0x3] }
 0x122   : > { %23924 = vst [vmem:[#allocation30_spill] sm:$0xff] %v19985_v46  ;;  %v5198_v4 = vor.u32 %v5196_v61, %v5194_v55  ;;  %v5208_v18 = vrot.slane %v5206_v9, 1  ;;  %v5210_v20 = vshll.u32 %v20009_v8, 16  ;;  %v5050_v21 = vsel %vm5010_vm5, %v5016_v11, %v727_v12  ;;  %v735_v12 = vld [vmem:[#allocation3 + $0x128] sm:$0xff]  ;;  %v762_v56 = vld [vmem:[#allocation3 + $0x200] sm:$0x3] }
 0x123   : > { %16079 = vmatmul.mubr.msk.bf16.gmra.mrb[8].mxu1 %vm954_vm4, %v19886_v23  ;;  %v19999_v60 = vsel %vm5113_vm6, %v5191_v54, %v5194_v55  ;;  %v5202_v5 = vrot.slane %v5200_v62, 1  ;;  %v20024_v27 = vpack.c.bf16 %v5050_v21, %v5050_v21  ;;  %v5214_v33 = vshrl.u32 %v20009_v8, 16 }
 0x124   : > { %1219 = vmatprep.mubr.bf16.mxu1 %v19034_v7  ;;  %23926 = vst [vmem:[#allocation32_spill] sm:$0xff] %v19999_v60  ;;  %v5209_v22 = vor.u32 %v5208_v18, %v5204_v17  ;;  %v5212_v25 = vrot.slane %v5210_v20, 1  ;;  %v20034_v36 = vpack.c.bf16 %v729_v30, %v728_v28  ;;  %v20039_v42 = vpack.c.bf16 %v731_v38, %v730_v37  ;;  %v736_v17 = vld [vmem:[#allocation3 + $0x130] sm:$0xff] }
 0x125   : > { %v20015_v15 = vsel %vm5113_vm6, %v5198_v4, %v5202_v5  ;;  %23928 = vst [vmem:[#allocation34_spill] sm:$0xff] %v20024_v27  ;;  %v5218_v34 = vshll.u32 %v20024_v27, 16  ;;  %v5017_v47 = vrot.slane %v728_v28, 6  ;;  %v20064_v11 = vpack.c.bf16 %v734_v2, %v733_v1  ;;  %v737_v28 = vld [vmem:[#allocation3 + $0x138] sm:$0x3] }
 0x126   : > { %23927 = vst [vmem:[#allocation33_spill] sm:$0xff] %v20015_v15  ;;  %v20029_v31 = vsel %vm5113_vm6, %v5209_v22, %v5212_v25  ;;  %v5216_v39 = vor.u32 %v5214_v33, %v5212_v25  ;;  %v5224_v44 = vshll.u32 %v20034_v36, 16  ;;  %v5222_v52 = vshrl.u32 %v20034_v36, 16 }
 0x127   : > { %23929 = vst [vmem:[#allocation35_spill] sm:$0xff] %v20029_v31  ;;  %v5220_v41 = vrot.slane %v5218_v34, 1  ;;  %v5228_v55 = vshll.u32 %v20039_v42, 16  ;;  %v5051_v58 = vsel %vm5010_vm5, %v5017_v47, %v732_v49  ;;  %v5232_v5 = vshrl.u32 %v20039_v42, 16  ;;  %v738_v47 = vld [vmem:[#allocation3 + $0x140] sm:$0xff]  ;;  %v739_v49 = vld [vmem:[#allocation3 + $0x148] sm:$0xff] }
 0x128   : > { %16339 = vmatmul.mubr.msk.bf16.gmra.mrb[8].mxu0 %vm954_vm4, %v19939_v3  ;;  %v5226_v54 = vrot.slane %v5224_v44, 1  ;;  %v20054_v62 = vpack.c.bf16 %v5051_v58, %v5051_v58  ;;  %v20069_v21 = vpack.c.bf16 %v736_v17, %v735_v12  ;;  %v5242_v22 = vshll.u32 %v20064_v11, 16  ;;  %v742_v17 = vld [vmem:[#allocation3 + $0x160] sm:$0x3] }
 0x129   : > { %7439 = vmatprep.mubr.bf16.mxu0 %v19034_v7  ;;  %v20045_v51 = vsel %vm5113_vm6, %v5216_v39, %v5220_v41  ;;  %v5230_v61 = vrot.slane %v5228_v55, 1  ;;  %v5018_v25 = vrot.slane %v733_v1, 6  ;;  %v5240_v33 = vshrl.u32 %v20064_v11, 16 }
 0x12a   : > { %23930 = vst [vmem:[#allocation36_spill] sm:$0xff] %v20045_v51  ;;  %v5227_v59 = vor.u32 %v5226_v54, %v5222_v52  ;;  %23931 = vst [vmem:[#allocation37_spill] sm:$0xff] %v20054_v62  ;;  %v5236_v9 = vshll.u32 %v20054_v62, 16  ;;  %v5244_v34 = vrot.slane %v5242_v22, 1  ;;  %v5246_v37 = vshll.u32 %v20069_v21, 16 }
 0x12b   : > { %16080 = vmatmul.mubr.msk.bf16.gmra.mrb[12].mxu1 %vm954_vm4, %v19892_v26  ;;  %v5234_v18 = vor.u32 %v5232_v5, %v5230_v61  ;;  %v5052_v38 = vsel %vm5010_vm5, %v5018_v25, %v737_v28  ;;  %v5250_v54 = vshrl.u32 %v20069_v21, 16  ;;  %v20094_v58 = vpack.c.bf16 %v739_v49, %v738_v47 }
 0x12c   : > { %1229 = vmatprep.mubr.bf16.mxu1 %v19034_v7  ;;  %v20059_v4 = vsel %vm5113_vm6, %v5227_v59, %v5230_v61  ;;  %v5238_v20 = vrot.slane %v5236_v9, 1  ;;  %v5245_v39 = vor.u32 %v5244_v34, %v5240_v33  ;;  %v5248_v41 = vrot.slane %v5246_v37, 1  ;;  %v740_v59 = vld [vmem:[#allocation3 + $0x150] sm:$0xff]  ;;  %v741_v61 = vld [vmem:[#allocation3 + $0x158] sm:$0xff] }
 0x12d   : > { %23932 = vst [vmem:[#allocation38_spill] sm:$0xff] %v20059_v4  ;;  %v20084_v44 = vpack.c.bf16 %v5052_v38, %v5052_v38  ;;  %v20099_v5 = vpack.c.bf16 %v741_v61, %v740_v59  ;;  %v5260_v9 = vshll.u32 %v20094_v58, 16  ;;  %v5019_v12 = vrot.slane %v738_v47, 6  ;;  %v743_v38 = vld [vmem:[#allocation3 + $0x168] sm:$0xff]  ;;  %v746_v59 = vld [vmem:[#allocation3 + $0x180] sm:$0xff] }
 0x12e   : > { %v20075_v30 = vsel %vm5113_vm6, %v5234_v18, %v5238_v20  ;;  %v20089_v52 = vsel %vm5113_vm6, %v5245_v39, %v5248_v41  ;;  %v5252_v1 = vor.u32 %v5250_v54, %v5248_v41  ;;  %v5258_v20 = vshrl.u32 %v20094_v58, 16  ;;  %v744_v39 = vld [vmem:[#allocation3 + $0x170] sm:$0xff] }
 0x12f   : > { %23933 = vst [vmem:[#allocation39_spill] sm:$0xff] %v20075_v30  ;;  %23934 = vst [vmem:[#allocation40_spill] sm:$0xff] %v20084_v44  ;;  %v5254_v55 = vshll.u32 %v20084_v44, 16  ;;  %v5262_v22 = vrot.slane %v5260_v9, 1  ;;  %v5264_v25 = vshll.u32 %v20099_v5, 16  ;;  %v5053_v28 = vsel %vm5010_vm5, %v5019_v12, %v742_v17 }
 0x130   : > { %16340 = vmatmul.mubr.msk.bf16.gmra.mrb[12].mxu0 %vm954_vm4, %v19955_v19  ;;  %23935 = vst [vmem:[#allocation41_spill] sm:$0xff] %v20089_v52  ;;  %23936 = vst [vmem:[#allocation42_spill] sm:$0xff] %v20099_v5  ;;  %v20114_v37 = vpack.c.bf16 %v5053_v28, %v5053_v28  ;;  %v5268_v47 = vshrl.u32 %v20099_v5, 16  ;;  %v20124_v54 = vpack.c.bf16 %v744_v39, %v743_v38  ;;  %v5020_v12 = vrot.slane %v743_v38, 6  ;;  %v747_v17 = vld [vmem:[#allocation3 + $0x188] sm:$0x3] }
 0x131   : > { %7449 = vmatprep.mubr.bf16.mxu0 %v19034_v7  ;;  %v5256_v2 = vrot.slane %v5254_v55, 1  ;;  %v5263_v33 = vor.u32 %v5262_v22, %v5258_v20  ;;  %v5266_v34 = vrot.slane %v5264_v25, 1  ;;  %v745_v55 = vld [vmem:[#allocation3 + $0x178] sm:$0xff] }
 0x132   : > { %23938 = vst [vmem:[#allocation44_spill] sm:$0xff] %v20114_v37  ;;  %v5272_v49 = vshll.u32 %v20114_v37, 16  ;;  %23940 = vst [vmem:[#allocation46_spill] sm:$0xff] %v20124_v54  ;;  %v5278_v9 = vshll.u32 %v20124_v54, 16  ;;  %v5276_v22 = vshrl.u32 %v20124_v54, 16 }
 0x133   : > { %16081 = vmatmul.mubr.msk.bf16.gmra.mrb[16].mxu1 %vm954_vm4, %v19908_v45  ;;  %v20105_v18 = vsel %vm5113_vm6, %v5252_v1, %v5256_v2  ;;  %v20119_v41 = vsel %vm5113_vm6, %v5263_v33, %v5266_v34  ;;  %v5270_v61 = vor.u32 %v5268_v47, %v5266_v34  ;;  %v20129_v2 = vpack.c.bf16 %v746_v59, %v745_v55  ;;  %v748_v47 = vld [vmem:[#allocation3 + $0x190] sm:$0xff]  ;;  %v20150_v59 = vld.sshfl [vmem:[%s19240_s25 + $0x8] sm:$0x33 pattern:$0x76325410] }
 0x134   : > { %1239 = vmatprep.mubr.bf16.mxu1 %v19034_v7  ;;  %23937 = vst [vmem:[#allocation43_spill] sm:$0xff] %v20105_v18  ;;  %23939 = vst [vmem:[#allocation45_spill] sm:$0xff] %v20119_v41  ;;  %v5274_v1 = vrot.slane %v5272_v49, 1  ;;  %v5280_v25 = vrot.slane %v5278_v9, 1  ;;  %v5054_v33 = vsel %vm5010_vm5, %v5020_v12, %v747_v17  ;;  %v749_v49 = vld [vmem:[#allocation3 + $0x198] sm:$0xff]  ;;  %v10563_v12 = vcombine.high %v20150_v59, %v20150_v59  ;;  %v750_v17 = vld [vmem:[#allocation3 + $0x1a0] sm:$0xff] }
 0x135   : > { %23941 = vst [vmem:[#allocation47_spill] sm:$0xff] %v20129_v2  ;;  %v5282_v28 = vshll.u32 %v20129_v2, 16  ;;  %v20144_v39 = vpack.c.bf16 %v5054_v33, %v5054_v33  ;;  %v5286_v55 = vshrl.u32 %v20129_v2, 16  ;;  %v20157_v9 = vpack.c.bf16 %v749_v49, %v748_v47  ;;  %v757_v37 = vld [vmem:[#allocation3 + $0x1d8] sm:$0x3] }
 0x136   : > { %v20135_v20 = vsel %vm5113_vm6, %v5270_v61, %v5274_v1  ;;  %v5281_v34 = vor.u32 %v5280_v25, %v5276_v22  ;;  %v751_v22 = vld [vmem:[#allocation3 + $0x1a8] sm:$0xff]  ;;  %v10760_v25 = vand.u32 %v10563_v12, %v19874_v10  ;;  %v5021_v49 = vrot.slane %v748_v47, 6 }
 0x137   : > { %23942 = vst [vmem:[#allocation48_spill] sm:$0xff] %v20135_v20  ;;  %v5284_v38 = vrot.slane %v5282_v28, 1  ;;  %23943 = vst [vmem:[#allocation49_spill] sm:$0xff] %v20144_v39  ;;  %v5290_v1 = vshll.u32 %v20144_v39, 16  ;;  %v5296_v57 = vshll.u32 %v20157_v9, 16  ;;  %v5294_v12 = vshrl.u32 %v20157_v9, 16 }
 0x138   : > { %16341 = vmatmul.mubr.msk.bf16.gmra.mrb[16].mxu0 %vm954_vm4, %v19969_v32  ;;  %23945 = vst [vmem:[#allocation51_spill] sm:$0xff] %v20157_v9  ;;  %10762 = vmatprep.subr.bf16.mxu0 %v10760_v25  ;;  %v754_v25 = vld [vmem:[#allocation3 + $0x1c0] sm:$0xff] }
 0x139   : > { %7459 = vmatprep.mubr.bf16.mxu0 %v19034_v7  ;;  %v20153_v61 = vsel %vm5113_vm6, %v5281_v34, %v5284_v38  ;;  %v5288_v28 = vor.u32 %v5286_v55, %v5284_v38  ;;  %v5292_v33 = vrot.slane %v5290_v1, 1  ;;  %v20165_v34 = vpack.c.bf16 %v751_v22, %v750_v17  ;;  %v753_v22 = vld [vmem:[#allocation3 + $0x1b8] sm:$0xff] }
 0x13a   : > { %23944 = vst [vmem:[#allocation50_spill] sm:$0xff] %v20153_v61  ;;  %v5298_v14 = vrot.slane %v5296_v57, 1  ;;  %v5055_v55 = vsel %vm5010_vm5, %v5021_v49, %v752_v48  ;;  %v756_v49 = vld [vmem:[#allocation3 + $0x1d0] sm:$0xff]  ;;  %v5022_v39 = vrot.slane %v753_v22, 6 }
 0x13b   : > { %16082 = vmatmul.mubr.msk.bf16.gmra.mrb[20].mxu1 %vm954_vm4, %v19919_v53  ;;  %23946 = vst [vmem:[#allocation52_spill] sm:$0xff] %v20165_v34  ;;  %v20171_v16 = vsel %vm5113_vm6, %v5288_v28, %v5292_v33  ;;  %v5300_v38 = vshll.u32 %v20165_v34, 16  ;;  %v20180_v17 = vpack.c.bf16 %v5055_v55, %v5055_v55  ;;  %v5304_v48 = vshrl.u32 %v20165_v34, 16 }
 0x13c   : > { %1249 = vmatprep.mubr.bf16.mxu1 %v19034_v7  ;;  %23947 = vst [vmem:[#allocation53_spill] sm:$0xff] %v20171_v16  ;;  %v5299_v47 = vor.u32 %v5298_v14, %v5294_v12  ;;  %v20190_v33 = vpack.c.bf16 %v754_v25, %v753_v22  ;;  %v755_v14 = vld [vmem:[#allocation3 + $0x1c8] sm:$0xff] }
 0x13d   : > { %v5302_v1 = vrot.slane %v5300_v38, 1  ;;  %23948 = vst [vmem:[#allocation54_spill] sm:$0xff] %v20180_v17  ;;  %v5308_v28 = vshll.u32 %v20180_v17, 16  ;;  %v20195_v55 = vpack.c.bf16 %v756_v49, %v755_v14  ;;  %v758_v49 = vld [vmem:[#allocation3 + $0x1e0] sm:$0xff] }
 0x13e   : > { %23950 = vst [vmem:[#allocation56_spill] sm:$0xff] %v20190_v33  ;;  %v5312_v17 = vshrl.u32 %v20190_v33, 16  ;;  %v5023_v27 = vrot.slane %v758_v49, 6 }
 0x13f   : > { %v20185_v57 = vsel %vm5113_vm6, %v5299_v47, %v5302_v1  ;;  %v5306_v12 = vor.u32 %v5304_v48, %v5302_v1  ;;  %v5310_v38 = vrot.slane %v5308_v28, 1  ;;  %23951 = vst [vmem:[#allocation57_spill] sm:$0xff] %v20195_v55  ;;  %v5314_v47 = vshll.u32 %v20190_v33, 16 }
 0x140   : > { %16342 = vmatmul.mubr.msk.bf16.gmra.mrb[20].mxu0 %vm954_vm4, %v19985_v46  ;;  %23949 = vst [vmem:[#allocation55_spill] sm:$0xff] %v20185_v57  ;;  %v5318_v1 = vshll.u32 %v20195_v55, 16  ;;  %v5056_v48 = vsel %vm5010_vm5, %v5022_v39, %v757_v37  ;;  %v5322_v37 = vshrl.u32 %v20195_v55, 16 }
 0x141   : > { %7469 = vmatprep.mubr.bf16.mxu0 %v19034_v7  ;;  %v20201_v25 = vsel %vm5113_vm6, %v5306_v12, %v5310_v38  ;;  %v5316_v44 = vrot.slane %v5314_v47, 1  ;;  %v20210_v14 = vpack.c.bf16 %v5056_v48, %v5056_v48  ;;  %v759_v12 = vld [vmem:[#allocation3 + $0x1e8] sm:$0xff] }
 0x142   : > { %23952 = vst [vmem:[#allocation58_spill] sm:$0xff] %v20201_v25  ;;  %v5320_v28 = vrot.slane %v5318_v1, 1  ;;  %v20220_v47 = vpack.c.bf16 %v759_v12, %v758_v49 }
 0x143   : > { %16083 = vmatmul.mubr.msk.bf16.gmra.mrb[24].mxu1 %vm954_vm4, %v19944_v6  ;;  %v5317_v22 = vor.u32 %v5316_v44, %v5312_v17  ;;  %23953 = vst [vmem:[#allocation59_spill] sm:$0xff] %v20210_v14  ;;  %v5326_v39 = vshll.u32 %v20210_v14, 16  ;;  %v760_v44 = vld [vmem:[#allocation3 + $0x1f0] sm:$0xff]  ;;  %v761_v17 = vld [vmem:[#allocation3 + $0x1f8] sm:$0xff] }
 0x144   : > { %1259 = vmatprep.mubr.bf16.mxu1 %v19034_v7  ;;  %23955 = vst [vmem:[#allocation61_spill] sm:$0xff] %v20220_v47  ;;  %v5324_v1 = vor.u32 %v5322_v37, %v5320_v28  ;;  %v20225_v62 = vpack.c.bf16 %v761_v17, %v760_v44  ;;  %v5330_v14 = vshrl.u32 %v20220_v47, 16  ;;  %v5057_v37 = vsel %vm5010_vm5, %v5023_v27, %v762_v56  ;;  %v763_v17 = vld [vmem:[#allocation3 + $0x208] sm:$0xff] }
 0x145   : > { %v20215_v38 = vsel %vm5113_vm6, %v5317_v22, %v5320_v28  ;;  %v5328_v48 = vrot.slane %v5326_v39, 1  ;;  %v5332_v22 = vshll.u32 %v20220_v47, 16  ;;  %v20240_v44 = vpack.c.bf16 %v5057_v37, %v5057_v37 }
 0x146   : > { %23954 = vst [vmem:[#allocation60_spill] sm:$0xff] %v20215_v38  ;;  %23956 = vst [vmem:[#allocation62_spill] sm:$0xff] %v20225_v62  ;;  %v5336_v28 = vshll.u32 %v20225_v62, 16  ;;  %v5340_v56 = vshrl.u32 %v20225_v62, 16  ;;  %v5024_v43 = vrot.slane %v763_v17, 6 }
 0x147   : > { %v20231_v12 = vsel %vm5113_vm6, %v5324_v1, %v5328_v48  ;;  %v5334_v29 = vrot.slane %v5332_v22, 1  ;;  %23958 = vst [vmem:[#allocation64_spill] sm:$0xff] %v20240_v44  ;;  %v764_v1 = vld [vmem:[#allocation3 + $0x210] sm:$0xff]  ;;  %v5344_v27 = vshll.u32 %v20240_v44, 16 }
 0x148   : > { %16343 = vmatmul.mubr.msk.bf16.gmra.mrb[24].mxu0 %vm954_vm4, %v19999_v60  ;;  %23957 = vst [vmem:[#allocation63_spill] sm:$0xff] %v20231_v12  ;;  %v5338_v39 = vrot.slane %v5336_v28, 1  ;;  %v20250_v22 = vpack.c.bf16 %v764_v1, %v763_v17 }
 0x149   : > { %7479 = vmatprep.mubr.bf16.mxu0 %v19034_v7  ;;  %v5335_v49 = vor.u32 %v5334_v29, %v5330_v14  ;;  %v765_v29 = vld [vmem:[#allocation3 + $0x218] sm:$0xff]  ;;  %v766_v14 = vld [vmem:[#allocation3 + $0x220] sm:$0xff]  ;;  %v5346_v37 = vrot.slane %v5344_v27, 1 }
 0x14a   : > { %23960 = vst [vmem:[#allocation66_spill] sm:$0xff] %v20250_v22  ;;  %v5342_v28 = vor.u32 %v5340_v56, %v5338_v39  ;;  %v20255_v0 = vpack.c.bf16 %v766_v14, %v765_v29  ;;  %v5348_v44 = vshrl.u32 %v20250_v22, 16  ;;  %v5058_v56 = vsel %vm5010_vm5, %v5024_v43, %v767_v50  ;;  %v768_v14 = vld [vmem:[#allocation3 + $0x230] sm:$0xff] }
 0x14b   : > { %16084 = vmatmul.mubr.msk.bf16.gmra.mrb[28].mxu1 %vm954_vm4, %v19949_v13  ;;  %v20245_v48 = vsel %vm5113_vm6, %v5335_v49, %v5338_v39  ;;  %v5350_v49 = vshll.u32 %v20250_v22, 16  ;;  %v20270_v29 = vpack.c.bf16 %v5058_v56, %v5058_v56 }
 0x14c   : > { %1269 = vmatprep.mubr.bf16.mxu1 %v19034_v7  ;;  %23959 = vst [vmem:[#allocation65_spill] sm:$0xff] %v20245_v48  ;;  %23961 = vst [vmem:[#allocation67_spill] sm:$0xff] %v20255_v0  ;;  %v20261_v1 = vsel %vm5113_vm6, %v5342_v28, %v5346_v37  ;;  %v5354_v39 = vshll.u32 %v20255_v0, 16  ;;  %v769_v28 = vld [vmem:[#allocation3 + $0x238] sm:$0xff]  ;;  %v5358_v43 = vshrl.u32 %v20255_v0, 16 }
 0x14d   : > { %23962 = vst [vmem:[#allocation68_spill] sm:$0xff] %v20261_v1  ;;  %v5352_v24 = vrot.slane %v5350_v49, 1  ;;  %23963 = vst [vmem:[#allocation69_spill] sm:$0xff] %v20270_v29  ;;  %v5362_v50 = vshll.u32 %v20270_v29, 16  ;;  %v20280_v49 = vpack.c.bf16 %v769_v28, %v768_v14 }
 0x14e   : > { %v5356_v27 = vrot.slane %v5354_v39, 1 }
 0x14f   : > { %v5353_v17 = vor.u32 %v5352_v24, %v5348_v44  ;;  %23965 = vst [vmem:[#allocation71_spill] sm:$0xff] %v20280_v49  ;;  %v770_v24 = vld [vmem:[#allocation3 + $0x240] sm:$0xff]  ;;  %v771_v44 = vld [vmem:[#allocation3 + $0x248] sm:$0xff]  ;;  %v5364_v56 = vrot.slane %v5362_v50, 1  ;;  %v5366_v29 = vshrl.u32 %v20280_v49, 16 }
 0x150   : > { %16344 = vmatmul.mubr.msk.bf16.gmra.mrb[28].mxu0 %vm954_vm4, %v20015_v15  ;;  %v5360_v39 = vor.u32 %v5358_v43, %v5356_v27 }
 0x151   : > { %7489 = vmatprep.mubr.bf16.mxu0 %v19034_v7  ;;  %v20275_v37 = vsel %vm5113_vm6, %v5353_v17, %v5356_v27  ;;  %v5368_v17 = vshll.u32 %v20280_v49, 16 }
 0x152   : > { %23964 = vst [vmem:[#allocation70_spill] sm:$0xff] %v20275_v37  ;;  %v20291_v28 = vsel %vm5113_vm6, %v5360_v39, %v5364_v56  ;;  %v774_v39 = vld [vmem:[#allocation3 + $0x260] sm:$0xff] }
 0x153   : > { %16085 = vmatmul.mubr.msk.bf16.gmra.mrb[32].mxu1 %vm954_vm4, %v19974_v35  ;;  %23967 = vst [vmem:[#allocation73_spill] sm:$0xff] %v20291_v28 }
 0x154   : > { %1279 = vmatprep.mubr.bf16.mxu1 %v19034_v7 }
 0x158   : > { %16345 = vmatmul.mubr.msk.bf16.gmra.mrb[32].mxu0 %vm954_vm4, %v20029_v31 }
 0x159   : > { %7499 = vmatprep.mubr.bf16.mxu0 %v19034_v7 }
 0x15b   : > { %16086 = vmatmul.mubr.msk.bf16.gmra.mrb[36].mxu1 %vm954_vm4, %v19979_v40 }
 0x15c   : > { %1289 = vmatprep.mubr.bf16.mxu1 %v19034_v7 }
 0x160   : > { %16346 = vmatmul.mubr.msk.bf16.gmra.mrb[36].mxu0 %vm954_vm4, %v20045_v51 }
 0x161   : > { %7509 = vmatprep.mubr.bf16.mxu0 %v19034_v7 }
 0x163   : > { %16087 = vmatmul.mubr.msk.bf16.gmra.mrb[40].mxu1 %vm954_vm4, %v20004_v63 }
 0x164   : > { %1299 = vmatprep.mubr.bf16.mxu1 %v19034_v7 }
 0x168   : > { %16347 = vmatmul.mubr.msk.bf16.gmra.mrb[40].mxu0 %vm954_vm4, %v20059_v4 }
 0x169   : > { %7519 = vmatprep.mubr.bf16.mxu0 %v19034_v7 }
 0x16b   : > { %16088 = vmatmul.mubr.msk.bf16.gmra.mrb[44].mxu1 %vm954_vm4, %v20009_v8 }
 0x16c   : > { %1309 = vmatprep.mubr.bf16.mxu1 %v19034_v7 }
 0x170   : > { %16348 = vmatmul.mubr.msk.bf16.gmra.mrb[44].mxu0 %vm954_vm4, %v20075_v30 }
 0x171   : > { %7529 = vmatprep.mubr.bf16.mxu0 %v19034_v7 }
 0x173   : > { %16089 = vmatmul.mubr.msk.bf16.gmra.mrb[48].mxu1 %vm954_vm4, %v20034_v36 }
 0x174   : > { %1319 = vmatprep.mubr.bf16.mxu1 %v19034_v7 }
 0x178   : > { %16349 = vmatmul.mubr.msk.bf16.gmra.mrb[48].mxu0 %vm954_vm4, %v20089_v52 }
 0x179   : > { %7539 = vmatprep.mubr.bf16.mxu0 %v19034_v7 }
 0x17b   : > { %16090 = vmatmul.mubr.msk.bf16.gmra.mrb[52].mxu1 %vm954_vm4, %v20039_v42 }
 0x17c   : > { %1329 = vmatprep.mubr.bf16.mxu1 %v19034_v7 }
 0x180   : > { %16350 = vmatmul.mubr.msk.bf16.gmra.mrb[52].mxu0 %vm954_vm4, %v20105_v18 }
 0x181   : > { %7549 = vmatprep.mubr.bf16.mxu0 %v19034_v7 }
 0x183   : > { %16091 = vmatmul.mubr.msk.bf16.gmra.mrb[56].mxu1 %vm954_vm4, %v20064_v11 }
 0x184   : > { %1339 = vmatprep.mubr.bf16.mxu1 %v19034_v7 }
 0x188   : > { %16351 = vmatmul.mubr.msk.bf16.gmra.mrb[56].mxu0 %vm954_vm4, %v20119_v41 }
 0x189   : > { %7559 = vmatprep.mubr.bf16.mxu0 %v19034_v7 }
 0x18b   : > { %16092 = vmatmul.mubr.msk.bf16.gmra.mrb[60].mxu1 %vm954_vm4, %v20069_v21 }
 0x18c   : > { %1349 = vmatprep.mubr.bf16.mxu1 %v19034_v7 }
 0x190   : > { %16352 = vmatmul.mubr.msk.bf16.gmra.mrb[60].mxu0 %vm954_vm4, %v20135_v20 }
 0x191   : > { %7569 = vmatprep.mubr.bf16.mxu0 %v19034_v7 }
 0x193   : > { %16093 = vmatmul.mubr.msk.bf16.gmra.mrb[64].mxu1 %vm954_vm4, %v20094_v58 }
 0x194   : > { %1359 = vmatprep.mubr.bf16.mxu1 %v19034_v7 }
 0x198   : > { %16353 = vmatmul.mubr.msk.bf16.gmra.mrb[64].mxu0 %vm954_vm4, %v20153_v61 }
 0x199   : > { %7579 = vmatprep.mubr.bf16.mxu0 %v19034_v7 }
 0x19b   : > { %16094 = vmatmul.mubr.msk.bf16.gmra.mrb[68].mxu1 %vm954_vm4, %v20099_v5 }
 0x19c   : > { %1369 = vmatprep.mubr.bf16.mxu1 %v19034_v7 }
 0x1a0   : > { %16354 = vmatmul.mubr.msk.bf16.gmra.mrb[68].mxu0 %vm954_vm4, %v20171_v16 }
 0x1a1   : > { %7589 = vmatprep.mubr.bf16.mxu0 %v19034_v7 }
 0x1a3   : > { %16095 = vmatmul.mubr.msk.bf16.gmra.mrb[72].mxu1 %vm954_vm4, %v20124_v54  ;;  %v782_v54 = vld [vmem:[#allocation3 + $0x2a0] sm:$0x3] }
 0x1a4   : > { %1379 = vmatprep.mubr.bf16.mxu1 %v19034_v7 }
 0x1a8   : > { %16355 = vmatmul.mubr.msk.bf16.gmra.mrb[72].mxu0 %vm954_vm4, %v20185_v57 }
 0x1a9   : > { %7599 = vmatprep.mubr.bf16.mxu0 %v19034_v7 }
 0x1ab   : > { %16096 = vmatmul.mubr.msk.bf16.gmra.mrb[76].mxu1 %vm954_vm4, %v20129_v2 }
 0x1ac   : > { %1389 = vmatprep.mubr.bf16.mxu1 %v19034_v7 }
 0x1b0   : > { %16356 = vmatmul.mubr.msk.bf16.gmra.mrb[76].mxu0 %vm954_vm4, %v20201_v25 }
 0x1b1   : > { %7609 = vmatprep.mubr.bf16.mxu0 %v19034_v7 }
 0x1b3   : > { %16097 = vmatmul.mubr.msk.bf16.gmra.mrb[80].mxu1 %vm954_vm4, %v20157_v9  ;;  %v777_v9 = vld [vmem:[#allocation3 + $0x278] sm:$0x3] }
 0x1b4   : > { %1399 = vmatprep.mubr.bf16.mxu1 %v19034_v7 }
 0x1b8   : > { %16357 = vmatmul.mubr.msk.bf16.gmra.mrb[80].mxu0 %vm954_vm4, %v20215_v38 }
 0x1b9   : > { %7619 = vmatprep.mubr.bf16.mxu0 %v19034_v7 }
 0x1bb   : > { %16098 = vmatmul.mubr.msk.bf16.gmra.mrb[84].mxu1 %vm954_vm4, %v20165_v34  ;;  %v5370_v34 = vrot.slane %v5368_v17, 1 }
 0x1bc   : > { %1409 = vmatprep.mubr.bf16.mxu1 %v19034_v7 }
 0x1c0   : > { %16358 = vmatmul.mubr.msk.bf16.gmra.mrb[84].mxu0 %vm954_vm4, %v20231_v12 }
 0x1c1   : > { %7629 = vmatprep.mubr.bf16.mxu0 %v19034_v7 }
 0x1c3   : > { %16099 = vmatmul.mubr.msk.bf16.gmra.mrb[88].mxu1 %vm954_vm4, %v20190_v33  ;;  %v772_v33 = vld [vmem:[#allocation3 + $0x250] sm:$0x3] }
 0x1c4   : > { %1419 = vmatprep.mubr.bf16.mxu1 %v19034_v7 }
 0x1c8   : > { %16359 = vmatmul.mubr.msk.bf16.gmra.mrb[88].mxu0 %vm954_vm4, %v20245_v48 }
 0x1c9   : > { %7639 = vmatprep.mubr.bf16.mxu0 %v19034_v7 }
 0x1cb   : > { %16100 = vmatmul.mubr.msk.bf16.gmra.mrb[92].mxu1 %vm954_vm4, %v20195_v55  ;;  %v5025_v55 = vrot.slane %v768_v14, 6  ;;  %v5371_v14 = vor.u32 %v5370_v34, %v5366_v29  ;;  %v775_v34 = vld [vmem:[#allocation3 + $0x268] sm:$0xff]  ;;  %v776_v29 = vld [vmem:[#allocation3 + $0x270] sm:$0xff] }
 0x1cc   : > { %1429 = vmatprep.mubr.bf16.mxu1 %v19034_v7 }
 0x1cd   : > { %v5059_v43 = vsel %vm5010_vm5, %v5025_v55, %v772_v33 }
 0x1d0   : > { %16360 = vmatmul.mubr.msk.bf16.gmra.mrb[92].mxu0 %vm954_vm4, %v20261_v1 }
 0x1d1   : > { %7649 = vmatprep.mubr.bf16.mxu0 %v19034_v7 }
 0x1d3   : > { %16101 = vmatmul.mubr.msk.bf16.gmra.mrb[96].mxu1 %vm954_vm4, %v20220_v47  ;;  %v20285_v47 = vpack.c.bf16 %v771_v44, %v770_v24  ;;  %v20300_v24 = vpack.c.bf16 %v5059_v43, %v5059_v43  ;;  %v773_v44 = vld [vmem:[#allocation3 + $0x258] sm:$0xff] }
 0x1d4   : > { %1439 = vmatprep.mubr.bf16.mxu1 %v19034_v7  ;;  %v20310_v17 = vpack.c.bf16 %v774_v39, %v773_v44 }
 0x1d5   : > { %23966 = vst [vmem:[#allocation72_spill] sm:$0xff] %v20285_v47  ;;  %v5372_v27 = vshll.u32 %v20285_v47, 16  ;;  %23968 = vst [vmem:[#allocation74_spill] sm:$0xff] %v20300_v24  ;;  %v5376_v33 = vshrl.u32 %v20285_v47, 16  ;;  %v5380_v55 = vshll.u32 %v20300_v24, 16 }
 0x1d6   : > { %23970 = vst [vmem:[#allocation76_spill] sm:$0xff] %v20310_v17  ;;  %v5384_v24 = vshrl.u32 %v20310_v17, 16 }
 0x1d7   : > { %v5374_v50 = vrot.slane %v5372_v27, 1  ;;  %v5382_v43 = vrot.slane %v5380_v55, 1 }
 0x1d8   : > { %16361 = vmatmul.mubr.msk.bf16.gmra.mrb[96].mxu0 %vm954_vm4, %v20275_v37 }
 0x1d9   : > { %7659 = vmatprep.mubr.bf16.mxu0 %v19034_v7  ;;  %v20305_v56 = vsel %vm5113_vm6, %v5371_v14, %v5374_v50  ;;  %v5378_v27 = vor.u32 %v5376_v33, %v5374_v50  ;;  %v5386_v14 = vshll.u32 %v20310_v17, 16 }
 0x1da   : > { %23969 = vst [vmem:[#allocation75_spill] sm:$0xff] %v20305_v56 }
 0x1db   : > { %16102 = vmatmul.mubr.msk.bf16.gmra.mrb[100].mxu1 %vm954_vm4, %v20225_v62  ;;  %v5026_v62 = vrot.slane %v773_v44, 6  ;;  %v20321_v39 = vsel %vm5113_vm6, %v5378_v27, %v5382_v43  ;;  %v5388_v2 = vrot.slane %v5386_v14, 1  ;;  %v779_v27 = vld [vmem:[#allocation3 + $0x288] sm:$0xff] }
 0x1dc   : > { %1449 = vmatprep.mubr.bf16.mxu1 %v19034_v7  ;;  %23972 = vst [vmem:[#allocation78_spill] sm:$0xff] %v20321_v39 }
 0x1dd   : > { %v5060_v33 = vsel %vm5010_vm5, %v5026_v62, %v777_v9  ;;  %v5389_v44 = vor.u32 %v5388_v2, %v5384_v24  ;;  %v780_v2 = vld [vmem:[#allocation3 + $0x290] sm:$0xff]  ;;  %v781_v24 = vld [vmem:[#allocation3 + $0x298] sm:$0xff] }
 0x1e0   : > { %16362 = vmatmul.mubr.msk.bf16.gmra.mrb[100].mxu0 %vm954_vm4, %v20291_v28 }
 0x1e1   : > { %7669 = vmatprep.mubr.bf16.mxu0 %v19034_v7 }
 0x1e3   : > { %16103 = vmatmul.mubr.msk.bf16.gmra.mrb[104].mxu1 %vm954_vm4, %v20250_v22  ;;  %v20315_v22 = vpack.c.bf16 %v776_v29, %v775_v34  ;;  %v20330_v34 = vpack.c.bf16 %v5060_v33, %v5060_v33  ;;  %v778_v29 = vld [vmem:[#allocation3 + $0x280] sm:$0xff] }
 0x1e4   : > { %1459 = vmatprep.mubr.bf16.mxu1 %v19034_v7  ;;  %v20340_v14 = vpack.c.bf16 %v779_v27, %v778_v29 }
 0x1e5   : > { %23971 = vst [vmem:[#allocation77_spill] sm:$0xff] %v20315_v22  ;;  %v5390_v50 = vshll.u32 %v20315_v22, 16  ;;  %23973 = vst [vmem:[#allocation79_spill] sm:$0xff] %v20330_v34  ;;  %v5394_v62 = vshrl.u32 %v20315_v22, 16  ;;  %v5398_v9 = vshll.u32 %v20330_v34, 16 }
 0x1e6   : > { %23975 = vst [vmem:[#allocation81_spill] sm:$0xff] %v20340_v14  ;;  %v5402_v34 = vshrl.u32 %v20340_v14, 16 }
 0x1e7   : > { %v5392_v55 = vrot.slane %v5390_v50, 1  ;;  %v5400_v33 = vrot.slane %v5398_v9, 1 }
 0x1e8   : > { %16363 = vmatmul.mubr.msk.bf16.gmra.mrb[104].mxu0 %vm954_vm4, %v20305_v56 }
 0x1e9   : > { %7679 = vmatprep.mubr.bf16.mxu0 %v19034_v7  ;;  %v20335_v43 = vsel %vm5113_vm6, %v5389_v44, %v5392_v55  ;;  %v5396_v50 = vor.u32 %v5394_v62, %v5392_v55  ;;  %v5404_v44 = vshll.u32 %v20340_v14, 16 }
 0x1ea   : > { %23974 = vst [vmem:[#allocation80_spill] sm:$0xff] %v20335_v43 }
 0x1eb   : > { %16104 = vmatmul.mubr.msk.bf16.gmra.mrb[108].mxu1 %vm954_vm4, %v20255_v0  ;;  %v5027_v0 = vrot.slane %v778_v29, 6  ;;  %v20351_v27 = vsel %vm5113_vm6, %v5396_v50, %v5400_v33  ;;  %v5406_v5 = vrot.slane %v5404_v44, 1  ;;  %v10757_v33 = vand.u32 %v20150_v59, %v19874_v10  ;;  %v20393_v44 = vld [vmem:[#allocation3 + $0x2a8] sm:$0xff] }
 0x1ec   : > { %1469 = vmatprep.mubr.bf16.mxu1 %v19034_v7  ;;  %23977 = vst [vmem:[#allocation83_spill] sm:$0xff] %v20351_v27 }
 0x1ed   : > { %v5061_v62 = vsel %vm5010_vm5, %v5027_v0, %v782_v54  ;;  %v5407_v29 = vor.u32 %v5406_v5, %v5402_v34 }
 0x1f0   : > { %16364 = vmatmul.mubr.msk.bf16.gmra.mrb[108].mxu0 %vm954_vm4, %v20321_v39 }
 0x1f1   : > { %7689 = vmatprep.mubr.bf16.mxu0 %v19034_v7 }
 0x1f3   : > { %16105 = vmatmul.mubr.msk.bf16.gmra.mrb[112].mxu1 %vm954_vm4, %v20280_v49  ;;  %v20345_v49 = vpack.c.bf16 %v781_v24, %v780_v2  ;;  %v20360_v2 = vpack.c.bf16 %v5061_v62, %v5061_v62  ;;  %v785_v62 = vld [vmem:[#allocation3 + $0x2b8] sm:$0xff] }
 0x1f4   : > { %1479 = vmatprep.mubr.bf16.mxu1 %v19034_v7 }
 0x1f5   : > { %23976 = vst [vmem:[#allocation82_spill] sm:$0xff] %v20345_v49  ;;  %v5408_v55 = vshll.u32 %v20345_v49, 16  ;;  %23978 = vst [vmem:[#allocation84_spill] sm:$0xff] %v20360_v2  ;;  %v5412_v50 = vshrl.u32 %v20345_v49, 16  ;;  %v5416_v0 = vshll.u32 %v20360_v2, 16 }
 0x1f7   : > { %v5410_v9 = vrot.slane %v5408_v55, 1  ;;  %v5418_v54 = vrot.slane %v5416_v0, 1  ;;  %v784_v55 = vld [vmem:[#allocation3 + $0x2b0] sm:$0xff]  ;;  %v789_v0 = vld [vmem:[#allocation3 + $0x2d8] sm:$0xff] }
 0x1f8   : > { %16365 = vmatmul.mubr.msk.bf16.gmra.mrb[112].mxu0 %vm954_vm4, %v20335_v43  ;;  %v20398_v59 = vpack.c.bf16 %v784_v55, %v20393_v44 }
 0x1f9   : > { %7699 = vmatprep.mubr.bf16.mxu0 %v19034_v7  ;;  %v20365_v24 = vsel %vm5113_vm6, %v5407_v29, %v5410_v9  ;;  %v5414_v5 = vor.u32 %v5412_v50, %v5410_v9  ;;  %v786_v29 = vld [vmem:[#allocation3 + $0x2c0] sm:$0xff]  ;;  %v20412_v50 = vld [vmem:[#allocation3 + $0x2d0] sm:$0xff] }
 0x1fa   : > { %23979 = vst [vmem:[#allocation85_spill] sm:$0xff] %v20365_v24  ;;  %23981 = vst [vmem:[#allocation87_spill] sm:$0xff] %v20398_v59  ;;  %v20406_v9 = vpack.c.bf16 %v786_v29, %v785_v62  ;;  %v20431_v62 = vld [vmem:[#allocation3 + $0x2f8] sm:$0xff]  ;;  %v794_v29 = vld [vmem:[#allocation3 + $0x300] sm:$0xff] }
 0x1fb   : > { %16106 = vmatmul.mubr.msk.bf16.gmra.mrb[116].mxu1 %vm954_vm4, %v20285_v47  ;;  %v20376_v34 = vsel %vm5113_vm6, %v5414_v5, %v5418_v54  ;;  %v20417_v5 = vpack.c.bf16 %v789_v0, %v20412_v50  ;;  %v790_v54 = vld [vmem:[#allocation3 + $0x2e0] sm:$0xff]  ;;  %v20436_v0 = vpack.c.bf16 %v794_v29, %v20431_v62 }
 0x1fc   : > { %1489 = vmatprep.mubr.bf16.mxu1 %v19034_v7  ;;  %23980 = vst [vmem:[#allocation86_spill] sm:$0xff] %v20376_v34  ;;  %23982 = vst [vmem:[#allocation88_spill] sm:$0xff] %v20406_v9  ;;  %v20450_v29 = vld [vmem:[#allocation3 + $0x320] sm:$0xff] }
 0x200   : > { %16366 = vmatmul.mubr.msk.bf16.gmra.mrb[116].mxu0 %vm954_vm4, %v20351_v27 }
 0x201   : > { %7709 = vmatprep.mubr.bf16.mxu0 %v19034_v7 }
 0x203   : > { %16107 = vmatmul.mubr.msk.bf16.gmra.mrb[120].mxu1 %vm954_vm4, %v20310_v17 }
 0x204   : > { %1499 = vmatprep.mubr.bf16.mxu1 %v19034_v7 }
 0x208   : > { %16367 = vmatmul.mubr.msk.bf16.gmra.mrb[120].mxu0 %vm954_vm4, %v20365_v24 }
 0x209   : > { %7719 = vmatprep.mubr.bf16.mxu0 %v19034_v7 }
 0x20b   : > { %16108 = vmatmul.mubr.msk.bf16.gmra.mrb[124].mxu1 %vm954_vm4, %v20315_v22  ;;  %v824_v22 = vld [vmem:[#allocation3 + $0x3f0] sm:$0xff] }
 0x20c   : > { %1509 = vmatprep.mubr.bf16.mxu1 %v19034_v7 }
 0x210   : > { %16368 = vmatmul.mubr.msk.bf16.gmra.mrb[124].mxu0 %vm954_vm4, %v20376_v34 }
 0x211   : > { %8889 = vmatprep.mubr.bf16.mxu0 %v19034_v7 }
 0x213   : > { %16109 = vmatmul.mubr.msk.bf16.gmra.mrb[128].mxu1 %vm954_vm4, %v20340_v14 }
 0x214   : > { %1519 = vmatprep.mubr.bf16.mxu1 %v19034_v7 }
 0x218   : > { %16402 = vmatmul.mubr.msk.bf16.vlgmr.msra.gmra.mrb[0].mxu0 %vm954_vm4, %v19939_v3 }
 0x219   : > { %10763 = vmatpush1.bf16.msra.mxu0 %v10757_v33  ;;  %8899 = vmatprep.mubr.bf16.mxu0 %v19034_v7  ;;  %v791_v33 = vld [vmem:[#allocation3 + $0x2e8] sm:$0xff] }
 0x21a   : > { %v20425_v55 = vpack.c.bf16 %v791_v33, %v790_v54  ;;  %v795_v54 = vld [vmem:[#allocation3 + $0x308] sm:$0xff]  ;;  %v796_v33 = vld [vmem:[#allocation3 + $0x310] sm:$0xff] }
 0x21b   : > { %16110 = vmatmul.mubr.msk.bf16.gmra.mrb[132].mxu1 %vm954_vm4, %v20345_v49 }
 0x21c   : > { %1529 = vmatprep.mubr.bf16.mxu1 %v19034_v7 }
 0x220   : > { %16403 = vmatmul.mubr.msk.bf16.gmra.mrb[4].mxu0 %vm954_vm4, %v19955_v19 }
 0x221   : > { %8909 = vmatprep.mubr.bf16.mxu0 %v19034_v7 }
 0x223   : > { %16111 = vmatmul.mubr.msk.bf16.gmra.mrb[136].mxu1 %vm954_vm4, %v20398_v59 }
 0x224   : > { %1539 = vmatprep.mubr.bf16.mxu1 %v19034_v7 }
 0x228   : > { %16404 = vmatmul.mubr.msk.bf16.gmra.mrb[8].mxu0 %vm954_vm4, %v19969_v32 }
 0x229   : > { %8919 = vmatprep.mubr.bf16.mxu0 %v19034_v7 }
 0x22b   : > { %16112 = vmatmul.mubr.msk.bf16.gmra.mrb[140].mxu1 %vm954_vm4, %v20406_v9 }
 0x22c   : > { %1549 = vmatprep.mubr.bf16.mxu1 %v19034_v7 }
 0x230   : > { %16405 = vmatmul.mubr.msk.bf16.gmra.mrb[12].mxu0 %vm954_vm4, %v19985_v46 }
 0x231   : > { %8929 = vmatprep.mubr.bf16.mxu0 %v19034_v7 }
 0x233   : > { %16113 = vmatmul.mubr.msk.bf16.gmra.mrb[144].mxu1 %vm954_vm4, %v20417_v5 }
 0x234   : > { %1559 = vmatprep.mubr.bf16.mxu1 %v19034_v7 }
 0x238   : > { %16406 = vmatmul.mubr.msk.bf16.gmra.mrb[16].mxu0 %vm954_vm4, %v19999_v60  ;;  %v20444_v60 = vpack.c.bf16 %v796_v33, %v795_v54  ;;  %v800_v54 = vld [vmem:[#allocation3 + $0x330] sm:$0xff]  ;;  %v801_v33 = vld [vmem:[#allocation3 + $0x338] sm:$0xff] }
 0x239   : > { %8939 = vmatprep.mubr.bf16.mxu0 %v19034_v7 }
 0x23b   : > { %16114 = vmatmul.mubr.msk.bf16.gmra.mrb[148].mxu1 %vm954_vm4, %v20425_v55 }
 0x23c   : > { %1569 = vmatprep.mubr.bf16.mxu1 %v19034_v7 }
 0x240   : > { %16407 = vmatmul.mubr.msk.bf16.gmra.mrb[20].mxu0 %vm954_vm4, %v20015_v15  ;;  %v799_v15 = vld [vmem:[#allocation3 + $0x328] sm:$0xff] }
 0x241   : > { %8949 = vmatprep.mubr.bf16.mxu0 %v19034_v7  ;;  %v20455_v46 = vpack.c.bf16 %v799_v15, %v20450_v29  ;;  %v20469_v15 = vld [vmem:[#allocation3 + $0x348] sm:$0xff] }
 0x243   : > { %16115 = vmatmul.mubr.msk.bf16.gmra.mrb[152].mxu1 %vm954_vm4, %v20436_v0 }
 0x244   : > { %1579 = vmatprep.mubr.bf16.mxu1 %v19034_v7 }
 0x248   : > { %16408 = vmatmul.mubr.msk.bf16.gmra.mrb[24].mxu0 %vm954_vm4, %v20029_v31  ;;  %v20463_v31 = vpack.c.bf16 %v801_v33, %v800_v54  ;;  %v805_v54 = vld [vmem:[#allocation3 + $0x358] sm:$0xff]  ;;  %v806_v33 = vld [vmem:[#allocation3 + $0x360] sm:$0xff] }
 0x249   : > { %8959 = vmatprep.mubr.bf16.mxu0 %v19034_v7 }
 0x24b   : > { %16116 = vmatmul.mubr.msk.bf16.gmra.mrb[156].mxu1 %vm954_vm4, %v20444_v60 }
 0x24c   : > { %1589 = vmatprep.mubr.bf16.mxu1 %v19034_v7 }
 0x250   : > { %16409 = vmatmul.mubr.msk.bf16.gmra.mrb[28].mxu0 %vm954_vm4, %v20045_v51  ;;  %v804_v51 = vld [vmem:[#allocation3 + $0x350] sm:$0xff] }
 0x251   : > { %8969 = vmatprep.mubr.bf16.mxu0 %v19034_v7  ;;  %v20474_v32 = vpack.c.bf16 %v804_v51, %v20469_v15  ;;  %v20488_v51 = vld [vmem:[#allocation3 + $0x370] sm:$0xff] }
 0x253   : > { %16117 = vmatmul.mubr.msk.bf16.gmra.mrb[160].mxu1 %vm954_vm4, %v20455_v46 }
 0x254   : > { %1599 = vmatprep.mubr.bf16.mxu1 %v19034_v7 }
 0x258   : > { %16410 = vmatmul.mubr.msk.bf16.gmra.mrb[32].mxu0 %vm954_vm4, %v20059_v4  ;;  %v20482_v4 = vpack.c.bf16 %v806_v33, %v805_v54  ;;  %v810_v54 = vld [vmem:[#allocation3 + $0x380] sm:$0xff]  ;;  %v811_v33 = vld [vmem:[#allocation3 + $0x388] sm:$0xff] }
 0x259   : > { %8979 = vmatprep.mubr.bf16.mxu0 %v19034_v7 }
 0x25b   : > { %16118 = vmatmul.mubr.msk.bf16.gmra.mrb[164].mxu1 %vm954_vm4, %v20463_v31 }
 0x25c   : > { %1609 = vmatprep.mubr.bf16.mxu1 %v19034_v7 }
 0x260   : > { %16411 = vmatmul.mubr.msk.bf16.gmra.mrb[36].mxu0 %vm954_vm4, %v20075_v30  ;;  %v809_v30 = vld [vmem:[#allocation3 + $0x378] sm:$0xff] }
 0x261   : > { %8989 = vmatprep.mubr.bf16.mxu0 %v19034_v7  ;;  %v20493_v19 = vpack.c.bf16 %v809_v30, %v20488_v51  ;;  %v20507_v30 = vld [vmem:[#allocation3 + $0x398] sm:$0xff] }
 0x263   : > { %16119 = vmatmul.mubr.msk.bf16.gmra.mrb[168].mxu1 %vm954_vm4, %v20474_v32 }
 0x264   : > { %1619 = vmatprep.mubr.bf16.mxu1 %v19034_v7 }
 0x268   : > { %16412 = vmatmul.mubr.msk.bf16.gmra.mrb[40].mxu0 %vm954_vm4, %v20089_v52  ;;  %v20501_v52 = vpack.c.bf16 %v811_v33, %v810_v54  ;;  %v815_v54 = vld [vmem:[#allocation3 + $0x3a8] sm:$0xff]  ;;  %v816_v33 = vld [vmem:[#allocation3 + $0x3b0] sm:$0xff] }
 0x269   : > { %8999 = vmatprep.mubr.bf16.mxu0 %v19034_v7 }
 0x26b   : > { %16120 = vmatmul.mubr.msk.bf16.gmra.mrb[172].mxu1 %vm954_vm4, %v20482_v4 }
 0x26c   : > { %1629 = vmatprep.mubr.bf16.mxu1 %v19034_v7 }
 0x270   : > { %16413 = vmatmul.mubr.msk.bf16.gmra.mrb[44].mxu0 %vm954_vm4, %v20105_v18  ;;  %v814_v18 = vld [vmem:[#allocation3 + $0x3a0] sm:$0xff] }
 0x271   : > { %9009 = vmatprep.mubr.bf16.mxu0 %v19034_v7  ;;  %v20512_v3 = vpack.c.bf16 %v814_v18, %v20507_v30  ;;  %v20526_v18 = vld [vmem:[#allocation3 + $0x3c0] sm:$0xff] }
 0x273   : > { %16121 = vmatmul.mubr.msk.bf16.gmra.mrb[176].mxu1 %vm954_vm4, %v20493_v19 }
 0x274   : > { %1639 = vmatprep.mubr.bf16.mxu1 %v19034_v7 }
 0x278   : > { %16414 = vmatmul.mubr.msk.bf16.gmra.mrb[48].mxu0 %vm954_vm4, %v20119_v41  ;;  %v20520_v41 = vpack.c.bf16 %v816_v33, %v815_v54  ;;  %v20537_v54 = vld.sshfl [vmem:[%s19240_s25 + $0x18] sm:$0x33 pattern:$0x76325410]  ;;  %v820_v33 = vld [vmem:[#allocation3 + $0x3d0] sm:$0xff] }
 0x279   : > { %9019 = vmatprep.mubr.bf16.mxu0 %v19034_v7  ;;  %v3556_v49 = vcombine.high %v20537_v54, %v20537_v54 }
 0x27b   : > { %16122 = vmatmul.mubr.msk.bf16.gmra.mrb[180].mxu1 %vm954_vm4, %v20501_v52  ;;  %v3567_v14 = vand.u32 %v3556_v49, %v19874_v10 }
 0x27c   : > { %1649 = vmatprep.mubr.bf16.mxu1 %v19034_v7 }
 0x27d   : > { %3569 = vmatprep.subr.bf16.mxu1 %v3567_v14  ;;  %v826_v14 = vld [vmem:[#allocation3 + $0x400] sm:$0xff] }
 0x280   : > { %16415 = vmatmul.mubr.msk.bf16.gmra.mrb[52].mxu0 %vm954_vm4, %v20135_v20  ;;  %v819_v20 = vld [vmem:[#allocation3 + $0x3c8] sm:$0xff] }
 0x281   : > { %9029 = vmatprep.mubr.bf16.mxu0 %v19034_v7  ;;  %v20531_v2 = vpack.c.bf16 %v819_v20, %v20526_v18 }
 0x283   : > { %16123 = vmatmul.mubr.msk.bf16.gmra.mrb[184].mxu1 %vm954_vm4, %v20512_v3 }
 0x284   : > { %1659 = vmatprep.mubr.bf16.mxu1 %v19034_v7 }
 0x288   : > { %16416 = vmatmul.mubr.msk.bf16.gmra.mrb[56].mxu0 %vm954_vm4, %v20153_v61  ;;  %v821_v61 = vld [vmem:[#allocation3 + $0x3d8] sm:$0xff] }
 0x289   : > { %9039 = vmatprep.mubr.bf16.mxu0 %v19034_v7  ;;  %v20545_v20 = vpack.c.bf16 %v821_v61, %v820_v33  ;;  %v825_v61 = vld [vmem:[#allocation3 + $0x3f8] sm:$0xff] }
 0x28a   : > { %v20564_v33 = vpack.c.bf16 %v826_v14, %v825_v61  ;;  %v830_v61 = vld [vmem:[#allocation3 + $0x420] sm:$0xff]  ;;  %v831_v14 = vld [vmem:[#allocation3 + $0x428] sm:$0xff] }
 0x28b   : > { %16124 = vmatmul.mubr.msk.bf16.gmra.mrb[188].mxu1 %vm954_vm4, %v20520_v41 }
 0x28c   : > { %1669 = vmatprep.mubr.bf16.mxu1 %v19034_v7 }
 0x290   : > { %16417 = vmatmul.mubr.msk.bf16.gmra.mrb[60].mxu0 %vm954_vm4, %v20171_v16  ;;  %v20551_v16 = vld [vmem:[#allocation3 + $0x3e8] sm:$0xff] }
 0x291   : > { %9049 = vmatprep.mubr.bf16.mxu0 %v19034_v7  ;;  %v20556_v49 = vpack.c.bf16 %v824_v22, %v20551_v16  ;;  %v20570_v22 = vld [vmem:[#allocation3 + $0x410] sm:$0xff] }
 0x293   : > { %16125 = vmatmul.mubr.msk.bf16.gmra.mrb[192].mxu1 %vm954_vm4, %v20531_v2 }
 0x294   : > { %1679 = vmatprep.mubr.bf16.mxu1 %v19034_v7 }
 0x298   : > { %16418 = vmatmul.mubr.msk.bf16.gmra.mrb[64].mxu0 %vm954_vm4, %v20185_v57 }
 0x299   : > { %9059 = vmatprep.mubr.bf16.mxu0 %v19034_v7 }
 0x29b   : > { %16126 = vmatmul.mubr.msk.bf16.gmra.mrb[196].mxu1 %vm954_vm4, %v20545_v20 }
 0x29c   : > { %1689 = vmatprep.mubr.bf16.mxu1 %v19034_v7 }
 0x2a0   : > { %16419 = vmatmul.mubr.msk.bf16.gmra.mrb[68].mxu0 %vm954_vm4, %v20201_v25  ;;  %v829_v25 = vld [vmem:[#allocation3 + $0x418] sm:$0xff] }
 0x2a1   : > { %9069 = vmatprep.mubr.bf16.mxu0 %v19034_v7  ;;  %v20575_v57 = vpack.c.bf16 %v829_v25, %v20570_v22  ;;  %v20589_v25 = vld [vmem:[#allocation3 + $0x438] sm:$0xff] }
 0x2a3   : > { %16127 = vmatmul.mubr.msk.bf16.gmra.mrb[200].mxu1 %vm954_vm4, %v20556_v49 }
 0x2a4   : > { %1699 = vmatprep.mubr.bf16.mxu1 %v19034_v7 }
 0x2a8   : > { %16420 = vmatmul.mubr.msk.bf16.gmra.mrb[72].mxu0 %vm954_vm4, %v20215_v38  ;;  %v20583_v38 = vpack.c.bf16 %v831_v14, %v830_v61  ;;  %v835_v61 = vld [vmem:[#allocation3 + $0x448] sm:$0xff]  ;;  %v836_v14 = vld [vmem:[#allocation3 + $0x450] sm:$0xff] }
 0x2a9   : > { %9079 = vmatprep.mubr.bf16.mxu0 %v19034_v7 }
 0x2ab   : > { %16128 = vmatmul.mubr.msk.bf16.gmra.mrb[204].mxu1 %vm954_vm4, %v20564_v33 }
 0x2ac   : > { %1709 = vmatprep.mubr.bf16.mxu1 %v19034_v7 }
 0x2b0   : > { %16421 = vmatmul.mubr.msk.bf16.gmra.mrb[76].mxu0 %vm954_vm4, %v20231_v12  ;;  %v834_v12 = vld [vmem:[#allocation3 + $0x440] sm:$0xff] }
 0x2b1   : > { %9089 = vmatprep.mubr.bf16.mxu0 %v19034_v7  ;;  %v20594_v17 = vpack.c.bf16 %v834_v12, %v20589_v25  ;;  %v20608_v12 = vld [vmem:[#allocation3 + $0x460] sm:$0xff] }
 0x2b2   : > { %23983 = vst [vmem:[#allocation89_spill] sm:$0xff] %v20608_v12 }
 0x2b3   : > { %16129 = vmatmul.mubr.msk.bf16.gmra.mrb[208].mxu1 %vm954_vm4, %v20575_v57 }
 0x2b4   : > { %1719 = vmatprep.mubr.bf16.mxu1 %v19034_v7 }
 0x2b8   : > { %16422 = vmatmul.mubr.msk.bf16.gmra.mrb[80].mxu0 %vm954_vm4, %v20245_v48  ;;  %v20602_v48 = vpack.c.bf16 %v836_v14, %v835_v61  ;;  %v840_v61 = vld [vmem:[#allocation3 + $0x470] sm:$0xff]  ;;  %v841_v14 = vld [vmem:[#allocation3 + $0x478] sm:$0xff] }
 0x2b9   : > { %9099 = vmatprep.mubr.bf16.mxu0 %v19034_v7 }
 0x2bb   : > { %16130 = vmatmul.mubr.msk.bf16.gmra.mrb[212].mxu1 %vm954_vm4, %v20583_v38 }
 0x2bc   : > { %1729 = vmatprep.mubr.bf16.mxu1 %v19034_v7 }
 0x2c0   : > { %16423 = vmatmul.mubr.msk.bf16.gmra.mrb[84].mxu0 %vm954_vm4, %v20261_v1  ;;  %v839_v1 = vld [vmem:[#allocation3 + $0x468] sm:$0xff] }
 0x2c1   : > { %9109 = vmatprep.mubr.bf16.mxu0 %v19034_v7  ;;  %v20613_v47 = vpack.c.bf16 %v839_v1, %v20608_v12  ;;  %v20627_v1 = vld [vmem:[#allocation3 + $0x488] sm:$0xff] }
 0x2c2   : > { %23986 = vst [vmem:[#allocation92_spill] sm:$0xff] %v20627_v1 }
 0x2c3   : > { %16131 = vmatmul.mubr.msk.bf16.gmra.mrb[216].mxu1 %vm954_vm4, %v20594_v17  ;;  %23984 = vst [vmem:[#allocation90_spill] sm:$0xff] %v20613_v47 }
 0x2c4   : > { %1739 = vmatprep.mubr.bf16.mxu1 %v19034_v7 }
 0x2c8   : > { %16424 = vmatmul.mubr.msk.bf16.gmra.mrb[88].mxu0 %vm954_vm4, %v20275_v37  ;;  %v20621_v37 = vpack.c.bf16 %v841_v14, %v840_v61  ;;  %v845_v61 = vld [vmem:[#allocation3 + $0x498] sm:$0xff]  ;;  %v846_v14 = vld [vmem:[#allocation3 + $0x4a0] sm:$0xff] }
 0x2c9   : > { %9119 = vmatprep.mubr.bf16.mxu0 %v19034_v7 }
 0x2ca   : > { %23985 = vst [vmem:[#allocation91_spill] sm:$0xff] %v20621_v37 }
 0x2cb   : > { %16132 = vmatmul.mubr.msk.bf16.gmra.mrb[220].mxu1 %vm954_vm4, %v20602_v48 }
 0x2cc   : > { %1749 = vmatprep.mubr.bf16.mxu1 %v19034_v7 }
 0x2d0   : > { %16425 = vmatmul.mubr.msk.bf16.gmra.mrb[92].mxu0 %vm954_vm4, %v20291_v28  ;;  %v844_v28 = vld [vmem:[#allocation3 + $0x490] sm:$0xff] }
 0x2d1   : > { %9129 = vmatprep.mubr.bf16.mxu0 %v19034_v7  ;;  %v20632_v12 = vpack.c.bf16 %v844_v28, %v20627_v1  ;;  %v20646_v28 = vld [vmem:[#allocation3 + $0x4b0] sm:$0xff] }
 0x2d2   : > { %23989 = vst [vmem:[#allocation95_spill] sm:$0xff] %v20646_v28 }
 0x2d3   : > { %16133 = vmatmul.mubr.msk.bf16.gmra.mrb[224].mxu1 %vm954_vm4, %v20613_v47  ;;  %23987 = vst [vmem:[#allocation93_spill] sm:$0xff] %v20632_v12 }
 0x2d4   : > { %1759 = vmatprep.mubr.bf16.mxu1 %v19034_v7 }
 0x2d8   : > { %16426 = vmatmul.mubr.msk.bf16.gmra.mrb[96].mxu0 %vm954_vm4, %v20305_v56  ;;  %v20640_v56 = vpack.c.bf16 %v846_v14, %v845_v61  ;;  %v850_v61 = vld [vmem:[#allocation3 + $0x4c0] sm:$0xff]  ;;  %v851_v14 = vld [vmem:[#allocation3 + $0x4c8] sm:$0xff] }
 0x2d9   : > { %9139 = vmatprep.mubr.bf16.mxu0 %v19034_v7 }
 0x2da   : > { %23988 = vst [vmem:[#allocation94_spill] sm:$0xff] %v20640_v56 }
 0x2db   : > { %16134 = vmatmul.mubr.msk.bf16.gmra.mrb[228].mxu1 %vm954_vm4, %v20621_v37 }
 0x2dc   : > { %1769 = vmatprep.mubr.bf16.mxu1 %v19034_v7 }
 0x2e0   : > { %16427 = vmatmul.mubr.msk.bf16.gmra.mrb[100].mxu0 %vm954_vm4, %v20321_v39  ;;  %v849_v39 = vld [vmem:[#allocation3 + $0x4b8] sm:$0xff] }
 0x2e1   : > { %9149 = vmatprep.mubr.bf16.mxu0 %v19034_v7  ;;  %v20651_v1 = vpack.c.bf16 %v849_v39, %v20646_v28  ;;  %v5028_v39 = vrot.slane %v20393_v44, 6  ;;  %v787_v28 = vld [vmem:[#allocation3 + $0x2c8] sm:$0x3] }
 0x2e3   : > { %16135 = vmatmul.mubr.msk.bf16.gmra.mrb[232].mxu1 %vm954_vm4, %v20632_v12  ;;  %23990 = vst [vmem:[#allocation96_spill] sm:$0xff] %v20651_v1  ;;  %v5420_v12 = vshrl.u32 %v20398_v59, 16 }
 0x2e4   : > { %1779 = vmatprep.mubr.bf16.mxu1 %v19034_v7 }
 0x2e8   : > { %16428 = vmatmul.mubr.msk.bf16.gmra.mrb[104].mxu0 %vm954_vm4, %v20335_v43  ;;  %v20659_v43 = vpack.c.bf16 %v851_v14, %v850_v61  ;;  %v5426_v61 = vshll.u32 %v20406_v9, 16  ;;  %v5062_v14 = vsel %vm5010_vm5, %v5028_v39, %v787_v28  ;;  %v855_v28 = vld [vmem:[#allocation3 + $0x4e8] sm:$0xff]  ;;  %v856_v39 = vld [vmem:[#allocation3 + $0x4f0] sm:$0xff] }
 0x2e9   : > { %9159 = vmatprep.mubr.bf16.mxu0 %v19034_v7  ;;  %v20678_v47 = vpack.c.bf16 %v5062_v14, %v5062_v14  ;;  %v5029_v14 = vrot.slane %v20412_v50, 6 }
 0x2ea   : > { %23991 = vst [vmem:[#allocation97_spill] sm:$0xff] %v20659_v43  ;;  %v5428_v37 = vrot.slane %v5426_v61, 1 }
 0x2eb   : > { %16136 = vmatmul.mubr.msk.bf16.gmra.mrb[236].mxu1 %vm954_vm4, %v20640_v56  ;;  %v854_v56 = vld [vmem:[#allocation3 + $0x4e0] sm:$0xff]  ;;  %23993 = vst [vmem:[#allocation99_spill] sm:$0xff] %v20678_v47 }
 0x2ec   : > { %1789 = vmatprep.mubr.bf16.mxu1 %v19034_v7 }
 0x2f0   : > { %16429 = vmatmul.mubr.msk.bf16.gmra.mrb[108].mxu0 %vm954_vm4, %v20351_v27  ;;  %v5422_v27 = vshll.u32 %v20398_v59, 16  ;;  %v792_v59 = vld [vmem:[#allocation3 + $0x2f0] sm:$0x3] }
 0x2f1   : > { %9169 = vmatprep.mubr.bf16.mxu0 %v19034_v7 }
 0x2f3   : > { %16137 = vmatmul.mubr.msk.bf16.gmra.mrb[240].mxu1 %vm954_vm4, %v20651_v1  ;;  %v20667_v1 = vld [vmem:[#allocation3 + $0x4d8] sm:$0xff] }
 0x2f4   : > { %1799 = vmatprep.mubr.bf16.mxu1 %v19034_v7  ;;  %v20675_v44 = vpack.c.bf16 %v854_v56, %v20667_v1  ;;  %v5434_v56 = vshll.u32 %v20678_v47, 16  ;;  %v24042_v47 = vld [vmem:[#allocation94_spill] sm:$0xff] }
 0x2f6   : > { %23992 = vst [vmem:[#allocation98_spill] sm:$0xff] %v20675_v44  ;;  %v5436_v61 = vrot.slane %v5434_v56, 1 }
 0x2f8   : > { %16430 = vmatmul.mubr.msk.bf16.gmra.mrb[112].mxu0 %vm954_vm4, %v20365_v24  ;;  %v5424_v24 = vrot.slane %v5422_v27, 1 }
 0x2f9   : > { %9179 = vmatprep.mubr.bf16.mxu0 %v19034_v7 }
 0x2fb   : > { %16138 = vmatmul.mubr.msk.bf16.gmra.mrb[244].mxu1 %vm954_vm4, %v20659_v43  ;;  %v5425_v43 = vor.u32 %v5424_v24, %v5420_v12  ;;  %v20690_v24 = vpack.c.bf16 %v856_v39, %v855_v28  ;;  %v5438_v28 = vshrl.u32 %v20417_v5, 16 }
 0x2fc   : > { %1809 = vmatprep.mubr.bf16.mxu1 %v19034_v7 }
 0x2fd   : > { %v20683_v27 = vsel %vm5113_vm6, %v5425_v43, %v5428_v37  ;;  %23995 = vst [vmem:[#allocation101_spill] sm:$0xff] %v20690_v24  ;;  %v5440_v43 = vshll.u32 %v20417_v5, 16 }
 0x2fe   : > { %23994 = vst [vmem:[#allocation100_spill] sm:$0xff] %v20683_v27 }
 0x2ff   : > { %v5442_v39 = vrot.slane %v5440_v43, 1 }
 0x300   : > { %16431 = vmatmul.mubr.msk.bf16.gmra.mrb[116].mxu0 %vm954_vm4, %v20376_v34  ;;  %v5430_v34 = vshrl.u32 %v20406_v9, 16 }
 0x301   : > { %9189 = vmatprep.mubr.bf16.mxu0 %v19034_v7  ;;  %v5443_v50 = vor.u32 %v5442_v39, %v5438_v28  ;;  %v5030_v28 = vrot.slane %v20431_v62, 6  ;;  %v797_v39 = vld [vmem:[#allocation3 + $0x318] sm:$0x3] }
 0x302   : > { %v5432_v12 = vor.u32 %v5430_v34, %v5428_v37  ;;  %v5063_v37 = vsel %vm5010_vm5, %v5029_v14, %v792_v59  ;;  %v3564_v34 = vand.u32 %v20537_v54, %v19874_v10  ;;  %v5448_v59 = vshrl.u32 %v20425_v55, 16 }
 0x303   : > { %16139 = vmatmul.mubr.msk.bf16.gmra.mrb[248].mxu1 %vm954_vm4, %v20675_v44  ;;  %v5458_v14 = vshll.u32 %v20436_v0, 16 }
 0x304   : > { %1819 = vmatprep.mubr.bf16.mxu1 %v19034_v7  ;;  %v20698_v9 = vsel %vm5113_vm6, %v5432_v12, %v5436_v61  ;;  %v20709_v12 = vpack.c.bf16 %v5063_v37, %v5063_v37 }
 0x305   : > { %23996 = vst [vmem:[#allocation102_spill] sm:$0xff] %v20698_v9 }
 0x306   : > { %23997 = vst [vmem:[#allocation103_spill] sm:$0xff] %v20709_v12  ;;  %v5452_v43 = vshll.u32 %v20709_v12, 16 }
 0x308   : > { %16432 = vmatmul.mubr.msk.bf16.gmra.mrb[120].mxu0 %vm954_vm4, %v20683_v27  ;;  %v5444_v27 = vshll.u32 %v20425_v55, 16 }
 0x309   : > { %9199 = vmatprep.mubr.bf16.mxu0 %v19034_v7 }
 0x30a   : > { %v5446_v56 = vrot.slane %v5444_v27, 1  ;;  %v5454_v27 = vrot.slane %v5452_v43, 1 }
 0x30b   : > { %16140 = vmatmul.mubr.msk.bf16.gmra.mrb[252].mxu1 %vm954_vm4, %v20690_v24 }
 0x30c   : > { %2139 = vmatprep.mubr.bf16.mxu1 %v19034_v7  ;;  %v20714_v61 = vsel %vm5113_vm6, %v5443_v50, %v5446_v56  ;;  %v5450_v54 = vor.u32 %v5448_v59, %v5446_v56  ;;  %v5460_v50 = vrot.slane %v5458_v14, 1  ;;  %v5064_v56 = vsel %vm5010_vm5, %v5030_v28, %v797_v39 }
 0x30d   : > { %23998 = vst [vmem:[#allocation104_spill] sm:$0xff] %v20714_v61  ;;  %v20736_v43 = vpack.c.bf16 %v5064_v56, %v5064_v56  ;;  %v5476_v39 = vshll.u32 %v20455_v46, 16 }
 0x30e   : > { %v20727_v37 = vsel %vm5113_vm6, %v5450_v54, %v5454_v27  ;;  %v5466_v27 = vshrl.u32 %v20444_v60, 16 }
 0x30f   : > { %23999 = vst [vmem:[#allocation105_spill] sm:$0xff] %v20727_v37  ;;  %24000 = vst [vmem:[#allocation106_spill] sm:$0xff] %v20736_v43  ;;  %v5470_v14 = vshll.u32 %v20736_v43, 16  ;;  %v847_v43 = vld [vmem:[#allocation3 + $0x4a8] sm:$0x3] }
 0x310   : > { %16433 = vmatmul.mubr.msk.bf16.gmra.mrb[124].mxu0 %vm954_vm4, %v20698_v9 }
 0x311   : > { %9209 = vmatprep.mubr.bf16.mxu0 %v19034_v7  ;;  %v5472_v28 = vrot.slane %v5470_v14, 1 }
 0x313   : > { %16142 = vmatmul.mubr.msk.bf16.vlgmr.msra.gmra.mrb[0].mxu1 %vm954_vm4, %v19886_v23 }
 0x314   : > { %3570 = vmatpush1.bf16.msra.mxu1 %v3564_v34  ;;  %2149 = vmatprep.mubr.bf16.mxu1 %v19034_v7  ;;  %v5456_v34 = vshrl.u32 %v20436_v0, 16 }
 0x316   : > { %v5461_v62 = vor.u32 %v5460_v50, %v5456_v34  ;;  %v5031_v34 = vrot.slane %v20450_v29, 6  ;;  %v802_v50 = vld [vmem:[#allocation3 + $0x340] sm:$0x3] }
 0x318   : > { %16434 = vmatmul.mubr.msk.bf16.gmra.mrb[128].mxu0 %vm954_vm4, %v20714_v61  ;;  %v5462_v61 = vshll.u32 %v20444_v60, 16 }
 0x319   : > { %9219 = vmatprep.mubr.bf16.mxu0 %v19034_v7 }
 0x31a   : > { %v5464_v59 = vrot.slane %v5462_v61, 1 }
 0x31b   : > { %16143 = vmatmul.mubr.msk.bf16.gmra.mrb[4].mxu1 %vm954_vm4, %v19892_v26 }
 0x31c   : > { %2159 = vmatprep.mubr.bf16.mxu1 %v19034_v7  ;;  %v20741_v54 = vsel %vm5113_vm6, %v5461_v62, %v5464_v59  ;;  %v5468_v61 = vor.u32 %v5466_v27, %v5464_v59  ;;  %v5474_v62 = vshrl.u32 %v20455_v46, 16  ;;  %v5065_v59 = vsel %vm5010_vm5, %v5031_v34, %v802_v50 }
 0x31d   : > { %24001 = vst [vmem:[#allocation107_spill] sm:$0xff] %v20741_v54  ;;  %v20763_v14 = vpack.c.bf16 %v5065_v59, %v5065_v59  ;;  %v5494_v34 = vshll.u32 %v20474_v32, 16  ;;  %v5032_v50 = vrot.slane %v20469_v15, 6 }
 0x31e   : > { %v20754_v56 = vsel %vm5113_vm6, %v5468_v61, %v5472_v28  ;;  %v5484_v28 = vshrl.u32 %v20463_v31, 16 }
 0x31f   : > { %24002 = vst [vmem:[#allocation108_spill] sm:$0xff] %v20754_v56  ;;  %24003 = vst [vmem:[#allocation109_spill] sm:$0xff] %v20763_v14 }
 0x320   : > { %16435 = vmatmul.mubr.msk.bf16.gmra.mrb[132].mxu0 %vm954_vm4, %v20727_v37  ;;  %v5480_v37 = vshll.u32 %v20463_v31, 16 }
 0x321   : > { %9229 = vmatprep.mubr.bf16.mxu0 %v19034_v7 }
 0x322   : > { %v5482_v27 = vrot.slane %v5480_v37, 1 }
 0x323   : > { %16144 = vmatmul.mubr.msk.bf16.gmra.mrb[8].mxu1 %vm954_vm4, %v19908_v45 }
 0x324   : > { %2169 = vmatprep.mubr.bf16.mxu1 %v19034_v7  ;;  %v5486_v37 = vor.u32 %v5484_v28, %v5482_v27 }
 0x328   : > { %16436 = vmatmul.mubr.msk.bf16.gmra.mrb[136].mxu0 %vm954_vm4, %v20741_v54  ;;  %v5478_v54 = vrot.slane %v5476_v39, 1  ;;  %v5488_v39 = vshll.u32 %v20763_v14, 16 }
 0x329   : > { %9239 = vmatprep.mubr.bf16.mxu0 %v19034_v7 }
 0x32a   : > { %v5479_v29 = vor.u32 %v5478_v54, %v5474_v62  ;;  %v5490_v54 = vrot.slane %v5488_v39, 1  ;;  %v807_v62 = vld [vmem:[#allocation3 + $0x368] sm:$0x3] }
 0x32b   : > { %16145 = vmatmul.mubr.msk.bf16.gmra.mrb[12].mxu1 %vm954_vm4, %v19919_v53 }
 0x32c   : > { %2179 = vmatprep.mubr.bf16.mxu1 %v19034_v7  ;;  %v20768_v61 = vsel %vm5113_vm6, %v5479_v29, %v5482_v27  ;;  %v20781_v59 = vsel %vm5113_vm6, %v5486_v37, %v5490_v54  ;;  %v5492_v29 = vshrl.u32 %v20474_v32, 16  ;;  %v5066_v27 = vsel %vm5010_vm5, %v5032_v50, %v807_v62 }
 0x32d   : > { %24004 = vst [vmem:[#allocation110_spill] sm:$0xff] %v20768_v61  ;;  %24005 = vst [vmem:[#allocation111_spill] sm:$0xff] %v20781_v59  ;;  %v20790_v39 = vpack.c.bf16 %v5066_v27, %v5066_v27  ;;  %v5502_v54 = vshrl.u32 %v20482_v4, 16  ;;  %v5512_v50 = vshll.u32 %v20493_v19, 16  ;;  %v5033_v62 = vrot.slane %v20488_v51, 6 }
 0x32f   : > { %24006 = vst [vmem:[#allocation112_spill] sm:$0xff] %v20790_v39 }
 0x330   : > { %16437 = vmatmul.mubr.msk.bf16.gmra.mrb[140].mxu0 %vm954_vm4, %v20754_v56  ;;  %v5498_v56 = vshll.u32 %v20482_v4, 16 }
 0x331   : > { %9249 = vmatprep.mubr.bf16.mxu0 %v19034_v7 }
 0x332   : > { %v5500_v28 = vrot.slane %v5498_v56, 1 }
 0x333   : > { %16146 = vmatmul.mubr.msk.bf16.gmra.mrb[16].mxu1 %vm954_vm4, %v19944_v6 }
 0x334   : > { %2189 = vmatprep.mubr.bf16.mxu1 %v19034_v7  ;;  %v5504_v56 = vor.u32 %v5502_v54, %v5500_v28 }
 0x338   : > { %16438 = vmatmul.mubr.msk.bf16.gmra.mrb[144].mxu0 %vm954_vm4, %v20768_v61  ;;  %v5496_v61 = vrot.slane %v5494_v34, 1  ;;  %v5506_v34 = vshll.u32 %v20790_v39, 16  ;;  %v24034_v39 = vld [vmem:[#allocation91_spill] sm:$0xff] }
 0x339   : > { %9259 = vmatprep.mubr.bf16.mxu0 %v19034_v7  ;;  %v5624_v14 = vshll.u32 %v24034_v39, 16 }
 0x33a   : > { %v5497_v15 = vor.u32 %v5496_v61, %v5492_v29  ;;  %v5508_v61 = vrot.slane %v5506_v34, 1  ;;  %v812_v29 = vld [vmem:[#allocation3 + $0x390] sm:$0x3] }
 0x33b   : > { %16147 = vmatmul.mubr.msk.bf16.gmra.mrb[20].mxu1 %vm954_vm4, %v19949_v13 }
 0x33c   : > { %2199 = vmatprep.mubr.bf16.mxu1 %v19034_v7  ;;  %v20795_v37 = vsel %vm5113_vm6, %v5497_v15, %v5500_v28  ;;  %v20808_v27 = vsel %vm5113_vm6, %v5504_v56, %v5508_v61  ;;  %v5510_v15 = vshrl.u32 %v20493_v19, 16  ;;  %v5067_v28 = vsel %vm5010_vm5, %v5033_v62, %v812_v29 }
 0x33d   : > { %24007 = vst [vmem:[#allocation113_spill] sm:$0xff] %v20795_v37  ;;  %24008 = vst [vmem:[#allocation114_spill] sm:$0xff] %v20808_v27  ;;  %v20817_v34 = vpack.c.bf16 %v5067_v28, %v5067_v28  ;;  %v5520_v61 = vshrl.u32 %v20501_v52, 16  ;;  %v5530_v62 = vshll.u32 %v20512_v3, 16  ;;  %v5034_v29 = vrot.slane %v20507_v30, 6 }
 0x33f   : > { %24009 = vst [vmem:[#allocation115_spill] sm:$0xff] %v20817_v34 }
 0x340   : > { %16439 = vmatmul.mubr.msk.bf16.gmra.mrb[148].mxu0 %vm954_vm4, %v20781_v59  ;;  %v5516_v59 = vshll.u32 %v20501_v52, 16 }
 0x341   : > { %9269 = vmatprep.mubr.bf16.mxu0 %v19034_v7 }
 0x342   : > { %v5518_v54 = vrot.slane %v5516_v59, 1 }
 0x343   : > { %16148 = vmatmul.mubr.msk.bf16.gmra.mrb[24].mxu1 %vm954_vm4, %v19974_v35 }
 0x344   : > { %2209 = vmatprep.mubr.bf16.mxu1 %v19034_v7  ;;  %v5522_v59 = vor.u32 %v5520_v61, %v5518_v54 }
 0x348   : > { %16440 = vmatmul.mubr.msk.bf16.gmra.mrb[152].mxu0 %vm954_vm4, %v20795_v37  ;;  %v5514_v37 = vrot.slane %v5512_v50, 1  ;;  %v5524_v50 = vshll.u32 %v20817_v34, 16 }
 0x349   : > { %9279 = vmatprep.mubr.bf16.mxu0 %v19034_v7 }
 0x34a   : > { %v5515_v51 = vor.u32 %v5514_v37, %v5510_v15  ;;  %v5526_v37 = vrot.slane %v5524_v50, 1  ;;  %v817_v15 = vld [vmem:[#allocation3 + $0x3b8] sm:$0x3] }
 0x34b   : > { %16149 = vmatmul.mubr.msk.bf16.gmra.mrb[28].mxu1 %vm954_vm4, %v19979_v40 }
 0x34c   : > { %2219 = vmatprep.mubr.bf16.mxu1 %v19034_v7  ;;  %v20822_v56 = vsel %vm5113_vm6, %v5515_v51, %v5518_v54  ;;  %v20835_v28 = vsel %vm5113_vm6, %v5522_v59, %v5526_v37  ;;  %v5528_v51 = vshrl.u32 %v20512_v3, 16  ;;  %v5068_v54 = vsel %vm5010_vm5, %v5034_v29, %v817_v15 }
 0x34d   : > { %24010 = vst [vmem:[#allocation116_spill] sm:$0xff] %v20822_v56  ;;  %24011 = vst [vmem:[#allocation117_spill] sm:$0xff] %v20835_v28  ;;  %v20844_v50 = vpack.c.bf16 %v5068_v54, %v5068_v54  ;;  %v5538_v37 = vshrl.u32 %v20520_v41, 16  ;;  %v5548_v29 = vshll.u32 %v20531_v2, 16  ;;  %v5035_v15 = vrot.slane %v20526_v18, 6 }
 0x34f   : > { %24012 = vst [vmem:[#allocation118_spill] sm:$0xff] %v20844_v50 }
 0x350   : > { %16441 = vmatmul.mubr.msk.bf16.gmra.mrb[156].mxu0 %vm954_vm4, %v20808_v27  ;;  %v5534_v27 = vshll.u32 %v20520_v41, 16 }
 0x351   : > { %9289 = vmatprep.mubr.bf16.mxu0 %v19034_v7 }
 0x352   : > { %v5536_v61 = vrot.slane %v5534_v27, 1 }
 0x353   : > { %16150 = vmatmul.mubr.msk.bf16.gmra.mrb[32].mxu1 %vm954_vm4, %v20004_v63 }
 0x354   : > { %2229 = vmatprep.mubr.bf16.mxu1 %v19034_v7  ;;  %v5540_v27 = vor.u32 %v5538_v37, %v5536_v61 }
 0x358   : > { %16442 = vmatmul.mubr.msk.bf16.gmra.mrb[160].mxu0 %vm954_vm4, %v20822_v56  ;;  %v5532_v56 = vrot.slane %v5530_v62, 1  ;;  %v5542_v62 = vshll.u32 %v20844_v50, 16  ;;  %v842_v50 = vld [vmem:[#allocation3 + $0x480] sm:$0x3] }
 0x359   : > { %9299 = vmatprep.mubr.bf16.mxu0 %v19034_v7 }
 0x35a   : > { %v5533_v30 = vor.u32 %v5532_v56, %v5528_v51  ;;  %v5544_v56 = vrot.slane %v5542_v62, 1  ;;  %v822_v51 = vld [vmem:[#allocation3 + $0x3e0] sm:$0x3] }
 0x35b   : > { %16151 = vmatmul.mubr.msk.bf16.gmra.mrb[36].mxu1 %vm954_vm4, %v20009_v8 }
 0x35c   : > { %2239 = vmatprep.mubr.bf16.mxu1 %v19034_v7  ;;  %v20849_v59 = vsel %vm5113_vm6, %v5533_v30, %v5536_v61  ;;  %v20862_v54 = vsel %vm5113_vm6, %v5540_v27, %v5544_v56  ;;  %v5546_v30 = vshrl.u32 %v20531_v2, 16  ;;  %v5069_v61 = vsel %vm5010_vm5, %v5035_v15, %v822_v51 }
 0x35d   : > { %24013 = vst [vmem:[#allocation119_spill] sm:$0xff] %v20849_v59  ;;  %24014 = vst [vmem:[#allocation120_spill] sm:$0xff] %v20862_v54  ;;  %v20871_v62 = vpack.c.bf16 %v5069_v61, %v5069_v61  ;;  %v5556_v56 = vshrl.u32 %v20545_v20, 16  ;;  %v5566_v15 = vshll.u32 %v20556_v49, 16  ;;  %v5036_v51 = vrot.slane %v20551_v16, 6 }
 0x35f   : > { %24015 = vst [vmem:[#allocation121_spill] sm:$0xff] %v20871_v62 }
 0x360   : > { %16443 = vmatmul.mubr.msk.bf16.gmra.mrb[164].mxu0 %vm954_vm4, %v20835_v28  ;;  %v5552_v28 = vshll.u32 %v20545_v20, 16 }
 0x361   : > { %9309 = vmatprep.mubr.bf16.mxu0 %v19034_v7 }
 0x362   : > { %v5554_v37 = vrot.slane %v5552_v28, 1 }
 0x363   : > { %16152 = vmatmul.mubr.msk.bf16.gmra.mrb[40].mxu1 %vm954_vm4, %v20034_v36 }
 0x364   : > { %2249 = vmatprep.mubr.bf16.mxu1 %v19034_v7  ;;  %v5558_v28 = vor.u32 %v5556_v56, %v5554_v37 }
 0x368   : > { %16444 = vmatmul.mubr.msk.bf16.gmra.mrb[168].mxu0 %vm954_vm4, %v20849_v59  ;;  %v5550_v59 = vrot.slane %v5548_v29, 1  ;;  %v5560_v29 = vshll.u32 %v20871_v62, 16  ;;  %v24025_v62 = vld [vmem:[#allocation47_spill] sm:$0xff] }
 0x369   : > { %9319 = vmatprep.mubr.bf16.mxu0 %v19034_v7 }
 0x36a   : > { %v5551_v18 = vor.u32 %v5550_v59, %v5546_v30  ;;  %v5562_v59 = vrot.slane %v5560_v29, 1  ;;  %v827_v30 = vld [vmem:[#allocation3 + $0x408] sm:$0x3] }
 0x36b   : > { %16153 = vmatmul.mubr.msk.bf16.gmra.mrb[44].mxu1 %vm954_vm4, %v20039_v42 }
 0x36c   : > { %2259 = vmatprep.mubr.bf16.mxu1 %v19034_v7  ;;  %v20876_v27 = vsel %vm5113_vm6, %v5551_v18, %v5554_v37  ;;  %v20889_v61 = vsel %vm5113_vm6, %v5558_v28, %v5562_v59  ;;  %v5564_v18 = vshrl.u32 %v20556_v49, 16  ;;  %v5070_v37 = vsel %vm5010_vm5, %v5036_v51, %v827_v30 }
 0x36d   : > { %24016 = vst [vmem:[#allocation122_spill] sm:$0xff] %v20876_v27  ;;  %24017 = vst [vmem:[#allocation123_spill] sm:$0xff] %v20889_v61  ;;  %v20898_v29 = vpack.c.bf16 %v5070_v37, %v5070_v37  ;;  %v5574_v59 = vshrl.u32 %v20564_v33, 16  ;;  %v5584_v51 = vshll.u32 %v20575_v57, 16  ;;  %v5037_v30 = vrot.slane %v20570_v22, 6  ;;  %v24020_v37 = vld [vmem:[#allocation42_spill] sm:$0xff] }
 0x36f   : > { %24018 = vst [vmem:[#allocation124_spill] sm:$0xff] %v20898_v29 }
 0x370   : > { %16445 = vmatmul.mubr.msk.bf16.gmra.mrb[172].mxu0 %vm954_vm4, %v20862_v54  ;;  %v5570_v54 = vshll.u32 %v20564_v33, 16 }
 0x371   : > { %9329 = vmatprep.mubr.bf16.mxu0 %v19034_v7 }
 0x372   : > { %v5572_v56 = vrot.slane %v5570_v54, 1 }
 0x373   : > { %16154 = vmatmul.mubr.msk.bf16.gmra.mrb[48].mxu1 %vm954_vm4, %v20064_v11 }
 0x374   : > { %2269 = vmatprep.mubr.bf16.mxu1 %v19034_v7  ;;  %v5576_v54 = vor.u32 %v5574_v59, %v5572_v56 }
 0x378   : > { %16446 = vmatmul.mubr.msk.bf16.gmra.mrb[176].mxu0 %vm954_vm4, %v20876_v27  ;;  %v5568_v27 = vrot.slane %v5566_v15, 1  ;;  %v5578_v15 = vshll.u32 %v20898_v29, 16  ;;  %v837_v29 = vld [vmem:[#allocation3 + $0x458] sm:$0x3] }
 0x379   : > { %9339 = vmatprep.mubr.bf16.mxu0 %v19034_v7 }
 0x37a   : > { %v5569_v16 = vor.u32 %v5568_v27, %v5564_v18  ;;  %v5580_v27 = vrot.slane %v5578_v15, 1  ;;  %v832_v18 = vld [vmem:[#allocation3 + $0x430] sm:$0x3] }
 0x37b   : > { %16155 = vmatmul.mubr.msk.bf16.gmra.mrb[52].mxu1 %vm954_vm4, %v20069_v21  ;;  %v5071_v59 = vsel %vm5010_vm5, %v5037_v30, %v832_v18  ;;  %v5592_v30 = vshrl.u32 %v20583_v38, 16 }
 0x37c   : > { %2279 = vmatprep.mubr.bf16.mxu1 %v19034_v7  ;;  %v20903_v28 = vsel %vm5113_vm6, %v5569_v16, %v5572_v56  ;;  %v20916_v16 = vsel %vm5113_vm6, %v5576_v54, %v5580_v27  ;;  %v5588_v56 = vshll.u32 %v20583_v38, 16  ;;  %v20925_v9 = vpack.c.bf16 %v5071_v59, %v5071_v59  ;;  %v24023_v54 = vld [vmem:[#allocation46_spill] sm:$0xff]  ;;  %v20930_v27 = vld.sshfl [vmem:[%s19240_s25 + $0x14] sm:$0x33 pattern:$0x76325410] }
 0x37d   : > { %24019 = vst [vmem:[#allocation125_spill] sm:$0xff] %v20903_v28  ;;  %24021 = vst [vmem:[#allocation42_spill] sm:$0xff] %v20916_v16 }
 0x37e   : > { %v5590_v15 = vrot.slane %v5588_v56, 1  ;;  %24022 = vst [vmem:[#allocation126_spill] sm:$0xff] %v20925_v9  ;;  %v5596_v18 = vshll.u32 %v20925_v9, 16 }
 0x380   : > { %16447 = vmatmul.mubr.msk.bf16.gmra.mrb[180].mxu0 %vm954_vm4, %v20889_v61  ;;  %v5586_v61 = vrot.slane %v5584_v51, 1  ;;  %v5594_v56 = vor.u32 %v5592_v30, %v5590_v15  ;;  %v5598_v59 = vrot.slane %v5596_v18, 1 }
 0x381   : > { %9349 = vmatprep.mubr.bf16.mxu0 %v19034_v7 }
 0x382   : > { %v20949_v9 = vsel %vm5113_vm6, %v5594_v56, %v5598_v59  ;;  %v24028_v56 = vld [vmem:[#allocation51_spill] sm:$0xff] }
 0x383   : > { %16156 = vmatmul.mubr.msk.bf16.gmra.mrb[56].mxu1 %vm954_vm4, %v20094_v58  ;;  %24026 = vst [vmem:[#allocation47_spill] sm:$0xff] %v20949_v9 }
 0x384   : > { %2289 = vmatprep.mubr.bf16.mxu1 %v19034_v7 }
 0x388   : > { %16448 = vmatmul.mubr.msk.bf16.gmra.mrb[184].mxu0 %vm954_vm4, %v20903_v28  ;;  %v5582_v28 = vshrl.u32 %v20575_v57, 16 }
 0x389   : > { %9359 = vmatprep.mubr.bf16.mxu0 %v19034_v7 }
 0x38a   : > { %v5587_v22 = vor.u32 %v5586_v61, %v5582_v28  ;;  %v12219_v61 = vcombine.high %v20930_v27, %v20930_v27 }
 0x38b   : > { %16157 = vmatmul.mubr.msk.bf16.gmra.mrb[60].mxu1 %vm954_vm4, %v24020_v37 }
 0x38c   : > { %2299 = vmatprep.mubr.bf16.mxu1 %v19034_v7  ;;  %v20933_v51 = vsel %vm5113_vm6, %v5587_v22, %v5590_v15  ;;  %v12230_v28 = vand.u32 %v12219_v61, %v19874_v10  ;;  %v5602_v22 = vshll.u32 %v20594_v17, 16  ;;  %v5600_v61 = vshrl.u32 %v20594_v17, 16 }
 0x38d   : > { %24024 = vst [vmem:[#allocation46_spill] sm:$0xff] %v20933_v51  ;;  %v5606_v15 = vshll.u32 %v20602_v48, 16 }
 0x38e   : > { %12232 = vmatprep.subr.bf16.mxu0 %v12230_v28 }
 0x38f   : > { %v5608_v18 = vrot.slane %v5606_v15, 1 }
 0x390   : > { %16449 = vmatmul.mubr.msk.bf16.gmra.mrb[188].mxu0 %vm954_vm4, %v20916_v16  ;;  %v5038_v16 = vrot.slane %v20589_v25, 6 }
 0x391   : > { %9369 = vmatprep.mubr.bf16.mxu0 %v19034_v7 }
 0x392   : > { %v5072_v30 = vsel %vm5010_vm5, %v5038_v16, %v837_v29 }
 0x393   : > { %16158 = vmatmul.mubr.msk.bf16.gmra.mrb[64].mxu1 %vm954_vm4, %v24023_v54  ;;  %v20958_v28 = vpack.c.bf16 %v5072_v30, %v5072_v30  ;;  %v24031_v30 = vld [vmem:[#allocation89_spill] sm:$0xff] }
 0x394   : > { %2309 = vmatprep.mubr.bf16.mxu1 %v19034_v7 }
 0x395   : > { %24027 = vst [vmem:[#allocation127_spill] sm:$0xff] %v20958_v28  ;;  %v5614_v29 = vshll.u32 %v20958_v28, 16 }
 0x398   : > { %16450 = vmatmul.mubr.msk.bf16.gmra.mrb[192].mxu0 %vm954_vm4, %v20933_v51  ;;  %v5604_v51 = vrot.slane %v5602_v22, 1  ;;  %v5610_v22 = vshrl.u32 %v20602_v48, 16 }
 0x399   : > { %9379 = vmatprep.mubr.bf16.mxu0 %v19034_v7 }
 0x39a   : > { %v5605_v25 = vor.u32 %v5604_v51, %v5600_v61  ;;  %v5612_v16 = vor.u32 %v5610_v22, %v5608_v18  ;;  %v5616_v51 = vrot.slane %v5614_v29, 1  ;;  %v24030_v61 = vld [vmem:[#allocation90_spill] sm:$0xff]  ;;  %v5626_v29 = vrot.slane %v5624_v14, 1 }
 0x39b   : > { %16159 = vmatmul.mubr.msk.bf16.gmra.mrb[68].mxu1 %vm954_vm4, %v24025_v62  ;;  %v5620_v15 = vshll.u32 %v24030_v61, 16  ;;  %v5618_v28 = vshrl.u32 %v24030_v61, 16 }
 0x39c   : > { %2319 = vmatprep.mubr.bf16.mxu1 %v19034_v7  ;;  %v20963_v59 = vsel %vm5113_vm6, %v5605_v25, %v5608_v18  ;;  %v24032_v25 = vld [vmem:[#allocation52_spill] sm:$0xff]  ;;  %v20976_v34 = vsel %vm5113_vm6, %v5612_v16, %v5616_v51 }
 0x39d   : > { %24029 = vst [vmem:[#allocation51_spill] sm:$0xff] %v20963_v59  ;;  %24033 = vst [vmem:[#allocation89_spill] sm:$0xff] %v20976_v34  ;;  %v24036_v16 = vld [vmem:[#allocation56_spill] sm:$0xff] }
 0x3a0   : > { %16451 = vmatmul.mubr.msk.bf16.gmra.mrb[196].mxu0 %vm954_vm4, %v20949_v9  ;;  %v5039_v9 = vrot.slane %v24031_v30, 6 }
 0x3a1   : > { %9389 = vmatprep.mubr.bf16.mxu0 %v19034_v7 }
 0x3a2   : > { %v5073_v18 = vsel %vm5010_vm5, %v5039_v9, %v842_v50 }
 0x3a3   : > { %16160 = vmatmul.mubr.msk.bf16.gmra.mrb[72].mxu1 %vm954_vm4, %v24028_v56  ;;  %v20985_v30 = vpack.c.bf16 %v5073_v18, %v5073_v18  ;;  %v24039_v18 = vld [vmem:[#allocation92_spill] sm:$0xff] }
 0x3a4   : > { %2329 = vmatprep.mubr.bf16.mxu1 %v19034_v7 }
 0x3a5   : > { %24035 = vst [vmem:[#allocation52_spill] sm:$0xff] %v20985_v30  ;;  %v5632_v9 = vshll.u32 %v20985_v30, 16 }
 0x3a7   : > { %v5634_v50 = vrot.slane %v5632_v9, 1 }
 0x3a8   : > { %16452 = vmatmul.mubr.msk.bf16.gmra.mrb[200].mxu0 %vm954_vm4, %v20963_v59  ;;  %v5622_v59 = vrot.slane %v5620_v15, 1  ;;  %v5628_v15 = vshrl.u32 %v24034_v39, 16  ;;  %v5642_v39 = vshll.u32 %v24042_v47, 16 }
 0x3a9   : > { %9399 = vmatprep.mubr.bf16.mxu0 %v19034_v7 }
 0x3aa   : > { %v5623_v22 = vor.u32 %v5622_v59, %v5618_v28  ;;  %v5630_v14 = vor.u32 %v5628_v15, %v5626_v29  ;;  %v24038_v28 = vld [vmem:[#allocation93_spill] sm:$0xff]  ;;  %v5644_v9 = vrot.slane %v5642_v39, 1 }
 0x3ab   : > { %16161 = vmatmul.mubr.msk.bf16.gmra.mrb[76].mxu1 %vm954_vm4, %v24032_v25  ;;  %v5638_v59 = vshll.u32 %v24038_v28, 16  ;;  %v5636_v30 = vshrl.u32 %v24038_v28, 16  ;;  %v852_v28 = vld [vmem:[#allocation3 + $0x4d0] sm:$0x3] }
 0x3ac   : > { %2339 = vmatprep.mubr.bf16.mxu1 %v19034_v7  ;;  %v20990_v51 = vsel %vm5113_vm6, %v5623_v22, %v5626_v29  ;;  %v24040_v22 = vld [vmem:[#allocation57_spill] sm:$0xff]  ;;  %v21003_v12 = vsel %vm5113_vm6, %v5630_v14, %v5634_v50 }
 0x3ad   : > { %24037 = vst [vmem:[#allocation56_spill] sm:$0xff] %v20990_v51  ;;  %24041 = vst [vmem:[#allocation92_spill] sm:$0xff] %v21003_v12  ;;  %v24044_v14 = vld [vmem:[#allocation61_spill] sm:$0xff] }
 0x3b0   : > { %16453 = vmatmul.mubr.msk.bf16.gmra.mrb[204].mxu0 %vm954_vm4, %v20976_v34  ;;  %v5040_v34 = vrot.slane %v24039_v18, 6 }
 0x3b1   : > { %9409 = vmatprep.mubr.bf16.mxu0 %v19034_v7 }
 0x3b2   : > { %v5074_v29 = vsel %vm5010_vm5, %v5040_v34, %v847_v43 }
 0x3b3   : > { %16162 = vmatmul.mubr.msk.bf16.gmra.mrb[80].mxu1 %vm954_vm4, %v24036_v16  ;;  %v21012_v18 = vpack.c.bf16 %v5074_v29, %v5074_v29  ;;  %v24047_v29 = vld [vmem:[#allocation95_spill] sm:$0xff] }
 0x3b4   : > { %2349 = vmatprep.mubr.bf16.mxu1 %v19034_v7 }
 0x3b5   : > { %24043 = vst [vmem:[#allocation57_spill] sm:$0xff] %v21012_v18  ;;  %v5650_v43 = vshll.u32 %v21012_v18, 16 }
 0x3b7   : > { %v5652_v34 = vrot.slane %v5650_v43, 1 }
 0x3b8   : > { %16454 = vmatmul.mubr.msk.bf16.gmra.mrb[208].mxu0 %vm954_vm4, %v20990_v51  ;;  %v5640_v51 = vrot.slane %v5638_v59, 1  ;;  %v5646_v59 = vshrl.u32 %v24042_v47, 16  ;;  %v24050_v47 = vld [vmem:[#allocation97_spill] sm:$0xff] }
 0x3b9   : > { %9419 = vmatprep.mubr.bf16.mxu0 %v19034_v7  ;;  %v5660_v61 = vshll.u32 %v24050_v47, 16 }
 0x3ba   : > { %v5641_v15 = vor.u32 %v5640_v51, %v5636_v30  ;;  %v5648_v39 = vor.u32 %v5646_v59, %v5644_v9  ;;  %v24046_v30 = vld [vmem:[#allocation96_spill] sm:$0xff] }
 0x3bb   : > { %16163 = vmatmul.mubr.msk.bf16.gmra.mrb[84].mxu1 %vm954_vm4, %v24040_v22  ;;  %v5656_v51 = vshll.u32 %v24046_v30, 16  ;;  %v5654_v18 = vshrl.u32 %v24046_v30, 16  ;;  %v5662_v43 = vrot.slane %v5660_v61, 1  ;;  %v24057_v30 = vld [vmem:[#allocation71_spill] sm:$0xff] }
 0x3bc   : > { %2359 = vmatprep.mubr.bf16.mxu1 %v19034_v7  ;;  %v21017_v50 = vsel %vm5113_vm6, %v5641_v15, %v5644_v9  ;;  %v24048_v15 = vld [vmem:[#allocation62_spill] sm:$0xff] }
 0x3bd   : > { %24045 = vst [vmem:[#allocation128_spill] sm:$0xff] %v21017_v50 }
 0x3c0   : > { %16455 = vmatmul.mubr.msk.bf16.gmra.mrb[212].mxu0 %vm954_vm4, %v21003_v12  ;;  %v5041_v12 = vrot.slane %v24047_v29, 6 }
 0x3c1   : > { %9429 = vmatprep.mubr.bf16.mxu0 %v19034_v7 }
 0x3c2   : > { %v5075_v9 = vsel %vm5010_vm5, %v5041_v12, %v852_v28 }
 0x3c3   : > { %16164 = vmatmul.mubr.msk.bf16.gmra.mrb[88].mxu1 %vm954_vm4, %v24044_v14  ;;  %v21030_v14 = vsel %vm5113_vm6, %v5648_v39, %v5652_v34  ;;  %v21039_v29 = vpack.c.bf16 %v5075_v9, %v5075_v9  ;;  %v24052_v39 = vld [vmem:[#allocation66_spill] sm:$0xff]  ;;  %v857_v9 = vld [vmem:[#allocation3 + $0x4f8] sm:$0x3] }
 0x3c4   : > { %2369 = vmatprep.mubr.bf16.mxu1 %v19034_v7  ;;  %24049 = vst [vmem:[#allocation95_spill] sm:$0xff] %v21030_v14 }
 0x3c5   : > { %24051 = vst [vmem:[#allocation62_spill] sm:$0xff] %v21039_v29  ;;  %v5668_v12 = vshll.u32 %v21039_v29, 16  ;;  %v5672_v29 = vshrl.u32 %v20675_v44, 16 }
 0x3c7   : > { %v5670_v28 = vrot.slane %v5668_v12, 1 }
 0x3c8   : > { %16456 = vmatmul.mubr.msk.bf16.gmra.mrb[216].mxu0 %vm954_vm4, %v21017_v50  ;;  %v5658_v50 = vrot.slane %v5656_v51, 1  ;;  %v5664_v51 = vshrl.u32 %v24050_v47, 16  ;;  %v5678_v47 = vshll.u32 %v20690_v24, 16 }
 0x3c9   : > { %9439 = vmatprep.mubr.bf16.mxu0 %v19034_v7 }
 0x3ca   : > { %v5659_v59 = vor.u32 %v5658_v50, %v5654_v18  ;;  %v5666_v61 = vor.u32 %v5664_v51, %v5662_v43  ;;  %v5674_v18 = vshll.u32 %v20675_v44, 16  ;;  %v5042_v50 = vrot.slane %v20667_v1, 6 }
 0x3cb   : > { %16165 = vmatmul.mubr.msk.bf16.gmra.mrb[92].mxu1 %vm954_vm4, %v24048_v15  ;;  %v5680_v51 = vrot.slane %v5678_v47, 1  ;;  %v861_v47 = vld [vmem:[#allocation3 + $0x518] sm:$0xff] }
 0x3cc   : > { %2379 = vmatprep.mubr.bf16.mxu1 %v19034_v7  ;;  %v21044_v34 = vsel %vm5113_vm6, %v5659_v59, %v5662_v43  ;;  %v24054_v59 = vld [vmem:[#allocation67_spill] sm:$0xff]  ;;  %v5076_v43 = vsel %vm5010_vm5, %v5042_v50, %v857_v9  ;;  %v5682_v50 = vshrl.u32 %v20690_v24, 16  ;;  %v24061_v24 = vld [vmem:[#allocation72_spill] sm:$0xff] }
 0x3cd   : > { %24053 = vst [vmem:[#allocation66_spill] sm:$0xff] %v21044_v34  ;;  %v21066_v12 = vpack.c.bf16 %v5076_v43, %v5076_v43 }
 0x3cf   : > { %24056 = vst [vmem:[#allocation130_spill] sm:$0xff] %v21066_v12  ;;  %v5686_v9 = vshll.u32 %v21066_v12, 16 }
 0x3d0   : > { %16457 = vmatmul.mubr.msk.bf16.gmra.mrb[220].mxu0 %vm954_vm4, %v21030_v14  ;;  %v21057_v14 = vsel %vm5113_vm6, %v5666_v61, %v5670_v28  ;;  %v858_v61 = vld [vmem:[#allocation3 + $0x500] sm:$0xff]  ;;  %v859_v28 = vld [vmem:[#allocation3 + $0x508] sm:$0xff] }
 0x3d1   : > { %9449 = vmatprep.mubr.bf16.mxu0 %v19034_v7  ;;  %24055 = vst [vmem:[#allocation129_spill] sm:$0xff] %v21057_v14  ;;  %v5688_v43 = vrot.slane %v5686_v9, 1 }
 0x3d3   : > { %16166 = vmatmul.mubr.msk.bf16.gmra.mrb[96].mxu1 %vm954_vm4, %v24052_v39 }
 0x3d4   : > { %2389 = vmatprep.mubr.bf16.mxu1 %v19034_v7 }
 0x3d8   : > { %16458 = vmatmul.mubr.msk.bf16.gmra.mrb[224].mxu0 %vm954_vm4, %v21044_v34  ;;  %v5676_v34 = vrot.slane %v5674_v18, 1 }
 0x3d9   : > { %9459 = vmatprep.mubr.bf16.mxu0 %v19034_v7 }
 0x3da   : > { %v5677_v1 = vor.u32 %v5676_v34, %v5672_v29  ;;  %v860_v29 = vld [vmem:[#allocation3 + $0x510] sm:$0xff]  ;;  %v5684_v34 = vor.u32 %v5682_v50, %v5680_v51 }
 0x3db   : > { %16167 = vmatmul.mubr.msk.bf16.gmra.mrb[100].mxu1 %vm954_vm4, %v24054_v59  ;;  %v21081_v44 = vpack.c.bf16 %v861_v47, %v860_v29  ;;  %v862_v59 = vld [vmem:[#allocation3 + $0x520] sm:$0x3]  ;;  %v863_v47 = vld [vmem:[#allocation3 + $0x528] sm:$0xff] }
 0x3dc   : > { %2399 = vmatprep.mubr.bf16.mxu1 %v19034_v7  ;;  %v21071_v18 = vsel %vm5113_vm6, %v5677_v1, %v5680_v51 }
 0x3dd   : > { %24058 = vst [vmem:[#allocation131_spill] sm:$0xff] %v21071_v18  ;;  %24060 = vst [vmem:[#allocation133_spill] sm:$0xff] %v21081_v44  ;;  %v7344_v51 = vshll.u32 %v21081_v44, 16 }
 0x3df   : > { %v7346_v9 = vrot.slane %v7344_v51, 1 }
 0x3e0   : > { %16459 = vmatmul.mubr.msk.bf16.gmra.mrb[228].mxu0 %vm954_vm4, %v21057_v14  ;;  %v21076_v14 = vpack.c.bf16 %v859_v28, %v858_v61  ;;  %v21087_v28 = vsel %vm5113_vm6, %v5684_v34, %v5688_v43  ;;  %v864_v34 = vld [vmem:[#allocation3 + $0x530] sm:$0xff] }
 0x3e1   : > { %9469 = vmatprep.mubr.bf16.mxu0 %v19034_v7  ;;  %24062 = vst [vmem:[#allocation134_spill] sm:$0xff] %v21087_v28  ;;  %v24064_v43 = vld [vmem:[#allocation76_spill] sm:$0xff] }
 0x3e2   : > { %24059 = vst [vmem:[#allocation132_spill] sm:$0xff] %v21076_v14  ;;  %v7340_v1 = vshll.u32 %v21076_v14, 16 }
 0x3e3   : > { %16168 = vmatmul.mubr.msk.bf16.gmra.mrb[104].mxu1 %vm954_vm4, %v24057_v30  ;;  %v5043_v30 = vrot.slane %v858_v61, 6 }
 0x3e4   : > { %2409 = vmatprep.mubr.bf16.mxu1 %v19034_v7  ;;  %v7342_v12 = vrot.slane %v7340_v1, 1 }
 0x3e5   : > { %v5077_v50 = vsel %vm5010_vm5, %v5043_v30, %v862_v59  ;;  %v7348_v30 = vshrl.u32 %v21081_v44, 16  ;;  %v24068_v44 = vld [vmem:[#allocation77_spill] sm:$0xff] }
 0x3e6   : > { %v21096_v29 = vpack.c.bf16 %v5077_v50, %v5077_v50 }
 0x3e7   : > { %v7350_v51 = vor.u32 %v7348_v30, %v7346_v9 }
 0x3e8   : > { %16460 = vmatmul.mubr.msk.bf16.gmra.mrb[232].mxu0 %vm954_vm4, %v21071_v18  ;;  %v7338_v18 = vshrl.u32 %v21076_v14, 16  ;;  %24063 = vst [vmem:[#allocation135_spill] sm:$0xff] %v21096_v29  ;;  %v7352_v59 = vshll.u32 %v21096_v29, 16 }
 0x3e9   : > { %9479 = vmatprep.mubr.bf16.mxu0 %v19034_v7 }
 0x3ea   : > { %v7343_v61 = vor.u32 %v7342_v12, %v7338_v18  ;;  %v865_v12 = vld [vmem:[#allocation3 + $0x538] sm:$0xff]  ;;  %v866_v18 = vld [vmem:[#allocation3 + $0x540] sm:$0xff]  ;;  %v7354_v50 = vrot.slane %v7352_v59, 1 }
 0x3eb   : > { %16169 = vmatmul.mubr.msk.bf16.gmra.mrb[108].mxu1 %vm954_vm4, %v24061_v24  ;;  %v21111_v14 = vpack.c.bf16 %v866_v18, %v865_v12  ;;  %v867_v24 = vld [vmem:[#allocation3 + $0x548] sm:$0x3]  ;;  %v24071_v18 = vld [vmem:[#allocation81_spill] sm:$0xff] }
 0x3ec   : > { %2419 = vmatprep.mubr.bf16.mxu1 %v19034_v7  ;;  %v21101_v1 = vsel %vm5113_vm6, %v7343_v61, %v7346_v9 }
 0x3ed   : > { %24065 = vst [vmem:[#allocation136_spill] sm:$0xff] %v21101_v1  ;;  %24067 = vst [vmem:[#allocation138_spill] sm:$0xff] %v21111_v14  ;;  %v8824_v9 = vshll.u32 %v21111_v14, 16 }
 0x3ef   : > { %v8826_v59 = vrot.slane %v8824_v9, 1  ;;  %v18838_v9 = vld [vmem:[#allocation3] sm:$0xff] }
 0x3f0   : > { %16461 = vmatmul.mubr.msk.bf16.gmra.mrb[236].mxu0 %vm954_vm4, %v21087_v28  ;;  %v21106_v28 = vpack.c.bf16 %v864_v34, %v863_v47  ;;  %v21117_v34 = vsel %vm5113_vm6, %v7350_v51, %v7354_v50  ;;  %v8828_v50 = vshrl.u32 %v21111_v14, 16 }
 0x3f1   : > { %9489 = vmatprep.mubr.bf16.mxu0 %v19034_v7  ;;  %24069 = vst [vmem:[#allocation77_spill] sm:$0xff] %v21117_v34 }
 0x3f2   : > { %24066 = vst [vmem:[#allocation137_spill] sm:$0xff] %v21106_v28  ;;  %v8820_v61 = vshll.u32 %v21106_v28, 16 }
 0x3f3   : > { %16170 = vmatmul.mubr.msk.bf16.gmra.mrb[112].mxu1 %vm954_vm4, %v24064_v43  ;;  %v5044_v43 = vrot.slane %v863_v47, 6 }
 0x3f4   : > { %2429 = vmatprep.mubr.bf16.mxu1 %v19034_v7  ;;  %v8822_v29 = vrot.slane %v8820_v61, 1 }
 0x3f5   : > { %v5078_v30 = vsel %vm5010_vm5, %v5044_v43, %v867_v24  ;;  %v8830_v43 = vor.u32 %v8828_v50, %v8826_v59  ;;  %v24075_v50 = vld [vmem:[#allocation87_spill] sm:$0xff] }
 0x3f6   : > { %v21126_v12 = vpack.c.bf16 %v5078_v30, %v5078_v30  ;;  %v5011_v30 = vrot.slane %v18838_v9, 6  ;;  %v24077_v9 = vld [vmem:[#allocation88_spill] sm:$0xff] }
 0x3f8   : > { %16462 = vmatmul.mubr.msk.bf16.gmra.mrb[240].mxu0 %vm954_vm4, %v21101_v1  ;;  %v8818_v1 = vshrl.u32 %v21106_v28, 16  ;;  %24070 = vst [vmem:[#allocation139_spill] sm:$0xff] %v21126_v12  ;;  %v8832_v24 = vshll.u32 %v21126_v12, 16  ;;  %v24074_v12 = vld [vmem:[#allocation23_spill] sm:$0xff]  ;;  %v10426_v28 = vrot.slane %v20039_v42, 1 }
 0x3f9   : > { %9499 = vmatprep.mubr.bf16.mxu0 %v19034_v7  ;;  %v10396_v14 = vrot.slane %v24074_v12, 1  ;;  %v10421_v12 = vrot.slane %v20009_v8, 1 }
 0x3fa   : > { %v8823_v47 = vor.u32 %v8822_v29, %v8818_v1  ;;  %v8834_v29 = vrot.slane %v8832_v24, 1  ;;  %v24072_v1 = vld [vmem:[#allocation82_spill] sm:$0xff] }
 0x3fb   : > { %16171 = vmatmul.mubr.msk.bf16.gmra.mrb[116].mxu1 %vm954_vm4, %v24068_v44 }
 0x3fc   : > { %2439 = vmatprep.mubr.bf16.mxu1 %v19034_v7  ;;  %v8827_v51 = vsel %vm5113_vm6, %v8823_v47, %v8826_v59  ;;  %v8835_v61 = vsel %vm5113_vm6, %v8830_v43, %v8834_v29  ;;  %v702_v47 = vld [vmem:[#allocation3 + $0x20] sm:$0x3]  ;;  %v12227_v43 = vand.u32 %v20930_v27, %v19874_v10  ;;  %v10400_v27 = vrot.slane %v19886_v23, 1 }
 0x3fd   : > { %v5045_v59 = vsel %vm5010_vm5, %v5011_v30, %v702_v47  ;;  %v10401_v47 = vrot.slane %v19892_v26, 1  ;;  %v10405_v26 = vrot.slane %v19908_v45, 1 }
 0x3fe   : > { %v21151_v29 = vpack.c.bf16 %v5045_v59, %v5045_v59 }
 0x400   : > { %16463 = vmatmul.mubr.msk.bf16.gmra.mrb[244].mxu0 %vm954_vm4, %v21117_v34  ;;  %v24073_v34 = vld [vmem:[#allocation20_spill] sm:$0xff]  ;;  %24076 = vst [vmem:[#allocation81_spill] sm:$0xff] %v21151_v29 }
 0x401   : > { %9509 = vmatprep.mubr.bf16.mxu0 %v19034_v7 }
 0x403   : > { %16172 = vmatmul.mubr.msk.bf16.gmra.mrb[120].mxu1 %vm954_vm4, %v24071_v18 }
 0x404   : > { %2449 = vmatprep.mubr.bf16.mxu1 %v19034_v7 }
 0x408   : > { %16464 = vmatmul.mubr.msk.bf16.gmra.mrb[248].mxu0 %vm954_vm4, %v8827_v51  ;;  %v10395_v51 = vrot.slane %v24073_v34, 1 }
 0x409   : > { %9519 = vmatprep.mubr.bf16.mxu0 %v19034_v7 }
 0x40a   : > { %v10397_v24 = vsel %vm10394_vm7, %v10395_v51, %v10396_v14  ;;  %v21167_v51 = vsel %vm10394_vm7, %v10400_v27, %v10401_v47 }
 0x40b   : > { %16173 = vmatmul.mubr.msk.bf16.gmra.mrb[124].mxu1 %vm954_vm4, %v24072_v1  ;;  %24078 = vst [vmem:[#allocation82_spill] sm:$0xff] %v21167_v51 }
 0x40c   : > { %2459 = vmatprep.mubr.bf16.mxu1 %v19034_v7 }
 0x410   : > { %16465 = vmatmul.mubr.msk.bf16.gmra.mrb[252].mxu0 %vm954_vm4, %v8835_v61  ;;  %v10398_v61 = vrot.slane %v21151_v29, 1 }
 0x411   : > { %10794 = vmatprep.mubr.bf16.mxu0 %v19034_v7 }
 0x412   : > { %v10399_v30 = vsel %vm10394_vm7, %v10396_v14, %v10398_v61  ;;  %v24079_v14 = vld [vmem:[#allocation21_spill] sm:$0xff] }
 0x413   : > { %16174 = vmatmul.mubr.msk.bf16.gmra.mrb[128].mxu1 %vm954_vm4, %v24075_v50  ;;  %v10403_v59 = vrot.slane %v24079_v14, 1  ;;  %v24082_v61 = vld [vmem:[#allocation25_spill] sm:$0xff]  ;;  %v10411_v14 = vrot.slane %v19949_v13, 1 }
 0x414   : > { %2469 = vmatprep.mubr.bf16.mxu1 %v19034_v7 }
 0x415   : > { %v21177_v23 = vsel %vm10394_vm7, %v10401_v47, %v10403_v59  ;;  %v10410_v47 = vrot.slane %v19944_v6, 1 }
 0x416   : > { %24080 = vst [vmem:[#allocation87_spill] sm:$0xff] %v21177_v23 }
 0x417   : > { %v21209_v59 = vsel %vm10394_vm7, %v10410_v47, %v10411_v14  ;;  %v10416_v47 = vrot.slane %v19979_v40, 1 }
 0x418   : > { %16467 = vmatmul.mubr.msk.bf16.vlgmr.msra.gmra.mrb[0].mxu0 %vm954_vm4, %v10397_v24  ;;  %v10406_v24 = vrot.slane %v19919_v53, 1  ;;  %24084 = vst [vmem:[#allocation25_spill] sm:$0xff] %v21209_v59 }
 0x419   : > { %12233 = vmatpush1.bf16.msra.mxu0 %v12227_v43  ;;  %10804 = vmatprep.mubr.bf16.mxu0 %v19034_v7 }
 0x41a   : > { %v21188_v43 = vsel %vm10394_vm7, %v10405_v26, %v10406_v24  ;;  %v24085_v26 = vld [vmem:[#allocation28_spill] sm:$0xff] }
 0x41b   : > { %16175 = vmatmul.mubr.msk.bf16.gmra.mrb[132].mxu1 %vm954_vm4, %v24077_v9  ;;  %24081 = vst [vmem:[#allocation88_spill] sm:$0xff] %v21188_v43 }
 0x41c   : > { %2479 = vmatprep.mubr.bf16.mxu1 %v19034_v7 }
 0x420   : > { %16468 = vmatmul.mubr.msk.bf16.gmra.mrb[4].mxu0 %vm954_vm4, %v10399_v30  ;;  %v10408_v30 = vrot.slane %v24082_v61, 1 }
 0x421   : > { %10814 = vmatprep.mubr.bf16.mxu0 %v19034_v7 }
 0x422   : > { %v21198_v27 = vsel %vm10394_vm7, %v10406_v24, %v10408_v30  ;;  %v10413_v24 = vrot.slane %v24085_v26, 1  ;;  %v10415_v30 = vrot.slane %v19974_v35, 1 }
 0x423   : > { %16176 = vmatmul.mubr.msk.bf16.gmra.mrb[136].mxu1 %vm954_vm4, %v20417_v5  ;;  %24083 = vst [vmem:[#allocation21_spill] sm:$0xff] %v21198_v27 }
 0x424   : > { %2489 = vmatprep.mubr.bf16.mxu1 %v19034_v7  ;;  %v21219_v61 = vsel %vm10394_vm7, %v10411_v14, %v10413_v24  ;;  %v21230_v26 = vsel %vm10394_vm7, %v10415_v30, %v10416_v47  ;;  %v24088_v14 = vld [vmem:[#allocation31_spill] sm:$0xff]  ;;  %v10420_v30 = vrot.slane %v20004_v63, 1 }
 0x425   : > { %24086 = vst [vmem:[#allocation28_spill] sm:$0xff] %v21219_v61  ;;  %24087 = vst [vmem:[#allocation140_spill] sm:$0xff] %v21230_v26  ;;  %v10418_v24 = vrot.slane %v24088_v14, 1 }
 0x426   : > { %v21251_v14 = vsel %vm10394_vm7, %v10420_v30, %v10421_v12  ;;  %v10425_v30 = vrot.slane %v20034_v36, 1 }
 0x427   : > { %v21240_v29 = vsel %vm10394_vm7, %v10416_v47, %v10418_v24  ;;  %24090 = vst [vmem:[#allocation141_spill] sm:$0xff] %v21251_v14  ;;  %v24091_v47 = vld [vmem:[#allocation34_spill] sm:$0xff] }
 0x428   : > { %16469 = vmatmul.mubr.msk.bf16.gmra.mrb[8].mxu0 %vm954_vm4, %v21167_v51  ;;  %24089 = vst [vmem:[#allocation31_spill] sm:$0xff] %v21240_v29  ;;  %v10423_v24 = vrot.slane %v24091_v47, 1  ;;  %v21272_v47 = vsel %vm10394_vm7, %v10425_v30, %v10426_v28  ;;  %v10430_v30 = vrot.slane %v20064_v11, 1 }
 0x429   : > { %10824 = vmatprep.mubr.bf16.mxu0 %v19034_v7  ;;  %24093 = vst [vmem:[#allocation142_spill] sm:$0xff] %v21272_v47 }
 0x42a   : > { %v21261_v34 = vsel %vm10394_vm7, %v10421_v12, %v10423_v24  ;;  %v24094_v12 = vld [vmem:[#allocation37_spill] sm:$0xff] }
 0x42b   : > { %16177 = vmatmul.mubr.msk.bf16.gmra.mrb[140].mxu1 %vm954_vm4, %v20425_v55  ;;  %24092 = vst [vmem:[#allocation34_spill] sm:$0xff] %v21261_v34  ;;  %v10428_v24 = vrot.slane %v24094_v12, 1 }
 0x42c   : > { %2499 = vmatprep.mubr.bf16.mxu1 %v19034_v7 }
 0x430   : > { %16470 = vmatmul.mubr.msk.bf16.gmra.mrb[12].mxu0 %vm954_vm4, %v21177_v23  ;;  %v24120_v23 = vld [vmem:[#allocation96_spill] sm:$0xff] }
 0x431   : > { %10834 = vmatprep.mubr.bf16.mxu0 %v19034_v7 }
 0x433   : > { %16178 = vmatmul.mubr.msk.bf16.gmra.mrb[144].mxu1 %vm954_vm4, %v20436_v0 }
 0x434   : > { %2509 = vmatprep.mubr.bf16.mxu1 %v19034_v7 }
 0x438   : > { %16471 = vmatmul.mubr.msk.bf16.gmra.mrb[16].mxu0 %vm954_vm4, %v21188_v43 }
 0x439   : > { %10844 = vmatprep.mubr.bf16.mxu0 %v19034_v7 }
 0x43b   : > { %16179 = vmatmul.mubr.msk.bf16.gmra.mrb[148].mxu1 %vm954_vm4, %v20444_v60 }
 0x43c   : > { %2519 = vmatprep.mubr.bf16.mxu1 %v19034_v7 }
 0x440   : > { %16472 = vmatmul.mubr.msk.bf16.gmra.mrb[20].mxu0 %vm954_vm4, %v21198_v27 }
 0x441   : > { %10854 = vmatprep.mubr.bf16.mxu0 %v19034_v7 }
 0x443   : > { %16180 = vmatmul.mubr.msk.bf16.gmra.mrb[152].mxu1 %vm954_vm4, %v20455_v46 }
 0x444   : > { %2529 = vmatprep.mubr.bf16.mxu1 %v19034_v7 }
 0x448   : > { %16473 = vmatmul.mubr.msk.bf16.gmra.mrb[24].mxu0 %vm954_vm4, %v21209_v59  ;;  %v24114_v59 = vld [vmem:[#allocation93_spill] sm:$0xff] }
 0x449   : > { %10864 = vmatprep.mubr.bf16.mxu0 %v19034_v7 }
 0x44b   : > { %16181 = vmatmul.mubr.msk.bf16.gmra.mrb[156].mxu1 %vm954_vm4, %v20463_v31 }
 0x44c   : > { %2539 = vmatprep.mubr.bf16.mxu1 %v19034_v7 }
 0x450   : > { %16474 = vmatmul.mubr.msk.bf16.gmra.mrb[28].mxu0 %vm954_vm4, %v21219_v61 }
 0x451   : > { %10874 = vmatprep.mubr.bf16.mxu0 %v19034_v7 }
 0x453   : > { %16182 = vmatmul.mubr.msk.bf16.gmra.mrb[160].mxu1 %vm954_vm4, %v20474_v32 }
 0x454   : > { %2549 = vmatprep.mubr.bf16.mxu1 %v19034_v7 }
 0x458   : > { %16475 = vmatmul.mubr.msk.bf16.gmra.mrb[32].mxu0 %vm954_vm4, %v21230_v26 }
 0x459   : > { %10884 = vmatprep.mubr.bf16.mxu0 %v19034_v7 }
 0x45b   : > { %16183 = vmatmul.mubr.msk.bf16.gmra.mrb[164].mxu1 %vm954_vm4, %v20482_v4 }
 0x45c   : > { %2559 = vmatprep.mubr.bf16.mxu1 %v19034_v7 }
 0x460   : > { %16476 = vmatmul.mubr.msk.bf16.gmra.mrb[36].mxu0 %vm954_vm4, %v21240_v29 }
 0x461   : > { %10894 = vmatprep.mubr.bf16.mxu0 %v19034_v7 }
 0x463   : > { %16184 = vmatmul.mubr.msk.bf16.gmra.mrb[168].mxu1 %vm954_vm4, %v20493_v19 }
 0x464   : > { %2569 = vmatprep.mubr.bf16.mxu1 %v19034_v7 }
 0x468   : > { %16477 = vmatmul.mubr.msk.bf16.gmra.mrb[40].mxu0 %vm954_vm4, %v21251_v14 }
 0x469   : > { %10904 = vmatprep.mubr.bf16.mxu0 %v19034_v7 }
 0x46b   : > { %16185 = vmatmul.mubr.msk.bf16.gmra.mrb[172].mxu1 %vm954_vm4, %v20501_v52 }
 0x46c   : > { %2579 = vmatprep.mubr.bf16.mxu1 %v19034_v7 }
 0x470   : > { %16478 = vmatmul.mubr.msk.bf16.gmra.mrb[44].mxu0 %vm954_vm4, %v21261_v34  ;;  %v21282_v34 = vsel %vm10394_vm7, %v10426_v28, %v10428_v24  ;;  %v24097_v28 = vld [vmem:[#allocation40_spill] sm:$0xff] }
 0x471   : > { %10914 = vmatprep.mubr.bf16.mxu0 %v19034_v7  ;;  %24095 = vst [vmem:[#allocation37_spill] sm:$0xff] %v21282_v34  ;;  %v10433_v24 = vrot.slane %v24097_v28, 1  ;;  %v21314_v28 = vld.sshfl [vmem:[%s19240_s25 + $0x4] sm:$0x33 pattern:$0x76325410] }
 0x473   : > { %16186 = vmatmul.mubr.msk.bf16.gmra.mrb[176].mxu1 %vm954_vm4, %v20512_v3 }
 0x474   : > { %2589 = vmatprep.mubr.bf16.mxu1 %v19034_v7 }
 0x478   : > { %16479 = vmatmul.mubr.msk.bf16.gmra.mrb[48].mxu0 %vm954_vm4, %v21272_v47  ;;  %v10431_v47 = vrot.slane %v20069_v21, 1 }
 0x479   : > { %10924 = vmatprep.mubr.bf16.mxu0 %v19034_v7 }
 0x47a   : > { %v21293_v12 = vsel %vm10394_vm7, %v10430_v30, %v10431_v47  ;;  %v10435_v30 = vrot.slane %v20094_v58, 1 }
 0x47b   : > { %16187 = vmatmul.mubr.msk.bf16.gmra.mrb[180].mxu1 %vm954_vm4, %v20520_v41  ;;  %24096 = vst [vmem:[#allocation143_spill] sm:$0xff] %v21293_v12 }
 0x47c   : > { %2599 = vmatprep.mubr.bf16.mxu1 %v19034_v7 }
 0x480   : > { %16480 = vmatmul.mubr.msk.bf16.gmra.mrb[52].mxu0 %vm954_vm4, %v21282_v34  ;;  %v21303_v34 = vsel %vm10394_vm7, %v10431_v47, %v10433_v24  ;;  %v5698_v47 = vcombine.high %v21314_v28, %v21314_v28 }
 0x481   : > { %10934 = vmatprep.mubr.bf16.mxu0 %v19034_v7  ;;  %24098 = vst [vmem:[#allocation40_spill] sm:$0xff] %v21303_v34 }
 0x482   : > { %v5895_v24 = vand.u32 %v5698_v47, %v19874_v10  ;;  %v10440_v47 = vrot.slane %v24023_v54, 1 }
 0x483   : > { %16188 = vmatmul.mubr.msk.bf16.gmra.mrb[184].mxu1 %vm954_vm4, %v20531_v2 }
 0x484   : > { %2609 = vmatprep.mubr.bf16.mxu1 %v19034_v7  ;;  %5897 = vmatprep.subr.bf16.mxu1 %v5895_v24 }
 0x488   : > { %16481 = vmatmul.mubr.msk.bf16.gmra.mrb[56].mxu0 %vm954_vm4, %v21293_v12  ;;  %v10436_v12 = vrot.slane %v24020_v37, 1 }
 0x489   : > { %10944 = vmatprep.mubr.bf16.mxu0 %v19034_v7 }
 0x48a   : > { %v21317_v14 = vsel %vm10394_vm7, %v10435_v30, %v10436_v12 }
 0x48b   : > { %16189 = vmatmul.mubr.msk.bf16.gmra.mrb[188].mxu1 %vm954_vm4, %v20545_v20  ;;  %24099 = vst [vmem:[#allocation144_spill] sm:$0xff] %v21317_v14 }
 0x48c   : > { %2619 = vmatprep.mubr.bf16.mxu1 %v19034_v7 }
 0x490   : > { %16482 = vmatmul.mubr.msk.bf16.gmra.mrb[60].mxu0 %vm954_vm4, %v21303_v34  ;;  %v24100_v34 = vld [vmem:[#allocation44_spill] sm:$0xff] }
 0x491   : > { %10954 = vmatprep.mubr.bf16.mxu0 %v19034_v7  ;;  %v10438_v29 = vrot.slane %v24100_v34, 1 }
 0x493   : > { %16190 = vmatmul.mubr.msk.bf16.gmra.mrb[192].mxu1 %vm954_vm4, %v20556_v49  ;;  %v21330_v30 = vsel %vm10394_vm7, %v10436_v12, %v10438_v29  ;;  %v24103_v29 = vld [vmem:[#allocation49_spill] sm:$0xff] }
 0x494   : > { %2629 = vmatprep.mubr.bf16.mxu1 %v19034_v7  ;;  %24101 = vst [vmem:[#allocation44_spill] sm:$0xff] %v21330_v30  ;;  %v10443_v12 = vrot.slane %v24103_v29, 1 }
 0x498   : > { %16483 = vmatmul.mubr.msk.bf16.gmra.mrb[64].mxu0 %vm954_vm4, %v21317_v14  ;;  %v10441_v14 = vrot.slane %v24025_v62, 1 }
 0x499   : > { %10964 = vmatprep.mubr.bf16.mxu0 %v19034_v7 }
 0x49a   : > { %v21341_v34 = vsel %vm10394_vm7, %v10440_v47, %v10441_v14  ;;  %v21351_v24 = vsel %vm10394_vm7, %v10441_v14, %v10443_v12  ;;  %v10445_v47 = vrot.slane %v24028_v56, 1  ;;  %v24106_v14 = vld [vmem:[#allocation54_spill] sm:$0xff] }
 0x49b   : > { %16191 = vmatmul.mubr.msk.bf16.gmra.mrb[196].mxu1 %vm954_vm4, %v20564_v33  ;;  %24102 = vst [vmem:[#allocation145_spill] sm:$0xff] %v21341_v34  ;;  %24104 = vst [vmem:[#allocation49_spill] sm:$0xff] %v21351_v24  ;;  %v10448_v12 = vrot.slane %v24106_v14, 1 }
 0x49c   : > { %2639 = vmatprep.mubr.bf16.mxu1 %v19034_v7 }
 0x4a0   : > { %16484 = vmatmul.mubr.msk.bf16.gmra.mrb[68].mxu0 %vm954_vm4, %v21330_v30  ;;  %v24108_v30 = vld [vmem:[#allocation90_spill] sm:$0xff] }
 0x4a1   : > { %10974 = vmatprep.mubr.bf16.mxu0 %v19034_v7 }
 0x4a3   : > { %16192 = vmatmul.mubr.msk.bf16.gmra.mrb[200].mxu1 %vm954_vm4, %v20575_v57 }
 0x4a4   : > { %2649 = vmatprep.mubr.bf16.mxu1 %v19034_v7 }
 0x4a8   : > { %16485 = vmatmul.mubr.msk.bf16.gmra.mrb[72].mxu0 %vm954_vm4, %v21341_v34  ;;  %v10446_v34 = vrot.slane %v24032_v25, 1 }
 0x4a9   : > { %10984 = vmatprep.mubr.bf16.mxu0 %v19034_v7 }
 0x4aa   : > { %v21362_v29 = vsel %vm10394_vm7, %v10445_v47, %v10446_v34  ;;  %v10450_v47 = vrot.slane %v24036_v16, 1 }
 0x4ab   : > { %16193 = vmatmul.mubr.msk.bf16.gmra.mrb[204].mxu1 %vm954_vm4, %v20583_v38  ;;  %24105 = vst [vmem:[#allocation146_spill] sm:$0xff] %v21362_v29 }
 0x4ac   : > { %2659 = vmatprep.mubr.bf16.mxu1 %v19034_v7 }
 0x4b0   : > { %16486 = vmatmul.mubr.msk.bf16.gmra.mrb[76].mxu0 %vm954_vm4, %v21351_v24  ;;  %v21372_v24 = vsel %vm10394_vm7, %v10446_v34, %v10448_v12  ;;  %v24110_v34 = vld [vmem:[#allocation59_spill] sm:$0xff] }
 0x4b1   : > { %10994 = vmatprep.mubr.bf16.mxu0 %v19034_v7  ;;  %24107 = vst [vmem:[#allocation54_spill] sm:$0xff] %v21372_v24  ;;  %v10453_v12 = vrot.slane %v24110_v34, 1 }
 0x4b3   : > { %16194 = vmatmul.mubr.msk.bf16.gmra.mrb[208].mxu1 %vm954_vm4, %v20594_v17 }
 0x4b4   : > { %2669 = vmatprep.mubr.bf16.mxu1 %v19034_v7 }
 0x4b8   : > { %16487 = vmatmul.mubr.msk.bf16.gmra.mrb[80].mxu0 %vm954_vm4, %v21362_v29  ;;  %v10451_v29 = vrot.slane %v24040_v22, 1 }
 0x4b9   : > { %11004 = vmatprep.mubr.bf16.mxu0 %v19034_v7 }
 0x4ba   : > { %v21383_v14 = vsel %vm10394_vm7, %v10450_v47, %v10451_v29  ;;  %v21393_v26 = vsel %vm10394_vm7, %v10451_v29, %v10453_v12  ;;  %v24113_v47 = vld [vmem:[#allocation61_spill] sm:$0xff]  ;;  %v24116_v29 = vld [vmem:[#allocation64_spill] sm:$0xff] }
 0x4bb   : > { %16195 = vmatmul.mubr.msk.bf16.gmra.mrb[212].mxu1 %vm954_vm4, %v20602_v48  ;;  %24109 = vst [vmem:[#allocation90_spill] sm:$0xff] %v21383_v14  ;;  %24112 = vst [vmem:[#allocation59_spill] sm:$0xff] %v21393_v26  ;;  %v10455_v61 = vrot.slane %v24113_v47, 1  ;;  %v10458_v12 = vrot.slane %v24116_v29, 1 }
 0x4bc   : > { %2679 = vmatprep.mubr.bf16.mxu1 %v19034_v7 }
 0x4c0   : > { %16488 = vmatmul.mubr.msk.bf16.gmra.mrb[84].mxu0 %vm954_vm4, %v21372_v24  ;;  %v24111_v24 = vld [vmem:[#allocation91_spill] sm:$0xff] }
 0x4c1   : > { %11014 = vmatprep.mubr.bf16.mxu0 %v19034_v7 }
 0x4c3   : > { %16196 = vmatmul.mubr.msk.bf16.gmra.mrb[216].mxu1 %vm954_vm4, %v24108_v30 }
 0x4c4   : > { %2689 = vmatprep.mubr.bf16.mxu1 %v19034_v7 }
 0x4c8   : > { %16489 = vmatmul.mubr.msk.bf16.gmra.mrb[88].mxu0 %vm954_vm4, %v21383_v14  ;;  %v10456_v14 = vrot.slane %v24048_v15, 1 }
 0x4c9   : > { %11024 = vmatprep.mubr.bf16.mxu0 %v19034_v7 }
 0x4ca   : > { %v21404_v34 = vsel %vm10394_vm7, %v10455_v61, %v10456_v14  ;;  %v21414_v27 = vsel %vm10394_vm7, %v10456_v14, %v10458_v12  ;;  %v10460_v61 = vrot.slane %v24052_v39, 1  ;;  %v24122_v14 = vld [vmem:[#allocation69_spill] sm:$0xff] }
 0x4cb   : > { %16197 = vmatmul.mubr.msk.bf16.gmra.mrb[220].mxu1 %vm954_vm4, %v24111_v24  ;;  %24115 = vst [vmem:[#allocation91_spill] sm:$0xff] %v21404_v34  ;;  %24118 = vst [vmem:[#allocation61_spill] sm:$0xff] %v21414_v27  ;;  %v10463_v12 = vrot.slane %v24122_v14, 1 }
 0x4cc   : > { %2699 = vmatprep.mubr.bf16.mxu1 %v19034_v7 }
 0x4d0   : > { %16490 = vmatmul.mubr.msk.bf16.gmra.mrb[92].mxu0 %vm954_vm4, %v21393_v26  ;;  %v24117_v26 = vld [vmem:[#allocation94_spill] sm:$0xff] }
 0x4d1   : > { %11034 = vmatprep.mubr.bf16.mxu0 %v19034_v7 }
 0x4d3   : > { %16198 = vmatmul.mubr.msk.bf16.gmra.mrb[224].mxu1 %vm954_vm4, %v24114_v59  ;;  %v24127_v59 = vld [vmem:[#allocation98_spill] sm:$0xff] }
 0x4d4   : > { %2709 = vmatprep.mubr.bf16.mxu1 %v19034_v7 }
 0x4d8   : > { %16491 = vmatmul.mubr.msk.bf16.gmra.mrb[96].mxu0 %vm954_vm4, %v21404_v34  ;;  %v24119_v34 = vld [vmem:[#allocation67_spill] sm:$0xff] }
 0x4d9   : > { %11044 = vmatprep.mubr.bf16.mxu0 %v19034_v7  ;;  %v10461_v43 = vrot.slane %v24119_v34, 1 }
 0x4db   : > { %16199 = vmatmul.mubr.msk.bf16.gmra.mrb[228].mxu1 %vm954_vm4, %v24117_v26  ;;  %v21425_v29 = vsel %vm10394_vm7, %v10460_v61, %v10461_v43  ;;  %v21435_v51 = vsel %vm10394_vm7, %v10461_v43, %v10463_v12  ;;  %v24125_v61 = vld [vmem:[#allocation71_spill] sm:$0xff]  ;;  %v24129_v43 = vld [vmem:[#allocation74_spill] sm:$0xff] }
 0x4dc   : > { %2719 = vmatprep.mubr.bf16.mxu1 %v19034_v7  ;;  %24121 = vst [vmem:[#allocation64_spill] sm:$0xff] %v21425_v29  ;;  %24124 = vst [vmem:[#allocation67_spill] sm:$0xff] %v21435_v51  ;;  %v10468_v12 = vrot.slane %v24129_v43, 1 }
 0x4e0   : > { %16492 = vmatmul.mubr.msk.bf16.gmra.mrb[100].mxu0 %vm954_vm4, %v21414_v27  ;;  %v24123_v27 = vld [vmem:[#allocation97_spill] sm:$0xff] }
 0x4e1   : > { %11054 = vmatprep.mubr.bf16.mxu0 %v19034_v7 }
 0x4e3   : > { %16200 = vmatmul.mubr.msk.bf16.gmra.mrb[232].mxu1 %vm954_vm4, %v24120_v23  ;;  %v10465_v23 = vrot.slane %v24125_v61, 1 }
 0x4e4   : > { %2729 = vmatprep.mubr.bf16.mxu1 %v19034_v7 }
 0x4e8   : > { %16493 = vmatmul.mubr.msk.bf16.gmra.mrb[104].mxu0 %vm954_vm4, %v21425_v29  ;;  %v24126_v29 = vld [vmem:[#allocation72_spill] sm:$0xff] }
 0x4e9   : > { %11064 = vmatprep.mubr.bf16.mxu0 %v19034_v7  ;;  %v10466_v26 = vrot.slane %v24126_v29, 1  ;;  %v24133_v29 = vld [vmem:[#allocation132_spill] sm:$0xff] }
 0x4eb   : > { %16201 = vmatmul.mubr.msk.bf16.gmra.mrb[236].mxu1 %vm954_vm4, %v24123_v27  ;;  %v21446_v14 = vsel %vm10394_vm7, %v10465_v23, %v10466_v26  ;;  %v21456_v27 = vsel %vm10394_vm7, %v10466_v26, %v10468_v12  ;;  %v24132_v23 = vld [vmem:[#allocation76_spill] sm:$0xff]  ;;  %v24135_v26 = vld [vmem:[#allocation79_spill] sm:$0xff] }
 0x4ec   : > { %2739 = vmatprep.mubr.bf16.mxu1 %v19034_v7  ;;  %24128 = vst [vmem:[#allocation69_spill] sm:$0xff] %v21446_v14  ;;  %24131 = vst [vmem:[#allocation71_spill] sm:$0xff] %v21456_v27  ;;  %v10473_v12 = vrot.slane %v24135_v26, 1  ;;  %v10476_v26 = vrot.slane %v24072_v1, 1 }
 0x4f0   : > { %16494 = vmatmul.mubr.msk.bf16.gmra.mrb[108].mxu0 %vm954_vm4, %v21435_v51  ;;  %v24130_v51 = vld [vmem:[#allocation101_spill] sm:$0xff] }
 0x4f1   : > { %11074 = vmatprep.mubr.bf16.mxu0 %v19034_v7 }
 0x4f3   : > { %16202 = vmatmul.mubr.msk.bf16.gmra.mrb[240].mxu1 %vm954_vm4, %v24127_v59  ;;  %v10470_v59 = vrot.slane %v24132_v23, 1 }
 0x4f4   : > { %2749 = vmatprep.mubr.bf16.mxu1 %v19034_v7 }
 0x4f8   : > { %16495 = vmatmul.mubr.msk.bf16.gmra.mrb[112].mxu0 %vm954_vm4, %v21446_v14  ;;  %v10471_v14 = vrot.slane %v24068_v44, 1 }
 0x4f9   : > { %11084 = vmatprep.mubr.bf16.mxu0 %v19034_v7 }
 0x4fa   : > { %v21467_v43 = vsel %vm10394_vm7, %v10470_v59, %v10471_v14  ;;  %v5892_v59 = vand.u32 %v21314_v28, %v19874_v10  ;;  %v24140_v28 = vld [vmem:[#allocation84_spill] sm:$0xff] }
 0x4fb   : > { %16203 = vmatmul.mubr.msk.bf16.gmra.mrb[244].mxu1 %vm954_vm4, %v24130_v51  ;;  %24134 = vst [vmem:[#allocation74_spill] sm:$0xff] %v21467_v43  ;;  %v21477_v51 = vsel %vm10394_vm7, %v10471_v14, %v10473_v12  ;;  %v24139_v12 = vld [vmem:[#allocation18_spill] sm:$0xff] }
 0x4fc   : > { %2759 = vmatprep.mubr.bf16.mxu1 %v19034_v7  ;;  %24137 = vst [vmem:[#allocation76_spill] sm:$0xff] %v21477_v51 }
 0x500   : > { %16496 = vmatmul.mubr.msk.bf16.gmra.mrb[116].mxu0 %vm954_vm4, %v21456_v27  ;;  %v24136_v27 = vld [vmem:[#allocation133_spill] sm:$0xff] }
 0x501   : > { %11094 = vmatprep.mubr.bf16.mxu0 %v19034_v7 }
 0x503   : > { %16204 = vmatmul.mubr.msk.bf16.gmra.mrb[248].mxu1 %vm954_vm4, %v24133_v29 }
 0x504   : > { %2769 = vmatprep.mubr.bf16.mxu1 %v19034_v7 }
 0x508   : > { %16497 = vmatmul.mubr.msk.bf16.gmra.mrb[120].mxu0 %vm954_vm4, %v21467_v43  ;;  %v10475_v43 = vrot.slane %v24071_v18, 1 }
 0x509   : > { %11104 = vmatprep.mubr.bf16.mxu0 %v19034_v7 }
 0x50a   : > { %v21490_v14 = vsel %vm10394_vm7, %v10475_v43, %v10476_v26  ;;  %v10480_v43 = vrot.slane %v24075_v50, 1 }
 0x50b   : > { %16205 = vmatmul.mubr.msk.bf16.gmra.mrb[252].mxu1 %vm954_vm4, %v24136_v27  ;;  %24138 = vst [vmem:[#allocation132_spill] sm:$0xff] %v21490_v14 }
 0x50c   : > { %3601 = vmatprep.mubr.bf16.mxu1 %v19034_v7 }
 0x510   : > { %16498 = vmatmul.mubr.msk.bf16.gmra.mrb[124].mxu0 %vm954_vm4, %v21477_v51  ;;  %v10478_v51 = vrot.slane %v24140_v28, 1  ;;  %v10486_v28 = vrot.slane %v20425_v55, 1 }
 0x511   : > { %11114 = vmatprep.mubr.bf16.mxu0 %v19034_v7 }
 0x513   : > { %16207 = vmatmul.mubr.msk.bf16.vlgmr.msra.gmra.mrb[0].mxu1 %vm954_vm4, %v19908_v45  ;;  %v21501_v45 = vsel %vm10394_vm7, %v10476_v26, %v10478_v51 }
 0x514   : > { %5898 = vmatpush1.bf16.msra.mxu1 %v5892_v59  ;;  %3611 = vmatprep.mubr.bf16.mxu1 %v19034_v7  ;;  %v10481_v59 = vrot.slane %v24077_v9, 1 }
 0x515   : > { %16670 = vmatprep.subr.bf16.mxu1 %v24139_v12 }
 0x516   : > { %v21512_v12 = vsel %vm10394_vm7, %v10480_v43, %v10481_v59 }
 0x518   : > { %16499 = vmatmul.mubr.msk.bf16.gmra.mrb[128].mxu0 %vm954_vm4, %v21490_v14 }
 0x519   : > { %11124 = vmatprep.mubr.bf16.mxu0 %v19034_v7 }
 0x51b   : > { %16208 = vmatmul.mubr.msk.bf16.gmra.mrb[4].mxu1 %vm954_vm4, %v19919_v53  ;;  %v24141_v53 = vld [vmem:[#allocation99_spill] sm:$0xff] }
 0x51c   : > { %3621 = vmatprep.mubr.bf16.mxu1 %v19034_v7  ;;  %v10483_v51 = vrot.slane %v24141_v53, 1 }
 0x51e   : > { %v21522_v26 = vsel %vm10394_vm7, %v10481_v59, %v10483_v51  ;;  %v10491_v51 = vrot.slane %v20444_v60, 1 }
 0x520   : > { %16500 = vmatmul.mubr.msk.bf16.gmra.mrb[132].mxu0 %vm954_vm4, %v21501_v45 }
 0x521   : > { %11134 = vmatprep.mubr.bf16.mxu0 %v19034_v7 }
 0x523   : > { %16209 = vmatmul.mubr.msk.bf16.gmra.mrb[8].mxu1 %vm954_vm4, %v19944_v6  ;;  %v10485_v6 = vrot.slane %v20417_v5, 1 }
 0x524   : > { %3631 = vmatprep.mubr.bf16.mxu1 %v19034_v7 }
 0x525   : > { %v21533_v43 = vsel %vm10394_vm7, %v10485_v6, %v10486_v28 }
 0x528   : > { %16501 = vmatmul.mubr.msk.bf16.gmra.mrb[136].mxu0 %vm954_vm4, %v21512_v12 }
 0x529   : > { %11144 = vmatprep.mubr.bf16.mxu0 %v19034_v7 }
 0x52b   : > { %16210 = vmatmul.mubr.msk.bf16.gmra.mrb[12].mxu1 %vm954_vm4, %v19949_v13  ;;  %v24142_v13 = vld [vmem:[#allocation103_spill] sm:$0xff] }
 0x52c   : > { %3641 = vmatprep.mubr.bf16.mxu1 %v19034_v7  ;;  %v10488_v59 = vrot.slane %v24142_v13, 1 }
 0x52e   : > { %v21543_v53 = vsel %vm10394_vm7, %v10486_v28, %v10488_v59  ;;  %v10496_v59 = vrot.slane %v20463_v31, 1 }
 0x530   : > { %16502 = vmatmul.mubr.msk.bf16.gmra.mrb[140].mxu0 %vm954_vm4, %v21522_v26 }
 0x531   : > { %11154 = vmatprep.mubr.bf16.mxu0 %v19034_v7 }
 0x533   : > { %16211 = vmatmul.mubr.msk.bf16.gmra.mrb[16].mxu1 %vm954_vm4, %v19974_v35  ;;  %v10490_v35 = vrot.slane %v20436_v0, 1 }
 0x534   : > { %3651 = vmatprep.mubr.bf16.mxu1 %v19034_v7 }
 0x535   : > { %v21554_v6 = vsel %vm10394_vm7, %v10490_v35, %v10491_v51 }
 0x536   : > { %24143 = vst [vmem:[#allocation79_spill] sm:$0xff] %v21554_v6 }
 0x538   : > { %16503 = vmatmul.mubr.msk.bf16.gmra.mrb[144].mxu0 %vm954_vm4, %v21533_v43 }
 0x539   : > { %11164 = vmatprep.mubr.bf16.mxu0 %v19034_v7 }
 0x53b   : > { %16212 = vmatmul.mubr.msk.bf16.gmra.mrb[20].mxu1 %vm954_vm4, %v19979_v40  ;;  %v24144_v40 = vld [vmem:[#allocation106_spill] sm:$0xff] }
 0x53c   : > { %3661 = vmatprep.mubr.bf16.mxu1 %v19034_v7  ;;  %v10493_v28 = vrot.slane %v24144_v40, 1 }
 0x53e   : > { %v21564_v13 = vsel %vm10394_vm7, %v10491_v51, %v10493_v28  ;;  %v10501_v28 = vrot.slane %v20482_v4, 1 }
 0x53f   : > { %24145 = vst [vmem:[#allocation133_spill] sm:$0xff] %v21564_v13 }
 0x540   : > { %16504 = vmatmul.mubr.msk.bf16.gmra.mrb[148].mxu0 %vm954_vm4, %v21543_v53 }
 0x541   : > { %11174 = vmatprep.mubr.bf16.mxu0 %v19034_v7 }
 0x543   : > { %16213 = vmatmul.mubr.msk.bf16.gmra.mrb[24].mxu1 %vm954_vm4, %v20004_v63  ;;  %v10495_v63 = vrot.slane %v20455_v46, 1 }
 0x544   : > { %3671 = vmatprep.mubr.bf16.mxu1 %v19034_v7 }
 0x545   : > { %v21575_v35 = vsel %vm10394_vm7, %v10495_v63, %v10496_v59 }
 0x546   : > { %24146 = vst [vmem:[#allocation18_spill] sm:$0xff] %v21575_v35 }
 0x548   : > { %16505 = vmatmul.mubr.msk.bf16.gmra.mrb[152].mxu0 %vm954_vm4, %v21554_v6 }
 0x549   : > { %11184 = vmatprep.mubr.bf16.mxu0 %v19034_v7 }
 0x54b   : > { %16214 = vmatmul.mubr.msk.bf16.gmra.mrb[28].mxu1 %vm954_vm4, %v20009_v8  ;;  %v24147_v8 = vld [vmem:[#allocation109_spill] sm:$0xff] }
 0x54c   : > { %3681 = vmatprep.mubr.bf16.mxu1 %v19034_v7  ;;  %v10498_v51 = vrot.slane %v24147_v8, 1 }
 0x54e   : > { %v21585_v40 = vsel %vm10394_vm7, %v10496_v59, %v10498_v51  ;;  %v10506_v51 = vrot.slane %v20501_v52, 1 }
 0x54f   : > { %24148 = vst [vmem:[#allocation84_spill] sm:$0xff] %v21585_v40 }
 0x550   : > { %16506 = vmatmul.mubr.msk.bf16.gmra.mrb[156].mxu0 %vm954_vm4, %v21564_v13 }
 0x551   : > { %11194 = vmatprep.mubr.bf16.mxu0 %v19034_v7 }
 0x553   : > { %16215 = vmatmul.mubr.msk.bf16.gmra.mrb[32].mxu1 %vm954_vm4, %v20034_v36  ;;  %v10500_v36 = vrot.slane %v20474_v32, 1 }
 0x554   : > { %3691 = vmatprep.mubr.bf16.mxu1 %v19034_v7 }
 0x555   : > { %v21596_v63 = vsel %vm10394_vm7, %v10500_v36, %v10501_v28 }
 0x556   : > { %24149 = vst [vmem:[#allocation99_spill] sm:$0xff] %v21596_v63 }
 0x558   : > { %16507 = vmatmul.mubr.msk.bf16.gmra.mrb[160].mxu0 %vm954_vm4, %v21575_v35 }
 0x559   : > { %11204 = vmatprep.mubr.bf16.mxu0 %v19034_v7 }
 0x55b   : > { %16216 = vmatmul.mubr.msk.bf16.gmra.mrb[36].mxu1 %vm954_vm4, %v20039_v42  ;;  %v24150_v42 = vld [vmem:[#allocation112_spill] sm:$0xff] }
 0x55c   : > { %3701 = vmatprep.mubr.bf16.mxu1 %v19034_v7  ;;  %v10503_v59 = vrot.slane %v24150_v42, 1 }
 0x55e   : > { %v21606_v8 = vsel %vm10394_vm7, %v10501_v28, %v10503_v59  ;;  %v10511_v59 = vrot.slane %v20520_v41, 1 }
 0x55f   : > { %24151 = vst [vmem:[#allocation103_spill] sm:$0xff] %v21606_v8 }
 0x560   : > { %16508 = vmatmul.mubr.msk.bf16.gmra.mrb[164].mxu0 %vm954_vm4, %v21585_v40 }
 0x561   : > { %11214 = vmatprep.mubr.bf16.mxu0 %v19034_v7 }
 0x563   : > { %16217 = vmatmul.mubr.msk.bf16.gmra.mrb[40].mxu1 %vm954_vm4, %v20064_v11  ;;  %v10505_v11 = vrot.slane %v20493_v19, 1 }
 0x564   : > { %3711 = vmatprep.mubr.bf16.mxu1 %v19034_v7 }
 0x565   : > { %v21617_v36 = vsel %vm10394_vm7, %v10505_v11, %v10506_v51  ;;  %v24156_v11 = vld [vmem:[#allocation118_spill] sm:$0xff] }
 0x566   : > { %24152 = vst [vmem:[#allocation106_spill] sm:$0xff] %v21617_v36 }
 0x568   : > { %16509 = vmatmul.mubr.msk.bf16.gmra.mrb[168].mxu0 %vm954_vm4, %v21596_v63 }
 0x569   : > { %11224 = vmatprep.mubr.bf16.mxu0 %v19034_v7 }
 0x56b   : > { %16218 = vmatmul.mubr.msk.bf16.gmra.mrb[44].mxu1 %vm954_vm4, %v20069_v21  ;;  %v24153_v21 = vld [vmem:[#allocation115_spill] sm:$0xff] }
 0x56c   : > { %3721 = vmatprep.mubr.bf16.mxu1 %v19034_v7  ;;  %v10508_v28 = vrot.slane %v24153_v21, 1 }
 0x56e   : > { %v21627_v42 = vsel %vm10394_vm7, %v10506_v51, %v10508_v28  ;;  %v10513_v51 = vrot.slane %v24156_v11, 1  ;;  %v10516_v28 = vrot.slane %v20545_v20, 1 }
 0x56f   : > { %24154 = vst [vmem:[#allocation109_spill] sm:$0xff] %v21627_v42 }
 0x570   : > { %16510 = vmatmul.mubr.msk.bf16.gmra.mrb[172].mxu0 %vm954_vm4, %v21606_v8  ;;  %v21648_v21 = vsel %vm10394_vm7, %v10511_v59, %v10513_v51  ;;  %v24159_v51 = vld [vmem:[#allocation121_spill] sm:$0xff] }
 0x571   : > { %11234 = vmatprep.mubr.bf16.mxu0 %v19034_v7  ;;  %24157 = vst [vmem:[#allocation115_spill] sm:$0xff] %v21648_v21 }
 0x573   : > { %16219 = vmatmul.mubr.msk.bf16.gmra.mrb[48].mxu1 %vm954_vm4, %v20094_v58  ;;  %v10510_v58 = vrot.slane %v20512_v3, 1 }
 0x574   : > { %3731 = vmatprep.mubr.bf16.mxu1 %v19034_v7 }
 0x578   : > { %16511 = vmatmul.mubr.msk.bf16.gmra.mrb[176].mxu0 %vm954_vm4, %v21617_v36 }
 0x579   : > { %11244 = vmatprep.mubr.bf16.mxu0 %v19034_v7 }
 0x57b   : > { %16220 = vmatmul.mubr.msk.bf16.gmra.mrb[52].mxu1 %vm954_vm4, %v24020_v37  ;;  %v21638_v37 = vsel %vm10394_vm7, %v10510_v58, %v10511_v59  ;;  %v21659_v58 = vld.sshfl [vmem:[%s19240_s25 + $0x20] sm:$0x33 pattern:$0x76325410]  ;;  %s23515_s25 = scalar_lea.hbm %s23591_s3, %s16664_s18 }
 0x57c   : > { %3741 = vmatprep.mubr.bf16.mxu1 %v19034_v7  ;;  %24155 = vst [vmem:[#allocation112_spill] sm:$0xff] %v21638_v37  ;;  %v13689_v59 = vcombine.high %v21659_v58, %v21659_v58 }
 0x57e   : > { %v13700_v11 = vand.u32 %v13689_v59, %v19874_v10  ;;  %v10521_v59 = vrot.slane %v20564_v33, 1 }
 0x580   : > { %16512 = vmatmul.mubr.msk.bf16.gmra.mrb[180].mxu0 %vm954_vm4, %v21627_v42  ;;  %13702 = vmatprep.subr.bf16.mxu0 %v13700_v11 }
 0x581   : > { %11254 = vmatprep.mubr.bf16.mxu0 %v19034_v7 }
 0x583   : > { %16221 = vmatmul.mubr.msk.bf16.gmra.mrb[56].mxu1 %vm954_vm4, %v24023_v54  ;;  %v10515_v54 = vrot.slane %v20531_v2, 1 }
 0x584   : > { %3751 = vmatprep.mubr.bf16.mxu1 %v19034_v7 }
 0x588   : > { %16513 = vmatmul.mubr.msk.bf16.gmra.mrb[184].mxu0 %vm954_vm4, %v21638_v37 }
 0x589   : > { %11264 = vmatprep.mubr.bf16.mxu0 %v19034_v7 }
 0x58b   : > { %16222 = vmatmul.mubr.msk.bf16.gmra.mrb[60].mxu1 %vm954_vm4, %v24025_v62  ;;  %v21662_v62 = vsel %vm10394_vm7, %v10515_v54, %v10516_v28  ;;  %v10520_v54 = vrot.slane %v20556_v49, 1 }
 0x58c   : > { %3761 = vmatprep.mubr.bf16.mxu1 %v19034_v7  ;;  %24158 = vst [vmem:[#allocation118_spill] sm:$0xff] %v21662_v62 }
 0x58d   : > { %v21686_v11 = vsel %vm10394_vm7, %v10520_v54, %v10521_v59 }
 0x58e   : > { %24161 = vst [vmem:[#allocation147_spill] sm:$0xff] %v21686_v11 }
 0x590   : > { %16514 = vmatmul.mubr.msk.bf16.gmra.mrb[188].mxu0 %vm954_vm4, %v21648_v21  ;;  %v10518_v21 = vrot.slane %v24159_v51, 1  ;;  %v10526_v51 = vrot.slane %v20583_v38, 1 }
 0x591   : > { %11274 = vmatprep.mubr.bf16.mxu0 %v19034_v7 }
 0x593   : > { %16223 = vmatmul.mubr.msk.bf16.gmra.mrb[64].mxu1 %vm954_vm4, %v24028_v56  ;;  %v21675_v56 = vsel %vm10394_vm7, %v10516_v28, %v10518_v21 }
 0x594   : > { %3771 = vmatprep.mubr.bf16.mxu1 %v19034_v7  ;;  %24160 = vst [vmem:[#allocation121_spill] sm:$0xff] %v21675_v56 }
 0x598   : > { %16515 = vmatmul.mubr.msk.bf16.gmra.mrb[192].mxu0 %vm954_vm4, %v21662_v62 }
 0x599   : > { %11284 = vmatprep.mubr.bf16.mxu0 %v19034_v7 }
 0x59b   : > { %16224 = vmatmul.mubr.msk.bf16.gmra.mrb[68].mxu1 %vm954_vm4, %v24032_v25  ;;  %v24162_v25 = vld [vmem:[#allocation124_spill] sm:$0xff] }
 0x59c   : > { %3781 = vmatprep.mubr.bf16.mxu1 %v19034_v7  ;;  %v10523_v21 = vrot.slane %v24162_v25, 1 }
 0x59e   : > { %v21696_v28 = vsel %vm10394_vm7, %v10521_v59, %v10523_v21  ;;  %v10531_v21 = vrot.slane %v20602_v48, 1 }
 0x59f   : > { %24163 = vst [vmem:[#allocation124_spill] sm:$0xff] %v21696_v28 }
 0x5a0   : > { %16516 = vmatmul.mubr.msk.bf16.gmra.mrb[196].mxu0 %vm954_vm4, %v21675_v56 }
 0x5a1   : > { %11294 = vmatprep.mubr.bf16.mxu0 %v19034_v7 }
 0x5a3   : > { %16225 = vmatmul.mubr.msk.bf16.gmra.mrb[72].mxu1 %vm954_vm4, %v24036_v16  ;;  %v10525_v16 = vrot.slane %v20575_v57, 1 }
 0x5a4   : > { %3791 = vmatprep.mubr.bf16.mxu1 %v19034_v7 }
 0x5a5   : > { %v21707_v54 = vsel %vm10394_vm7, %v10525_v16, %v10526_v51 }
 0x5a6   : > { %24164 = vst [vmem:[#allocation148_spill] sm:$0xff] %v21707_v54 }
 0x5a8   : > { %16517 = vmatmul.mubr.msk.bf16.gmra.mrb[200].mxu0 %vm954_vm4, %v21686_v11 }
 0x5a9   : > { %11304 = vmatprep.mubr.bf16.mxu0 %v19034_v7 }
 0x5ab   : > { %16226 = vmatmul.mubr.msk.bf16.gmra.mrb[76].mxu1 %vm954_vm4, %v24040_v22  ;;  %v24165_v22 = vld [vmem:[#allocation126_spill] sm:$0xff] }
 0x5ac   : > { %3801 = vmatprep.mubr.bf16.mxu1 %v19034_v7  ;;  %v10528_v59 = vrot.slane %v24165_v22, 1 }
 0x5ae   : > { %v21717_v25 = vsel %vm10394_vm7, %v10526_v51, %v10528_v59  ;;  %v10536_v59 = vrot.slane %v24111_v24, 1 }
 0x5af   : > { %24166 = vst [vmem:[#allocation126_spill] sm:$0xff] %v21717_v25 }
 0x5b0   : > { %16518 = vmatmul.mubr.msk.bf16.gmra.mrb[204].mxu0 %vm954_vm4, %v21696_v28 }
 0x5b1   : > { %11314 = vmatprep.mubr.bf16.mxu0 %v19034_v7 }
 0x5b3   : > { %16227 = vmatmul.mubr.msk.bf16.gmra.mrb[80].mxu1 %vm954_vm4, %v24113_v47  ;;  %v10530_v47 = vrot.slane %v20594_v17, 1 }
 0x5b4   : > { %3811 = vmatprep.mubr.bf16.mxu1 %v19034_v7 }
 0x5b5   : > { %v21728_v16 = vsel %vm10394_vm7, %v10530_v47, %v10531_v21 }
 0x5b6   : > { %24167 = vst [vmem:[#allocation149_spill] sm:$0xff] %v21728_v16 }
 0x5b8   : > { %16519 = vmatmul.mubr.msk.bf16.gmra.mrb[208].mxu0 %vm954_vm4, %v21707_v54 }
 0x5b9   : > { %11324 = vmatprep.mubr.bf16.mxu0 %v19034_v7 }
 0x5bb   : > { %16228 = vmatmul.mubr.msk.bf16.gmra.mrb[84].mxu1 %vm954_vm4, %v24048_v15  ;;  %v24168_v15 = vld [vmem:[#allocation127_spill] sm:$0xff] }
 0x5bc   : > { %3821 = vmatprep.mubr.bf16.mxu1 %v19034_v7  ;;  %v10533_v51 = vrot.slane %v24168_v15, 1  ;;  %v24172_v15 = vld [vmem:[#allocation72_spill] sm:$0xff] }
 0x5be   : > { %v21738_v22 = vsel %vm10394_vm7, %v10531_v21, %v10533_v51 }
 0x5bf   : > { %24169 = vst [vmem:[#allocation127_spill] sm:$0xff] %v21738_v22 }
 0x5c0   : > { %16520 = vmatmul.mubr.msk.bf16.gmra.mrb[212].mxu0 %vm954_vm4, %v21717_v25 }
 0x5c1   : > { %11334 = vmatprep.mubr.bf16.mxu0 %v19034_v7 }
 0x5c3   : > { %16229 = vmatmul.mubr.msk.bf16.gmra.mrb[88].mxu1 %vm954_vm4, %v24052_v39  ;;  %v10535_v39 = vrot.slane %v24108_v30, 1 }
 0x5c4   : > { %3831 = vmatprep.mubr.bf16.mxu1 %v19034_v7 }
 0x5c5   : > { %v21749_v47 = vsel %vm10394_vm7, %v10535_v39, %v10536_v59 }
 0x5c6   : > { %24170 = vst [vmem:[#allocation150_spill] sm:$0xff] %v21749_v47 }
 0x5c8   : > { %16521 = vmatmul.mubr.msk.bf16.gmra.mrb[216].mxu0 %vm954_vm4, %v21728_v16 }
 0x5c9   : > { %11344 = vmatprep.mubr.bf16.mxu0 %v19034_v7 }
 0x5cb   : > { %16230 = vmatmul.mubr.msk.bf16.gmra.mrb[92].mxu1 %vm954_vm4, %v24119_v34  ;;  %v24171_v34 = vld [vmem:[#allocation52_spill] sm:$0xff] }
 0x5cc   : > { %3841 = vmatprep.mubr.bf16.mxu1 %v19034_v7  ;;  %v10538_v21 = vrot.slane %v24171_v34, 1 }
 0x5ce   : > { %v21759_v51 = vsel %vm10394_vm7, %v10536_v59, %v10538_v21  ;;  %v24177_v59 = vld [vmem:[#allocation57_spill] sm:$0xff] }
 0x5cf   : > { %24173 = vst [vmem:[#allocation52_spill] sm:$0xff] %v21759_v51  ;;  %v10543_v21 = vrot.slane %v24177_v59, 1 }
 0x5d0   : > { %16522 = vmatmul.mubr.msk.bf16.gmra.mrb[220].mxu0 %vm954_vm4, %v21738_v22 }
 0x5d1   : > { %11354 = vmatprep.mubr.bf16.mxu0 %v19034_v7 }
 0x5d3   : > { %16231 = vmatmul.mubr.msk.bf16.gmra.mrb[96].mxu1 %vm954_vm4, %v24125_v61  ;;  %v24174_v61 = vld [vmem:[#allocation93_spill] sm:$0xff] }
 0x5d4   : > { %3851 = vmatprep.mubr.bf16.mxu1 %v19034_v7  ;;  %v10540_v39 = vrot.slane %v24174_v61, 1 }
 0x5d8   : > { %16523 = vmatmul.mubr.msk.bf16.gmra.mrb[224].mxu0 %vm954_vm4, %v21749_v47  ;;  %v24175_v47 = vld [vmem:[#allocation94_spill] sm:$0xff] }
 0x5d9   : > { %11364 = vmatprep.mubr.bf16.mxu0 %v19034_v7  ;;  %v10541_v22 = vrot.slane %v24175_v47, 1 }
 0x5db   : > { %16232 = vmatmul.mubr.msk.bf16.gmra.mrb[100].mxu1 %vm954_vm4, %v24172_v15  ;;  %v21770_v34 = vsel %vm10394_vm7, %v10540_v39, %v10541_v22  ;;  %v21780_v15 = vsel %vm10394_vm7, %v10541_v22, %v10543_v21 }
 0x5dc   : > { %3861 = vmatprep.mubr.bf16.mxu1 %v19034_v7  ;;  %24176 = vst [vmem:[#allocation72_spill] sm:$0xff] %v21770_v34  ;;  %24178 = vst [vmem:[#allocation93_spill] sm:$0xff] %v21780_v15 }
 0x5e0   : > { %16524 = vmatmul.mubr.msk.bf16.gmra.mrb[228].mxu0 %vm954_vm4, %v21759_v51 }
 0x5e1   : > { %11374 = vmatprep.mubr.bf16.mxu0 %v19034_v7 }
 0x5e3   : > { %16233 = vmatmul.mubr.msk.bf16.gmra.mrb[104].mxu1 %vm954_vm4, %v24132_v23  ;;  %v24179_v23 = vld [vmem:[#allocation96_spill] sm:$0xff] }
 0x5e4   : > { %3871 = vmatprep.mubr.bf16.mxu1 %v19034_v7  ;;  %v10545_v39 = vrot.slane %v24179_v23, 1 }
 0x5e8   : > { %16525 = vmatmul.mubr.msk.bf16.gmra.mrb[232].mxu0 %vm954_vm4, %v21770_v34  ;;  %v24180_v34 = vld [vmem:[#allocation97_spill] sm:$0xff] }
 0x5e9   : > { %11384 = vmatprep.mubr.bf16.mxu0 %v19034_v7  ;;  %v10546_v51 = vrot.slane %v24180_v34, 1 }
 0x5eb   : > { %16234 = vmatmul.mubr.msk.bf16.gmra.mrb[108].mxu1 %vm954_vm4, %v24068_v44  ;;  %v21791_v59 = vsel %vm10394_vm7, %v10545_v39, %v10546_v51  ;;  %v24182_v44 = vld [vmem:[#allocation62_spill] sm:$0xff] }
 0x5ec   : > { %3881 = vmatprep.mubr.bf16.mxu1 %v19034_v7  ;;  %24181 = vst [vmem:[#allocation94_spill] sm:$0xff] %v21791_v59  ;;  %v10548_v22 = vrot.slane %v24182_v44, 1 }
 0x5ee   : > { %v21801_v21 = vsel %vm10394_vm7, %v10546_v51, %v10548_v22 }
 0x5ef   : > { %24183 = vst [vmem:[#allocation57_spill] sm:$0xff] %v21801_v21 }
 0x5f0   : > { %16526 = vmatmul.mubr.msk.bf16.gmra.mrb[236].mxu0 %vm954_vm4, %v21780_v15 }
 0x5f1   : > { %11394 = vmatprep.mubr.bf16.mxu0 %v19034_v7 }
 0x5f3   : > { %16235 = vmatmul.mubr.msk.bf16.gmra.mrb[112].mxu1 %vm954_vm4, %v24071_v18  ;;  %v24184_v18 = vld [vmem:[#allocation98_spill] sm:$0xff] }
 0x5f4   : > { %3891 = vmatprep.mubr.bf16.mxu1 %v19034_v7  ;;  %v10550_v39 = vrot.slane %v24184_v18, 1 }
 0x5f8   : > { %16527 = vmatmul.mubr.msk.bf16.gmra.mrb[240].mxu0 %vm954_vm4, %v21791_v59  ;;  %v24185_v59 = vld [vmem:[#allocation101_spill] sm:$0xff] }
 0x5f9   : > { %11404 = vmatprep.mubr.bf16.mxu0 %v19034_v7  ;;  %v10551_v15 = vrot.slane %v24185_v59, 1 }
 0x5fb   : > { %16236 = vmatmul.mubr.msk.bf16.gmra.mrb[116].mxu1 %vm954_vm4, %v24072_v1  ;;  %v21812_v44 = vsel %vm10394_vm7, %v10550_v39, %v10551_v15  ;;  %v24187_v1 = vld [vmem:[#allocation130_spill] sm:$0xff] }
 0x5fc   : > { %3901 = vmatprep.mubr.bf16.mxu1 %v19034_v7  ;;  %24186 = vst [vmem:[#allocation96_spill] sm:$0xff] %v21812_v44  ;;  %v10553_v51 = vrot.slane %v24187_v1, 1  ;;  %v24189_v39 = vld [vmem:[#allocation82_spill] sm:$0xff] }
 0x5fe   : > { %v21822_v22 = vsel %vm10394_vm7, %v10551_v15, %v10553_v51  ;;  %v24218_v15 = vld [vmem:[#allocation76_spill] sm:$0xff] }
 0x5ff   : > { %24188 = vst [vmem:[#allocation97_spill] sm:$0xff] %v21822_v22 }
 0x600   : > { %16528 = vmatmul.mubr.msk.bf16.gmra.mrb[244].mxu0 %vm954_vm4, %v21801_v21 }
 0x601   : > { %11414 = vmatprep.mubr.bf16.mxu0 %v19034_v7 }
 0x603   : > { %16237 = vmatmul.mubr.msk.bf16.gmra.mrb[120].mxu1 %vm954_vm4, %v24075_v50  ;;  %v13697_v50 = vand.u32 %v21659_v58, %v19874_v10  ;;  %v24191_v10 = vld [vmem:[#allocation88_spill] sm:$0xff]  ;;  %v24214_v58 = vld [vmem:[#allocation67_spill] sm:$0xff] }
 0x604   : > { %3911 = vmatprep.mubr.bf16.mxu1 %v19034_v7 }
 0x608   : > { %16529 = vmatmul.mubr.msk.bf16.gmra.mrb[248].mxu0 %vm954_vm4, %v21812_v44 }
 0x609   : > { %11424 = vmatprep.mubr.bf16.mxu0 %v19034_v7 }
 0x60b   : > { %16238 = vmatmul.mubr.msk.bf16.gmra.mrb[124].mxu1 %vm954_vm4, %v24077_v9  ;;  %v24190_v9 = vld [vmem:[#allocation87_spill] sm:$0xff] }
 0x60c   : > { %3921 = vmatprep.mubr.bf16.mxu1 %v19034_v7 }
 0x610   : > { %16530 = vmatmul.mubr.msk.bf16.gmra.mrb[252].mxu0 %vm954_vm4, %v21822_v22 }
 0x611   : > { %12264 = vmatprep.mubr.bf16.mxu0 %v19034_v7 }
 0x613   : > { %16239 = vmatmul.mubr.msk.bf16.gmra.mrb[128].mxu1 %vm954_vm4, %v20417_v5  ;;  %v24192_v5 = vld [vmem:[#allocation21_spill] sm:$0xff] }
 0x614   : > { %3931 = vmatprep.mubr.bf16.mxu1 %v19034_v7 }
 0x618   : > { %16532 = vmatmul.mubr.msk.bf16.vlgmr.msra.gmra.mrb[0].mxu0 %vm954_vm4, %v24189_v39 }
 0x619   : > { %13703 = vmatpush1.bf16.msra.mxu0 %v13697_v50  ;;  %12274 = vmatprep.mubr.bf16.mxu0 %v19034_v7  ;;  %v24221_v50 = vld [vmem:[#allocation23_spill] sm:$0xff] }
 0x61a   : > { %v5120_v39 = vshll.u32 %v24221_v50, 16 }
 0x61b   : > { %16240 = vmatmul.mubr.msk.bf16.gmra.mrb[132].mxu1 %vm954_vm4, %v20425_v55  ;;  %v24193_v55 = vld [vmem:[#allocation25_spill] sm:$0xff] }
 0x61c   : > { %3941 = vmatprep.mubr.bf16.mxu1 %v19034_v7 }
 0x620   : > { %16533 = vmatmul.mubr.msk.bf16.gmra.mrb[4].mxu0 %vm954_vm4, %v24190_v9  ;;  %v24222_v9 = vld [vmem:[#allocation138_spill] sm:$0xff] }
 0x621   : > { %12284 = vmatprep.mubr.bf16.mxu0 %v19034_v7 }
 0x623   : > { %16241 = vmatmul.mubr.msk.bf16.gmra.mrb[136].mxu1 %vm954_vm4, %v20436_v0  ;;  %v24204_v0 = vld [vmem:[#allocation44_spill] sm:$0xff] }
 0x624   : > { %3951 = vmatprep.mubr.bf16.mxu1 %v19034_v7 }
 0x628   : > { %16534 = vmatmul.mubr.msk.bf16.gmra.mrb[8].mxu0 %vm954_vm4, %v24191_v10 }
 0x629   : > { %12294 = vmatprep.mubr.bf16.mxu0 %v19034_v7 }
 0x62b   : > { %16242 = vmatmul.mubr.msk.bf16.gmra.mrb[140].mxu1 %vm954_vm4, %v20444_v60  ;;  %v24194_v60 = vld [vmem:[#allocation28_spill] sm:$0xff] }
 0x62c   : > { %3961 = vmatprep.mubr.bf16.mxu1 %v19034_v7 }
 0x630   : > { %16535 = vmatmul.mubr.msk.bf16.gmra.mrb[12].mxu0 %vm954_vm4, %v24192_v5 }
 0x631   : > { %12304 = vmatprep.mubr.bf16.mxu0 %v19034_v7 }
 0x633   : > { %16243 = vmatmul.mubr.msk.bf16.gmra.mrb[144].mxu1 %vm954_vm4, %v20455_v46  ;;  %v24195_v46 = vld [vmem:[#allocation140_spill] sm:$0xff] }
 0x634   : > { %3971 = vmatprep.mubr.bf16.mxu1 %v19034_v7 }
 0x638   : > { %16536 = vmatmul.mubr.msk.bf16.gmra.mrb[16].mxu0 %vm954_vm4, %v24193_v55 }
 0x639   : > { %12314 = vmatprep.mubr.bf16.mxu0 %v19034_v7 }
 0x63b   : > { %16244 = vmatmul.mubr.msk.bf16.gmra.mrb[148].mxu1 %vm954_vm4, %v20463_v31  ;;  %v24196_v31 = vld [vmem:[#allocation31_spill] sm:$0xff] }
 0x63c   : > { %3981 = vmatprep.mubr.bf16.mxu1 %v19034_v7 }
 0x640   : > { %16537 = vmatmul.mubr.msk.bf16.gmra.mrb[20].mxu0 %vm954_vm4, %v24194_v60 }
 0x641   : > { %12324 = vmatprep.mubr.bf16.mxu0 %v19034_v7 }
 0x643   : > { %16245 = vmatmul.mubr.msk.bf16.gmra.mrb[152].mxu1 %vm954_vm4, %v20474_v32  ;;  %v24197_v32 = vld [vmem:[#allocation141_spill] sm:$0xff] }
 0x644   : > { %3991 = vmatprep.mubr.bf16.mxu1 %v19034_v7 }
 0x648   : > { %16538 = vmatmul.mubr.msk.bf16.gmra.mrb[24].mxu0 %vm954_vm4, %v24195_v46 }
 0x649   : > { %12334 = vmatprep.mubr.bf16.mxu0 %v19034_v7 }
 0x64b   : > { %16246 = vmatmul.mubr.msk.bf16.gmra.mrb[156].mxu1 %vm954_vm4, %v20482_v4  ;;  %v24198_v4 = vld [vmem:[#allocation34_spill] sm:$0xff] }
 0x64c   : > { %4001 = vmatprep.mubr.bf16.mxu1 %v19034_v7 }
 0x650   : > { %16539 = vmatmul.mubr.msk.bf16.gmra.mrb[28].mxu0 %vm954_vm4, %v24196_v31 }
 0x651   : > { %12344 = vmatprep.mubr.bf16.mxu0 %v19034_v7 }
 0x653   : > { %16247 = vmatmul.mubr.msk.bf16.gmra.mrb[160].mxu1 %vm954_vm4, %v20493_v19  ;;  %v24199_v19 = vld [vmem:[#allocation142_spill] sm:$0xff] }
 0x654   : > { %4011 = vmatprep.mubr.bf16.mxu1 %v19034_v7 }
 0x658   : > { %16540 = vmatmul.mubr.msk.bf16.gmra.mrb[32].mxu0 %vm954_vm4, %v24197_v32 }
 0x659   : > { %12354 = vmatprep.mubr.bf16.mxu0 %v19034_v7 }
 0x65b   : > { %16248 = vmatmul.mubr.msk.bf16.gmra.mrb[164].mxu1 %vm954_vm4, %v20501_v52  ;;  %v24200_v52 = vld [vmem:[#allocation37_spill] sm:$0xff] }
 0x65c   : > { %4021 = vmatprep.mubr.bf16.mxu1 %v19034_v7 }
 0x660   : > { %16541 = vmatmul.mubr.msk.bf16.gmra.mrb[36].mxu0 %vm954_vm4, %v24198_v4 }
 0x661   : > { %12364 = vmatprep.mubr.bf16.mxu0 %v19034_v7 }
 0x663   : > { %16249 = vmatmul.mubr.msk.bf16.gmra.mrb[168].mxu1 %vm954_vm4, %v20512_v3  ;;  %v24201_v3 = vld [vmem:[#allocation143_spill] sm:$0xff] }
 0x664   : > { %4031 = vmatprep.mubr.bf16.mxu1 %v19034_v7 }
 0x668   : > { %16542 = vmatmul.mubr.msk.bf16.gmra.mrb[40].mxu0 %vm954_vm4, %v24199_v19 }
 0x669   : > { %12374 = vmatprep.mubr.bf16.mxu0 %v19034_v7 }
 0x66b   : > { %16250 = vmatmul.mubr.msk.bf16.gmra.mrb[172].mxu1 %vm954_vm4, %v20520_v41  ;;  %v24202_v41 = vld [vmem:[#allocation40_spill] sm:$0xff] }
 0x66c   : > { %4041 = vmatprep.mubr.bf16.mxu1 %v19034_v7 }
 0x670   : > { %16543 = vmatmul.mubr.msk.bf16.gmra.mrb[44].mxu0 %vm954_vm4, %v24200_v52 }
 0x671   : > { %12384 = vmatprep.mubr.bf16.mxu0 %v19034_v7 }
 0x673   : > { %16251 = vmatmul.mubr.msk.bf16.gmra.mrb[176].mxu1 %vm954_vm4, %v20531_v2  ;;  %v24203_v2 = vld [vmem:[#allocation144_spill] sm:$0xff] }
 0x674   : > { %4051 = vmatprep.mubr.bf16.mxu1 %v19034_v7 }
 0x678   : > { %16544 = vmatmul.mubr.msk.bf16.gmra.mrb[48].mxu0 %vm954_vm4, %v24201_v3 }
 0x679   : > { %12394 = vmatprep.mubr.bf16.mxu0 %v19034_v7 }
 0x67b   : > { %16252 = vmatmul.mubr.msk.bf16.gmra.mrb[180].mxu1 %vm954_vm4, %v20545_v20  ;;  %v24205_v20 = vld [vmem:[#allocation145_spill] sm:$0xff] }
 0x67c   : > { %4061 = vmatprep.mubr.bf16.mxu1 %v19034_v7 }
 0x680   : > { %16545 = vmatmul.mubr.msk.bf16.gmra.mrb[52].mxu0 %vm954_vm4, %v24202_v41 }
 0x681   : > { %12404 = vmatprep.mubr.bf16.mxu0 %v19034_v7 }
 0x683   : > { %16253 = vmatmul.mubr.msk.bf16.gmra.mrb[184].mxu1 %vm954_vm4, %v20556_v49  ;;  %v24206_v49 = vld [vmem:[#allocation49_spill] sm:$0xff] }
 0x684   : > { %4071 = vmatprep.mubr.bf16.mxu1 %v19034_v7 }
 0x688   : > { %16546 = vmatmul.mubr.msk.bf16.gmra.mrb[56].mxu0 %vm954_vm4, %v24203_v2 }
 0x689   : > { %12414 = vmatprep.mubr.bf16.mxu0 %v19034_v7 }
 0x68b   : > { %16254 = vmatmul.mubr.msk.bf16.gmra.mrb[188].mxu1 %vm954_vm4, %v20564_v33  ;;  %v24211_v33 = vld [vmem:[#allocation91_spill] sm:$0xff] }
 0x68c   : > { %4081 = vmatprep.mubr.bf16.mxu1 %v19034_v7 }
 0x690   : > { %16547 = vmatmul.mubr.msk.bf16.gmra.mrb[60].mxu0 %vm954_vm4, %v24204_v0 }
 0x691   : > { %12424 = vmatprep.mubr.bf16.mxu0 %v19034_v7 }
 0x693   : > { %16255 = vmatmul.mubr.msk.bf16.gmra.mrb[192].mxu1 %vm954_vm4, %v20575_v57  ;;  %v24207_v57 = vld [vmem:[#allocation146_spill] sm:$0xff] }
 0x694   : > { %4091 = vmatprep.mubr.bf16.mxu1 %v19034_v7 }
 0x698   : > { %16548 = vmatmul.mubr.msk.bf16.gmra.mrb[64].mxu0 %vm954_vm4, %v24205_v20 }
 0x699   : > { %12434 = vmatprep.mubr.bf16.mxu0 %v19034_v7 }
 0x69b   : > { %16256 = vmatmul.mubr.msk.bf16.gmra.mrb[196].mxu1 %vm954_vm4, %v20583_v38  ;;  %v24208_v38 = vld [vmem:[#allocation54_spill] sm:$0xff] }
 0x69c   : > { %4101 = vmatprep.mubr.bf16.mxu1 %v19034_v7 }
 0x6a0   : > { %16549 = vmatmul.mubr.msk.bf16.gmra.mrb[68].mxu0 %vm954_vm4, %v24206_v49 }
 0x6a1   : > { %12444 = vmatprep.mubr.bf16.mxu0 %v19034_v7 }
 0x6a3   : > { %16257 = vmatmul.mubr.msk.bf16.gmra.mrb[200].mxu1 %vm954_vm4, %v20594_v17  ;;  %v24209_v17 = vld [vmem:[#allocation90_spill] sm:$0xff] }
 0x6a4   : > { %4111 = vmatprep.mubr.bf16.mxu1 %v19034_v7 }
 0x6a8   : > { %16550 = vmatmul.mubr.msk.bf16.gmra.mrb[72].mxu0 %vm954_vm4, %v24207_v57 }
 0x6a9   : > { %12454 = vmatprep.mubr.bf16.mxu0 %v19034_v7 }
 0x6ab   : > { %16258 = vmatmul.mubr.msk.bf16.gmra.mrb[204].mxu1 %vm954_vm4, %v20602_v48  ;;  %v24210_v48 = vld [vmem:[#allocation59_spill] sm:$0xff] }
 0x6ac   : > { %4121 = vmatprep.mubr.bf16.mxu1 %v19034_v7 }
 0x6b0   : > { %16551 = vmatmul.mubr.msk.bf16.gmra.mrb[76].mxu0 %vm954_vm4, %v24208_v38 }
 0x6b1   : > { %12464 = vmatprep.mubr.bf16.mxu0 %v19034_v7 }
 0x6b3   : > { %16259 = vmatmul.mubr.msk.bf16.gmra.mrb[208].mxu1 %vm954_vm4, %v24108_v30  ;;  %v24212_v30 = vld [vmem:[#allocation61_spill] sm:$0xff] }
 0x6b4   : > { %4131 = vmatprep.mubr.bf16.mxu1 %v19034_v7 }
 0x6b8   : > { %16552 = vmatmul.mubr.msk.bf16.gmra.mrb[80].mxu0 %vm954_vm4, %v24209_v17 }
 0x6b9   : > { %12474 = vmatprep.mubr.bf16.mxu0 %v19034_v7 }
 0x6bb   : > { %16260 = vmatmul.mubr.msk.bf16.gmra.mrb[212].mxu1 %vm954_vm4, %v24111_v24  ;;  %v24213_v24 = vld [vmem:[#allocation64_spill] sm:$0xff] }
 0x6bc   : > { %4141 = vmatprep.mubr.bf16.mxu1 %v19034_v7 }
 0x6c0   : > { %16553 = vmatmul.mubr.msk.bf16.gmra.mrb[84].mxu0 %vm954_vm4, %v24210_v48 }
 0x6c1   : > { %12484 = vmatprep.mubr.bf16.mxu0 %v19034_v7 }
 0x6c3   : > { %16261 = vmatmul.mubr.msk.bf16.gmra.mrb[216].mxu1 %vm954_vm4, %v24174_v61  ;;  %v24216_v61 = vld [vmem:[#allocation71_spill] sm:$0xff] }
 0x6c4   : > { %4151 = vmatprep.mubr.bf16.mxu1 %v19034_v7 }
 0x6c8   : > { %16554 = vmatmul.mubr.msk.bf16.gmra.mrb[88].mxu0 %vm954_vm4, %v24211_v33 }
 0x6c9   : > { %12494 = vmatprep.mubr.bf16.mxu0 %v19034_v7 }
 0x6cb   : > { %16262 = vmatmul.mubr.msk.bf16.gmra.mrb[220].mxu1 %vm954_vm4, %v24175_v47  ;;  %v24215_v47 = vld [vmem:[#allocation69_spill] sm:$0xff] }
 0x6cc   : > { %4161 = vmatprep.mubr.bf16.mxu1 %v19034_v7 }
 0x6d0   : > { %16555 = vmatmul.mubr.msk.bf16.gmra.mrb[92].mxu0 %vm954_vm4, %v24212_v30 }
 0x6d1   : > { %12504 = vmatprep.mubr.bf16.mxu0 %v19034_v7 }
 0x6d3   : > { %16263 = vmatmul.mubr.msk.bf16.gmra.mrb[224].mxu1 %vm954_vm4, %v24179_v23  ;;  %v24219_v23 = vld [vmem:[#allocation137_spill] sm:$0xff] }
 0x6d4   : > { %4171 = vmatprep.mubr.bf16.mxu1 %v19034_v7 }
 0x6d8   : > { %16556 = vmatmul.mubr.msk.bf16.gmra.mrb[96].mxu0 %vm954_vm4, %v24213_v24 }
 0x6d9   : > { %12514 = vmatprep.mubr.bf16.mxu0 %v19034_v7 }
 0x6db   : > { %16264 = vmatmul.mubr.msk.bf16.gmra.mrb[228].mxu1 %vm954_vm4, %v24180_v34  ;;  %v24217_v34 = vld [vmem:[#allocation74_spill] sm:$0xff] }
 0x6dc   : > { %4181 = vmatprep.mubr.bf16.mxu1 %v19034_v7 }
 0x6e0   : > { %16557 = vmatmul.mubr.msk.bf16.gmra.mrb[100].mxu0 %vm954_vm4, %v24214_v58 }
 0x6e1   : > { %12524 = vmatprep.mubr.bf16.mxu0 %v19034_v7 }
 0x6e3   : > { %16265 = vmatmul.mubr.msk.bf16.gmra.mrb[232].mxu1 %vm954_vm4, %v24184_v18 }
 0x6e4   : > { %4191 = vmatprep.mubr.bf16.mxu1 %v19034_v7 }
 0x6e8   : > { %16558 = vmatmul.mubr.msk.bf16.gmra.mrb[104].mxu0 %vm954_vm4, %v24215_v47 }
 0x6e9   : > { %12534 = vmatprep.mubr.bf16.mxu0 %v19034_v7 }
 0x6eb   : > { %16266 = vmatmul.mubr.msk.bf16.gmra.mrb[236].mxu1 %vm954_vm4, %v24185_v59  ;;  %v24220_v59 = vld [vmem:[#allocation20_spill] sm:$0xff] }
 0x6ec   : > { %4201 = vmatprep.mubr.bf16.mxu1 %v19034_v7  ;;  %v5116_v18 = vshll.u32 %v24220_v59, 16  ;;  %v5114_v1 = vshrl.u32 %v24220_v59, 16  ;;  %v24223_v59 = vld [vmem:[#allocation81_spill] sm:$0xff] }
 0x6ee   : > { %v5118_v51 = vrot.slane %v5116_v18, 1  ;;  %v5128_v18 = vshll.u32 %v24223_v59, 16  ;;  %v24233_v59 = vld [vmem:[#allocation35_spill] sm:$0xff] }
 0x6f0   : > { %16559 = vmatmul.mubr.msk.bf16.gmra.mrb[108].mxu0 %vm954_vm4, %v24216_v61  ;;  %v24224_v61 = vld [vmem:[#allocation19_spill] sm:$0xff] }
 0x6f1   : > { %12544 = vmatprep.mubr.bf16.mxu0 %v19034_v7 }
 0x6f3   : > { %16267 = vmatmul.mubr.msk.bf16.gmra.mrb[240].mxu1 %vm954_vm4, %v24133_v29 }
 0x6f4   : > { %4211 = vmatprep.mubr.bf16.mxu1 %v19034_v7 }
 0x6f8   : > { %16560 = vmatmul.mubr.msk.bf16.gmra.mrb[112].mxu0 %vm954_vm4, %v24217_v34 }
 0x6f9   : > { %12554 = vmatprep.mubr.bf16.mxu0 %v19034_v7 }
 0x6fb   : > { %16268 = vmatmul.mubr.msk.bf16.gmra.mrb[244].mxu1 %vm954_vm4, %v24136_v27 }
 0x6fc   : > { %4221 = vmatprep.mubr.bf16.mxu1 %v19034_v7 }
 0x700   : > { %16561 = vmatmul.mubr.msk.bf16.gmra.mrb[116].mxu0 %vm954_vm4, %v24218_v15  ;;  %v5122_v15 = vrot.slane %v5120_v39, 1  ;;  %v24231_v39 = vld [vmem:[#allocation32_spill] sm:$0xff] }
 0x701   : > { %12564 = vmatprep.mubr.bf16.mxu0 %v19034_v7 }
 0x703   : > { %16269 = vmatmul.mubr.msk.bf16.gmra.mrb[248].mxu1 %vm954_vm4, %v24219_v23  ;;  %v5119_v23 = vor.u32 %v5118_v51, %v5114_v1  ;;  %v5130_v1 = vrot.slane %v5128_v18, 1  ;;  %v24234_v18 = vld [vmem:[#allocation36_spill] sm:$0xff] }
 0x704   : > { %4231 = vmatprep.mubr.bf16.mxu1 %v19034_v7 }
 0x705   : > { %v5123_v34 = vsel %vm5113_vm6, %v5119_v23, %v5122_v15  ;;  %v24229_v23 = vld [vmem:[#allocation29_spill] sm:$0xff] }
 0x708   : > { %16562 = vmatmul.mubr.msk.bf16.gmra.mrb[120].mxu0 %vm954_vm4, %v21490_v14  ;;  %v5124_v14 = vshrl.u32 %v24221_v50, 16  ;;  %v24230_v50 = vld [vmem:[#allocation30_spill] sm:$0xff] }
 0x709   : > { %12574 = vmatprep.mubr.bf16.mxu0 %v19034_v7 }
 0x70b   : > { %16270 = vmatmul.mubr.msk.bf16.gmra.mrb[252].mxu1 %vm954_vm4, %v24222_v9  ;;  %v5126_v9 = vor.u32 %v5124_v14, %v5122_v15  ;;  %v24226_v14 = vld [vmem:[#allocation24_spill] sm:$0xff]  ;;  %v24228_v15 = vld [vmem:[#allocation27_spill] sm:$0xff] }
 0x70c   : > { %5929 = vmatprep.mubr.bf16.mxu1 %v19034_v7 }
 0x70d   : > { %v5131_v51 = vsel %vm5113_vm6, %v5126_v9, %v5130_v1  ;;  %v24232_v9 = vld [vmem:[#allocation33_spill] sm:$0xff]  ;;  %v24235_v1 = vld [vmem:[#allocation38_spill] sm:$0xff] }
 0x710   : > { %16563 = vmatmul.mubr.msk.bf16.gmra.mrb[124].mxu0 %vm954_vm4, %v21501_v45 }
 0x711   : > { %12584 = vmatprep.mubr.bf16.mxu0 %v19034_v7 }
 0x713   : > { %16272 = vmatmul.mubr.msk.bf16.vlgmr.msra.gmra.mrb[0].mxu1 %vm954_vm4, %v5123_v34  ;;  %v24227_v34 = vld [vmem:[#allocation26_spill] sm:$0xff] }
 0x714   : > { %16671 = vmatpush1.bf16.msra.mxu1 %v24224_v61  ;;  %5939 = vmatprep.mubr.bf16.mxu1 %v19034_v7  ;;  %v24225_v61 = vld [vmem:[#allocation22_spill] sm:$0xff] }
 0x718   : > { %16564 = vmatmul.mubr.msk.bf16.gmra.mrb[128].mxu0 %vm954_vm4, %v21512_v12 }
 0x719   : > { %12594 = vmatprep.mubr.bf16.mxu0 %v19034_v7 }
 0x71b   : > { %16273 = vmatmul.mubr.msk.bf16.gmra.mrb[4].mxu1 %vm954_vm4, %v5131_v51  ;;  %v24236_v51 = vld [vmem:[#allocation39_spill] sm:$0xff] }
 0x71c   : > { %5949 = vmatprep.mubr.bf16.mxu1 %v19034_v7 }
 0x720   : > { %16565 = vmatmul.mubr.msk.bf16.gmra.mrb[132].mxu0 %vm954_vm4, %v21522_v26 }
 0x721   : > { %12604 = vmatprep.mubr.bf16.mxu0 %v19034_v7 }
 0x723   : > { %16274 = vmatmul.mubr.msk.bf16.gmra.mrb[8].mxu1 %vm954_vm4, %v24225_v61  ;;  %v24237_v61 = vld [vmem:[#allocation115_spill] sm:$0xff] }
 0x724   : > { %5959 = vmatprep.mubr.bf16.mxu1 %v19034_v7 }
 0x728   : > { %16566 = vmatmul.mubr.msk.bf16.gmra.mrb[136].mxu0 %vm954_vm4, %v21533_v43 }
 0x729   : > { %12614 = vmatprep.mubr.bf16.mxu0 %v19034_v7 }
 0x72b   : > { %16275 = vmatmul.mubr.msk.bf16.gmra.mrb[12].mxu1 %vm954_vm4, %v24226_v14  ;;  %v24238_v14 = vld [vmem:[#allocation41_spill] sm:$0xff] }
 0x72c   : > { %5969 = vmatprep.mubr.bf16.mxu1 %v19034_v7 }
 0x730   : > { %16567 = vmatmul.mubr.msk.bf16.gmra.mrb[140].mxu0 %vm954_vm4, %v21543_v53 }
 0x731   : > { %12624 = vmatprep.mubr.bf16.mxu0 %v19034_v7 }
 0x733   : > { %16276 = vmatmul.mubr.msk.bf16.gmra.mrb[16].mxu1 %vm954_vm4, %v24227_v34  ;;  %v24239_v34 = vld [vmem:[#allocation43_spill] sm:$0xff] }
 0x734   : > { %5979 = vmatprep.mubr.bf16.mxu1 %v19034_v7 }
 0x738   : > { %16568 = vmatmul.mubr.msk.bf16.gmra.mrb[144].mxu0 %vm954_vm4, %v21554_v6  ;;  %v24271_v6 = vld [vmem:[#allocation100_spill] sm:$0xff] }
 0x739   : > { %12634 = vmatprep.mubr.bf16.mxu0 %v19034_v7 }
 0x73b   : > { %16277 = vmatmul.mubr.msk.bf16.gmra.mrb[20].mxu1 %vm954_vm4, %v24228_v15  ;;  %v24240_v15 = vld [vmem:[#allocation45_spill] sm:$0xff] }
 0x73c   : > { %5989 = vmatprep.mubr.bf16.mxu1 %v19034_v7 }
 0x740   : > { %16569 = vmatmul.mubr.msk.bf16.gmra.mrb[148].mxu0 %vm954_vm4, %v21564_v13 }
 0x741   : > { %12644 = vmatprep.mubr.bf16.mxu0 %v19034_v7 }
 0x743   : > { %16278 = vmatmul.mubr.msk.bf16.gmra.mrb[24].mxu1 %vm954_vm4, %v24229_v23  ;;  %v24241_v23 = vld [vmem:[#allocation48_spill] sm:$0xff] }
 0x744   : > { %5999 = vmatprep.mubr.bf16.mxu1 %v19034_v7 }
 0x748   : > { %16570 = vmatmul.mubr.msk.bf16.gmra.mrb[152].mxu0 %vm954_vm4, %v21575_v35 }
 0x749   : > { %12654 = vmatprep.mubr.bf16.mxu0 %v19034_v7 }
 0x74b   : > { %16279 = vmatmul.mubr.msk.bf16.gmra.mrb[28].mxu1 %vm954_vm4, %v24230_v50  ;;  %v24242_v50 = vld [vmem:[#allocation50_spill] sm:$0xff] }
 0x74c   : > { %6009 = vmatprep.mubr.bf16.mxu1 %v19034_v7 }
 0x750   : > { %16571 = vmatmul.mubr.msk.bf16.gmra.mrb[156].mxu0 %vm954_vm4, %v21585_v40  ;;  %v24266_v40 = vld [vmem:[#allocation86_spill] sm:$0xff] }
 0x751   : > { %12664 = vmatprep.mubr.bf16.mxu0 %v19034_v7 }
 0x753   : > { %16280 = vmatmul.mubr.msk.bf16.gmra.mrb[32].mxu1 %vm954_vm4, %v24231_v39  ;;  %v24243_v39 = vld [vmem:[#allocation53_spill] sm:$0xff] }
 0x754   : > { %6019 = vmatprep.mubr.bf16.mxu1 %v19034_v7 }
 0x758   : > { %16572 = vmatmul.mubr.msk.bf16.gmra.mrb[160].mxu0 %vm954_vm4, %v21596_v63  ;;  %v24265_v63 = vld [vmem:[#allocation85_spill] sm:$0xff] }
 0x759   : > { %12674 = vmatprep.mubr.bf16.mxu0 %v19034_v7 }
 0x75b   : > { %16281 = vmatmul.mubr.msk.bf16.gmra.mrb[36].mxu1 %vm954_vm4, %v24232_v9  ;;  %v24244_v9 = vld [vmem:[#allocation55_spill] sm:$0xff] }
 0x75c   : > { %6029 = vmatprep.mubr.bf16.mxu1 %v19034_v7 }
 0x760   : > { %16573 = vmatmul.mubr.msk.bf16.gmra.mrb[164].mxu0 %vm954_vm4, %v21606_v8 }
 0x761   : > { %12684 = vmatprep.mubr.bf16.mxu0 %v19034_v7 }
 0x763   : > { %16282 = vmatmul.mubr.msk.bf16.gmra.mrb[40].mxu1 %vm954_vm4, %v24233_v59  ;;  %v24245_v59 = vld [vmem:[#allocation58_spill] sm:$0xff] }
 0x764   : > { %6039 = vmatprep.mubr.bf16.mxu1 %v19034_v7 }
 0x768   : > { %16574 = vmatmul.mubr.msk.bf16.gmra.mrb[168].mxu0 %vm954_vm4, %v21617_v36 }
 0x769   : > { %12694 = vmatprep.mubr.bf16.mxu0 %v19034_v7 }
 0x76b   : > { %16283 = vmatmul.mubr.msk.bf16.gmra.mrb[44].mxu1 %vm954_vm4, %v24234_v18  ;;  %v24246_v18 = vld [vmem:[#allocation127_spill] sm:$0xff] }
 0x76c   : > { %6049 = vmatprep.mubr.bf16.mxu1 %v19034_v7 }
 0x770   : > { %16575 = vmatmul.mubr.msk.bf16.gmra.mrb[172].mxu0 %vm954_vm4, %v21627_v42 }
 0x771   : > { %12704 = vmatprep.mubr.bf16.mxu0 %v19034_v7 }
 0x773   : > { %16284 = vmatmul.mubr.msk.bf16.gmra.mrb[48].mxu1 %vm954_vm4, %v24235_v1  ;;  %v24247_v1 = vld [vmem:[#allocation60_spill] sm:$0xff] }
 0x774   : > { %6059 = vmatprep.mubr.bf16.mxu1 %v19034_v7 }
 0x778   : > { %16576 = vmatmul.mubr.msk.bf16.gmra.mrb[176].mxu0 %vm954_vm4, %v21638_v37 }
 0x779   : > { %12714 = vmatprep.mubr.bf16.mxu0 %v19034_v7 }
 0x77b   : > { %16285 = vmatmul.mubr.msk.bf16.gmra.mrb[52].mxu1 %vm954_vm4, %v24236_v51  ;;  %v24248_v51 = vld [vmem:[#allocation150_spill] sm:$0xff] }
 0x77c   : > { %6069 = vmatprep.mubr.bf16.mxu1 %v19034_v7 }
 0x780   : > { %16577 = vmatmul.mubr.msk.bf16.gmra.mrb[180].mxu0 %vm954_vm4, %v24237_v61 }
 0x781   : > { %12724 = vmatprep.mubr.bf16.mxu0 %v19034_v7 }
 0x783   : > { %16286 = vmatmul.mubr.msk.bf16.gmra.mrb[56].mxu1 %vm954_vm4, %v24238_v14  ;;  %v24249_v14 = vld [vmem:[#allocation63_spill] sm:$0xff] }
 0x784   : > { %6079 = vmatprep.mubr.bf16.mxu1 %v19034_v7 }
 0x788   : > { %16578 = vmatmul.mubr.msk.bf16.gmra.mrb[184].mxu0 %vm954_vm4, %v21662_v62 }
 0x789   : > { %12734 = vmatprep.mubr.bf16.mxu0 %v19034_v7 }
 0x78b   : > { %16287 = vmatmul.mubr.msk.bf16.gmra.mrb[60].mxu1 %vm954_vm4, %v24239_v34  ;;  %v24250_v34 = vld [vmem:[#allocation52_spill] sm:$0xff] }
 0x78c   : > { %6089 = vmatprep.mubr.bf16.mxu1 %v19034_v7 }
 0x790   : > { %16579 = vmatmul.mubr.msk.bf16.gmra.mrb[188].mxu0 %vm954_vm4, %v21675_v56 }
 0x791   : > { %12744 = vmatprep.mubr.bf16.mxu0 %v19034_v7 }
 0x793   : > { %16288 = vmatmul.mubr.msk.bf16.gmra.mrb[64].mxu1 %vm954_vm4, %v24240_v15  ;;  %v24251_v15 = vld [vmem:[#allocation65_spill] sm:$0xff] }
 0x794   : > { %6099 = vmatprep.mubr.bf16.mxu1 %v19034_v7 }
 0x798   : > { %16580 = vmatmul.mubr.msk.bf16.gmra.mrb[192].mxu0 %vm954_vm4, %v21686_v11  ;;  %v12207_v11 = vrot.slane %v24136_v27, 1  ;;  %v24262_v27 = vld [vmem:[#allocation135_spill] sm:$0xff] }
 0x799   : > { %12754 = vmatprep.mubr.bf16.mxu0 %v19034_v7  ;;  %v12209_v37 = vrot.slane %v24262_v27, 1 }
 0x79b   : > { %16289 = vmatmul.mubr.msk.bf16.gmra.mrb[68].mxu1 %vm954_vm4, %v24241_v23  ;;  %v24252_v23 = vld [vmem:[#allocation72_spill] sm:$0xff] }
 0x79c   : > { %6109 = vmatprep.mubr.bf16.mxu1 %v19034_v7 }
 0x7a0   : > { %16581 = vmatmul.mubr.msk.bf16.gmra.mrb[196].mxu0 %vm954_vm4, %v21696_v28  ;;  %v12206_v28 = vrot.slane %v24133_v29, 1 }
 0x7a1   : > { %12764 = vmatprep.mubr.bf16.mxu0 %v19034_v7 }
 0x7a2   : > { %v22245_v62 = vsel %vm10394_vm7, %v12206_v28, %v12207_v11  ;;  %v22263_v28 = vsel %vm10394_vm7, %v12207_v11, %v12209_v37 }
 0x7a3   : > { %16290 = vmatmul.mubr.msk.bf16.gmra.mrb[72].mxu1 %vm954_vm4, %v24242_v50  ;;  %v24253_v50 = vld [vmem:[#allocation68_spill] sm:$0xff]  ;;  %24261 = vst [vmem:[#allocation62_spill] sm:$0xff] %v22245_v62  ;;  %24264 = vst [vmem:[#allocation98_spill] sm:$0xff] %v22263_v28 }
 0x7a4   : > { %6119 = vmatprep.mubr.bf16.mxu1 %v19034_v7 }
 0x7a8   : > { %16582 = vmatmul.mubr.msk.bf16.gmra.mrb[200].mxu0 %vm954_vm4, %v21707_v54 }
 0x7a9   : > { %12774 = vmatprep.mubr.bf16.mxu0 %v19034_v7 }
 0x7ab   : > { %16291 = vmatmul.mubr.msk.bf16.gmra.mrb[76].mxu1 %vm954_vm4, %v24243_v39  ;;  %v24254_v39 = vld [vmem:[#allocation93_spill] sm:$0xff] }
 0x7ac   : > { %6129 = vmatprep.mubr.bf16.mxu1 %v19034_v7 }
 0x7b0   : > { %16583 = vmatmul.mubr.msk.bf16.gmra.mrb[204].mxu0 %vm954_vm4, %v21717_v25  ;;  %v24259_v25 = vld [vmem:[#allocation78_spill] sm:$0xff] }
 0x7b1   : > { %12784 = vmatprep.mubr.bf16.mxu0 %v19034_v7 }
 0x7b3   : > { %16292 = vmatmul.mubr.msk.bf16.gmra.mrb[80].mxu1 %vm954_vm4, %v24244_v9  ;;  %v24255_v9 = vld [vmem:[#allocation70_spill] sm:$0xff] }
 0x7b4   : > { %6139 = vmatprep.mubr.bf16.mxu1 %v19034_v7 }
 0x7b8   : > { %16584 = vmatmul.mubr.msk.bf16.gmra.mrb[208].mxu0 %vm954_vm4, %v21728_v16 }
 0x7b9   : > { %12794 = vmatprep.mubr.bf16.mxu0 %v19034_v7 }
 0x7bb   : > { %16293 = vmatmul.mubr.msk.bf16.gmra.mrb[84].mxu1 %vm954_vm4, %v24245_v59 }
 0x7bc   : > { %6149 = vmatprep.mubr.bf16.mxu1 %v19034_v7 }
 0x7c0   : > { %16585 = vmatmul.mubr.msk.bf16.gmra.mrb[212].mxu0 %vm954_vm4, %v24246_v18 }
 0x7c1   : > { %12804 = vmatprep.mubr.bf16.mxu0 %v19034_v7 }
 0x7c3   : > { %16294 = vmatmul.mubr.msk.bf16.gmra.mrb[88].mxu1 %vm954_vm4, %v24247_v1  ;;  %v24256_v1 = vld [vmem:[#allocation94_spill] sm:$0xff] }
 0x7c4   : > { %6159 = vmatprep.mubr.bf16.mxu1 %v19034_v7 }
 0x7c8   : > { %16586 = vmatmul.mubr.msk.bf16.gmra.mrb[216].mxu0 %vm954_vm4, %v24248_v51  ;;  %v24258_v51 = vld [vmem:[#allocation75_spill] sm:$0xff] }
 0x7c9   : > { %12814 = vmatprep.mubr.bf16.mxu0 %v19034_v7 }
 0x7cb   : > { %16295 = vmatmul.mubr.msk.bf16.gmra.mrb[92].mxu1 %vm954_vm4, %v24249_v14 }
 0x7cc   : > { %6169 = vmatprep.mubr.bf16.mxu1 %v19034_v7 }
 0x7d0   : > { %16587 = vmatmul.mubr.msk.bf16.gmra.mrb[220].mxu0 %vm954_vm4, %v24250_v34 }
 0x7d1   : > { %12824 = vmatprep.mubr.bf16.mxu0 %v19034_v7 }
 0x7d3   : > { %16296 = vmatmul.mubr.msk.bf16.gmra.mrb[96].mxu1 %vm954_vm4, %v24251_v15 }
 0x7d4   : > { %6179 = vmatprep.mubr.bf16.mxu1 %v19034_v7 }
 0x7d8   : > { %16588 = vmatmul.mubr.msk.bf16.gmra.mrb[224].mxu0 %vm954_vm4, %v24252_v23 }
 0x7d9   : > { %12834 = vmatprep.mubr.bf16.mxu0 %v19034_v7 }
 0x7db   : > { %16297 = vmatmul.mubr.msk.bf16.gmra.mrb[100].mxu1 %vm954_vm4, %v24253_v50 }
 0x7dc   : > { %6189 = vmatprep.mubr.bf16.mxu1 %v19034_v7 }
 0x7e0   : > { %16589 = vmatmul.mubr.msk.bf16.gmra.mrb[228].mxu0 %vm954_vm4, %v24254_v39  ;;  %v24257_v39 = vld [vmem:[#allocation73_spill] sm:$0xff] }
 0x7e1   : > { %12844 = vmatprep.mubr.bf16.mxu0 %v19034_v7 }
 0x7e3   : > { %16298 = vmatmul.mubr.msk.bf16.gmra.mrb[104].mxu1 %vm954_vm4, %v24255_v9 }
 0x7e4   : > { %6199 = vmatprep.mubr.bf16.mxu1 %v19034_v7 }
 0x7e6   : > { %v22187_v59 = vpop.f32.mrb[0].mxu1 }
 0x7e7   : > { %v22191_v14 = vpop.f32.mrb[1].mxu1 }
 0x7e8   : > { %16590 = vmatmul.mubr.msk.bf16.gmra.mrb[232].mxu0 %vm954_vm4, %v24256_v1  ;;  %v22193_v15 = vpop.f32.mrb[2].mxu1 }
 0x7e9   : > { %12854 = vmatprep.mubr.bf16.mxu0 %v19034_v7  ;;  %v22196_v50 = vpop.f32.mrb[3].mxu1 }
 0x7eb   : > { %16299 = vmatmul.mubr.msk.bf16.gmra.mrb[108].mxu1 %vm954_vm4, %v24257_v39 }
 0x7ec   : > { %6209 = vmatprep.mubr.bf16.mxu1 %v19034_v7 }
 0x7ee   : > { %v22201_v9 = vpop.f32.mrb[4].mxu1 }
 0x7ef   : > { %v22205_v23 = vpop.f32.mrb[5].mxu1 }
 0x7f0   : > { %16591 = vmatmul.mubr.msk.bf16.gmra.mrb[236].mxu0 %vm954_vm4, %v21801_v21  ;;  %v22207_v1 = vpop.f32.mrb[6].mxu1 }
 0x7f1   : > { %12864 = vmatprep.mubr.bf16.mxu0 %v19034_v7  ;;  %v22210_v34 = vpop.f32.mrb[7].mxu1 }
 0x7f3   : > { %16300 = vmatmul.mubr.msk.bf16.gmra.mrb[112].mxu1 %vm954_vm4, %v24258_v51 }
 0x7f4   : > { %6219 = vmatprep.mubr.bf16.mxu1 %v19034_v7 }
 0x7f6   : > { %v22215_v39 = vpop.f32.mrb[8].mxu1 }
 0x7f7   : > { %v22219_v18 = vpop.f32.mrb[9].mxu1 }
 0x7f8   : > { %16592 = vmatmul.mubr.msk.bf16.gmra.mrb[240].mxu0 %vm954_vm4, %v21812_v44  ;;  %v22221_v21 = vpop.f32.mrb[10].mxu1 }
 0x7f9   : > { %12874 = vmatprep.mubr.bf16.mxu0 %v19034_v7  ;;  %v22224_v16 = vpop.f32.mrb[11].mxu1 }
 0x7fb   : > { %16301 = vmatmul.mubr.msk.bf16.gmra.mrb[116].mxu1 %vm954_vm4, %v24259_v25  ;;  %v24260_v25 = vld [vmem:[#allocation80_spill] sm:$0xff] }
 0x7fc   : > { %6229 = vmatprep.mubr.bf16.mxu1 %v19034_v7 }
 0x7fe   : > { %v22229_v51 = vpop.f32.mrb[12].mxu1 }
 0x7ff   : > { %v22233_v54 = vpop.f32.mrb[13].mxu1 }
 0x800   : > { %16593 = vmatmul.mubr.msk.bf16.gmra.mrb[244].mxu0 %vm954_vm4, %v21822_v22  ;;  %v22235_v44 = vpop.f32.mrb[14].mxu1 }
 0x801   : > { %12884 = vmatprep.mubr.bf16.mxu0 %v19034_v7  ;;  %v22240_v56 = vpop.f32.mrb[15].mxu1 }
 0x803   : > { %16302 = vmatmul.mubr.msk.bf16.gmra.mrb[120].mxu1 %vm954_vm4, %v24260_v25  ;;  %v24263_v25 = vld [vmem:[#allocation83_spill] sm:$0xff] }
 0x804   : > { %6239 = vmatprep.mubr.bf16.mxu1 %v19034_v7 }
 0x806   : > { %v22248_v22 = vpop.f32.mrb[16].mxu1 }
 0x807   : > { %v22252_v61 = vpop.f32.mrb[17].mxu1 }
 0x808   : > { %16594 = vmatmul.mubr.msk.bf16.gmra.mrb[248].mxu0 %vm954_vm4, %v22245_v62  ;;  %v22254_v29 = vpop.f32.mrb[18].mxu1 }
 0x809   : > { %12894 = vmatprep.mubr.bf16.mxu0 %v19034_v7  ;;  %v22258_v42 = vpop.f32.mrb[19].mxu1 }
 0x80b   : > { %16303 = vmatmul.mubr.msk.bf16.gmra.mrb[124].mxu1 %vm954_vm4, %v24263_v25 }
 0x80c   : > { %6249 = vmatprep.mubr.bf16.mxu1 %v19034_v7 }
 0x80e   : > { %v22266_v36 = vpop.f32.mrb[20].mxu1 }
 0x80f   : > { %v22270_v62 = vpop.f32.mrb[21].mxu1 }
 0x810   : > { %16595 = vmatmul.mubr.msk.bf16.gmra.mrb[252].mxu0 %vm954_vm4, %v22263_v28  ;;  %v22272_v8 = vpop.f32.mrb[22].mxu1 }
 0x811   : > { %13734 = vmatprep.mubr.bf16.mxu0 %v19034_v7  ;;  %v22275_v27 = vpop.f32.mrb[23].mxu1 }
 0x813   : > { %16304 = vmatmul.mubr.msk.bf16.gmra.mrb[128].mxu1 %vm954_vm4, %v24265_v63 }
 0x814   : > { %6259 = vmatprep.mubr.bf16.mxu1 %v19034_v7 }
 0x816   : > { %v22280_v37 = vpop.f32.mrb[24].mxu1 }
 0x817   : > { %v22284_v11 = vpop.f32.mrb[25].mxu1 }
 0x818   : > { %16597 = vmatmul.mubr.msk.bf16.vlgmr.msra.gmra.mrb[0].mxu0 %vm954_vm4, %v24191_v10  ;;  %v22286_v25 = vpop.f32.mrb[26].mxu1 }
 0x819   : > { %13744 = vmatprep.mubr.bf16.mxu0 %v19034_v7  ;;  %v22289_v28 = vpop.f32.mrb[27].mxu1 }
 0x81b   : > { %16305 = vmatmul.mubr.msk.bf16.gmra.mrb[132].mxu1 %vm954_vm4, %v24266_v40 }
 0x81c   : > { %6269 = vmatprep.mubr.bf16.mxu1 %v19034_v7 }
 0x81e   : > { %v22294_v63 = vpop.f32.mrb[28].mxu1 }
 0x81f   : > { %24267 = vst [vmem:[#allocation101_spill] sm:$0xff] %v22294_v63  ;;  %v22298_v35 = vpop.f32.mrb[29].mxu1 }
 0x820   : > { %16598 = vmatmul.mubr.msk.bf16.gmra.mrb[4].mxu0 %vm954_vm4, %v24192_v5  ;;  %24268 = vst [vmem:[#allocation130_spill] sm:$0xff] %v22298_v35  ;;  %v22300_v10 = vpop.f32.mrb[30].mxu1  ;;  %v24276_v35 = vld [vmem:[#allocation102_spill] sm:$0xff] }
 0x821   : > { %24269 = vst [vmem:[#allocation82_spill] sm:$0xff] %v22300_v10  ;;  %13754 = vmatprep.mubr.bf16.mxu0 %v19034_v7  ;;  %v22303_v13 = vpop.f32.mrb[31].mxu1 }
 0x822   : > { %24270 = vst [vmem:[#allocation87_spill] sm:$0xff] %v22303_v13 }
 0x823   : > { %16306 = vmatmul.mubr.msk.bf16.gmra.mrb[136].mxu1 %vm954_vm4, %v24271_v6 }
 0x824   : > { %6279 = vmatprep.mubr.bf16.mxu1 %v19034_v7 }
 0x826   : > { %v22308_v40 = vpop.f32.mrb[32].mxu1 }
 0x827   : > { %24272 = vst [vmem:[#allocation88_spill] sm:$0xff] %v22308_v40  ;;  %v22312_v63 = vpop.f32.mrb[33].mxu1 }
 0x828   : > { %16599 = vmatmul.mubr.msk.bf16.gmra.mrb[8].mxu0 %vm954_vm4, %v24193_v55  ;;  %24273 = vst [vmem:[#allocation21_spill] sm:$0xff] %v22312_v63  ;;  %v22314_v5 = vpop.f32.mrb[34].mxu1  ;;  %v24281_v63 = vld [vmem:[#allocation104_spill] sm:$0xff] }
 0x829   : > { %24274 = vst [vmem:[#allocation25_spill] sm:$0xff] %v22314_v5  ;;  %13764 = vmatprep.mubr.bf16.mxu0 %v19034_v7  ;;  %v22317_v10 = vpop.f32.mrb[35].mxu1 }
 0x82a   : > { %24275 = vst [vmem:[#allocation28_spill] sm:$0xff] %v22317_v10 }
 0x82b   : > { %16307 = vmatmul.mubr.msk.bf16.gmra.mrb[140].mxu1 %vm954_vm4, %v24276_v35 }
 0x82c   : > { %6289 = vmatprep.mubr.bf16.mxu1 %v19034_v7 }
 0x82e   : > { %v22322_v13 = vpop.f32.mrb[36].mxu1 }
 0x82f   : > { %24277 = vst [vmem:[#allocation140_spill] sm:$0xff] %v22322_v13  ;;  %v22326_v40 = vpop.f32.mrb[37].mxu1 }
 0x830   : > { %16600 = vmatmul.mubr.msk.bf16.gmra.mrb[12].mxu0 %vm954_vm4, %v24194_v60  ;;  %24278 = vst [vmem:[#allocation31_spill] sm:$0xff] %v22326_v40  ;;  %v22328_v55 = vpop.f32.mrb[38].mxu1  ;;  %v24286_v40 = vld [vmem:[#allocation105_spill] sm:$0xff] }
 0x831   : > { %24279 = vst [vmem:[#allocation141_spill] sm:$0xff] %v22328_v55  ;;  %13774 = vmatprep.mubr.bf16.mxu0 %v19034_v7  ;;  %v22331_v5 = vpop.f32.mrb[39].mxu1 }
 0x832   : > { %24280 = vst [vmem:[#allocation34_spill] sm:$0xff] %v22331_v5 }
 0x833   : > { %16308 = vmatmul.mubr.msk.bf16.gmra.mrb[144].mxu1 %vm954_vm4, %v24281_v63 }
 0x834   : > { %6299 = vmatprep.mubr.bf16.mxu1 %v19034_v7 }
 0x836   : > { %v22336_v10 = vpop.f32.mrb[40].mxu1 }
 0x837   : > { %24282 = vst [vmem:[#allocation142_spill] sm:$0xff] %v22336_v10  ;;  %v22340_v13 = vpop.f32.mrb[41].mxu1 }
 0x838   : > { %16601 = vmatmul.mubr.msk.bf16.gmra.mrb[16].mxu0 %vm954_vm4, %v24195_v46  ;;  %24283 = vst [vmem:[#allocation37_spill] sm:$0xff] %v22340_v13  ;;  %v22342_v60 = vpop.f32.mrb[42].mxu1  ;;  %v24291_v13 = vld [vmem:[#allocation107_spill] sm:$0xff] }
 0x839   : > { %24284 = vst [vmem:[#allocation143_spill] sm:$0xff] %v22342_v60  ;;  %13784 = vmatprep.mubr.bf16.mxu0 %v19034_v7  ;;  %v22345_v55 = vpop.f32.mrb[43].mxu1 }
 0x83a   : > { %24285 = vst [vmem:[#allocation40_spill] sm:$0xff] %v22345_v55 }
 0x83b   : > { %16309 = vmatmul.mubr.msk.bf16.gmra.mrb[148].mxu1 %vm954_vm4, %v24286_v40 }
 0x83c   : > { %6309 = vmatprep.mubr.bf16.mxu1 %v19034_v7 }
 0x83e   : > { %v22350_v5 = vpop.f32.mrb[44].mxu1 }
 0x83f   : > { %24287 = vst [vmem:[#allocation144_spill] sm:$0xff] %v22350_v5  ;;  %v22354_v10 = vpop.f32.mrb[45].mxu1 }
 0x840   : > { %16602 = vmatmul.mubr.msk.bf16.gmra.mrb[20].mxu0 %vm954_vm4, %v24196_v31  ;;  %24288 = vst [vmem:[#allocation44_spill] sm:$0xff] %v22354_v10  ;;  %v22356_v46 = vpop.f32.mrb[46].mxu1  ;;  %v24296_v10 = vld [vmem:[#allocation108_spill] sm:$0xff] }
 0x841   : > { %24289 = vst [vmem:[#allocation145_spill] sm:$0xff] %v22356_v46  ;;  %13794 = vmatprep.mubr.bf16.mxu0 %v19034_v7  ;;  %v22359_v60 = vpop.f32.mrb[47].mxu1 }
 0x842   : > { %24290 = vst [vmem:[#allocation49_spill] sm:$0xff] %v22359_v60 }
 0x843   : > { %16310 = vmatmul.mubr.msk.bf16.gmra.mrb[152].mxu1 %vm954_vm4, %v24291_v13 }
 0x844   : > { %6319 = vmatprep.mubr.bf16.mxu1 %v19034_v7 }
 0x846   : > { %v22364_v55 = vpop.f32.mrb[48].mxu1 }
 0x847   : > { %24292 = vst [vmem:[#allocation146_spill] sm:$0xff] %v22364_v55  ;;  %v22368_v5 = vpop.f32.mrb[49].mxu1 }
 0x848   : > { %16603 = vmatmul.mubr.msk.bf16.gmra.mrb[24].mxu0 %vm954_vm4, %v24197_v32  ;;  %24293 = vst [vmem:[#allocation54_spill] sm:$0xff] %v22368_v5  ;;  %v22370_v31 = vpop.f32.mrb[50].mxu1  ;;  %v24301_v5 = vld [vmem:[#allocation110_spill] sm:$0xff] }
 0x849   : > { %24294 = vst [vmem:[#allocation90_spill] sm:$0xff] %v22370_v31  ;;  %13804 = vmatprep.mubr.bf16.mxu0 %v19034_v7  ;;  %v22373_v46 = vpop.f32.mrb[51].mxu1 }
 0x84a   : > { %24295 = vst [vmem:[#allocation59_spill] sm:$0xff] %v22373_v46 }
 0x84b   : > { %16311 = vmatmul.mubr.msk.bf16.gmra.mrb[156].mxu1 %vm954_vm4, %v24296_v10 }
 0x84c   : > { %6329 = vmatprep.mubr.bf16.mxu1 %v19034_v7 }
 0x84e   : > { %v22378_v60 = vpop.f32.mrb[52].mxu1 }
 0x84f   : > { %24297 = vst [vmem:[#allocation91_spill] sm:$0xff] %v22378_v60  ;;  %v22382_v55 = vpop.f32.mrb[53].mxu1 }
 0x850   : > { %16604 = vmatmul.mubr.msk.bf16.gmra.mrb[28].mxu0 %vm954_vm4, %v24198_v4  ;;  %24298 = vst [vmem:[#allocation61_spill] sm:$0xff] %v22382_v55  ;;  %v22384_v32 = vpop.f32.mrb[54].mxu1  ;;  %v24306_v55 = vld [vmem:[#allocation111_spill] sm:$0xff] }
 0x851   : > { %24299 = vst [vmem:[#allocation64_spill] sm:$0xff] %v22384_v32  ;;  %13814 = vmatprep.mubr.bf16.mxu0 %v19034_v7  ;;  %v22387_v31 = vpop.f32.mrb[55].mxu1 }
 0x852   : > { %24300 = vst [vmem:[#allocation67_spill] sm:$0xff] %v22387_v31 }
 0x853   : > { %16312 = vmatmul.mubr.msk.bf16.gmra.mrb[160].mxu1 %vm954_vm4, %v24301_v5 }
 0x854   : > { %6339 = vmatprep.mubr.bf16.mxu1 %v19034_v7 }
 0x856   : > { %v22392_v46 = vpop.f32.mrb[56].mxu1 }
 0x857   : > { %24302 = vst [vmem:[#allocation69_spill] sm:$0xff] %v22392_v46  ;;  %v22396_v60 = vpop.f32.mrb[57].mxu1 }
 0x858   : > { %16605 = vmatmul.mubr.msk.bf16.gmra.mrb[32].mxu0 %vm954_vm4, %v24199_v19  ;;  %24303 = vst [vmem:[#allocation20_spill] sm:$0xff] %v22396_v60  ;;  %v22398_v4 = vpop.f32.mrb[58].mxu1  ;;  %v24311_v60 = vld [vmem:[#allocation113_spill] sm:$0xff] }
 0x859   : > { %24304 = vst [vmem:[#allocation23_spill] sm:$0xff] %v22398_v4  ;;  %13824 = vmatprep.mubr.bf16.mxu0 %v19034_v7  ;;  %v22401_v32 = vpop.f32.mrb[59].mxu1 }
 0x85a   : > { %24305 = vst [vmem:[#allocation81_spill] sm:$0xff] %v22401_v32 }
 0x85b   : > { %16313 = vmatmul.mubr.msk.bf16.gmra.mrb[164].mxu1 %vm954_vm4, %v24306_v55 }
 0x85c   : > { %6349 = vmatprep.mubr.bf16.mxu1 %v19034_v7 }
 0x85e   : > { %v22406_v31 = vpop.f32.mrb[60].mxu1 }
 0x85f   : > { %24307 = vst [vmem:[#allocation19_spill] sm:$0xff] %v22406_v31  ;;  %v22410_v46 = vpop.f32.mrb[61].mxu1 }
 0x860   : > { %16606 = vmatmul.mubr.msk.bf16.gmra.mrb[36].mxu0 %vm954_vm4, %v24200_v52  ;;  %24308 = vst [vmem:[#allocation22_spill] sm:$0xff] %v22410_v46  ;;  %v22412_v19 = vpop.f32.mrb[62].mxu1  ;;  %v24316_v46 = vld [vmem:[#allocation114_spill] sm:$0xff] }
 0x861   : > { %24309 = vst [vmem:[#allocation24_spill] sm:$0xff] %v22412_v19  ;;  %13834 = vmatprep.mubr.bf16.mxu0 %v19034_v7  ;;  %v22415_v4 = vpop.f32.mrb[63].mxu1 }
 0x862   : > { %24310 = vst [vmem:[#allocation26_spill] sm:$0xff] %v22415_v4 }
 0x863   : > { %16314 = vmatmul.mubr.msk.bf16.gmra.mrb[168].mxu1 %vm954_vm4, %v24311_v60 }
 0x864   : > { %6359 = vmatprep.mubr.bf16.mxu1 %v19034_v7 }
 0x866   : > { %v22420_v32 = vpop.f32.mrb[64].mxu1 }
 0x867   : > { %24312 = vst [vmem:[#allocation27_spill] sm:$0xff] %v22420_v32  ;;  %v22424_v31 = vpop.f32.mrb[65].mxu1 }
 0x868   : > { %16607 = vmatmul.mubr.msk.bf16.gmra.mrb[40].mxu0 %vm954_vm4, %v24201_v3  ;;  %24313 = vst [vmem:[#allocation29_spill] sm:$0xff] %v22424_v31  ;;  %v22426_v52 = vpop.f32.mrb[66].mxu1  ;;  %v24321_v31 = vld [vmem:[#allocation116_spill] sm:$0xff] }
 0x869   : > { %24314 = vst [vmem:[#allocation30_spill] sm:$0xff] %v22426_v52  ;;  %13844 = vmatprep.mubr.bf16.mxu0 %v19034_v7  ;;  %v22429_v19 = vpop.f32.mrb[67].mxu1 }
 0x86a   : > { %24315 = vst [vmem:[#allocation32_spill] sm:$0xff] %v22429_v19 }
 0x86b   : > { %16315 = vmatmul.mubr.msk.bf16.gmra.mrb[172].mxu1 %vm954_vm4, %v24316_v46 }
 0x86c   : > { %6369 = vmatprep.mubr.bf16.mxu1 %v19034_v7 }
 0x86e   : > { %v22434_v4 = vpop.f32.mrb[68].mxu1 }
 0x86f   : > { %24317 = vst [vmem:[#allocation33_spill] sm:$0xff] %v22434_v4  ;;  %v22438_v32 = vpop.f32.mrb[69].mxu1 }
 0x870   : > { %16608 = vmatmul.mubr.msk.bf16.gmra.mrb[44].mxu0 %vm954_vm4, %v24202_v41  ;;  %24318 = vst [vmem:[#allocation35_spill] sm:$0xff] %v22438_v32  ;;  %v22440_v3 = vpop.f32.mrb[70].mxu1  ;;  %v24326_v32 = vld [vmem:[#allocation117_spill] sm:$0xff] }
 0x871   : > { %24319 = vst [vmem:[#allocation36_spill] sm:$0xff] %v22440_v3  ;;  %13854 = vmatprep.mubr.bf16.mxu0 %v19034_v7  ;;  %v22443_v52 = vpop.f32.mrb[71].mxu1 }
 0x872   : > { %24320 = vst [vmem:[#allocation38_spill] sm:$0xff] %v22443_v52 }
 0x873   : > { %16316 = vmatmul.mubr.msk.bf16.gmra.mrb[176].mxu1 %vm954_vm4, %v24321_v31 }
 0x874   : > { %6379 = vmatprep.mubr.bf16.mxu1 %v19034_v7 }
 0x876   : > { %v22448_v19 = vpop.f32.mrb[72].mxu1 }
 0x877   : > { %24322 = vst [vmem:[#allocation39_spill] sm:$0xff] %v22448_v19  ;;  %v22452_v4 = vpop.f32.mrb[73].mxu1 }
 0x878   : > { %16609 = vmatmul.mubr.msk.bf16.gmra.mrb[48].mxu0 %vm954_vm4, %v24203_v2  ;;  %24323 = vst [vmem:[#allocation41_spill] sm:$0xff] %v22452_v4  ;;  %v22454_v41 = vpop.f32.mrb[74].mxu1  ;;  %v24331_v4 = vld [vmem:[#allocation119_spill] sm:$0xff] }
 0x879   : > { %24324 = vst [vmem:[#allocation43_spill] sm:$0xff] %v22454_v41  ;;  %13864 = vmatprep.mubr.bf16.mxu0 %v19034_v7  ;;  %v22457_v3 = vpop.f32.mrb[75].mxu1 }
 0x87a   : > { %24325 = vst [vmem:[#allocation45_spill] sm:$0xff] %v22457_v3 }
 0x87b   : > { %16317 = vmatmul.mubr.msk.bf16.gmra.mrb[180].mxu1 %vm954_vm4, %v24326_v32 }
 0x87c   : > { %6389 = vmatprep.mubr.bf16.mxu1 %v19034_v7 }
 0x87e   : > { %v22462_v52 = vpop.f32.mrb[76].mxu1 }
 0x87f   : > { %24327 = vst [vmem:[#allocation48_spill] sm:$0xff] %v22462_v52  ;;  %v22466_v19 = vpop.f32.mrb[77].mxu1 }
 0x880   : > { %16610 = vmatmul.mubr.msk.bf16.gmra.mrb[52].mxu0 %vm954_vm4, %v24204_v0  ;;  %24328 = vst [vmem:[#allocation50_spill] sm:$0xff] %v22466_v19  ;;  %v22468_v2 = vpop.f32.mrb[78].mxu1  ;;  %v24336_v19 = vld [vmem:[#allocation120_spill] sm:$0xff] }
 0x881   : > { %24329 = vst [vmem:[#allocation53_spill] sm:$0xff] %v22468_v2  ;;  %13874 = vmatprep.mubr.bf16.mxu0 %v19034_v7  ;;  %v22471_v41 = vpop.f32.mrb[79].mxu1 }
 0x882   : > { %24330 = vst [vmem:[#allocation55_spill] sm:$0xff] %v22471_v41 }
 0x883   : > { %16318 = vmatmul.mubr.msk.bf16.gmra.mrb[184].mxu1 %vm954_vm4, %v24331_v4 }
 0x884   : > { %6399 = vmatprep.mubr.bf16.mxu1 %v19034_v7 }
 0x886   : > { %v22476_v3 = vpop.f32.mrb[80].mxu1 }
 0x887   : > { %24332 = vst [vmem:[#allocation58_spill] sm:$0xff] %v22476_v3  ;;  %v22480_v52 = vpop.f32.mrb[81].mxu1 }
 0x888   : > { %16611 = vmatmul.mubr.msk.bf16.gmra.mrb[56].mxu0 %vm954_vm4, %v24205_v20  ;;  %24333 = vst [vmem:[#allocation60_spill] sm:$0xff] %v22480_v52  ;;  %v22482_v0 = vpop.f32.mrb[82].mxu1  ;;  %v24341_v52 = vld [vmem:[#allocation122_spill] sm:$0xff] }
 0x889   : > { %24334 = vst [vmem:[#allocation63_spill] sm:$0xff] %v22482_v0  ;;  %13884 = vmatprep.mubr.bf16.mxu0 %v19034_v7  ;;  %v22485_v2 = vpop.f32.mrb[83].mxu1 }
 0x88a   : > { %24335 = vst [vmem:[#allocation65_spill] sm:$0xff] %v22485_v2 }
 0x88b   : > { %16319 = vmatmul.mubr.msk.bf16.gmra.mrb[188].mxu1 %vm954_vm4, %v24336_v19 }
 0x88c   : > { %6409 = vmatprep.mubr.bf16.mxu1 %v19034_v7 }
 0x88e   : > { %v22490_v41 = vpop.f32.mrb[84].mxu1 }
 0x88f   : > { %24337 = vst [vmem:[#allocation68_spill] sm:$0xff] %v22490_v41  ;;  %v22494_v3 = vpop.f32.mrb[85].mxu1 }
 0x890   : > { %16612 = vmatmul.mubr.msk.bf16.gmra.mrb[60].mxu0 %vm954_vm4, %v24206_v49  ;;  %24338 = vst [vmem:[#allocation70_spill] sm:$0xff] %v22494_v3  ;;  %v22496_v20 = vpop.f32.mrb[86].mxu1  ;;  %v24346_v3 = vld [vmem:[#allocation123_spill] sm:$0xff] }
 0x891   : > { %24339 = vst [vmem:[#allocation73_spill] sm:$0xff] %v22496_v20  ;;  %13894 = vmatprep.mubr.bf16.mxu0 %v19034_v7  ;;  %v22499_v0 = vpop.f32.mrb[87].mxu1 }
 0x892   : > { %24340 = vst [vmem:[#allocation75_spill] sm:$0xff] %v22499_v0 }
 0x893   : > { %16320 = vmatmul.mubr.msk.bf16.gmra.mrb[192].mxu1 %vm954_vm4, %v24341_v52 }
 0x894   : > { %6419 = vmatprep.mubr.bf16.mxu1 %v19034_v7 }
 0x896   : > { %v22504_v2 = vpop.f32.mrb[88].mxu1 }
 0x897   : > { %24342 = vst [vmem:[#allocation78_spill] sm:$0xff] %v22504_v2  ;;  %v22508_v41 = vpop.f32.mrb[89].mxu1 }
 0x898   : > { %16613 = vmatmul.mubr.msk.bf16.gmra.mrb[64].mxu0 %vm954_vm4, %v24207_v57  ;;  %24343 = vst [vmem:[#allocation80_spill] sm:$0xff] %v22508_v41  ;;  %v22510_v49 = vpop.f32.mrb[90].mxu1  ;;  %v24351_v41 = vld [vmem:[#allocation125_spill] sm:$0xff] }
 0x899   : > { %24344 = vst [vmem:[#allocation135_spill] sm:$0xff] %v22510_v49  ;;  %13904 = vmatprep.mubr.bf16.mxu0 %v19034_v7  ;;  %v22513_v20 = vpop.f32.mrb[91].mxu1 }
 0x89a   : > { %24345 = vst [vmem:[#allocation83_spill] sm:$0xff] %v22513_v20 }
 0x89b   : > { %16321 = vmatmul.mubr.msk.bf16.gmra.mrb[196].mxu1 %vm954_vm4, %v24346_v3 }
 0x89c   : > { %6429 = vmatprep.mubr.bf16.mxu1 %v19034_v7 }
 0x89e   : > { %v22518_v0 = vpop.f32.mrb[92].mxu1 }
 0x89f   : > { %24347 = vst [vmem:[#allocation85_spill] sm:$0xff] %v22518_v0  ;;  %v22522_v2 = vpop.f32.mrb[93].mxu1 }
 0x8a0   : > { %16614 = vmatmul.mubr.msk.bf16.gmra.mrb[68].mxu0 %vm954_vm4, %v24208_v38  ;;  %24348 = vst [vmem:[#allocation86_spill] sm:$0xff] %v22522_v2  ;;  %v22524_v57 = vpop.f32.mrb[94].mxu1  ;;  %v24356_v2 = vld [vmem:[#allocation42_spill] sm:$0xff] }
 0x8a1   : > { %24349 = vst [vmem:[#allocation100_spill] sm:$0xff] %v22524_v57  ;;  %13914 = vmatprep.mubr.bf16.mxu0 %v19034_v7  ;;  %v22527_v49 = vpop.f32.mrb[95].mxu1 }
 0x8a2   : > { %24350 = vst [vmem:[#allocation102_spill] sm:$0xff] %v22527_v49 }
 0x8a3   : > { %16322 = vmatmul.mubr.msk.bf16.gmra.mrb[200].mxu1 %vm954_vm4, %v24351_v41 }
 0x8a4   : > { %6439 = vmatprep.mubr.bf16.mxu1 %v19034_v7 }
 0x8a6   : > { %v22532_v20 = vpop.f32.mrb[96].mxu1 }
 0x8a7   : > { %24352 = vst [vmem:[#allocation104_spill] sm:$0xff] %v22532_v20  ;;  %v22536_v0 = vpop.f32.mrb[97].mxu1 }
 0x8a8   : > { %16615 = vmatmul.mubr.msk.bf16.gmra.mrb[72].mxu0 %vm954_vm4, %v24209_v17  ;;  %24353 = vst [vmem:[#allocation105_spill] sm:$0xff] %v22536_v0  ;;  %v22538_v38 = vpop.f32.mrb[98].mxu1  ;;  %v24361_v0 = vld [vmem:[#allocation46_spill] sm:$0xff] }
 0x8a9   : > { %24354 = vst [vmem:[#allocation107_spill] sm:$0xff] %v22538_v38  ;;  %13924 = vmatprep.mubr.bf16.mxu0 %v19034_v7  ;;  %v22541_v57 = vpop.f32.mrb[99].mxu1 }
 0x8aa   : > { %24355 = vst [vmem:[#allocation108_spill] sm:$0xff] %v22541_v57 }
 0x8ab   : > { %16323 = vmatmul.mubr.msk.bf16.gmra.mrb[204].mxu1 %vm954_vm4, %v24356_v2 }
 0x8ac   : > { %6449 = vmatprep.mubr.bf16.mxu1 %v19034_v7 }
 0x8ae   : > { %v22546_v49 = vpop.f32.mrb[100].mxu1 }
 0x8af   : > { %24357 = vst [vmem:[#allocation110_spill] sm:$0xff] %v22546_v49  ;;  %v22550_v20 = vpop.f32.mrb[101].mxu1 }
 0x8b0   : > { %16616 = vmatmul.mubr.msk.bf16.gmra.mrb[76].mxu0 %vm954_vm4, %v24210_v48  ;;  %24358 = vst [vmem:[#allocation111_spill] sm:$0xff] %v22550_v20  ;;  %v22552_v17 = vpop.f32.mrb[102].mxu1  ;;  %v24366_v20 = vld [vmem:[#allocation47_spill] sm:$0xff] }
 0x8b1   : > { %24359 = vst [vmem:[#allocation113_spill] sm:$0xff] %v22552_v17  ;;  %13934 = vmatprep.mubr.bf16.mxu0 %v19034_v7  ;;  %v22555_v38 = vpop.f32.mrb[103].mxu1 }
 0x8b2   : > { %24360 = vst [vmem:[#allocation114_spill] sm:$0xff] %v22555_v38 }
 0x8b3   : > { %16324 = vmatmul.mubr.msk.bf16.gmra.mrb[208].mxu1 %vm954_vm4, %v24361_v0 }
 0x8b4   : > { %6459 = vmatprep.mubr.bf16.mxu1 %v19034_v7 }
 0x8b6   : > { %v22560_v57 = vpop.f32.mrb[104].mxu1 }
 0x8b7   : > { %24362 = vst [vmem:[#allocation116_spill] sm:$0xff] %v22560_v57  ;;  %v22564_v49 = vpop.f32.mrb[105].mxu1 }
 0x8b8   : > { %16617 = vmatmul.mubr.msk.bf16.gmra.mrb[80].mxu0 %vm954_vm4, %v24211_v33  ;;  %24363 = vst [vmem:[#allocation117_spill] sm:$0xff] %v22564_v49  ;;  %v22566_v48 = vpop.f32.mrb[106].mxu1  ;;  %v24371_v49 = vld [vmem:[#allocation51_spill] sm:$0xff] }
 0x8b9   : > { %24364 = vst [vmem:[#allocation119_spill] sm:$0xff] %v22566_v48  ;;  %13944 = vmatprep.mubr.bf16.mxu0 %v19034_v7  ;;  %v22569_v17 = vpop.f32.mrb[107].mxu1 }
 0x8ba   : > { %24365 = vst [vmem:[#allocation120_spill] sm:$0xff] %v22569_v17 }
 0x8bb   : > { %16325 = vmatmul.mubr.msk.bf16.gmra.mrb[212].mxu1 %vm954_vm4, %v24366_v20  ;;  %v24393_v20 = vld [vmem:[#allocation74_spill] sm:$0xff] }
 0x8bc   : > { %6469 = vmatprep.mubr.bf16.mxu1 %v19034_v7 }
 0x8be   : > { %v22574_v38 = vpop.f32.mrb[108].mxu1 }
 0x8bf   : > { %24367 = vst [vmem:[#allocation122_spill] sm:$0xff] %v22574_v38  ;;  %v22578_v57 = vpop.f32.mrb[109].mxu1 }
 0x8c0   : > { %16618 = vmatmul.mubr.msk.bf16.gmra.mrb[84].mxu0 %vm954_vm4, %v24212_v30  ;;  %24368 = vst [vmem:[#allocation123_spill] sm:$0xff] %v22578_v57  ;;  %v22580_v33 = vpop.f32.mrb[110].mxu1  ;;  %v24376_v57 = vld [vmem:[#allocation89_spill] sm:$0xff] }
 0x8c1   : > { %24369 = vst [vmem:[#allocation125_spill] sm:$0xff] %v22580_v33  ;;  %13954 = vmatprep.mubr.bf16.mxu0 %v19034_v7  ;;  %v22583_v48 = vpop.f32.mrb[111].mxu1 }
 0x8c2   : > { %24370 = vst [vmem:[#allocation151_spill] sm:$0xff] %v22583_v48 }
 0x8c3   : > { %16326 = vmatmul.mubr.msk.bf16.gmra.mrb[216].mxu1 %vm954_vm4, %v24371_v49  ;;  %v15399_v49 = vld [vmem:[%s19246_s27] sm:$0x3]  ;;  %s19035_s27 = smov [#allocation9]  }
 0x8c4   : > { %6479 = vmatprep.mubr.bf16.mxu1 %v19034_v7  ;;  %s18903_s15 = sshll.u32 %s19035_s27, 4  ;;  %s18904_s15 = int_to_ptr.vmem [resolvable:$false] %s18903_s15 }
 0x8c5   : > { %s18905_s21 = scalar_lea.vmem %s18904_s15, 65536  ;;  %p18906_p7 = scmp.lt.s32.totalorder %s23519_s19, %s18904_s15 }
 0x8c6   : > { %v22588_v17 = vpop.f32.mrb[112].mxu1  ;;  %p18907_p13 = scmp.lt.s32.totalorder %s18905_s21, %s18899_s23 }
 0x8c7   : > { %24372 = vst [vmem:[#allocation152_spill] sm:$0xff] %v22588_v17  ;;  %v22592_v38 = vpop.f32.mrb[113].mxu1 }
 0x8c8   : > { %16619 = vmatmul.mubr.msk.bf16.gmra.mrb[88].mxu0 %vm954_vm4, %v24213_v24  ;;  %24373 = vst [vmem:[#allocation153_spill] sm:$0xff] %v22592_v38  ;;  %v22594_v30 = vpop.f32.mrb[114].mxu1  ;;  %v24381_v38 = vld [vmem:[#allocation56_spill] sm:$0xff]  ;;  %p18908_p12 = por %p18907_p13, %p18906_p7 }
 0x8c9   : > { %24374 = vst [vmem:[#allocation154_spill] sm:$0xff] %v22594_v30  ;;  %13964 = vmatprep.mubr.bf16.mxu0 %v19034_v7  ;;  %v22597_v33 = vpop.f32.mrb[115].mxu1 }
 0x8ca   : > { %24375 = vst [vmem:[#allocation155_spill] sm:$0xff] %v22597_v33  ;;  %p18909_p0 = pnand %p18908_p12, %p18902_p11 }
 0x8cb   : > { %16327 = vmatmul.mubr.msk.bf16.gmra.mrb[220].mxu1 %vm954_vm4, %v24376_v57  ;;  %v24392_v57 = vld [vmem:[#allocation128_spill] sm:$0xff] }
 0x8cc   : > { %6489 = vmatprep.mubr.bf16.mxu1 %v19034_v7 }
 0x8ce   : > { %v22602_v48 = vpop.f32.mrb[116].mxu1 }
 0x8cf   : > { %24377 = vst [vmem:[#allocation156_spill] sm:$0xff] %v22602_v48  ;;  %v22606_v17 = vpop.f32.mrb[117].mxu1 }
 0x8d0   : > { %16620 = vmatmul.mubr.msk.bf16.gmra.mrb[92].mxu0 %vm954_vm4, %v24214_v58  ;;  %24378 = vst [vmem:[#allocation157_spill] sm:$0xff] %v22606_v17  ;;  %v22608_v24 = vpop.f32.mrb[118].mxu1  ;;  %v15401_v17 = vlaneseq }
 0x8d1   : > { %24379 = vst [vmem:[#allocation158_spill] sm:$0xff] %v22608_v24  ;;  %13974 = vmatprep.mubr.bf16.mxu0 %v19034_v7  ;;  %v22611_v30 = vpop.f32.mrb[119].mxu1 }
 0x8d2   : > { %24380 = vst [vmem:[#allocation159_spill] sm:$0xff] %v22611_v30  ;;  %v24386_v30 = vld [vmem:[#allocation92_spill] sm:$0xff] }
 0x8d3   : > { %16328 = vmatmul.mubr.msk.bf16.gmra.mrb[224].mxu1 %vm954_vm4, %v24381_v38 }
 0x8d4   : > { %6499 = vmatprep.mubr.bf16.mxu1 %v19034_v7 }
 0x8d6   : > { %v22616_v33 = vpop.f32.mrb[120].mxu1 }
 0x8d7   : > { %24382 = vst [vmem:[#allocation160_spill] sm:$0xff] %v22616_v33  ;;  %v22620_v48 = vpop.f32.mrb[121].mxu1  ;;  %v24388_v33 = vld [vmem:[#allocation71_spill] sm:$0xff] }
 0x8d8   : > { %16621 = vmatmul.mubr.msk.bf16.gmra.mrb[96].mxu0 %vm954_vm4, %v24215_v47  ;;  %24383 = vst [vmem:[#allocation161_spill] sm:$0xff] %v22620_v48  ;;  %v22622_v58 = vpop.f32.mrb[122].mxu1 }
 0x8d9   : > { %24384 = vst [vmem:[#allocation162_spill] sm:$0xff] %v22622_v58  ;;  %13984 = vmatprep.mubr.bf16.mxu0 %v19034_v7  ;;  %v22625_v24 = vpop.f32.mrb[123].mxu1 }
 0x8da   : > { %24385 = vst [vmem:[#allocation163_spill] sm:$0xff] %v22625_v24  ;;  %v15402_v24 = vshrl.u32 %v15401_v17, 7 }
 0x8db   : > { %16329 = vmatmul.mubr.msk.bf16.gmra.mrb[228].mxu1 %vm954_vm4, %v24386_v30 }
 0x8dc   : > { %6509 = vmatprep.mubr.bf16.mxu1 %v19034_v7  ;;  %v15403_v30 = vsub.s32 0, %v15402_v24 }
 0x8de   : > { %v22630_v38 = vpop.f32.mrb[124].mxu1 }
 0x8df   : > { %24387 = vst [vmem:[#allocation164_spill] sm:$0xff] %v22630_v38  ;;  %v22634_v47 = vpop.f32.mrb[125].mxu1  ;;  %v15407_v38 = vsub.s32 1, %v15402_v24 }
 0x8e0   : > { %16622 = vmatmul.mubr.msk.bf16.gmra.mrb[100].mxu0 %vm954_vm4, %v24388_v33  ;;  %24389 = vst [vmem:[#allocation71_spill] sm:$0xff] %v22634_v47  ;;  %v22636_v48 = vpop.f32.mrb[126].mxu1  ;;  %v22648_v33 = vrot.slane %v15399_v49, %v15403_v30 }
 0x8e1   : > { %24390 = vst [vmem:[#allocation165_spill] sm:$0xff] %v22636_v48  ;;  %13994 = vmatprep.mubr.bf16.mxu0 %v19034_v7  ;;  %v22639_v58 = vpop.f32.mrb[127].mxu1 }
 0x8e2   : > { %24391 = vst [vmem:[#allocation166_spill] sm:$0xff] %v22639_v58  ;;  %v22650_v58 = vrot.slane %v15399_v49, %v15407_v38 }
 0x8e3   : > { %16330 = vmatmul.mubr.msk.bf16.gmra.mrb[232].mxu1 %vm954_vm4, %v24392_v57  ;;  %v24394_v57 = vld [vmem:[#allocation95_spill] sm:$0xff] }
 0x8e4   : > { %6519 = vmatprep.mubr.bf16.mxu1 %v19034_v7 }
 0x8e8   : > { %16623 = vmatmul.mubr.msk.bf16.gmra.mrb[104].mxu0 %vm954_vm4, %v24393_v20 }
 0x8e9   : > { %14004 = vmatprep.mubr.bf16.mxu0 %v19034_v7 }
 0x8eb   : > { %v13736_v48 = vpop.f32.mrb[0].mxu0  ;;  %16331 = vmatmul.mubr.msk.bf16.gmra.mrb[236].mxu1 %vm954_vm4, %v24394_v57 }
 0x8ec   : > { %v16672_v17 = vadd.f32 %v13736_v48, %v22187_v59  ;;  %v13738_v47 = vpop.f32.mrb[1].mxu0  ;;  %6529 = vmatprep.mubr.bf16.mxu1 %v19034_v7  ;;  %v24395_v48 = vld [vmem:[#allocation76_spill] sm:$0xff] }
 0x8ed   : > { %v16673_v24 = vadd.f32 %v13738_v47, %v22191_v14  ;;  %v13740_v20 = vpop.f32.mrb[2].mxu0 }
 0x8ee   : > { %v15411_v30 = vadd.f32 %v16672_v17, %v22648_v33  ;;  %v16674_v0 = vadd.f32 %v13740_v20, %v22193_v15  ;;  %v13742_v2 = vpop.f32.mrb[3].mxu0 }
 0x8ef   : > { %v15412_v49 = vadd.f32 %v16673_v24, %v22650_v58  ;;  %v16675_v59 = vadd.f32 %v13742_v2, %v22196_v50  ;;  %v24396_v50 = vld [vmem:[#allocation66_spill] sm:$0xff] }
 0x8f0   : > { %15667 = vst [vmem:[%s19262_s5] sm:$0xff] %v15411_v30  ;;  %v15413_v38 = vadd.f32 %v16674_v0, %v22648_v33  ;;  %16624 = vmatmul.mubr.msk.bf16.gmra.mrb[108].mxu0 %vm954_vm4, %v24395_v48 }
 0x8f1   : > { %15668 = vst [vmem:[%s19262_s5 + $0x8] sm:$0xff] %v15412_v49  ;;  %v15414_v14 = vadd.f32 %v16675_v59, %v22650_v58  ;;  %14014 = vmatprep.mubr.bf16.mxu0 %v19034_v7 }
 0x8f2   : > { %15669 = vst [vmem:[%s19262_s5 + $0x10] sm:$0xff] %v15413_v38  ;;  %v24397_v38 = vld [vmem:[#allocation132_spill] sm:$0xff] }
 0x8f3   : > { %15670 = vst [vmem:[%s19262_s5 + $0x18] sm:$0xff] %v15414_v14  ;;  %v13746_v15 = vpop.f32.mrb[4].mxu0  ;;  %16332 = vmatmul.mubr.msk.bf16.gmra.mrb[240].mxu1 %vm954_vm4, %v24396_v50 }
 0x8f4   : > { %v16676_v47 = vadd.f32 %v13746_v15, %v22201_v9  ;;  %v13748_v17 = vpop.f32.mrb[5].mxu0  ;;  %6539 = vmatprep.mubr.bf16.mxu1 %v19034_v7 }
 0x8f5   : > { %v16677_v2 = vadd.f32 %v13748_v17, %v22205_v23  ;;  %v13750_v0 = vpop.f32.mrb[6].mxu0 }
 0x8f6   : > { %v15415_v24 = vadd.f32 %v16676_v47, %v22648_v33  ;;  %v16678_v20 = vadd.f32 %v13750_v0, %v22207_v1  ;;  %v13752_v30 = vpop.f32.mrb[7].mxu0 }
 0x8f7   : > { %v15416_v49 = vadd.f32 %v16677_v2, %v22650_v58  ;;  %v16679_v9 = vadd.f32 %v13752_v30, %v22210_v34  ;;  %v24398_v34 = vld [vmem:[#allocation129_spill] sm:$0xff] }
 0x8f8   : > { %15671 = vst [vmem:[%s19262_s5 + $0x20] sm:$0xff] %v15415_v24  ;;  %v15417_v59 = vadd.f32 %v16678_v20, %v22648_v33  ;;  %16625 = vmatmul.mubr.msk.bf16.gmra.mrb[112].mxu0 %vm954_vm4, %v24397_v38 }
 0x8f9   : > { %15672 = vst [vmem:[%s19262_s5 + $0x28] sm:$0xff] %v15416_v49  ;;  %v15418_v23 = vadd.f32 %v16679_v9, %v22650_v58  ;;  %14024 = vmatprep.mubr.bf16.mxu0 %v19034_v7 }
 0x8fa   : > { %15673 = vst [vmem:[%s19262_s5 + $0x30] sm:$0xff] %v15417_v59 }
 0x8fb   : > { %15674 = vst [vmem:[%s19262_s5 + $0x38] sm:$0xff] %v15418_v23  ;;  %v13756_v1 = vpop.f32.mrb[8].mxu0  ;;  %16333 = vmatmul.mubr.msk.bf16.gmra.mrb[244].mxu1 %vm954_vm4, %v24398_v34 }
 0x8fc   : > { %v16680_v48 = vadd.f32 %v13756_v1, %v22215_v39  ;;  %v13758_v14 = vpop.f32.mrb[9].mxu0  ;;  %6549 = vmatprep.mubr.bf16.mxu1 %v19034_v7 }
 0x8fd   : > { %v16681_v15 = vadd.f32 %v13758_v14, %v22219_v18  ;;  %v13760_v47 = vpop.f32.mrb[10].mxu0 }
 0x8fe   : > { %v15419_v17 = vadd.f32 %v16680_v48, %v22648_v33  ;;  %v16682_v2 = vadd.f32 %v13760_v47, %v22221_v21  ;;  %v13762_v0 = vpop.f32.mrb[11].mxu0 }
 0x8ff   : > { %v15420_v24 = vadd.f32 %v16681_v15, %v22650_v58  ;;  %v16683_v39 = vadd.f32 %v13762_v0, %v22224_v16  ;;  %v24399_v16 = vld [vmem:[#allocation131_spill] sm:$0xff] }
 0x900   : > { %15675 = vst [vmem:[%s19262_s5 + $0x40] sm:$0xff] %v15419_v17  ;;  %v15421_v20 = vadd.f32 %v16682_v2, %v22648_v33  ;;  %16626 = vmatmul.mubr.msk.bf16.gmra.mrb[116].mxu0 %vm954_vm4, %v21501_v45 }
 0x901   : > { %15676 = vst [vmem:[%s19262_s5 + $0x48] sm:$0xff] %v15420_v24  ;;  %v15422_v18 = vadd.f32 %v16683_v39, %v22650_v58  ;;  %14034 = vmatprep.mubr.bf16.mxu0 %v19034_v7 }
 0x902   : > { %15677 = vst [vmem:[%s19262_s5 + $0x50] sm:$0xff] %v15421_v20 }
 0x903   : > { %15678 = vst [vmem:[%s19262_s5 + $0x58] sm:$0xff] %v15422_v18  ;;  %v13766_v21 = vpop.f32.mrb[12].mxu0  ;;  %16334 = vmatmul.mubr.msk.bf16.gmra.mrb[248].mxu1 %vm954_vm4, %v24399_v16 }
 0x904   : > { %v16684_v30 = vadd.f32 %v13766_v21, %v22229_v51  ;;  %v13768_v49 = vpop.f32.mrb[13].mxu0  ;;  %6559 = vmatprep.mubr.bf16.mxu1 %v19034_v7 }
 0x905   : > { %v16685_v45 = vadd.f32 %v13768_v49, %v22233_v54  ;;  %v13770_v9 = vpop.f32.mrb[14].mxu0 }
 0x906   : > { %v15423_v59 = vadd.f32 %v16684_v30, %v22648_v33  ;;  %v16686_v38 = vadd.f32 %v13770_v9, %v22235_v44  ;;  %v13772_v23 = vpop.f32.mrb[15].mxu0 }
 0x907   : > { %v15424_v1 = vadd.f32 %v16685_v45, %v22650_v58  ;;  %v16687_v51 = vadd.f32 %v13772_v23, %v22240_v56  ;;  %v24400_v56 = vld [vmem:[#allocation134_spill] sm:$0xff] }
 0x908   : > { %15679 = vst [vmem:[%s19262_s5 + $0x60] sm:$0xff] %v15423_v59  ;;  %v15425_v48 = vadd.f32 %v16686_v38, %v22648_v33  ;;  %16627 = vmatmul.mubr.msk.bf16.gmra.mrb[120].mxu0 %vm954_vm4, %v21512_v12 }
 0x909   : > { %15680 = vst [vmem:[%s19262_s5 + $0x68] sm:$0xff] %v15424_v1  ;;  %v15426_v54 = vadd.f32 %v16687_v51, %v22650_v58  ;;  %14044 = vmatprep.mubr.bf16.mxu0 %v19034_v7 }
 0x90a   : > { %15681 = vst [vmem:[%s19262_s5 + $0x70] sm:$0xff] %v15425_v48 }
 0x90b   : > { %15682 = vst [vmem:[%s19262_s5 + $0x78] sm:$0xff] %v15426_v54  ;;  %v13776_v44 = vpop.f32.mrb[16].mxu0  ;;  %16335 = vmatmul.mubr.msk.bf16.gmra.mrb[252].mxu1 %vm954_vm4, %v24400_v56 }
 0x90c   : > { %v16688_v14 = vadd.f32 %v13776_v44, %v22248_v22  ;;  %v13778_v15 = vpop.f32.mrb[17].mxu0  ;;  %7729 = vmatprep.mubr.bf16.mxu1 %v19034_v7 }
 0x90d   : > { %v16689_v12 = vadd.f32 %v13778_v15, %v22252_v61  ;;  %v13780_v47 = vpop.f32.mrb[18].mxu0 }
 0x90e   : > { %v15427_v17 = vadd.f32 %v16688_v14, %v22648_v33  ;;  %v16690_v2 = vadd.f32 %v13780_v47, %v22254_v29  ;;  %v13782_v0 = vpop.f32.mrb[19].mxu0 }
 0x90f   : > { %v15428_v24 = vadd.f32 %v16689_v12, %v22650_v58  ;;  %v16691_v22 = vadd.f32 %v13782_v0, %v22258_v42  ;;  %v24403_v12 = vld [vmem:[#allocation82_spill] sm:$0xff]  ;;  %v24404_v0 = vld [vmem:[#allocation87_spill] sm:$0xff] }
 0x910   : > { %15683 = vst [vmem:[%s19262_s5 + $0x80] sm:$0xff] %v15427_v17  ;;  %v15429_v39 = vadd.f32 %v16690_v2, %v22648_v33  ;;  %16628 = vmatmul.mubr.msk.bf16.gmra.mrb[124].mxu0 %vm954_vm4, %v21522_v26 }
 0x911   : > { %15684 = vst [vmem:[%s19262_s5 + $0x88] sm:$0xff] %v15428_v24  ;;  %v15430_v61 = vadd.f32 %v16691_v22, %v22650_v58  ;;  %14054 = vmatprep.mubr.bf16.mxu0 %v19034_v7 }
 0x912   : > { %15685 = vst [vmem:[%s19262_s5 + $0x90] sm:$0xff] %v15429_v39  ;;  %v24405_v39 = vld [vmem:[#allocation79_spill] sm:$0xff] }
 0x913   : > { %15686 = vst [vmem:[%s19262_s5 + $0x98] sm:$0xff] %v15430_v61  ;;  %v13786_v29 = vpop.f32.mrb[20].mxu0  ;;  %16369 = vmatmul.mubr.msk.bf16.vlgmr.msra.gmra.mrb[128].mxu1 %vm954_vm4, %v24271_v6 }
 0x914   : > { %v16692_v20 = vadd.f32 %v13786_v29, %v22266_v36  ;;  %v13788_v18 = vpop.f32.mrb[21].mxu0  ;;  %7739 = vmatprep.mubr.bf16.mxu1 %v19034_v7  ;;  %v24406_v29 = vld [vmem:[#allocation88_spill] sm:$0xff] }
 0x915   : > { %v16693_v26 = vadd.f32 %v13788_v18, %v22270_v62  ;;  %v13790_v42 = vpop.f32.mrb[22].mxu0 }
 0x916   : > { %v15431_v21 = vadd.f32 %v16692_v20, %v22648_v33  ;;  %v16694_v30 = vadd.f32 %v13790_v42, %v22272_v8  ;;  %v13792_v49 = vpop.f32.mrb[23].mxu0 }
 0x917   : > { %v15432_v45 = vadd.f32 %v16693_v26, %v22650_v58  ;;  %v16695_v36 = vadd.f32 %v13792_v49, %v22275_v27  ;;  %v24407_v26 = vld [vmem:[#allocation21_spill] sm:$0xff] }
 0x918   : > { %15687 = vst [vmem:[%s19262_s5 + $0xa0] sm:$0xff] %v15431_v21  ;;  %v15433_v9 = vadd.f32 %v16694_v30, %v22648_v33  ;;  %16629 = vmatmul.mubr.msk.bf16.gmra.mrb[128].mxu0 %vm954_vm4, %v21533_v43  ;;  %v24408_v49 = vld [vmem:[#allocation25_spill] sm:$0xff] }
 0x919   : > { %15688 = vst [vmem:[%s19262_s5 + $0xa8] sm:$0xff] %v15432_v45  ;;  %v15434_v6 = vadd.f32 %v16695_v36, %v22650_v58  ;;  %14064 = vmatprep.mubr.bf16.mxu0 %v19034_v7 }
 0x91a   : > { %15689 = vst [vmem:[%s19262_s5 + $0xb0] sm:$0xff] %v15433_v9 }
 0x91b   : > { %15690 = vst [vmem:[%s19262_s5 + $0xb8] sm:$0xff] %v15434_v6  ;;  %v13796_v8 = vpop.f32.mrb[24].mxu0  ;;  %16370 = vmatmul.mubr.msk.bf16.gmra.mrb[132].mxu1 %vm954_vm4, %v24276_v35  ;;  %v24409_v6 = vld [vmem:[#allocation28_spill] sm:$0xff] }
 0x91c   : > { %v16696_v62 = vadd.f32 %v13796_v8, %v22280_v37  ;;  %v13798_v59 = vpop.f32.mrb[25].mxu0  ;;  %7749 = vmatprep.mubr.bf16.mxu1 %v19034_v7 }
 0x91d   : > { %v16697_v43 = vadd.f32 %v13798_v59, %v22284_v11  ;;  %v13800_v27 = vpop.f32.mrb[26].mxu0  ;;  %v24410_v59 = vld [vmem:[#allocation133_spill] sm:$0xff] }
 0x91e   : > { %v15435_v38 = vadd.f32 %v16696_v62, %v22648_v33  ;;  %v16698_v23 = vadd.f32 %v13800_v27, %v22286_v25  ;;  %v13802_v1 = vpop.f32.mrb[27].mxu0  ;;  %v24401_v25 = vld [vmem:[#allocation101_spill] sm:$0xff]  ;;  %v24411_v27 = vld [vmem:[#allocation140_spill] sm:$0xff] }
 0x91f   : > { %v15436_v51 = vadd.f32 %v16697_v43, %v22650_v58  ;;  %v16699_v37 = vadd.f32 %v13802_v1, %v22289_v28  ;;  %v24402_v28 = vld [vmem:[#allocation130_spill] sm:$0xff]  ;;  %v24412_v1 = vld [vmem:[#allocation31_spill] sm:$0xff] }
 0x920   : > { %15691 = vst [vmem:[%s19262_s5 + $0xc0] sm:$0xff] %v15435_v38  ;;  %v15437_v48 = vadd.f32 %v16698_v23, %v22648_v33  ;;  %16630 = vmatmul.mubr.msk.bf16.gmra.mrb[132].mxu0 %vm954_vm4, %v21543_v53 }
 0x921   : > { %15692 = vst [vmem:[%s19262_s5 + $0xc8] sm:$0xff] %v15436_v51  ;;  %v15438_v35 = vadd.f32 %v16699_v37, %v22650_v58  ;;  %14074 = vmatprep.mubr.bf16.mxu0 %v19034_v7 }
 0x922   : > { %15693 = vst [vmem:[%s19262_s5 + $0xd0] sm:$0xff] %v15437_v48 }
 0x923   : > { %15694 = vst [vmem:[%s19262_s5 + $0xd8] sm:$0xff] %v15438_v35  ;;  %v13806_v11 = vpop.f32.mrb[28].mxu0  ;;  %16371 = vmatmul.mubr.msk.bf16.gmra.mrb[136].mxu1 %vm954_vm4, %v24281_v63  ;;  %v24413_v35 = vld [vmem:[#allocation141_spill] sm:$0xff] }
 0x924   : > { %v16700_v54 = vadd.f32 %v13806_v11, %v24401_v25  ;;  %v13808_v44 = vpop.f32.mrb[29].mxu0  ;;  %7759 = vmatprep.mubr.bf16.mxu1 %v19034_v7 }
 0x925   : > { %v16701_v53 = vadd.f32 %v13808_v44, %v24402_v28  ;;  %v13810_v14 = vpop.f32.mrb[30].mxu0  ;;  %v24414_v44 = vld [vmem:[#allocation34_spill] sm:$0xff] }
 0x926   : > { %v15439_v15 = vadd.f32 %v16700_v54, %v22648_v33  ;;  %v16702_v47 = vadd.f32 %v13810_v14, %v24403_v12  ;;  %v13812_v17 = vpop.f32.mrb[31].mxu0  ;;  %v24415_v14 = vld [vmem:[#allocation18_spill] sm:$0xff] }
 0x927   : > { %v15440_v2 = vadd.f32 %v16701_v53, %v22650_v58  ;;  %v16703_v24 = vadd.f32 %v13812_v17, %v24404_v0  ;;  %v24416_v12 = vld [vmem:[#allocation142_spill] sm:$0xff] }
 0x928   : > { %15695 = vst [vmem:[%s19262_s5 + $0xe0] sm:$0xff] %v15439_v15  ;;  %v15441_v22 = vadd.f32 %v16702_v47, %v22648_v33  ;;  %16631 = vmatmul.mubr.msk.bf16.gmra.mrb[136].mxu0 %vm954_vm4, %v24405_v39  ;;  %v24418_v39 = vld [vmem:[#allocation143_spill] sm:$0xff] }
 0x929   : > { %15696 = vst [vmem:[%s19262_s5 + $0xe8] sm:$0xff] %v15440_v2  ;;  %v15442_v63 = vadd.f32 %v16703_v24, %v22650_v58  ;;  %14084 = vmatprep.mubr.bf16.mxu0 %v19034_v7  ;;  %v24417_v2 = vld [vmem:[#allocation37_spill] sm:$0xff] }
 0x92a   : > { %15697 = vst [vmem:[%s19262_s5 + $0xf0] sm:$0xff] %v15441_v22 }
 0x92b   : > { %15698 = vst [vmem:[%s19262_s5 + $0xf8] sm:$0xff] %v15442_v63  ;;  %v13816_v61 = vpop.f32.mrb[32].mxu0  ;;  %16372 = vmatmul.mubr.msk.bf16.gmra.mrb[140].mxu1 %vm954_vm4, %v24286_v40 }
 0x92c   : > { %v16704_v20 = vadd.f32 %v13816_v61, %v24406_v29  ;;  %v13818_v18 = vpop.f32.mrb[33].mxu0  ;;  %7769 = vmatprep.mubr.bf16.mxu1 %v19034_v7 }
 0x92d   : > { %v16705_v42 = vadd.f32 %v13818_v18, %v24407_v26  ;;  %v13820_v21 = vpop.f32.mrb[34].mxu0 }
 0x92e   : > { %v15443_v30 = vadd.f32 %v16704_v20, %v22648_v33  ;;  %v16706_v45 = vadd.f32 %v13820_v21, %v24408_v49  ;;  %v13822_v36 = vpop.f32.mrb[35].mxu0  ;;  %v24419_v20 = vld [vmem:[#allocation40_spill] sm:$0xff] }
 0x92f   : > { %v15444_v9 = vadd.f32 %v16705_v42, %v22650_v58  ;;  %v16707_v8 = vadd.f32 %v13822_v36, %v24409_v6  ;;  %v24420_v42 = vld [vmem:[#allocation84_spill] sm:$0xff] }
 0x930   : > { %15699 = vst [vmem:[%s19262_s5 + $0x100] sm:$0xff] %v15443_v30  ;;  %v15445_v62 = vadd.f32 %v16706_v45, %v22648_v33  ;;  %16632 = vmatmul.mubr.msk.bf16.gmra.mrb[140].mxu0 %vm954_vm4, %v24410_v59  ;;  %v24421_v30 = vld [vmem:[#allocation144_spill] sm:$0xff] }
 0x931   : > { %15700 = vst [vmem:[%s19262_s5 + $0x108] sm:$0xff] %v15444_v9  ;;  %v15446_v40 = vadd.f32 %v16707_v8, %v22650_v58  ;;  %14094 = vmatprep.mubr.bf16.mxu0 %v19034_v7  ;;  %v24422_v36 = vld [vmem:[#allocation44_spill] sm:$0xff] }
 0x932   : > { %15701 = vst [vmem:[%s19262_s5 + $0x110] sm:$0xff] %v15445_v62  ;;  %v24423_v62 = vld [vmem:[#allocation145_spill] sm:$0xff] }
 0x933   : > { %15702 = vst [vmem:[%s19262_s5 + $0x118] sm:$0xff] %v15446_v40  ;;  %v13826_v43 = vpop.f32.mrb[36].mxu0  ;;  %16373 = vmatmul.mubr.msk.bf16.gmra.mrb[144].mxu1 %vm954_vm4, %v24291_v13 }
 0x934   : > { %v16708_v38 = vadd.f32 %v13826_v43, %v24411_v27  ;;  %v13828_v23 = vpop.f32.mrb[37].mxu0  ;;  %7779 = vmatprep.mubr.bf16.mxu1 %v19034_v7  ;;  %v24424_v27 = vld [vmem:[#allocation49_spill] sm:$0xff] }
 0x935   : > { %v16709_v51 = vadd.f32 %v13828_v23, %v24412_v1  ;;  %v13830_v37 = vpop.f32.mrb[38].mxu0  ;;  %v24425_v1 = vld [vmem:[#allocation99_spill] sm:$0xff] }
 0x936   : > { %v15447_v48 = vadd.f32 %v16708_v38, %v22648_v33  ;;  %v16710_v11 = vadd.f32 %v13830_v37, %v24413_v35  ;;  %v13832_v25 = vpop.f32.mrb[39].mxu0  ;;  %v24426_v37 = vld [vmem:[#allocation146_spill] sm:$0xff] }
 0x937   : > { %v15448_v54 = vadd.f32 %v16709_v51, %v22650_v58  ;;  %v16711_v28 = vadd.f32 %v13832_v25, %v24414_v44 }
 0x938   : > { %15703 = vst [vmem:[%s19262_s5 + $0x120] sm:$0xff] %v15447_v48  ;;  %v15449_v53 = vadd.f32 %v16710_v11, %v22648_v33  ;;  %16633 = vmatmul.mubr.msk.bf16.gmra.mrb[144].mxu0 %vm954_vm4, %v24415_v14  ;;  %v24427_v11 = vld [vmem:[#allocation54_spill] sm:$0xff] }
 0x939   : > { %15704 = vst [vmem:[%s19262_s5 + $0x128] sm:$0xff] %v15448_v54  ;;  %v15450_v13 = vadd.f32 %v16711_v28, %v22650_v58  ;;  %14104 = vmatprep.mubr.bf16.mxu0 %v19034_v7  ;;  %v24428_v28 = vld [vmem:[#allocation90_spill] sm:$0xff] }
 0x93a   : > { %15705 = vst [vmem:[%s19262_s5 + $0x130] sm:$0xff] %v15449_v53 }
 0x93b   : > { %15706 = vst [vmem:[%s19262_s5 + $0x138] sm:$0xff] %v15450_v13  ;;  %v13836_v15 = vpop.f32.mrb[40].mxu0  ;;  %16374 = vmatmul.mubr.msk.bf16.gmra.mrb[148].mxu1 %vm954_vm4, %v24296_v10 }
 0x93c   : > { %v16712_v47 = vadd.f32 %v13836_v15, %v24416_v12  ;;  %v13838_v17 = vpop.f32.mrb[41].mxu0  ;;  %7789 = vmatprep.mubr.bf16.mxu1 %v19034_v7  ;;  %v24429_v15 = vld [vmem:[#allocation59_spill] sm:$0xff] }
 0x93d   : > { %v16713_v0 = vadd.f32 %v13838_v17, %v24417_v2  ;;  %v13840_v24 = vpop.f32.mrb[42].mxu0  ;;  %v24430_v17 = vld [vmem:[#allocation103_spill] sm:$0xff] }
 0x93e   : > { %v15451_v22 = vadd.f32 %v16712_v47, %v22648_v33  ;;  %v16714_v63 = vadd.f32 %v13840_v24, %v24418_v39  ;;  %v13842_v61 = vpop.f32.mrb[43].mxu0  ;;  %v24432_v39 = vld [vmem:[#allocation61_spill] sm:$0xff] }
 0x93f   : > { %v15452_v29 = vadd.f32 %v16713_v0, %v22650_v58  ;;  %v16715_v18 = vadd.f32 %v13842_v61, %v24419_v20  ;;  %v24431_v0 = vld [vmem:[#allocation91_spill] sm:$0xff]  ;;  %v24433_v20 = vld [vmem:[#allocation64_spill] sm:$0xff] }
 0x940   : > { %15707 = vst [vmem:[%s19262_s5 + $0x140] sm:$0xff] %v15451_v22  ;;  %v15453_v26 = vadd.f32 %v16714_v63, %v22648_v33  ;;  %16634 = vmatmul.mubr.msk.bf16.gmra.mrb[148].mxu0 %vm954_vm4, %v24420_v42 }
 0x941   : > { %15708 = vst [vmem:[%s19262_s5 + $0x148] sm:$0xff] %v15452_v29  ;;  %v15454_v10 = vadd.f32 %v16715_v18, %v22650_v58  ;;  %14114 = vmatprep.mubr.bf16.mxu0 %v19034_v7 }
 0x942   : > { %15709 = vst [vmem:[%s19262_s5 + $0x150] sm:$0xff] %v15453_v26 }
 0x943   : > { %15710 = vst [vmem:[%s19262_s5 + $0x158] sm:$0xff] %v15454_v10  ;;  %v13846_v21 = vpop.f32.mrb[44].mxu0  ;;  %16375 = vmatmul.mubr.msk.bf16.gmra.mrb[152].mxu1 %vm954_vm4, %v24301_v5  ;;  %v24434_v10 = vld [vmem:[#allocation67_spill] sm:$0xff] }
 0x944   : > { %v16716_v49 = vadd.f32 %v13846_v21, %v24421_v30  ;;  %v13848_v45 = vpop.f32.mrb[45].mxu0  ;;  %7799 = vmatprep.mubr.bf16.mxu1 %v19034_v7 }
 0x945   : > { %v16717_v9 = vadd.f32 %v13848_v45, %v24422_v36  ;;  %v13850_v6 = vpop.f32.mrb[46].mxu0  ;;  %v24436_v36 = vld [vmem:[#allocation69_spill] sm:$0xff] }
 0x946   : > { %v15455_v8 = vadd.f32 %v16716_v49, %v22648_v33  ;;  %v16718_v59 = vadd.f32 %v13850_v6, %v24423_v62  ;;  %v13852_v40 = vpop.f32.mrb[47].mxu0  ;;  %v24435_v49 = vld [vmem:[#allocation106_spill] sm:$0xff] }
 0x947   : > { %v15456_v43 = vadd.f32 %v16717_v9, %v22650_v58  ;;  %v16719_v38 = vadd.f32 %v13852_v40, %v24424_v27 }
 0x948   : > { %15711 = vst [vmem:[%s19262_s5 + $0x160] sm:$0xff] %v15455_v8  ;;  %v15457_v23 = vadd.f32 %v16718_v59, %v22648_v33  ;;  %16635 = vmatmul.mubr.msk.bf16.gmra.mrb[152].mxu0 %vm954_vm4, %v24425_v1  ;;  %v24437_v8 = vld [vmem:[#allocation20_spill] sm:$0xff]  ;;  %v24439_v1 = vld [vmem:[#allocation81_spill] sm:$0xff] }
 0x949   : > { %15712 = vst [vmem:[%s19262_s5 + $0x168] sm:$0xff] %v15456_v43  ;;  %v15458_v5 = vadd.f32 %v16719_v38, %v22650_v58  ;;  %14124 = vmatprep.mubr.bf16.mxu0 %v19034_v7  ;;  %v24438_v43 = vld [vmem:[#allocation23_spill] sm:$0xff] }
 0x94a   : > { %15713 = vst [vmem:[%s19262_s5 + $0x170] sm:$0xff] %v15457_v23 }
 0x94b   : > { %15714 = vst [vmem:[%s19262_s5 + $0x178] sm:$0xff] %v15458_v5  ;;  %v13856_v51 = vpop.f32.mrb[48].mxu0  ;;  %16376 = vmatmul.mubr.msk.bf16.gmra.mrb[156].mxu1 %vm954_vm4, %v24306_v55 }
 0x94c   : > { %v16720_v48 = vadd.f32 %v13856_v51, %v24426_v37  ;;  %v13858_v35 = vpop.f32.mrb[49].mxu0  ;;  %7809 = vmatprep.mubr.bf16.mxu1 %v19034_v7  ;;  %v24440_v37 = vld [vmem:[#allocation109_spill] sm:$0xff] }
 0x94d   : > { %v16721_v25 = vadd.f32 %v13858_v35, %v24427_v11  ;;  %v13860_v54 = vpop.f32.mrb[50].mxu0  ;;  %v24441_v35 = vld [vmem:[#allocation19_spill] sm:$0xff] }
 0x94e   : > { %v15459_v44 = vadd.f32 %v16720_v48, %v22648_v33  ;;  %v16722_v53 = vadd.f32 %v13860_v54, %v24428_v28  ;;  %v13862_v14 = vpop.f32.mrb[51].mxu0  ;;  %v24442_v54 = vld [vmem:[#allocation22_spill] sm:$0xff] }
 0x94f   : > { %v15460_v13 = vadd.f32 %v16721_v25, %v22650_v58  ;;  %v16723_v12 = vadd.f32 %v13862_v14, %v24429_v15  ;;  %v24443_v14 = vld [vmem:[#allocation24_spill] sm:$0xff] }
 0x950   : > { %15715 = vst [vmem:[%s19262_s5 + $0x180] sm:$0xff] %v15459_v44  ;;  %v15461_v47 = vadd.f32 %v16722_v53, %v22648_v33  ;;  %16636 = vmatmul.mubr.msk.bf16.gmra.mrb[156].mxu0 %vm954_vm4, %v24430_v17 }
 0x951   : > { %15716 = vst [vmem:[%s19262_s5 + $0x188] sm:$0xff] %v15460_v13  ;;  %v15462_v55 = vadd.f32 %v16723_v12, %v22650_v58  ;;  %14134 = vmatprep.mubr.bf16.mxu0 %v19034_v7 }
 0x952   : > { %15717 = vst [vmem:[%s19262_s5 + $0x190] sm:$0xff] %v15461_v47  ;;  %v24444_v47 = vld [vmem:[#allocation26_spill] sm:$0xff] }
 0x953   : > { %15718 = vst [vmem:[%s19262_s5 + $0x198] sm:$0xff] %v15462_v55  ;;  %v13866_v2 = vpop.f32.mrb[52].mxu0  ;;  %16377 = vmatmul.mubr.msk.bf16.gmra.mrb[160].mxu1 %vm954_vm4, %v24311_v60 }
 0x954   : > { %v16724_v24 = vadd.f32 %v13866_v2, %v24431_v0  ;;  %v13868_v22 = vpop.f32.mrb[53].mxu0  ;;  %7819 = vmatprep.mubr.bf16.mxu1 %v19034_v7  ;;  %v24445_v2 = vld [vmem:[#allocation112_spill] sm:$0xff] }
 0x955   : > { %v16725_v63 = vadd.f32 %v13868_v22, %v24432_v39  ;;  %v13870_v61 = vpop.f32.mrb[54].mxu0 }
 0x956   : > { %v15463_v29 = vadd.f32 %v16724_v24, %v22648_v33  ;;  %v16726_v18 = vadd.f32 %v13870_v61, %v24433_v20  ;;  %v13872_v26 = vpop.f32.mrb[55].mxu0  ;;  %v24446_v24 = vld [vmem:[#allocation27_spill] sm:$0xff] }
 0x957   : > { %v15464_v42 = vadd.f32 %v16725_v63, %v22650_v58  ;;  %v16727_v21 = vadd.f32 %v13872_v26, %v24434_v10  ;;  %v24447_v63 = vld [vmem:[#allocation29_spill] sm:$0xff] }
 0x958   : > { %15719 = vst [vmem:[%s19262_s5 + $0x1a0] sm:$0xff] %v15463_v29  ;;  %v15465_v30 = vadd.f32 %v16726_v18, %v22648_v33  ;;  %16637 = vmatmul.mubr.msk.bf16.gmra.mrb[160].mxu0 %vm954_vm4, %v24435_v49  ;;  %v24448_v18 = vld [vmem:[#allocation30_spill] sm:$0xff] }
 0x959   : > { %15720 = vst [vmem:[%s19262_s5 + $0x1a8] sm:$0xff] %v15464_v42  ;;  %v15466_v60 = vadd.f32 %v16727_v21, %v22650_v58  ;;  %14144 = vmatprep.mubr.bf16.mxu0 %v19034_v7  ;;  %v24449_v21 = vld [vmem:[#allocation32_spill] sm:$0xff] }
 0x95a   : > { %15721 = vst [vmem:[%s19262_s5 + $0x1b0] sm:$0xff] %v15465_v30 }
 0x95b   : > { %15722 = vst [vmem:[%s19262_s5 + $0x1b8] sm:$0xff] %v15466_v60  ;;  %v13876_v45 = vpop.f32.mrb[56].mxu0  ;;  %16378 = vmatmul.mubr.msk.bf16.gmra.mrb[164].mxu1 %vm954_vm4, %v24316_v46  ;;  %v24450_v60 = vld [vmem:[#allocation115_spill] sm:$0xff] }
 0x95c   : > { %v16728_v9 = vadd.f32 %v13876_v45, %v24436_v36  ;;  %v13878_v6 = vpop.f32.mrb[57].mxu0  ;;  %7829 = vmatprep.mubr.bf16.mxu1 %v19034_v7  ;;  %v24451_v36 = vld [vmem:[#allocation33_spill] sm:$0xff] }
 0x95d   : > { %v16729_v62 = vadd.f32 %v13878_v6, %v24437_v8  ;;  %v13880_v59 = vpop.f32.mrb[58].mxu0  ;;  %v24452_v8 = vld [vmem:[#allocation35_spill] sm:$0xff] }
 0x95e   : > { %v15467_v40 = vadd.f32 %v16728_v9, %v22648_v33  ;;  %v16730_v27 = vadd.f32 %v13880_v59, %v24438_v43  ;;  %v13882_v38 = vpop.f32.mrb[59].mxu0  ;;  %v24453_v43 = vld [vmem:[#allocation36_spill] sm:$0xff] }
 0x95f   : > { %v15468_v23 = vadd.f32 %v16729_v62, %v22650_v58  ;;  %v16731_v5 = vadd.f32 %v13882_v38, %v24439_v1  ;;  %v24454_v1 = vld [vmem:[#allocation38_spill] sm:$0xff] }
 0x960   : > { %15723 = vst [vmem:[%s19262_s5 + $0x1c0] sm:$0xff] %v15467_v40  ;;  %v15469_v51 = vadd.f32 %v16730_v27, %v22648_v33  ;;  %16638 = vmatmul.mubr.msk.bf16.gmra.mrb[164].mxu0 %vm954_vm4, %v24440_v37  ;;  %v24455_v37 = vld [vmem:[#allocation118_spill] sm:$0xff] }
 0x961   : > { %15724 = vst [vmem:[%s19262_s5 + $0x1c8] sm:$0xff] %v15468_v23  ;;  %v15470_v46 = vadd.f32 %v16731_v5, %v22650_v58  ;;  %14154 = vmatprep.mubr.bf16.mxu0 %v19034_v7 }
 0x962   : > { %15725 = vst [vmem:[%s19262_s5 + $0x1d0] sm:$0xff] %v15469_v51 }
 0x963   : > { %15726 = vst [vmem:[%s19262_s5 + $0x1d8] sm:$0xff] %v15470_v46  ;;  %v13886_v48 = vpop.f32.mrb[60].mxu0  ;;  %16379 = vmatmul.mubr.msk.bf16.gmra.mrb[168].mxu1 %vm954_vm4, %v24321_v31 }
 0x964   : > { %v16732_v11 = vadd.f32 %v13886_v48, %v24441_v35  ;;  %v13888_v25 = vpop.f32.mrb[61].mxu0  ;;  %7839 = vmatprep.mubr.bf16.mxu1 %v19034_v7  ;;  %v24456_v48 = vld [vmem:[#allocation39_spill] sm:$0xff] }
 0x965   : > { %v16733_v44 = vadd.f32 %v13888_v25, %v24442_v54  ;;  %v13890_v28 = vpop.f32.mrb[62].mxu0  ;;  %v24457_v25 = vld [vmem:[#allocation41_spill] sm:$0xff] }
 0x966   : > { %v15471_v53 = vadd.f32 %v16732_v11, %v22648_v33  ;;  %v16734_v13 = vadd.f32 %v13890_v28, %v24443_v14  ;;  %v13892_v15 = vpop.f32.mrb[63].mxu0 }
 0x967   : > { %v15472_v12 = vadd.f32 %v16733_v44, %v22650_v58  ;;  %v16735_v17 = vadd.f32 %v13892_v15, %v24444_v47 }
 0x968   : > { %15727 = vst [vmem:[%s19262_s5 + $0x1e0] sm:$0xff] %v15471_v53  ;;  %v15473_v55 = vadd.f32 %v16734_v13, %v22648_v33  ;;  %16639 = vmatmul.mubr.msk.bf16.gmra.mrb[168].mxu0 %vm954_vm4, %v24445_v2  ;;  %v24458_v53 = vld [vmem:[#allocation43_spill] sm:$0xff] }
 0x969   : > { %15728 = vst [vmem:[%s19262_s5 + $0x1e8] sm:$0xff] %v15472_v12  ;;  %v15474_v31 = vadd.f32 %v16735_v17, %v22650_v58  ;;  %14164 = vmatprep.mubr.bf16.mxu0 %v19034_v7  ;;  %v24459_v12 = vld [vmem:[#allocation45_spill] sm:$0xff] }
 0x96a   : > { %15729 = vst [vmem:[%s19262_s5 + $0x1f0] sm:$0xff] %v15473_v55  ;;  %v24460_v55 = vld [vmem:[#allocation121_spill] sm:$0xff] }
 0x96b   : > { %15730 = vst [vmem:[%s19262_s5 + $0x1f8] sm:$0xff] %v15474_v31  ;;  %v13896_v0 = vpop.f32.mrb[64].mxu0  ;;  %16380 = vmatmul.mubr.msk.bf16.gmra.mrb[172].mxu1 %vm954_vm4, %v24326_v32  ;;  %v24461_v31 = vld [vmem:[#allocation48_spill] sm:$0xff] }
 0x96c   : > { %v16736_v22 = vadd.f32 %v13896_v0, %v24446_v24  ;;  %v13898_v39 = vpop.f32.mrb[65].mxu0  ;;  %7849 = vmatprep.mubr.bf16.mxu1 %v19034_v7 }
 0x96d   : > { %v16737_v61 = vadd.f32 %v13898_v39, %v24447_v63  ;;  %v13900_v29 = vpop.f32.mrb[66].mxu0 }
 0x96e   : > { %v15475_v20 = vadd.f32 %v16736_v22, %v22648_v33  ;;  %v16738_v26 = vadd.f32 %v13900_v29, %v24448_v18  ;;  %v13902_v42 = vpop.f32.mrb[67].mxu0  ;;  %v24462_v22 = vld [vmem:[#allocation50_spill] sm:$0xff]  ;;  %v24463_v29 = vld [vmem:[#allocation53_spill] sm:$0xff] }
 0x96f   : > { %v15476_v10 = vadd.f32 %v16737_v61, %v22650_v58  ;;  %v16739_v30 = vadd.f32 %v13902_v42, %v24449_v21  ;;  %v24464_v42 = vld [vmem:[#allocation55_spill] sm:$0xff] }
 0x970   : > { %15731 = vst [vmem:[%s19262_s5 + $0x200] sm:$0xff] %v15475_v20  ;;  %v15477_v49 = vadd.f32 %v16738_v26, %v22648_v33  ;;  %16640 = vmatmul.mubr.msk.bf16.gmra.mrb[172].mxu0 %vm954_vm4, %v24450_v60  ;;  %v24466_v60 = vld [vmem:[#allocation58_spill] sm:$0xff] }
 0x971   : > { %15732 = vst [vmem:[%s19262_s5 + $0x208] sm:$0xff] %v15476_v10  ;;  %v15478_v32 = vadd.f32 %v16739_v30, %v22650_v58  ;;  %14174 = vmatprep.mubr.bf16.mxu0 %v19034_v7  ;;  %v24465_v30 = vld [vmem:[#allocation147_spill] sm:$0xff] }
 0x972   : > { %15733 = vst [vmem:[%s19262_s5 + $0x210] sm:$0xff] %v15477_v49 }
 0x973   : > { %15734 = vst [vmem:[%s19262_s5 + $0x218] sm:$0xff] %v15478_v32  ;;  %v13906_v45 = vpop.f32.mrb[68].mxu0  ;;  %16381 = vmatmul.mubr.msk.bf16.gmra.mrb[176].mxu1 %vm954_vm4, %v24331_v4 }
 0x974   : > { %v16740_v9 = vadd.f32 %v13906_v45, %v24451_v36  ;;  %v13908_v6 = vpop.f32.mrb[69].mxu0  ;;  %7859 = vmatprep.mubr.bf16.mxu1 %v19034_v7  ;;  %v24467_v36 = vld [vmem:[#allocation60_spill] sm:$0xff] }
 0x975   : > { %v16741_v62 = vadd.f32 %v13908_v6, %v24452_v8  ;;  %v13910_v59 = vpop.f32.mrb[70].mxu0 }
 0x976   : > { %v15479_v40 = vadd.f32 %v16740_v9, %v22648_v33  ;;  %v16742_v27 = vadd.f32 %v13910_v59, %v24453_v43  ;;  %v13912_v38 = vpop.f32.mrb[71].mxu0 }
 0x977   : > { %v15480_v23 = vadd.f32 %v16741_v62, %v22650_v58  ;;  %v16743_v5 = vadd.f32 %v13912_v38, %v24454_v1  ;;  %v24468_v62 = vld [vmem:[#allocation63_spill] sm:$0xff]  ;;  %v24470_v1 = vld [vmem:[#allocation124_spill] sm:$0xff] }
 0x978   : > { %15735 = vst [vmem:[%s19262_s5 + $0x220] sm:$0xff] %v15479_v40  ;;  %v15481_v51 = vadd.f32 %v16742_v27, %v22648_v33  ;;  %16641 = vmatmul.mubr.msk.bf16.gmra.mrb[176].mxu0 %vm954_vm4, %v24455_v37  ;;  %v24469_v27 = vld [vmem:[#allocation65_spill] sm:$0xff] }
 0x979   : > { %15736 = vst [vmem:[%s19262_s5 + $0x228] sm:$0xff] %v15480_v23  ;;  %v15482_v4 = vadd.f32 %v16743_v5, %v22650_v58  ;;  %14184 = vmatprep.mubr.bf16.mxu0 %v19034_v7 }
 0x97a   : > { %15737 = vst [vmem:[%s19262_s5 + $0x230] sm:$0xff] %v15481_v51  ;;  %v24471_v51 = vld [vmem:[#allocation68_spill] sm:$0xff] }
 0x97b   : > { %15738 = vst [vmem:[%s19262_s5 + $0x238] sm:$0xff] %v15482_v4  ;;  %v13916_v46 = vpop.f32.mrb[72].mxu0  ;;  %16382 = vmatmul.mubr.msk.bf16.gmra.mrb[180].mxu1 %vm954_vm4, %v24336_v19 }
 0x97c   : > { %v16744_v35 = vadd.f32 %v13916_v46, %v24456_v48  ;;  %v13918_v11 = vpop.f32.mrb[73].mxu0  ;;  %7869 = vmatprep.mubr.bf16.mxu1 %v19034_v7  ;;  %v24472_v46 = vld [vmem:[#allocation70_spill] sm:$0xff] }
 0x97d   : > { %v16745_v54 = vadd.f32 %v13918_v11, %v24457_v25  ;;  %v13920_v44 = vpop.f32.mrb[74].mxu0  ;;  %v24473_v25 = vld [vmem:[#allocation73_spill] sm:$0xff] }
 0x97e   : > { %v15483_v28 = vadd.f32 %v16744_v35, %v22648_v33  ;;  %v16746_v14 = vadd.f32 %v13920_v44, %v24458_v53  ;;  %v13922_v13 = vpop.f32.mrb[75].mxu0  ;;  %v24474_v53 = vld [vmem:[#allocation75_spill] sm:$0xff] }
 0x97f   : > { %v15484_v15 = vadd.f32 %v16745_v54, %v22650_v58  ;;  %v16747_v47 = vadd.f32 %v13922_v13, %v24459_v12 }
 0x980   : > { %15739 = vst [vmem:[%s19262_s5 + $0x240] sm:$0xff] %v15483_v28  ;;  %v15485_v17 = vadd.f32 %v16746_v14, %v22648_v33  ;;  %16642 = vmatmul.mubr.msk.bf16.gmra.mrb[180].mxu0 %vm954_vm4, %v24460_v55 }
 0x981   : > { %15740 = vst [vmem:[%s19262_s5 + $0x248] sm:$0xff] %v15484_v15  ;;  %v15486_v19 = vadd.f32 %v16747_v47, %v22650_v58  ;;  %14194 = vmatprep.mubr.bf16.mxu0 %v19034_v7  ;;  %v24475_v15 = vld [vmem:[#allocation148_spill] sm:$0xff]  ;;  %v24476_v47 = vld [vmem:[#allocation78_spill] sm:$0xff] }
 0x982   : > { %15741 = vst [vmem:[%s19262_s5 + $0x250] sm:$0xff] %v15485_v17 }
 0x983   : > { %15742 = vst [vmem:[%s19262_s5 + $0x258] sm:$0xff] %v15486_v19  ;;  %v13926_v2 = vpop.f32.mrb[76].mxu0  ;;  %16383 = vmatmul.mubr.msk.bf16.gmra.mrb[184].mxu1 %vm954_vm4, %v24341_v52  ;;  %v24477_v19 = vld [vmem:[#allocation42_spill] sm:$0xff] }
 0x984   : > { %v16748_v0 = vadd.f32 %v13926_v2, %v24461_v31  ;;  %v13928_v24 = vpop.f32.mrb[77].mxu0  ;;  %7879 = vmatprep.mubr.bf16.mxu1 %v19034_v7  ;;  %v24478_v2 = vld [vmem:[#allocation80_spill] sm:$0xff] }
 0x985   : > { %v16749_v39 = vadd.f32 %v13928_v24, %v24462_v22  ;;  %v13930_v63 = vpop.f32.mrb[78].mxu0  ;;  %v24479_v22 = vld [vmem:[#allocation135_spill] sm:$0xff] }
 0x986   : > { %v15487_v61 = vadd.f32 %v16748_v0, %v22648_v33  ;;  %v16750_v20 = vadd.f32 %v13930_v63, %v24463_v29  ;;  %v13932_v18 = vpop.f32.mrb[79].mxu0  ;;  %v24480_v29 = vld [vmem:[#allocation83_spill] sm:$0xff] }
 0x987   : > { %v15488_v26 = vadd.f32 %v16749_v39, %v22650_v58  ;;  %v16751_v10 = vadd.f32 %v13932_v18, %v24464_v42 }
 0x988   : > { %15743 = vst [vmem:[%s19262_s5 + $0x260] sm:$0xff] %v15487_v61  ;;  %v15489_v21 = vadd.f32 %v16750_v20, %v22648_v33  ;;  %16643 = vmatmul.mubr.msk.bf16.gmra.mrb[184].mxu0 %vm954_vm4, %v24465_v30 }
 0x989   : > { %15744 = vst [vmem:[%s19262_s5 + $0x268] sm:$0xff] %v15488_v26  ;;  %v15490_v52 = vadd.f32 %v16751_v10, %v22650_v58  ;;  %14204 = vmatprep.mubr.bf16.mxu0 %v19034_v7  ;;  %v24481_v26 = vld [vmem:[#allocation126_spill] sm:$0xff] }
 0x98a   : > { %15745 = vst [vmem:[%s19262_s5 + $0x270] sm:$0xff] %v15489_v21  ;;  %v24482_v21 = vld [vmem:[#allocation85_spill] sm:$0xff] }
 0x98b   : > { %15746 = vst [vmem:[%s19262_s5 + $0x278] sm:$0xff] %v15490_v52  ;;  %v13936_v49 = vpop.f32.mrb[80].mxu0  ;;  %16384 = vmatmul.mubr.msk.bf16.gmra.mrb[188].mxu1 %vm954_vm4, %v24346_v3 }
 0x98c   : > { %v16752_v32 = vadd.f32 %v13936_v49, %v24466_v60  ;;  %v13938_v45 = vpop.f32.mrb[81].mxu0  ;;  %7889 = vmatprep.mubr.bf16.mxu1 %v19034_v7  ;;  %v24483_v49 = vld [vmem:[#allocation46_spill] sm:$0xff] }
 0x98d   : > { %v16753_v9 = vadd.f32 %v13938_v45, %v24467_v36  ;;  %v13940_v6 = vpop.f32.mrb[82].mxu0  ;;  %v24484_v60 = vld [vmem:[#allocation86_spill] sm:$0xff] }
 0x98e   : > { %v15491_v8 = vadd.f32 %v16752_v32, %v22648_v33  ;;  %v16754_v59 = vadd.f32 %v13940_v6, %v24468_v62  ;;  %v13942_v40 = vpop.f32.mrb[83].mxu0 }
 0x98f   : > { %v15492_v43 = vadd.f32 %v16753_v9, %v22650_v58  ;;  %v16755_v38 = vadd.f32 %v13942_v40, %v24469_v27  ;;  %v24485_v9 = vld [vmem:[#allocation100_spill] sm:$0xff]  ;;  %v24487_v27 = vld [vmem:[#allocation149_spill] sm:$0xff] }
 0x990   : > { %15747 = vst [vmem:[%s19262_s5 + $0x280] sm:$0xff] %v15491_v8  ;;  %v15493_v23 = vadd.f32 %v16754_v59, %v22648_v33  ;;  %16644 = vmatmul.mubr.msk.bf16.gmra.mrb[188].mxu0 %vm954_vm4, %v24470_v1  ;;  %v24486_v59 = vld [vmem:[#allocation102_spill] sm:$0xff]  ;;  %v24488_v1 = vld [vmem:[#allocation104_spill] sm:$0xff] }
 0x991   : > { %15748 = vst [vmem:[%s19262_s5 + $0x288] sm:$0xff] %v15492_v43  ;;  %v15494_v3 = vadd.f32 %v16755_v38, %v22650_v58  ;;  %14214 = vmatprep.mubr.bf16.mxu0 %v19034_v7 }
 0x992   : > { %15749 = vst [vmem:[%s19262_s5 + $0x290] sm:$0xff] %v15493_v23 }
 0x993   : > { %15750 = vst [vmem:[%s19262_s5 + $0x298] sm:$0xff] %v15494_v3  ;;  %v13946_v5 = vpop.f32.mrb[84].mxu0  ;;  %16385 = vmatmul.mubr.msk.bf16.gmra.mrb[192].mxu1 %vm954_vm4, %v24351_v41 }
 0x994   : > { %v16756_v37 = vadd.f32 %v13946_v5, %v24471_v51  ;;  %v13948_v4 = vpop.f32.mrb[85].mxu0  ;;  %7899 = vmatprep.mubr.bf16.mxu1 %v19034_v7  ;;  %v24489_v51 = vld [vmem:[#allocation47_spill] sm:$0xff] }
 0x995   : > { %v16757_v48 = vadd.f32 %v13948_v4, %v24472_v46  ;;  %v13950_v35 = vpop.f32.mrb[86].mxu0 }
 0x996   : > { %v15495_v11 = vadd.f32 %v16756_v37, %v22648_v33  ;;  %v16758_v54 = vadd.f32 %v13950_v35, %v24473_v25  ;;  %v13952_v44 = vpop.f32.mrb[87].mxu0  ;;  %v24490_v37 = vld [vmem:[#allocation105_spill] sm:$0xff]  ;;  %v24491_v35 = vld [vmem:[#allocation107_spill] sm:$0xff] }
 0x997   : > { %v15496_v28 = vadd.f32 %v16757_v48, %v22650_v58  ;;  %v16759_v14 = vadd.f32 %v13952_v44, %v24474_v53  ;;  %v24492_v44 = vld [vmem:[#allocation108_spill] sm:$0xff] }
 0x998   : > { %15751 = vst [vmem:[%s19262_s5 + $0x2a0] sm:$0xff] %v15495_v11  ;;  %v15497_v13 = vadd.f32 %v16758_v54, %v22648_v33  ;;  %16645 = vmatmul.mubr.msk.bf16.gmra.mrb[192].mxu0 %vm954_vm4, %v24475_v15 }
 0x999   : > { %15752 = vst [vmem:[%s19262_s5 + $0x2a8] sm:$0xff] %v15496_v28  ;;  %v15498_v41 = vadd.f32 %v16759_v14, %v22650_v58  ;;  %14224 = vmatprep.mubr.bf16.mxu0 %v19034_v7  ;;  %v24493_v14 = vld [vmem:[#allocation127_spill] sm:$0xff] }
 0x99a   : > { %15753 = vst [vmem:[%s19262_s5 + $0x2b0] sm:$0xff] %v15497_v13 }
 0x99b   : > { %15754 = vst [vmem:[%s19262_s5 + $0x2b8] sm:$0xff] %v15498_v41  ;;  %v13956_v12 = vpop.f32.mrb[88].mxu0  ;;  %16386 = vmatmul.mubr.msk.bf16.gmra.mrb[196].mxu1 %vm954_vm4, %v24477_v19  ;;  %v24494_v41 = vld [vmem:[#allocation110_spill] sm:$0xff] }
 0x99c   : > { %v16760_v17 = vadd.f32 %v13956_v12, %v24476_v47  ;;  %v13958_v55 = vpop.f32.mrb[89].mxu0  ;;  %7909 = vmatprep.mubr.bf16.mxu1 %v19034_v7 }
 0x99d   : > { %v16761_v31 = vadd.f32 %v13958_v55, %v24478_v2  ;;  %v13960_v0 = vpop.f32.mrb[90].mxu0  ;;  %v24496_v55 = vld [vmem:[#allocation111_spill] sm:$0xff] }
 0x99e   : > { %v15499_v24 = vadd.f32 %v16760_v17, %v22648_v33  ;;  %v16762_v39 = vadd.f32 %v13960_v0, %v24479_v22  ;;  %v13962_v63 = vpop.f32.mrb[91].mxu0  ;;  %v24495_v17 = vld [vmem:[#allocation51_spill] sm:$0xff]  ;;  %v24497_v0 = vld [vmem:[#allocation113_spill] sm:$0xff] }
 0x99f   : > { %v15500_v61 = vadd.f32 %v16761_v31, %v22650_v58  ;;  %v16763_v20 = vadd.f32 %v13962_v63, %v24480_v29  ;;  %v24498_v63 = vld [vmem:[#allocation114_spill] sm:$0xff] }
 0x9a0   : > { %15755 = vst [vmem:[%s19262_s5 + $0x2c0] sm:$0xff] %v15499_v24  ;;  %v15501_v18 = vadd.f32 %v16762_v39, %v22648_v33  ;;  %16646 = vmatmul.mubr.msk.bf16.gmra.mrb[196].mxu0 %vm954_vm4, %v24481_v26 }
 0x9a1   : > { %15756 = vst [vmem:[%s19262_s5 + $0x2c8] sm:$0xff] %v15500_v61  ;;  %v15502_v42 = vadd.f32 %v16763_v20, %v22650_v58  ;;  %14234 = vmatprep.mubr.bf16.mxu0 %v19034_v7  ;;  %v24499_v20 = vld [vmem:[#allocation150_spill] sm:$0xff] }
 0x9a2   : > { %15757 = vst [vmem:[%s19262_s5 + $0x2d0] sm:$0xff] %v15501_v18 }
 0x9a3   : > { %15758 = vst [vmem:[%s19262_s5 + $0x2d8] sm:$0xff] %v15502_v42  ;;  %v13966_v10 = vpop.f32.mrb[92].mxu0  ;;  %16387 = vmatmul.mubr.msk.bf16.gmra.mrb[200].mxu1 %vm954_vm4, %v24483_v49  ;;  %v24500_v42 = vld [vmem:[#allocation116_spill] sm:$0xff] }
 0x9a4   : > { %v16764_v30 = vadd.f32 %v13966_v10, %v24482_v21  ;;  %v13968_v52 = vpop.f32.mrb[93].mxu0  ;;  %7919 = vmatprep.mubr.bf16.mxu1 %v19034_v7 }
 0x9a5   : > { %v16765_v32 = vadd.f32 %v13968_v52, %v24484_v60  ;;  %v13970_v45 = vpop.f32.mrb[94].mxu0  ;;  %v24502_v52 = vld [vmem:[#allocation117_spill] sm:$0xff] }
 0x9a6   : > { %v15503_v36 = vadd.f32 %v16764_v30, %v22648_v33  ;;  %v16766_v6 = vadd.f32 %v13970_v45, %v24485_v9  ;;  %v13972_v8 = vpop.f32.mrb[95].mxu0  ;;  %v24501_v30 = vld [vmem:[#allocation89_spill] sm:$0xff]  ;;  %v24503_v45 = vld [vmem:[#allocation119_spill] sm:$0xff] }
 0x9a7   : > { %v15504_v62 = vadd.f32 %v16765_v32, %v22650_v58  ;;  %v16767_v40 = vadd.f32 %v13972_v8, %v24486_v59  ;;  %v24504_v8 = vld [vmem:[#allocation120_spill] sm:$0xff] }
 0x9a8   : > { %15759 = vst [vmem:[%s19262_s5 + $0x2e0] sm:$0xff] %v15503_v36  ;;  %v15505_v43 = vadd.f32 %v16766_v6, %v22648_v33  ;;  %16647 = vmatmul.mubr.msk.bf16.gmra.mrb[200].mxu0 %vm954_vm4, %v24487_v27 }
 0x9a9   : > { %15760 = vst [vmem:[%s19262_s5 + $0x2e8] sm:$0xff] %v15504_v62  ;;  %v15506_v38 = vadd.f32 %v16767_v40, %v22650_v58  ;;  %14244 = vmatprep.mubr.bf16.mxu0 %v19034_v7  ;;  %v24505_v40 = vld [vmem:[#allocation52_spill] sm:$0xff] }
 0x9aa   : > { %15761 = vst [vmem:[%s19262_s5 + $0x2f0] sm:$0xff] %v15505_v43 }
 0x9ab   : > { %15762 = vst [vmem:[%s19262_s5 + $0x2f8] sm:$0xff] %v15506_v38  ;;  %v13976_v23 = vpop.f32.mrb[96].mxu0  ;;  %16388 = vmatmul.mubr.msk.bf16.gmra.mrb[204].mxu1 %vm954_vm4, %v24489_v51  ;;  %v24506_v38 = vld [vmem:[#allocation122_spill] sm:$0xff] }
 0x9ac   : > { %v16768_v3 = vadd.f32 %v13976_v23, %v24488_v1  ;;  %v13978_v5 = vpop.f32.mrb[97].mxu0  ;;  %7929 = vmatprep.mubr.bf16.mxu1 %v19034_v7 }
 0x9ad   : > { %v16769_v4 = vadd.f32 %v13978_v5, %v24490_v37  ;;  %v13980_v46 = vpop.f32.mrb[98].mxu0  ;;  %v24508_v5 = vld [vmem:[#allocation123_spill] sm:$0xff] }
 0x9ae   : > { %v15507_v48 = vadd.f32 %v16768_v3, %v22648_v33  ;;  %v16770_v11 = vadd.f32 %v13980_v46, %v24491_v35  ;;  %v13982_v25 = vpop.f32.mrb[99].mxu0  ;;  %v24507_v3 = vld [vmem:[#allocation56_spill] sm:$0xff]  ;;  %v24509_v46 = vld [vmem:[#allocation125_spill] sm:$0xff] }
 0x9af   : > { %v15508_v54 = vadd.f32 %v16769_v4, %v22650_v58  ;;  %v16771_v28 = vadd.f32 %v13982_v25, %v24492_v44  ;;  %v24510_v25 = vld [vmem:[#allocation151_spill] sm:$0xff] }
 0x9b0   : > { %15763 = vst [vmem:[%s19262_s5 + $0x300] sm:$0xff] %v15507_v48  ;;  %v15509_v53 = vadd.f32 %v16770_v11, %v22648_v33  ;;  %16648 = vmatmul.mubr.msk.bf16.gmra.mrb[204].mxu0 %vm954_vm4, %v24493_v14 }
 0x9b1   : > { %15764 = vst [vmem:[%s19262_s5 + $0x308] sm:$0xff] %v15508_v54  ;;  %v15510_v13 = vadd.f32 %v16771_v28, %v22650_v58  ;;  %14254 = vmatprep.mubr.bf16.mxu0 %v19034_v7  ;;  %v24511_v28 = vld [vmem:[#allocation72_spill] sm:$0xff] }
 0x9b2   : > { %15765 = vst [vmem:[%s19262_s5 + $0x310] sm:$0xff] %v15509_v53 }
 0x9b3   : > { %15766 = vst [vmem:[%s19262_s5 + $0x318] sm:$0xff] %v15510_v13  ;;  %v13986_v15 = vpop.f32.mrb[100].mxu0  ;;  %16389 = vmatmul.mubr.msk.bf16.gmra.mrb[208].mxu1 %vm954_vm4, %v24495_v17  ;;  %v24512_v13 = vld [vmem:[#allocation152_spill] sm:$0xff] }
 0x9b4   : > { %v16772_v12 = vadd.f32 %v13986_v15, %v24494_v41  ;;  %v13988_v47 = vpop.f32.mrb[101].mxu0  ;;  %7939 = vmatprep.mubr.bf16.mxu1 %v19034_v7 }
 0x9b5   : > { %v16773_v19 = vadd.f32 %v13988_v47, %v24496_v55  ;;  %v13990_v2 = vpop.f32.mrb[102].mxu0  ;;  %v24514_v47 = vld [vmem:[#allocation153_spill] sm:$0xff] }
 0x9b6   : > { %v15511_v31 = vadd.f32 %v16772_v12, %v22648_v33  ;;  %v16774_v24 = vadd.f32 %v13990_v2, %v24497_v0  ;;  %v13992_v22 = vpop.f32.mrb[103].mxu0  ;;  %v24513_v12 = vld [vmem:[#allocation92_spill] sm:$0xff]  ;;  %v24515_v2 = vld [vmem:[#allocation154_spill] sm:$0xff] }
 0x9b7   : > { %v15512_v39 = vadd.f32 %v16773_v19, %v22650_v58  ;;  %v16775_v61 = vadd.f32 %v13992_v22, %v24498_v63  ;;  %v24516_v22 = vld [vmem:[#allocation155_spill] sm:$0xff] }
 0x9b8   : > { %15767 = vst [vmem:[%s19262_s5 + $0x320] sm:$0xff] %v15511_v31  ;;  %v15513_v29 = vadd.f32 %v16774_v24, %v22648_v33  ;;  %16649 = vmatmul.mubr.msk.bf16.gmra.mrb[208].mxu0 %vm954_vm4, %v24499_v20 }
 0x9b9   : > { %15768 = vst [vmem:[%s19262_s5 + $0x328] sm:$0xff] %v15512_v39  ;;  %v15514_v18 = vadd.f32 %v16775_v61, %v22650_v58  ;;  %14264 = vmatprep.mubr.bf16.mxu0 %v19034_v7  ;;  %v24517_v61 = vld [vmem:[#allocation93_spill] sm:$0xff] }
 0x9ba   : > { %15769 = vst [vmem:[%s19262_s5 + $0x330] sm:$0xff] %v15513_v29 }
 0x9bb   : > { %15770 = vst [vmem:[%s19262_s5 + $0x338] sm:$0xff] %v15514_v18  ;;  %v13996_v26 = vpop.f32.mrb[104].mxu0  ;;  %16390 = vmatmul.mubr.msk.bf16.gmra.mrb[212].mxu1 %vm954_vm4, %v24501_v30  ;;  %v24518_v18 = vld [vmem:[#allocation156_spill] sm:$0xff] }
 0x9bc   : > { %v16776_v10 = vadd.f32 %v13996_v26, %v24500_v42  ;;  %v13998_v21 = vpop.f32.mrb[105].mxu0  ;;  %7949 = vmatprep.mubr.bf16.mxu1 %v19034_v7 }
 0x9bd   : > { %v16777_v49 = vadd.f32 %v13998_v21, %v24502_v52  ;;  %v14000_v60 = vpop.f32.mrb[106].mxu0  ;;  %v24520_v21 = vld [vmem:[#allocation157_spill] sm:$0xff] }
 0x9be   : > { %v15515_v32 = vadd.f32 %v16776_v10, %v22648_v33  ;;  %v16778_v36 = vadd.f32 %v14000_v60, %v24503_v45  ;;  %v14002_v9 = vpop.f32.mrb[107].mxu0  ;;  %v24519_v10 = vld [vmem:[#allocation128_spill] sm:$0xff]  ;;  %v24521_v60 = vld [vmem:[#allocation158_spill] sm:$0xff] }
 0x9bf   : > { %v15516_v6 = vadd.f32 %v16777_v49, %v22650_v58  ;;  %v16779_v62 = vadd.f32 %v14002_v9, %v24504_v8  ;;  %v24522_v9 = vld [vmem:[#allocation159_spill] sm:$0xff] }
 0x9c0   : > { %15771 = vst [vmem:[%s19262_s5 + $0x340] sm:$0xff] %v15515_v32  ;;  %v15517_v59 = vadd.f32 %v16778_v36, %v22648_v33  ;;  %16650 = vmatmul.mubr.msk.bf16.gmra.mrb[212].mxu0 %vm954_vm4, %v24505_v40 }
 0x9c1   : > { %15772 = vst [vmem:[%s19262_s5 + $0x348] sm:$0xff] %v15516_v6  ;;  %v15518_v43 = vadd.f32 %v16779_v62, %v22650_v58  ;;  %14274 = vmatprep.mubr.bf16.mxu0 %v19034_v7  ;;  %v24523_v62 = vld [vmem:[#allocation94_spill] sm:$0xff] }
 0x9c2   : > { %15773 = vst [vmem:[%s19262_s5 + $0x350] sm:$0xff] %v15517_v59 }
 0x9c3   : > { %15774 = vst [vmem:[%s19262_s5 + $0x358] sm:$0xff] %v15518_v43  ;;  %v14006_v27 = vpop.f32.mrb[108].mxu0  ;;  %16391 = vmatmul.mubr.msk.bf16.gmra.mrb[216].mxu1 %vm954_vm4, %v24507_v3  ;;  %v24524_v43 = vld [vmem:[#allocation160_spill] sm:$0xff] }
 0x9c4   : > { %v16780_v23 = vadd.f32 %v14006_v27, %v24506_v38  ;;  %v14008_v1 = vpop.f32.mrb[109].mxu0  ;;  %7959 = vmatprep.mubr.bf16.mxu1 %v19034_v7 }
 0x9c5   : > { %v16781_v51 = vadd.f32 %v14008_v1, %v24508_v5  ;;  %v14010_v37 = vpop.f32.mrb[110].mxu0 }
 0x9c6   : > { %v15519_v4 = vadd.f32 %v16780_v23, %v22648_v33  ;;  %v16782_v48 = vadd.f32 %v14010_v37, %v24509_v46  ;;  %v14012_v35 = vpop.f32.mrb[111].mxu0  ;;  %v24525_v23 = vld [vmem:[#allocation161_spill] sm:$0xff] }
 0x9c7   : > { %v15520_v11 = vadd.f32 %v16781_v51, %v22650_v58  ;;  %v16783_v54 = vadd.f32 %v14012_v35, %v24510_v25  ;;  %v24526_v51 = vld [vmem:[#allocation162_spill] sm:$0xff]  ;;  %v24528_v25 = vld [vmem:[#allocation57_spill] sm:$0xff] }
 0x9c8   : > { %15775 = vst [vmem:[%s19262_s5 + $0x360] sm:$0xff] %v15519_v4  ;;  %v15521_v44 = vadd.f32 %v16782_v48, %v22648_v33  ;;  %16651 = vmatmul.mubr.msk.bf16.gmra.mrb[216].mxu0 %vm954_vm4, %v24511_v28  ;;  %v24527_v48 = vld [vmem:[#allocation163_spill] sm:$0xff] }
 0x9c9   : > { %15776 = vst [vmem:[%s19262_s5 + $0x368] sm:$0xff] %v15520_v11  ;;  %v15522_v53 = vadd.f32 %v16783_v54, %v22650_v58  ;;  %14284 = vmatprep.mubr.bf16.mxu0 %v19034_v7 }
 0x9ca   : > { %15777 = vst [vmem:[%s19262_s5 + $0x370] sm:$0xff] %v15521_v44  ;;  %v24529_v44 = vld [vmem:[#allocation164_spill] sm:$0xff] }
 0x9cb   : > { %15778 = vst [vmem:[%s19262_s5 + $0x378] sm:$0xff] %v15522_v53  ;;  %v14016_v14 = vpop.f32.mrb[112].mxu0  ;;  %16392 = vmatmul.mubr.msk.bf16.gmra.mrb[220].mxu1 %vm954_vm4, %v24513_v12  ;;  %v24531_v12 = vld [vmem:[#allocation165_spill] sm:$0xff] }
 0x9cc   : > { %v16784_v15 = vadd.f32 %v14016_v14, %v24512_v13  ;;  %v14018_v41 = vpop.f32.mrb[113].mxu0  ;;  %7969 = vmatprep.mubr.bf16.mxu1 %v19034_v7  ;;  %v24530_v14 = vld [vmem:[#allocation71_spill] sm:$0xff] }
 0x9cd   : > { %v16785_v17 = vadd.f32 %v14018_v41, %v24514_v47  ;;  %v14020_v55 = vpop.f32.mrb[114].mxu0 }
 0x9ce   : > { %v15523_v19 = vadd.f32 %v16784_v15, %v22648_v33  ;;  %v16786_v31 = vadd.f32 %v14020_v55, %v24515_v2  ;;  %v14022_v0 = vpop.f32.mrb[115].mxu0 }
 0x9cf   : > { %v15524_v24 = vadd.f32 %v16785_v17, %v22650_v58  ;;  %v16787_v39 = vadd.f32 %v14022_v0, %v24516_v22  ;;  %v24533_v0 = vld [vmem:[#allocation96_spill] sm:$0xff] }
 0x9d0   : > { %15779 = vst [vmem:[%s19262_s5 + $0x380] sm:$0xff] %v15523_v19  ;;  %v15525_v63 = vadd.f32 %v16786_v31, %v22648_v33  ;;  %16652 = vmatmul.mubr.msk.bf16.gmra.mrb[220].mxu0 %vm954_vm4, %v24517_v61  ;;  %v24532_v19 = vld [vmem:[#allocation166_spill] sm:$0xff] }
 0x9d1   : > { %15780 = vst [vmem:[%s19262_s5 + $0x388] sm:$0xff] %v15524_v24  ;;  %v15526_v29 = vadd.f32 %v16787_v39, %v22650_v58  ;;  %14294 = vmatprep.mubr.bf16.mxu0 %v19034_v7 }
 0x9d2   : > { %15781 = vst [vmem:[%s19262_s5 + $0x390] sm:$0xff] %v15525_v63 }
 0x9d3   : > { %15782 = vst [vmem:[%s19262_s5 + $0x398] sm:$0xff] %v15526_v29  ;;  %v14026_v20 = vpop.f32.mrb[116].mxu0  ;;  %16393 = vmatmul.mubr.msk.bf16.gmra.mrb[224].mxu1 %vm954_vm4, %v24519_v10 }
 0x9d4   : > { %v16788_v26 = vadd.f32 %v14026_v20, %v24518_v18  ;;  %v14028_v42 = vpop.f32.mrb[117].mxu0  ;;  %7979 = vmatprep.mubr.bf16.mxu1 %v19034_v7 }
 0x9d5   : > { %v16789_v30 = vadd.f32 %v14028_v42, %v24520_v21  ;;  %v14030_v52 = vpop.f32.mrb[118].mxu0 }
 0x9d6   : > { %v15527_v49 = vadd.f32 %v16788_v26, %v22648_v33  ;;  %v16790_v32 = vadd.f32 %v14030_v52, %v24521_v60  ;;  %v14032_v45 = vpop.f32.mrb[119].mxu0 }
 0x9d7   : > { %v15528_v36 = vadd.f32 %v16789_v30, %v22650_v58  ;;  %v16791_v6 = vadd.f32 %v14032_v45, %v24522_v9 }
 0x9d8   : > { %15783 = vst [vmem:[%s19262_s5 + $0x3a0] sm:$0xff] %v15527_v49  ;;  %v15529_v8 = vadd.f32 %v16790_v32, %v22648_v33  ;;  %16653 = vmatmul.mubr.msk.bf16.gmra.mrb[224].mxu0 %vm954_vm4, %v24523_v62  ;;  %v24534_v32 = vld [vmem:[#allocation97_spill] sm:$0xff] }
 0x9d9   : > { %15784 = vst [vmem:[%s19262_s5 + $0x3a8] sm:$0xff] %v15528_v36  ;;  %v15530_v59 = vadd.f32 %v16791_v6, %v22650_v58  ;;  %14304 = vmatprep.mubr.bf16.mxu0 %v19034_v7 }
 0x9da   : > { %15785 = vst [vmem:[%s19262_s5 + $0x3b0] sm:$0xff] %v15529_v8 }
 0x9db   : > { %15786 = vst [vmem:[%s19262_s5 + $0x3b8] sm:$0xff] %v15530_v59  ;;  %v14036_v40 = vpop.f32.mrb[120].mxu0  ;;  %16394 = vmatmul.mubr.msk.bf16.gmra.mrb[228].mxu1 %vm954_vm4, %v24394_v57 }
 0x9dc   : > { %v16792_v27 = vadd.f32 %v14036_v40, %v24524_v43  ;;  %v14038_v38 = vpop.f32.mrb[121].mxu0  ;;  %7989 = vmatprep.mubr.bf16.mxu1 %v19034_v7 }
 0x9dd   : > { %v16793_v1 = vadd.f32 %v14038_v38, %v24525_v23  ;;  %v14040_v3 = vpop.f32.mrb[122].mxu0 }
 0x9de   : > { %v15531_v5 = vadd.f32 %v16792_v27, %v22648_v33  ;;  %v16794_v37 = vadd.f32 %v14040_v3, %v24526_v51  ;;  %v14042_v4 = vpop.f32.mrb[123].mxu0  ;;  %v24535_v51 = vld [vmem:[#allocation62_spill] sm:$0xff] }
 0x9df   : > { %v15532_v46 = vadd.f32 %v16793_v1, %v22650_v58  ;;  %v16795_v35 = vadd.f32 %v14042_v4, %v24527_v48 }
 0x9e0   : > { %15787 = vst [vmem:[%s19262_s5 + $0x3c0] sm:$0xff] %v15531_v5  ;;  %v15533_v11 = vadd.f32 %v16794_v37, %v22648_v33  ;;  %16654 = vmatmul.mubr.msk.bf16.gmra.mrb[228].mxu0 %vm954_vm4, %v24528_v25 }
 0x9e1   : > { %15788 = vst [vmem:[%s19262_s5 + $0x3c8] sm:$0xff] %v15532_v46  ;;  %v15534_v57 = vadd.f32 %v16795_v35, %v22650_v58  ;;  %14314 = vmatprep.mubr.bf16.mxu0 %v19034_v7 }
 0x9e2   : > { %15789 = vst [vmem:[%s19262_s5 + $0x3d0] sm:$0xff] %v15533_v11 }
 0x9e3   : > { %15790 = vst [vmem:[%s19262_s5 + $0x3d8] sm:$0xff] %v15534_v57  ;;  %v14046_v54 = vpop.f32.mrb[124].mxu0  ;;  %16395 = vmatmul.mubr.msk.bf16.gmra.mrb[232].mxu1 %vm954_vm4, %v24396_v50 }
 0x9e4   : > { %v16796_v28 = vadd.f32 %v14046_v54, %v24529_v44  ;;  %v14048_v53 = vpop.f32.mrb[125].mxu0  ;;  %7999 = vmatprep.mubr.bf16.mxu1 %v19034_v7 }
 0x9e5   : > { %v16797_v13 = vadd.f32 %v14048_v53, %v24530_v14  ;;  %v14050_v15 = vpop.f32.mrb[126].mxu0 }
 0x9e6   : > { %v15535_v41 = vadd.f32 %v16796_v28, %v22648_v33  ;;  %v16798_v47 = vadd.f32 %v14050_v15, %v24531_v12  ;;  %v14052_v17 = vpop.f32.mrb[127].mxu0  ;;  %v7731_v31 = vpop.f32.mrb[128].mxu1 }
 0x9e7   : > { %v15536_v55 = vadd.f32 %v16797_v13, %v22650_v58  ;;  %v16799_v2 = vadd.f32 %v14052_v17, %v24532_v19  ;;  %v7733_v24 = vpop.f32.mrb[129].mxu1  ;;  %v24537_v17 = vld [vmem:[#allocation137_spill] sm:$0xff]  ;;  %v24538_v19 = vld [vmem:[#allocation138_spill] sm:$0xff] }
 0x9e8   : > { %15791 = vst [vmem:[%s19262_s5 + $0x3e0] sm:$0xff] %v15535_v41  ;;  %v15537_v50 = vadd.f32 %v16798_v47, %v22648_v33  ;;  %16655 = vmatmul.mubr.msk.bf16.gmra.mrb[232].mxu0 %vm954_vm4, %v24533_v0  ;;  %v7735_v39 = vpop.f32.mrb[130].mxu1  ;;  %v24536_v41 = vld [vmem:[#allocation98_spill] sm:$0xff] }
 0x9e9   : > { %15792 = vst [vmem:[%s19262_s5 + $0x3e8] sm:$0xff] %v15536_v55  ;;  %v15538_v22 = vadd.f32 %v16799_v2, %v22650_v58  ;;  %14324 = vmatprep.mubr.bf16.mxu0 %v19034_v7  ;;  %v7737_v63 = vpop.f32.mrb[131].mxu1  ;;  %v13676_v55 = vrot.slane %v24537_v17, 1  ;;  %v13677_v2 = vrot.slane %v24538_v19, 1 }
 0x9ea   : > { %15793 = vst [vmem:[%s19262_s5 + $0x3f0] sm:$0xff] %v15537_v50 }
 0x9eb   : > { %15794 = vst [vmem:[%s19262_s5 + $0x3f8] sm:$0xff] %v15538_v22  ;;  %v14056_v61 = vpop.f32.mrb[128].mxu0  ;;  %16396 = vmatmul.mubr.msk.bf16.gmra.mrb[236].mxu1 %vm954_vm4, %v24398_v34  ;;  %v24539_v22 = vld [vmem:[#allocation136_spill] sm:$0xff] }
 0x9ec   : > { %v16800_v29 = vadd.f32 %v14056_v61, %v7731_v31  ;;  %v14058_v20 = vpop.f32.mrb[129].mxu0  ;;  %8009 = vmatprep.mubr.bf16.mxu1 %v19034_v7  ;;  %v13678_v61 = vsel %vm10394_vm7, %v13676_v55, %v13677_v2 }
 0x9ed   : > { %v16801_v18 = vadd.f32 %v14058_v20, %v7733_v24  ;;  %v14060_v26 = vpop.f32.mrb[130].mxu0 }
 0x9ee   : > { %v15539_v42 = vadd.f32 %v16800_v29, %v22648_v33  ;;  %v16802_v10 = vadd.f32 %v14060_v26, %v7735_v39  ;;  %v14062_v21 = vpop.f32.mrb[131].mxu0  ;;  %v7741_v49 = vpop.f32.mrb[132].mxu1 }
 0x9ef   : > { %v15540_v30 = vadd.f32 %v16801_v18, %v22650_v58  ;;  %v16803_v52 = vadd.f32 %v14062_v21, %v7737_v63  ;;  %v7743_v34 = vpop.f32.mrb[133].mxu1 }
 0x9f0   : > { %15795 = vst [vmem:[%s19262_s5 + $0x400] sm:$0xff] %v15539_v42  ;;  %v15541_v60 = vadd.f32 %v16802_v10, %v22648_v33  ;;  %16656 = vmatmul.mubr.msk.bf16.gmra.mrb[236].mxu0 %vm954_vm4, %v24534_v32  ;;  %v7745_v36 = vpop.f32.mrb[134].mxu1 }
 0x9f1   : > { %15796 = vst [vmem:[%s19262_s5 + $0x408] sm:$0xff] %v15540_v30  ;;  %v15542_v45 = vadd.f32 %v16803_v52, %v22650_v58  ;;  %14334 = vmatprep.mubr.bf16.mxu0 %v19034_v7  ;;  %v7747_v9 = vpop.f32.mrb[135].mxu1 }
 0x9f2   : > { %15797 = vst [vmem:[%s19262_s5 + $0x410] sm:$0xff] %v15541_v60  ;;  %v24540_v60 = vld [vmem:[#allocation139_spill] sm:$0xff] }
 0x9f3   : > { %15798 = vst [vmem:[%s19262_s5 + $0x418] sm:$0xff] %v15542_v45  ;;  %v14066_v6 = vpop.f32.mrb[132].mxu0  ;;  %16397 = vmatmul.mubr.msk.bf16.gmra.mrb[240].mxu1 %vm954_vm4, %v24399_v16  ;;  %v13679_v32 = vrot.slane %v24540_v60, 1 }
 0x9f4   : > { %v16804_v8 = vadd.f32 %v14066_v6, %v7741_v49  ;;  %v14068_v62 = vpop.f32.mrb[133].mxu0  ;;  %8019 = vmatprep.mubr.bf16.mxu1 %v19034_v7  ;;  %v24541_v6 = vld [vmem:[#allocation77_spill] sm:$0xff] }
 0x9f5   : > { %v16805_v59 = vadd.f32 %v14068_v62, %v7743_v34  ;;  %v14070_v40 = vpop.f32.mrb[134].mxu0 }
 0x9f6   : > { %v15543_v43 = vadd.f32 %v16804_v8, %v22648_v33  ;;  %v16806_v27 = vadd.f32 %v14070_v40, %v7745_v36  ;;  %v14072_v38 = vpop.f32.mrb[135].mxu0  ;;  %v7751_v3 = vpop.f32.mrb[136].mxu1 }
 0x9f7   : > { %v15544_v23 = vadd.f32 %v16805_v59, %v22650_v58  ;;  %v16807_v1 = vadd.f32 %v14072_v38, %v7747_v9  ;;  %v7753_v16 = vpop.f32.mrb[137].mxu1  ;;  %v13680_v59 = vsel %vm10394_vm7, %v13677_v2, %v13679_v32 }
 0x9f8   : > { %15799 = vst [vmem:[%s19262_s5 + $0x420] sm:$0xff] %v15543_v43  ;;  %v15545_v5 = vadd.f32 %v16806_v27, %v22648_v33  ;;  %16657 = vmatmul.mubr.msk.bf16.gmra.mrb[240].mxu0 %vm954_vm4, %v24535_v51  ;;  %v7755_v4 = vpop.f32.mrb[138].mxu1 }
 0x9f9   : > { %15800 = vst [vmem:[%s19262_s5 + $0x428] sm:$0xff] %v15544_v23  ;;  %v15546_v37 = vadd.f32 %v16807_v1, %v22650_v58  ;;  %14344 = vmatprep.mubr.bf16.mxu0 %v19034_v7  ;;  %v7757_v46 = vpop.f32.mrb[139].mxu1 }
 0x9fa   : > { %15801 = vst [vmem:[%s19262_s5 + $0x430] sm:$0xff] %v15545_v5 }
 0x9fb   : > { %15802 = vst [vmem:[%s19262_s5 + $0x438] sm:$0xff] %v15546_v37  ;;  %v14076_v48 = vpop.f32.mrb[136].mxu0  ;;  %16398 = vmatmul.mubr.msk.bf16.gmra.mrb[244].mxu1 %vm954_vm4, %v24400_v56 }
 0x9fc   : > { %v16808_v35 = vadd.f32 %v14076_v48, %v7751_v3  ;;  %v14078_v11 = vpop.f32.mrb[137].mxu0  ;;  %8029 = vmatprep.mubr.bf16.mxu1 %v19034_v7 }
 0x9fd   : > { %v16809_v25 = vadd.f32 %v14078_v11, %v7753_v16  ;;  %v14080_v57 = vpop.f32.mrb[138].mxu0 }
 0x9fe   : > { %v15547_v54 = vadd.f32 %v16808_v35, %v22648_v33  ;;  %v16810_v44 = vadd.f32 %v14080_v57, %v7755_v4  ;;  %v14082_v28 = vpop.f32.mrb[139].mxu0  ;;  %v7761_v13 = vpop.f32.mrb[140].mxu1 }
 0x9ff   : > { %v15548_v53 = vadd.f32 %v16809_v25, %v22650_v58  ;;  %v16811_v14 = vadd.f32 %v14082_v28, %v7757_v46  ;;  %v7763_v56 = vpop.f32.mrb[141].mxu1 }
 0xa00   : > { %15803 = vst [vmem:[%s19262_s5 + $0x440] sm:$0xff] %v15547_v54  ;;  %v15549_v15 = vadd.f32 %v16810_v44, %v22648_v33  ;;  %16658 = vmatmul.mubr.msk.bf16.gmra.mrb[244].mxu0 %vm954_vm4, %v24536_v41  ;;  %v7765_v47 = vpop.f32.mrb[142].mxu1 }
 0xa01   : > { %15804 = vst [vmem:[%s19262_s5 + $0x448] sm:$0xff] %v15548_v53  ;;  %v15550_v12 = vadd.f32 %v16811_v14, %v22650_v58  ;;  %14354 = vmatprep.mubr.bf16.mxu0 %v19034_v7  ;;  %v7767_v31 = vpop.f32.mrb[143].mxu1 }
 0xa02   : > { %15805 = vst [vmem:[%s19262_s5 + $0x450] sm:$0xff] %v15549_v15 }
 0xa03   : > { %15806 = vst [vmem:[%s19262_s5 + $0x458] sm:$0xff] %v15550_v12  ;;  %v14086_v50 = vpop.f32.mrb[140].mxu0  ;;  %16399 = vmatmul.mubr.msk.bf16.gmra.mrb[248].mxu1 %vm954_vm4, %v24539_v22 }
 0xa04   : > { %v16812_v0 = vadd.f32 %v14086_v50, %v7761_v13  ;;  %v14088_v24 = vpop.f32.mrb[141].mxu0  ;;  %8039 = vmatprep.mubr.bf16.mxu1 %v19034_v7 }
 0xa05   : > { %v16813_v39 = vadd.f32 %v14088_v24, %v7763_v56  ;;  %v14090_v63 = vpop.f32.mrb[142].mxu0 }
 0xa06   : > { %v15551_v29 = vadd.f32 %v16812_v0, %v22648_v33  ;;  %v16814_v20 = vadd.f32 %v14090_v63, %v7765_v47  ;;  %v14092_v18 = vpop.f32.mrb[143].mxu0  ;;  %v7771_v10 = vpop.f32.mrb[144].mxu1 }
 0xa07   : > { %v15552_v26 = vadd.f32 %v16813_v39, %v22650_v58  ;;  %v16815_v42 = vadd.f32 %v14092_v18, %v7767_v31  ;;  %v7773_v30 = vpop.f32.mrb[145].mxu1 }
 0xa08   : > { %15807 = vst [vmem:[%s19262_s5 + $0x460] sm:$0xff] %v15551_v29  ;;  %v15553_v21 = vadd.f32 %v16814_v20, %v22648_v33  ;;  %16659 = vmatmul.mubr.msk.bf16.gmra.mrb[248].mxu0 %vm954_vm4, %v13678_v61  ;;  %v7775_v49 = vpop.f32.mrb[146].mxu1 }
 0xa09   : > { %15808 = vst [vmem:[%s19262_s5 + $0x468] sm:$0xff] %v15552_v26  ;;  %v15554_v52 = vadd.f32 %v16815_v42, %v22650_v58  ;;  %14364 = vmatprep.mubr.bf16.mxu0 %v19034_v7  ;;  %v7777_v34 = vpop.f32.mrb[147].mxu1 }
 0xa0a   : > { %15809 = vst [vmem:[%s19262_s5 + $0x470] sm:$0xff] %v15553_v21 }
 0xa0b   : > { %15810 = vst [vmem:[%s19262_s5 + $0x478] sm:$0xff] %v15554_v52  ;;  %v14096_v45 = vpop.f32.mrb[144].mxu0  ;;  %16400 = vmatmul.mubr.msk.bf16.gmra.mrb[252].mxu1 %vm954_vm4, %v24541_v6 }
 0xa0c   : > { %v16816_v36 = vadd.f32 %v14096_v45, %v7771_v10  ;;  %v14098_v9 = vpop.f32.mrb[145].mxu0 }
 0xa0d   : > { %v16817_v8 = vadd.f32 %v14098_v9, %v7773_v30  ;;  %v14100_v62 = vpop.f32.mrb[146].mxu0 }
 0xa0e   : > { %v15555_v7 = vadd.f32 %v16816_v36, %v22648_v33  ;;  %v16818_v40 = vadd.f32 %v14100_v62, %v7775_v49  ;;  %v14102_v43 = vpop.f32.mrb[147].mxu0  ;;  %v7781_v23 = vpop.f32.mrb[148].mxu1 }
 0xa0f   : > { %v15556_v27 = vadd.f32 %v16817_v8, %v22650_v58  ;;  %v16819_v38 = vadd.f32 %v14102_v43, %v7777_v34  ;;  %v7783_v3 = vpop.f32.mrb[149].mxu1 }
 0xa10   : > { %15811 = vst [vmem:[%s19262_s5 + $0x480] sm:$0xff] %v15555_v7  ;;  %v15557_v1 = vadd.f32 %v16818_v40, %v22648_v33  ;;  %16660 = vmatmul.mubr.msk.bf16.gmra.mrb[252].mxu0 %vm954_vm4, %v13680_v59  ;;  %v7785_v51 = vpop.f32.mrb[150].mxu1 }
 0xa11   : > { %15812 = vst [vmem:[%s19262_s5 + $0x488] sm:$0xff] %v15556_v27  ;;  %v15558_v5 = vadd.f32 %v16819_v38, %v22650_v58  ;;  %v7787_v16 = vpop.f32.mrb[151].mxu1 }
 0xa12   : > { %15813 = vst [vmem:[%s19262_s5 + $0x490] sm:$0xff] %v15557_v1 }
 0xa13   : > { %15814 = vst [vmem:[%s19262_s5 + $0x498] sm:$0xff] %v15558_v5  ;;  %v14106_v37 = vpop.f32.mrb[148].mxu0 }
 0xa14   : > { %v16820_v4 = vadd.f32 %v14106_v37, %v7781_v23  ;;  %v14108_v46 = vpop.f32.mrb[149].mxu0 }
 0xa15   : > { %v16821_v48 = vadd.f32 %v14108_v46, %v7783_v3  ;;  %v14110_v35 = vpop.f32.mrb[150].mxu0 }
 0xa16   : > { %v15559_v11 = vadd.f32 %v16820_v4, %v22648_v33  ;;  %v16822_v25 = vadd.f32 %v14110_v35, %v7785_v51  ;;  %v14112_v57 = vpop.f32.mrb[151].mxu0  ;;  %v7791_v28 = vpop.f32.mrb[152].mxu1 }
 0xa17   : > { %v15560_v54 = vadd.f32 %v16821_v48, %v22650_v58  ;;  %v16823_v44 = vadd.f32 %v14112_v57, %v7787_v16  ;;  %v7793_v14 = vpop.f32.mrb[153].mxu1 }
 0xa18   : > { %15815 = vst [vmem:[%s19262_s5 + $0x4a0] sm:$0xff] %v15559_v11  ;;  %v15561_v53 = vadd.f32 %v16822_v25, %v22648_v33  ;;  %v7795_v15 = vpop.f32.mrb[154].mxu1 }
 0xa19   : > { %15816 = vst [vmem:[%s19262_s5 + $0x4a8] sm:$0xff] %v15560_v54  ;;  %v15562_v13 = vadd.f32 %v16823_v44, %v22650_v58  ;;  %v7797_v41 = vpop.f32.mrb[155].mxu1 }
 0xa1a   : > { %15817 = vst [vmem:[%s19262_s5 + $0x4b0] sm:$0xff] %v15561_v53 }
 0xa1b   : > { %15818 = vst [vmem:[%s19262_s5 + $0x4b8] sm:$0xff] %v15562_v13  ;;  %v14116_v56 = vpop.f32.mrb[152].mxu0 }
 0xa1c   : > { %v16824_v12 = vadd.f32 %v14116_v56, %v7791_v28  ;;  %v14118_v47 = vpop.f32.mrb[153].mxu0 }
 0xa1d   : > { %v16825_v17 = vadd.f32 %v14118_v47, %v7793_v14  ;;  %v14120_v55 = vpop.f32.mrb[154].mxu0 }
 0xa1e   : > { %v15563_v19 = vadd.f32 %v16824_v12, %v22648_v33  ;;  %v16826_v2 = vadd.f32 %v14120_v55, %v7795_v15  ;;  %v14122_v31 = vpop.f32.mrb[155].mxu0  ;;  %v7801_v24 = vpop.f32.mrb[156].mxu1 }
 0xa1f   : > { %v15564_v50 = vadd.f32 %v16825_v17, %v22650_v58  ;;  %v16827_v0 = vadd.f32 %v14122_v31, %v7797_v41  ;;  %v7803_v39 = vpop.f32.mrb[157].mxu1 }
 0xa20   : > { %15819 = vst [vmem:[%s19262_s5 + $0x4c0] sm:$0xff] %v15563_v19  ;;  %v15565_v22 = vadd.f32 %v16826_v2, %v22648_v33  ;;  %v7805_v61 = vpop.f32.mrb[158].mxu1 }
 0xa21   : > { %15820 = vst [vmem:[%s19262_s5 + $0x4c8] sm:$0xff] %v15564_v50  ;;  %v15566_v63 = vadd.f32 %v16827_v0, %v22650_v58  ;;  %v7807_v29 = vpop.f32.mrb[159].mxu1 }
 0xa22   : > { %15821 = vst [vmem:[%s19262_s5 + $0x4d0] sm:$0xff] %v15565_v22 }
 0xa23   : > { %15822 = vst [vmem:[%s19262_s5 + $0x4d8] sm:$0xff] %v15566_v63  ;;  %v14126_v20 = vpop.f32.mrb[156].mxu0 }
 0xa24   : > { %v16828_v18 = vadd.f32 %v14126_v20, %v7801_v24  ;;  %v14128_v26 = vpop.f32.mrb[157].mxu0 }
 0xa25   : > { %v16829_v42 = vadd.f32 %v14128_v26, %v7803_v39  ;;  %v14130_v10 = vpop.f32.mrb[158].mxu0 }
 0xa26   : > { %v15567_v21 = vadd.f32 %v16828_v18, %v22648_v33  ;;  %v16830_v30 = vadd.f32 %v14130_v10, %v7805_v61  ;;  %v14132_v52 = vpop.f32.mrb[159].mxu0  ;;  %v7811_v32 = vpop.f32.mrb[160].mxu1 }
 0xa27   : > { %v15568_v49 = vadd.f32 %v16829_v42, %v22650_v58  ;;  %v16831_v60 = vadd.f32 %v14132_v52, %v7807_v29  ;;  %v7813_v45 = vpop.f32.mrb[161].mxu1 }
 0xa28   : > { %15823 = vst [vmem:[%s19262_s5 + $0x4e0] sm:$0xff] %v15567_v21  ;;  %v15569_v34 = vadd.f32 %v16830_v30, %v22648_v33  ;;  %v7815_v9 = vpop.f32.mrb[162].mxu1 }
 0xa29   : > { %15824 = vst [vmem:[%s19262_s5 + $0x4e8] sm:$0xff] %v15568_v49  ;;  %v15570_v36 = vadd.f32 %v16831_v60, %v22650_v58  ;;  %v7817_v6 = vpop.f32.mrb[163].mxu1 }
 0xa2a   : > { %15825 = vst [vmem:[%s19262_s5 + $0x4f0] sm:$0xff] %v15569_v34 }
 0xa2b   : > { %15826 = vst [vmem:[%s19262_s5 + $0x4f8] sm:$0xff] %v15570_v36  ;;  %v14136_v8 = vpop.f32.mrb[160].mxu0 }
 0xa2c   : > { %v16832_v62 = vadd.f32 %v14136_v8, %v7811_v32  ;;  %v14138_v59 = vpop.f32.mrb[161].mxu0 }
 0xa2d   : > { %v16833_v7 = vadd.f32 %v14138_v59, %v7813_v45  ;;  %v14140_v40 = vpop.f32.mrb[162].mxu0 }
 0xa2e   : > { %v15571_v43 = vadd.f32 %v16832_v62, %v22648_v33  ;;  %v16834_v27 = vadd.f32 %v14140_v40, %v7815_v9  ;;  %v14142_v38 = vpop.f32.mrb[163].mxu0  ;;  %v7821_v3 = vpop.f32.mrb[164].mxu1 }
 0xa2f   : > { %v15572_v23 = vadd.f32 %v16833_v7, %v22650_v58  ;;  %v16835_v1 = vadd.f32 %v14142_v38, %v7817_v6  ;;  %v7823_v51 = vpop.f32.mrb[165].mxu1 }
 0xa30   : > { %15827 = vst [vmem:[%s19262_s5 + $0x500] sm:$0xff] %v15571_v43  ;;  %v15573_v5 = vadd.f32 %v16834_v27, %v22648_v33  ;;  %v7825_v37 = vpop.f32.mrb[166].mxu1 }
 0xa31   : > { %15828 = vst [vmem:[%s19262_s5 + $0x508] sm:$0xff] %v15572_v23  ;;  %v15574_v16 = vadd.f32 %v16835_v1, %v22650_v58  ;;  %v7827_v4 = vpop.f32.mrb[167].mxu1 }
 0xa32   : > { %15829 = vst [vmem:[%s19262_s5 + $0x510] sm:$0xff] %v15573_v5 }
 0xa33   : > { %15830 = vst [vmem:[%s19262_s5 + $0x518] sm:$0xff] %v15574_v16  ;;  %v14146_v46 = vpop.f32.mrb[164].mxu0 }
 0xa34   : > { %v16836_v48 = vadd.f32 %v14146_v46, %v7821_v3  ;;  %v14148_v35 = vpop.f32.mrb[165].mxu0 }
 0xa35   : > { %v16837_v11 = vadd.f32 %v14148_v35, %v7823_v51  ;;  %v14150_v25 = vpop.f32.mrb[166].mxu0 }
 0xa36   : > { %v15575_v57 = vadd.f32 %v16836_v48, %v22648_v33  ;;  %v16838_v54 = vadd.f32 %v14150_v25, %v7825_v37  ;;  %v14152_v44 = vpop.f32.mrb[167].mxu0  ;;  %v7831_v14 = vpop.f32.mrb[168].mxu1 }
 0xa37   : > { %v15576_v28 = vadd.f32 %v16837_v11, %v22650_v58  ;;  %v16839_v53 = vadd.f32 %v14152_v44, %v7827_v4  ;;  %v7833_v15 = vpop.f32.mrb[169].mxu1 }
 0xa38   : > { %15831 = vst [vmem:[%s19262_s5 + $0x520] sm:$0xff] %v15575_v57  ;;  %v15577_v13 = vadd.f32 %v16838_v54, %v22648_v33  ;;  %v7835_v56 = vpop.f32.mrb[170].mxu1 }
 0xa39   : > { %15832 = vst [vmem:[%s19262_s5 + $0x528] sm:$0xff] %v15576_v28  ;;  %v15578_v41 = vadd.f32 %v16839_v53, %v22650_v58  ;;  %v7837_v12 = vpop.f32.mrb[171].mxu1 }
 0xa3a   : > { %15833 = vst [vmem:[%s19262_s5 + $0x530] sm:$0xff] %v15577_v13 }
 0xa3b   : > { %15834 = vst [vmem:[%s19262_s5 + $0x538] sm:$0xff] %v15578_v41  ;;  %v14156_v47 = vpop.f32.mrb[168].mxu0 }
 0xa3c   : > { %v16840_v17 = vadd.f32 %v14156_v47, %v7831_v14  ;;  %v14158_v55 = vpop.f32.mrb[169].mxu0 }
 0xa3d   : > { %v16841_v19 = vadd.f32 %v14158_v55, %v7833_v15  ;;  %v14160_v2 = vpop.f32.mrb[170].mxu0 }
 0xa3e   : > { %v15579_v31 = vadd.f32 %v16840_v17, %v22648_v33  ;;  %v16842_v50 = vadd.f32 %v14160_v2, %v7835_v56  ;;  %v14162_v0 = vpop.f32.mrb[171].mxu0  ;;  %v7841_v39 = vpop.f32.mrb[172].mxu1 }
 0xa3f   : > { %v15580_v24 = vadd.f32 %v16841_v19, %v22650_v58  ;;  %v16843_v22 = vadd.f32 %v14162_v0, %v7837_v12  ;;  %v7843_v61 = vpop.f32.mrb[173].mxu1 }
 0xa40   : > { %15835 = vst [vmem:[%s19262_s5 + $0x540] sm:$0xff] %v15579_v31  ;;  %v15581_v63 = vadd.f32 %v16842_v50, %v22648_v33  ;;  %v7845_v20 = vpop.f32.mrb[174].mxu1 }
 0xa41   : > { %15836 = vst [vmem:[%s19262_s5 + $0x548] sm:$0xff] %v15580_v24  ;;  %v15582_v29 = vadd.f32 %v16843_v22, %v22650_v58  ;;  %v7847_v18 = vpop.f32.mrb[175].mxu1 }
 0xa42   : > { %15837 = vst [vmem:[%s19262_s5 + $0x550] sm:$0xff] %v15581_v63 }
 0xa43   : > { %15838 = vst [vmem:[%s19262_s5 + $0x558] sm:$0xff] %v15582_v29  ;;  %v14166_v26 = vpop.f32.mrb[172].mxu0 }
 0xa44   : > { %v16844_v42 = vadd.f32 %v14166_v26, %v7841_v39  ;;  %v14168_v10 = vpop.f32.mrb[173].mxu0 }
 0xa45   : > { %v16845_v21 = vadd.f32 %v14168_v10, %v7843_v61  ;;  %v14170_v30 = vpop.f32.mrb[174].mxu0 }
 0xa46   : > { %v15583_v52 = vadd.f32 %v16844_v42, %v22648_v33  ;;  %v16846_v49 = vadd.f32 %v14170_v30, %v7845_v20  ;;  %v14172_v60 = vpop.f32.mrb[175].mxu0  ;;  %v7851_v45 = vpop.f32.mrb[176].mxu1 }
 0xa47   : > { %v15584_v32 = vadd.f32 %v16845_v21, %v22650_v58  ;;  %v16847_v34 = vadd.f32 %v14172_v60, %v7847_v18  ;;  %v7853_v9 = vpop.f32.mrb[177].mxu1 }
 0xa48   : > { %15839 = vst [vmem:[%s19262_s5 + $0x560] sm:$0xff] %v15583_v52  ;;  %v15585_v36 = vadd.f32 %v16846_v49, %v22648_v33  ;;  %v7855_v8 = vpop.f32.mrb[178].mxu1 }
 0xa49   : > { %15840 = vst [vmem:[%s19262_s5 + $0x568] sm:$0xff] %v15584_v32  ;;  %v15586_v6 = vadd.f32 %v16847_v34, %v22650_v58  ;;  %v7857_v62 = vpop.f32.mrb[179].mxu1 }
 0xa4a   : > { %15841 = vst [vmem:[%s19262_s5 + $0x570] sm:$0xff] %v15585_v36 }
 0xa4b   : > { %15842 = vst [vmem:[%s19262_s5 + $0x578] sm:$0xff] %v15586_v6  ;;  %v14176_v59 = vpop.f32.mrb[176].mxu0 }
 0xa4c   : > { %v16848_v7 = vadd.f32 %v14176_v59, %v7851_v45  ;;  %v14178_v40 = vpop.f32.mrb[177].mxu0 }
 0xa4d   : > { %v16849_v43 = vadd.f32 %v14178_v40, %v7853_v9  ;;  %v14180_v27 = vpop.f32.mrb[178].mxu0 }
 0xa4e   : > { %v15587_v38 = vadd.f32 %v16848_v7, %v22648_v33  ;;  %v16850_v23 = vadd.f32 %v14180_v27, %v7855_v8  ;;  %v14182_v1 = vpop.f32.mrb[179].mxu0  ;;  %v7861_v51 = vpop.f32.mrb[180].mxu1 }
 0xa4f   : > { %v15588_v3 = vadd.f32 %v16849_v43, %v22650_v58  ;;  %v16851_v5 = vadd.f32 %v14182_v1, %v7857_v62  ;;  %v7863_v37 = vpop.f32.mrb[181].mxu1 }
 0xa50   : > { %15843 = vst [vmem:[%s19262_s5 + $0x580] sm:$0xff] %v15587_v38  ;;  %v15589_v16 = vadd.f32 %v16850_v23, %v22648_v33  ;;  %v7865_v46 = vpop.f32.mrb[182].mxu1 }
 0xa51   : > { %15844 = vst [vmem:[%s19262_s5 + $0x588] sm:$0xff] %v15588_v3  ;;  %v15590_v4 = vadd.f32 %v16851_v5, %v22650_v58  ;;  %v7867_v48 = vpop.f32.mrb[183].mxu1 }
 0xa52   : > { %15845 = vst [vmem:[%s19262_s5 + $0x590] sm:$0xff] %v15589_v16 }
 0xa53   : > { %15846 = vst [vmem:[%s19262_s5 + $0x598] sm:$0xff] %v15590_v4  ;;  %v14186_v35 = vpop.f32.mrb[180].mxu0 }
 0xa54   : > { %v16852_v11 = vadd.f32 %v14186_v35, %v7861_v51  ;;  %v14188_v25 = vpop.f32.mrb[181].mxu0 }
 0xa55   : > { %v16853_v57 = vadd.f32 %v14188_v25, %v7863_v37  ;;  %v14190_v54 = vpop.f32.mrb[182].mxu0 }
 0xa56   : > { %v15591_v44 = vadd.f32 %v16852_v11, %v22648_v33  ;;  %v16854_v28 = vadd.f32 %v14190_v54, %v7865_v46  ;;  %v14192_v53 = vpop.f32.mrb[183].mxu0  ;;  %v7871_v15 = vpop.f32.mrb[184].mxu1 }
 0xa57   : > { %v15592_v14 = vadd.f32 %v16853_v57, %v22650_v58  ;;  %v16855_v13 = vadd.f32 %v14192_v53, %v7867_v48  ;;  %v7873_v56 = vpop.f32.mrb[185].mxu1 }
 0xa58   : > { %15847 = vst [vmem:[%s19262_s5 + $0x5a0] sm:$0xff] %v15591_v44  ;;  %v15593_v41 = vadd.f32 %v16854_v28, %v22648_v33  ;;  %v7875_v47 = vpop.f32.mrb[186].mxu1 }
 0xa59   : > { %15848 = vst [vmem:[%s19262_s5 + $0x5a8] sm:$0xff] %v15592_v14  ;;  %v15594_v12 = vadd.f32 %v16855_v13, %v22650_v58  ;;  %v7877_v17 = vpop.f32.mrb[187].mxu1 }
 0xa5a   : > { %15849 = vst [vmem:[%s19262_s5 + $0x5b0] sm:$0xff] %v15593_v41 }
 0xa5b   : > { %15850 = vst [vmem:[%s19262_s5 + $0x5b8] sm:$0xff] %v15594_v12  ;;  %v14196_v55 = vpop.f32.mrb[184].mxu0 }
 0xa5c   : > { %v16856_v19 = vadd.f32 %v14196_v55, %v7871_v15  ;;  %v14198_v2 = vpop.f32.mrb[185].mxu0 }
 0xa5d   : > { %v16857_v31 = vadd.f32 %v14198_v2, %v7873_v56  ;;  %v14200_v50 = vpop.f32.mrb[186].mxu0 }
 0xa5e   : > { %v15595_v0 = vadd.f32 %v16856_v19, %v22648_v33  ;;  %v16858_v24 = vadd.f32 %v14200_v50, %v7875_v47  ;;  %v14202_v22 = vpop.f32.mrb[187].mxu0  ;;  %v7881_v61 = vpop.f32.mrb[188].mxu1 }
 0xa5f   : > { %v15596_v39 = vadd.f32 %v16857_v31, %v22650_v58  ;;  %v16859_v63 = vadd.f32 %v14202_v22, %v7877_v17  ;;  %v7883_v20 = vpop.f32.mrb[189].mxu1 }
 0xa60   : > { %15851 = vst [vmem:[%s19262_s5 + $0x5c0] sm:$0xff] %v15595_v0  ;;  %v15597_v29 = vadd.f32 %v16858_v24, %v22648_v33  ;;  %v7885_v26 = vpop.f32.mrb[190].mxu1 }
 0xa61   : > { %15852 = vst [vmem:[%s19262_s5 + $0x5c8] sm:$0xff] %v15596_v39  ;;  %v15598_v18 = vadd.f32 %v16859_v63, %v22650_v58  ;;  %v7887_v42 = vpop.f32.mrb[191].mxu1 }
 0xa62   : > { %15853 = vst [vmem:[%s19262_s5 + $0x5d0] sm:$0xff] %v15597_v29 }
 0xa63   : > { %15854 = vst [vmem:[%s19262_s5 + $0x5d8] sm:$0xff] %v15598_v18  ;;  %v14206_v10 = vpop.f32.mrb[188].mxu0 }
 0xa64   : > { %v16860_v21 = vadd.f32 %v14206_v10, %v7881_v61  ;;  %v14208_v30 = vpop.f32.mrb[189].mxu0 }
 0xa65   : > { %v16861_v52 = vadd.f32 %v14208_v30, %v7883_v20  ;;  %v14210_v49 = vpop.f32.mrb[190].mxu0 }
 0xa66   : > { %v15599_v60 = vadd.f32 %v16860_v21, %v22648_v33  ;;  %v16862_v32 = vadd.f32 %v14210_v49, %v7885_v26  ;;  %v14212_v34 = vpop.f32.mrb[191].mxu0  ;;  %v7891_v9 = vpop.f32.mrb[192].mxu1 }
 0xa67   : > { %v15600_v45 = vadd.f32 %v16861_v52, %v22650_v58  ;;  %v16863_v36 = vadd.f32 %v14212_v34, %v7887_v42  ;;  %v7893_v8 = vpop.f32.mrb[193].mxu1 }
 0xa68   : > { %15855 = vst [vmem:[%s19262_s5 + $0x5e0] sm:$0xff] %v15599_v60  ;;  %v15601_v6 = vadd.f32 %v16862_v32, %v22648_v33  ;;  %v7895_v59 = vpop.f32.mrb[194].mxu1 }
 0xa69   : > { %15856 = vst [vmem:[%s19262_s5 + $0x5e8] sm:$0xff] %v15600_v45  ;;  %v15602_v62 = vadd.f32 %v16863_v36, %v22650_v58  ;;  %v7897_v7 = vpop.f32.mrb[195].mxu1 }
 0xa6a   : > { %15857 = vst [vmem:[%s19262_s5 + $0x5f0] sm:$0xff] %v15601_v6 }
 0xa6b   : > { %15858 = vst [vmem:[%s19262_s5 + $0x5f8] sm:$0xff] %v15602_v62  ;;  %v14216_v40 = vpop.f32.mrb[192].mxu0 }
 0xa6c   : > { %v16864_v43 = vadd.f32 %v14216_v40, %v7891_v9  ;;  %v14218_v27 = vpop.f32.mrb[193].mxu0 }
 0xa6d   : > { %v16865_v38 = vadd.f32 %v14218_v27, %v7893_v8  ;;  %v14220_v23 = vpop.f32.mrb[194].mxu0 }
 0xa6e   : > { %v15603_v1 = vadd.f32 %v16864_v43, %v22648_v33  ;;  %v16866_v3 = vadd.f32 %v14220_v23, %v7895_v59  ;;  %v14222_v5 = vpop.f32.mrb[195].mxu0  ;;  %v7901_v37 = vpop.f32.mrb[196].mxu1 }
 0xa6f   : > { %v15604_v51 = vadd.f32 %v16865_v38, %v22650_v58  ;;  %v16867_v16 = vadd.f32 %v14222_v5, %v7897_v7  ;;  %v7903_v46 = vpop.f32.mrb[197].mxu1 }
 0xa70   : > { %15859 = vst [vmem:[%s19262_s5 + $0x600] sm:$0xff] %v15603_v1  ;;  %v15605_v4 = vadd.f32 %v16866_v3, %v22648_v33  ;;  %v7905_v35 = vpop.f32.mrb[198].mxu1 }
 0xa71   : > { %15860 = vst [vmem:[%s19262_s5 + $0x608] sm:$0xff] %v15604_v51  ;;  %v15606_v48 = vadd.f32 %v16867_v16, %v22650_v58  ;;  %v7907_v11 = vpop.f32.mrb[199].mxu1 }
 0xa72   : > { %15861 = vst [vmem:[%s19262_s5 + $0x610] sm:$0xff] %v15605_v4 }
 0xa73   : > { %15862 = vst [vmem:[%s19262_s5 + $0x618] sm:$0xff] %v15606_v48  ;;  %v14226_v25 = vpop.f32.mrb[196].mxu0 }
 0xa74   : > { %v16868_v57 = vadd.f32 %v14226_v25, %v7901_v37  ;;  %v14228_v54 = vpop.f32.mrb[197].mxu0 }
 0xa75   : > { %v16869_v44 = vadd.f32 %v14228_v54, %v7903_v46  ;;  %v14230_v28 = vpop.f32.mrb[198].mxu0 }
 0xa76   : > { %v15607_v53 = vadd.f32 %v16868_v57, %v22648_v33  ;;  %v16870_v14 = vadd.f32 %v14230_v28, %v7905_v35  ;;  %v14232_v13 = vpop.f32.mrb[199].mxu0  ;;  %v7911_v56 = vpop.f32.mrb[200].mxu1 }
 0xa77   : > { %v15608_v15 = vadd.f32 %v16869_v44, %v22650_v58  ;;  %v16871_v41 = vadd.f32 %v14232_v13, %v7907_v11  ;;  %v7913_v47 = vpop.f32.mrb[201].mxu1 }
 0xa78   : > { %15863 = vst [vmem:[%s19262_s5 + $0x620] sm:$0xff] %v15607_v53  ;;  %v15609_v12 = vadd.f32 %v16870_v14, %v22648_v33  ;;  %v7915_v55 = vpop.f32.mrb[202].mxu1 }
 0xa79   : > { %15864 = vst [vmem:[%s19262_s5 + $0x628] sm:$0xff] %v15608_v15  ;;  %v15610_v17 = vadd.f32 %v16871_v41, %v22650_v58  ;;  %v7917_v19 = vpop.f32.mrb[203].mxu1 }
 0xa7a   : > { %15865 = vst [vmem:[%s19262_s5 + $0x630] sm:$0xff] %v15609_v12 }
 0xa7b   : > { %15866 = vst [vmem:[%s19262_s5 + $0x638] sm:$0xff] %v15610_v17  ;;  %v14236_v2 = vpop.f32.mrb[200].mxu0 }
 0xa7c   : > { %v16872_v31 = vadd.f32 %v14236_v2, %v7911_v56  ;;  %v14238_v50 = vpop.f32.mrb[201].mxu0 }
 0xa7d   : > { %v16873_v0 = vadd.f32 %v14238_v50, %v7913_v47  ;;  %v14240_v24 = vpop.f32.mrb[202].mxu0 }
 0xa7e   : > { %v15611_v22 = vadd.f32 %v16872_v31, %v22648_v33  ;;  %v16874_v39 = vadd.f32 %v14240_v24, %v7915_v55  ;;  %v14242_v63 = vpop.f32.mrb[203].mxu0  ;;  %v7921_v20 = vpop.f32.mrb[204].mxu1 }
 0xa7f   : > { %v15612_v61 = vadd.f32 %v16873_v0, %v22650_v58  ;;  %v16875_v29 = vadd.f32 %v14242_v63, %v7917_v19  ;;  %v7923_v26 = vpop.f32.mrb[205].mxu1 }
 0xa80   : > { %15867 = vst [vmem:[%s19262_s5 + $0x640] sm:$0xff] %v15611_v22  ;;  %v15613_v18 = vadd.f32 %v16874_v39, %v22648_v33  ;;  %v7925_v10 = vpop.f32.mrb[206].mxu1 }
 0xa81   : > { %15868 = vst [vmem:[%s19262_s5 + $0x648] sm:$0xff] %v15612_v61  ;;  %v15614_v42 = vadd.f32 %v16875_v29, %v22650_v58  ;;  %v7927_v21 = vpop.f32.mrb[207].mxu1 }
 0xa82   : > { %15869 = vst [vmem:[%s19262_s5 + $0x650] sm:$0xff] %v15613_v18 }
 0xa83   : > { %15870 = vst [vmem:[%s19262_s5 + $0x658] sm:$0xff] %v15614_v42  ;;  %v14246_v30 = vpop.f32.mrb[204].mxu0 }
 0xa84   : > { %v16876_v52 = vadd.f32 %v14246_v30, %v7921_v20  ;;  %v14248_v49 = vpop.f32.mrb[205].mxu0 }
 0xa85   : > { %v16877_v60 = vadd.f32 %v14248_v49, %v7923_v26  ;;  %v14250_v32 = vpop.f32.mrb[206].mxu0 }
 0xa86   : > { %v15615_v34 = vadd.f32 %v16876_v52, %v22648_v33  ;;  %v16878_v45 = vadd.f32 %v14250_v32, %v7925_v10  ;;  %v14252_v36 = vpop.f32.mrb[207].mxu0  ;;  %v7931_v8 = vpop.f32.mrb[208].mxu1 }
 0xa87   : > { %v15616_v9 = vadd.f32 %v16877_v60, %v22650_v58  ;;  %v16879_v6 = vadd.f32 %v14252_v36, %v7927_v21  ;;  %v7933_v59 = vpop.f32.mrb[209].mxu1 }
 0xa88   : > { %15871 = vst [vmem:[%s19262_s5 + $0x660] sm:$0xff] %v15615_v34  ;;  %v15617_v62 = vadd.f32 %v16878_v45, %v22648_v33  ;;  %v7935_v40 = vpop.f32.mrb[210].mxu1 }
 0xa89   : > { %15872 = vst [vmem:[%s19262_s5 + $0x668] sm:$0xff] %v15616_v9  ;;  %v15618_v7 = vadd.f32 %v16879_v6, %v22650_v58  ;;  %v7937_v43 = vpop.f32.mrb[211].mxu1 }
 0xa8a   : > { %15873 = vst [vmem:[%s19262_s5 + $0x670] sm:$0xff] %v15617_v62 }
 0xa8b   : > { %15874 = vst [vmem:[%s19262_s5 + $0x678] sm:$0xff] %v15618_v7  ;;  %v14256_v27 = vpop.f32.mrb[208].mxu0 }
 0xa8c   : > { %v16880_v38 = vadd.f32 %v14256_v27, %v7931_v8  ;;  %v14258_v23 = vpop.f32.mrb[209].mxu0 }
 0xa8d   : > { %v16881_v1 = vadd.f32 %v14258_v23, %v7933_v59  ;;  %v14260_v3 = vpop.f32.mrb[210].mxu0 }
 0xa8e   : > { %v15619_v5 = vadd.f32 %v16880_v38, %v22648_v33  ;;  %v16882_v51 = vadd.f32 %v14260_v3, %v7935_v40  ;;  %v14262_v16 = vpop.f32.mrb[211].mxu0  ;;  %v7941_v46 = vpop.f32.mrb[212].mxu1 }
 0xa8f   : > { %v15620_v37 = vadd.f32 %v16881_v1, %v22650_v58  ;;  %v16883_v4 = vadd.f32 %v14262_v16, %v7937_v43  ;;  %v7943_v35 = vpop.f32.mrb[213].mxu1 }
 0xa90   : > { %15875 = vst [vmem:[%s19262_s5 + $0x680] sm:$0xff] %v15619_v5  ;;  %v15621_v48 = vadd.f32 %v16882_v51, %v22648_v33  ;;  %v7945_v25 = vpop.f32.mrb[214].mxu1 }
 0xa91   : > { %15876 = vst [vmem:[%s19262_s5 + $0x688] sm:$0xff] %v15620_v37  ;;  %v15622_v11 = vadd.f32 %v16883_v4, %v22650_v58  ;;  %v7947_v57 = vpop.f32.mrb[215].mxu1 }
 0xa92   : > { %15877 = vst [vmem:[%s19262_s5 + $0x690] sm:$0xff] %v15621_v48 }
 0xa93   : > { %15878 = vst [vmem:[%s19262_s5 + $0x698] sm:$0xff] %v15622_v11  ;;  %v14266_v54 = vpop.f32.mrb[212].mxu0 }
 0xa94   : > { %v16884_v44 = vadd.f32 %v14266_v54, %v7941_v46  ;;  %v14268_v28 = vpop.f32.mrb[213].mxu0 }
 0xa95   : > { %v16885_v53 = vadd.f32 %v14268_v28, %v7943_v35  ;;  %v14270_v14 = vpop.f32.mrb[214].mxu0 }
 0xa96   : > { %v15623_v13 = vadd.f32 %v16884_v44, %v22648_v33  ;;  %v16886_v15 = vadd.f32 %v14270_v14, %v7945_v25  ;;  %v14272_v41 = vpop.f32.mrb[215].mxu0  ;;  %v7951_v47 = vpop.f32.mrb[216].mxu1 }
 0xa97   : > { %v15624_v56 = vadd.f32 %v16885_v53, %v22650_v58  ;;  %v16887_v12 = vadd.f32 %v14272_v41, %v7947_v57  ;;  %v7953_v55 = vpop.f32.mrb[217].mxu1 }
 0xa98   : > { %15879 = vst [vmem:[%s19262_s5 + $0x6a0] sm:$0xff] %v15623_v13  ;;  %v15625_v17 = vadd.f32 %v16886_v15, %v22648_v33  ;;  %v7955_v2 = vpop.f32.mrb[218].mxu1 }
 0xa99   : > { %15880 = vst [vmem:[%s19262_s5 + $0x6a8] sm:$0xff] %v15624_v56  ;;  %v15626_v19 = vadd.f32 %v16887_v12, %v22650_v58  ;;  %v7957_v31 = vpop.f32.mrb[219].mxu1 }
 0xa9a   : > { %15881 = vst [vmem:[%s19262_s5 + $0x6b0] sm:$0xff] %v15625_v17 }
 0xa9b   : > { %15882 = vst [vmem:[%s19262_s5 + $0x6b8] sm:$0xff] %v15626_v19  ;;  %v14276_v50 = vpop.f32.mrb[216].mxu0 }
 0xa9c   : > { %v16888_v0 = vadd.f32 %v14276_v50, %v7951_v47  ;;  %v14278_v24 = vpop.f32.mrb[217].mxu0 }
 0xa9d   : > { %v16889_v22 = vadd.f32 %v14278_v24, %v7953_v55  ;;  %v14280_v39 = vpop.f32.mrb[218].mxu0 }
 0xa9e   : > { %v15627_v63 = vadd.f32 %v16888_v0, %v22648_v33  ;;  %v16890_v61 = vadd.f32 %v14280_v39, %v7955_v2  ;;  %v14282_v29 = vpop.f32.mrb[219].mxu0  ;;  %v7961_v26 = vpop.f32.mrb[220].mxu1 }
 0xa9f   : > { %v15628_v20 = vadd.f32 %v16889_v22, %v22650_v58  ;;  %v16891_v18 = vadd.f32 %v14282_v29, %v7957_v31  ;;  %v7963_v10 = vpop.f32.mrb[221].mxu1 }
 0xaa0   : > { %15883 = vst [vmem:[%s19262_s5 + $0x6c0] sm:$0xff] %v15627_v63  ;;  %v15629_v42 = vadd.f32 %v16890_v61, %v22648_v33  ;;  %v7965_v30 = vpop.f32.mrb[222].mxu1 }
 0xaa1   : > { %15884 = vst [vmem:[%s19262_s5 + $0x6c8] sm:$0xff] %v15628_v20  ;;  %v15630_v21 = vadd.f32 %v16891_v18, %v22650_v58  ;;  %v7967_v52 = vpop.f32.mrb[223].mxu1 }
 0xaa2   : > { %15885 = vst [vmem:[%s19262_s5 + $0x6d0] sm:$0xff] %v15629_v42 }
 0xaa3   : > { %15886 = vst [vmem:[%s19262_s5 + $0x6d8] sm:$0xff] %v15630_v21  ;;  %v14286_v49 = vpop.f32.mrb[220].mxu0 }
 0xaa4   : > { %v16892_v60 = vadd.f32 %v14286_v49, %v7961_v26  ;;  %v14288_v32 = vpop.f32.mrb[221].mxu0 }
 0xaa5   : > { %v16893_v34 = vadd.f32 %v14288_v32, %v7963_v10  ;;  %v14290_v45 = vpop.f32.mrb[222].mxu0 }
 0xaa6   : > { %v15631_v36 = vadd.f32 %v16892_v60, %v22648_v33  ;;  %v16894_v9 = vadd.f32 %v14290_v45, %v7965_v30  ;;  %v14292_v6 = vpop.f32.mrb[223].mxu0  ;;  %v7971_v59 = vpop.f32.mrb[224].mxu1 }
 0xaa7   : > { %v15632_v8 = vadd.f32 %v16893_v34, %v22650_v58  ;;  %v16895_v62 = vadd.f32 %v14292_v6, %v7967_v52  ;;  %v7973_v40 = vpop.f32.mrb[225].mxu1 }
 0xaa8   : > { %15887 = vst [vmem:[%s19262_s5 + $0x6e0] sm:$0xff] %v15631_v36  ;;  %v15633_v7 = vadd.f32 %v16894_v9, %v22648_v33  ;;  %v7975_v27 = vpop.f32.mrb[226].mxu1 }
 0xaa9   : > { %15888 = vst [vmem:[%s19262_s5 + $0x6e8] sm:$0xff] %v15632_v8  ;;  %v15634_v43 = vadd.f32 %v16895_v62, %v22650_v58  ;;  %v7977_v38 = vpop.f32.mrb[227].mxu1 }
 0xaaa   : > { %15889 = vst [vmem:[%s19262_s5 + $0x6f0] sm:$0xff] %v15633_v7 }
 0xaab   : > { %15890 = vst [vmem:[%s19262_s5 + $0x6f8] sm:$0xff] %v15634_v43  ;;  %v14296_v23 = vpop.f32.mrb[224].mxu0 }
 0xaac   : > { %v16896_v1 = vadd.f32 %v14296_v23, %v7971_v59  ;;  %v14298_v3 = vpop.f32.mrb[225].mxu0 }
 0xaad   : > { %v16897_v5 = vadd.f32 %v14298_v3, %v7973_v40  ;;  %v14300_v51 = vpop.f32.mrb[226].mxu0 }
 0xaae   : > { %v15635_v16 = vadd.f32 %v16896_v1, %v22648_v33  ;;  %v16898_v37 = vadd.f32 %v14300_v51, %v7975_v27  ;;  %v14302_v4 = vpop.f32.mrb[227].mxu0  ;;  %v7981_v35 = vpop.f32.mrb[228].mxu1 }
 0xaaf   : > { %v15636_v46 = vadd.f32 %v16897_v5, %v22650_v58  ;;  %v16899_v48 = vadd.f32 %v14302_v4, %v7977_v38  ;;  %v7983_v25 = vpop.f32.mrb[229].mxu1 }
 0xab0   : > { %15891 = vst [vmem:[%s19262_s5 + $0x700] sm:$0xff] %v15635_v16  ;;  %v15637_v11 = vadd.f32 %v16898_v37, %v22648_v33  ;;  %v7985_v54 = vpop.f32.mrb[230].mxu1 }
 0xab1   : > { %15892 = vst [vmem:[%s19262_s5 + $0x708] sm:$0xff] %v15636_v46  ;;  %v15638_v57 = vadd.f32 %v16899_v48, %v22650_v58  ;;  %v7987_v44 = vpop.f32.mrb[231].mxu1 }
 0xab2   : > { %15893 = vst [vmem:[%s19262_s5 + $0x710] sm:$0xff] %v15637_v11 }
 0xab3   : > { %15894 = vst [vmem:[%s19262_s5 + $0x718] sm:$0xff] %v15638_v57  ;;  %v14306_v28 = vpop.f32.mrb[228].mxu0 }
 0xab4   : > { %v16900_v53 = vadd.f32 %v14306_v28, %v7981_v35  ;;  %v14308_v14 = vpop.f32.mrb[229].mxu0 }
 0xab5   : > { %v16901_v13 = vadd.f32 %v14308_v14, %v7983_v25  ;;  %v14310_v15 = vpop.f32.mrb[230].mxu0 }
 0xab6   : > { %v15639_v41 = vadd.f32 %v16900_v53, %v22648_v33  ;;  %v16902_v56 = vadd.f32 %v14310_v15, %v7985_v54  ;;  %v14312_v12 = vpop.f32.mrb[231].mxu0  ;;  %v7991_v55 = vpop.f32.mrb[232].mxu1 }
 0xab7   : > { %v15640_v47 = vadd.f32 %v16901_v13, %v22650_v58  ;;  %v16903_v17 = vadd.f32 %v14312_v12, %v7987_v44  ;;  %v7993_v2 = vpop.f32.mrb[233].mxu1 }
 0xab8   : > { %15895 = vst [vmem:[%s19262_s5 + $0x720] sm:$0xff] %v15639_v41  ;;  %v15641_v19 = vadd.f32 %v16902_v56, %v22648_v33  ;;  %v7995_v50 = vpop.f32.mrb[234].mxu1 }
 0xab9   : > { %15896 = vst [vmem:[%s19262_s5 + $0x728] sm:$0xff] %v15640_v47  ;;  %v15642_v31 = vadd.f32 %v16903_v17, %v22650_v58  ;;  %v7997_v0 = vpop.f32.mrb[235].mxu1 }
 0xaba   : > { %15897 = vst [vmem:[%s19262_s5 + $0x730] sm:$0xff] %v15641_v19 }
 0xabb   : > { %15898 = vst [vmem:[%s19262_s5 + $0x738] sm:$0xff] %v15642_v31  ;;  %v14316_v24 = vpop.f32.mrb[232].mxu0 }
 0xabc   : > { %v16904_v22 = vadd.f32 %v14316_v24, %v7991_v55  ;;  %v14318_v39 = vpop.f32.mrb[233].mxu0 }
 0xabd   : > { %v16905_v63 = vadd.f32 %v14318_v39, %v7993_v2  ;;  %v14320_v61 = vpop.f32.mrb[234].mxu0 }
 0xabe   : > { %v15643_v29 = vadd.f32 %v16904_v22, %v22648_v33  ;;  %v16906_v20 = vadd.f32 %v14320_v61, %v7995_v50  ;;  %v14322_v18 = vpop.f32.mrb[235].mxu0  ;;  %v8001_v10 = vpop.f32.mrb[236].mxu1 }
 0xabf   : > { %v15644_v26 = vadd.f32 %v16905_v63, %v22650_v58  ;;  %v16907_v42 = vadd.f32 %v14322_v18, %v7997_v0  ;;  %v8003_v30 = vpop.f32.mrb[237].mxu1 }
 0xac0   : > { %15899 = vst [vmem:[%s19262_s5 + $0x740] sm:$0xff] %v15643_v29  ;;  %v15645_v21 = vadd.f32 %v16906_v20, %v22648_v33  ;;  %v8005_v49 = vpop.f32.mrb[238].mxu1 }
 0xac1   : > { %15900 = vst [vmem:[%s19262_s5 + $0x748] sm:$0xff] %v15644_v26  ;;  %v15646_v52 = vadd.f32 %v16907_v42, %v22650_v58  ;;  %v8007_v60 = vpop.f32.mrb[239].mxu1 }
 0xac2   : > { %15901 = vst [vmem:[%s19262_s5 + $0x750] sm:$0xff] %v15645_v21 }
 0xac3   : > { %15902 = vst [vmem:[%s19262_s5 + $0x758] sm:$0xff] %v15646_v52  ;;  %v14326_v32 = vpop.f32.mrb[236].mxu0 }
 0xac4   : > { %v16908_v34 = vadd.f32 %v14326_v32, %v8001_v10  ;;  %v14328_v45 = vpop.f32.mrb[237].mxu0 }
 0xac5   : > { %v16909_v36 = vadd.f32 %v14328_v45, %v8003_v30  ;;  %v14330_v9 = vpop.f32.mrb[238].mxu0 }
 0xac6   : > { %v15647_v6 = vadd.f32 %v16908_v34, %v22648_v33  ;;  %v16910_v8 = vadd.f32 %v14330_v9, %v8005_v49  ;;  %v14332_v62 = vpop.f32.mrb[239].mxu0  ;;  %v8011_v40 = vpop.f32.mrb[240].mxu1 }
 0xac7   : > { %v15648_v59 = vadd.f32 %v16909_v36, %v22650_v58  ;;  %v16911_v7 = vadd.f32 %v14332_v62, %v8007_v60  ;;  %v8013_v27 = vpop.f32.mrb[241].mxu1 }
 0xac8   : > { %15903 = vst [vmem:[%s19262_s5 + $0x760] sm:$0xff] %v15647_v6  ;;  %v15649_v43 = vadd.f32 %v16910_v8, %v22648_v33  ;;  %v8015_v23 = vpop.f32.mrb[242].mxu1 }
 0xac9   : > { %15904 = vst [vmem:[%s19262_s5 + $0x768] sm:$0xff] %v15648_v59  ;;  %v15650_v38 = vadd.f32 %v16911_v7, %v22650_v58  ;;  %v8017_v1 = vpop.f32.mrb[243].mxu1 }
 0xaca   : > { %15905 = vst [vmem:[%s19262_s5 + $0x770] sm:$0xff] %v15649_v43 }
 0xacb   : > { %15906 = vst [vmem:[%s19262_s5 + $0x778] sm:$0xff] %v15650_v38  ;;  %v14336_v3 = vpop.f32.mrb[240].mxu0 }
 0xacc   : > { %v16912_v5 = vadd.f32 %v14336_v3, %v8011_v40  ;;  %v14338_v51 = vpop.f32.mrb[241].mxu0 }
 0xacd   : > { %v16913_v16 = vadd.f32 %v14338_v51, %v8013_v27  ;;  %v14340_v37 = vpop.f32.mrb[242].mxu0 }
 0xace   : > { %v15651_v4 = vadd.f32 %v16912_v5, %v22648_v33  ;;  %v16914_v46 = vadd.f32 %v14340_v37, %v8015_v23  ;;  %v14342_v48 = vpop.f32.mrb[243].mxu0  ;;  %v8021_v25 = vpop.f32.mrb[244].mxu1 }
 0xacf   : > { %v15652_v35 = vadd.f32 %v16913_v16, %v22650_v58  ;;  %v16915_v11 = vadd.f32 %v14342_v48, %v8017_v1  ;;  %v8023_v54 = vpop.f32.mrb[245].mxu1 }
 0xad0   : > { %15907 = vst [vmem:[%s19262_s5 + $0x780] sm:$0xff] %v15651_v4  ;;  %v15653_v57 = vadd.f32 %v16914_v46, %v22648_v33  ;;  %v8025_v28 = vpop.f32.mrb[246].mxu1 }
 0xad1   : > { %15908 = vst [vmem:[%s19262_s5 + $0x788] sm:$0xff] %v15652_v35  ;;  %v15654_v44 = vadd.f32 %v16915_v11, %v22650_v58  ;;  %v8027_v53 = vpop.f32.mrb[247].mxu1 }
 0xad2   : > { %15909 = vst [vmem:[%s19262_s5 + $0x790] sm:$0xff] %v15653_v57 }
 0xad3   : > { %15910 = vst [vmem:[%s19262_s5 + $0x798] sm:$0xff] %v15654_v44  ;;  %v14346_v14 = vpop.f32.mrb[244].mxu0 }
 0xad4   : > { %v16916_v13 = vadd.f32 %v14346_v14, %v8021_v25  ;;  %v14348_v15 = vpop.f32.mrb[245].mxu0 }
 0xad5   : > { %v16917_v41 = vadd.f32 %v14348_v15, %v8023_v54  ;;  %v14350_v56 = vpop.f32.mrb[246].mxu0 }
 0xad6   : > { %v15655_v12 = vadd.f32 %v16916_v13, %v22648_v33  ;;  %v16918_v47 = vadd.f32 %v14350_v56, %v8025_v28  ;;  %v14352_v17 = vpop.f32.mrb[247].mxu0  ;;  %v8031_v2 = vpop.f32.mrb[248].mxu1 }
 0xad7   : > { %v15656_v55 = vadd.f32 %v16917_v41, %v22650_v58  ;;  %v16919_v19 = vadd.f32 %v14352_v17, %v8027_v53  ;;  %v8033_v50 = vpop.f32.mrb[249].mxu1 }
 0xad8   : > { %15911 = vst [vmem:[%s19262_s5 + $0x7a0] sm:$0xff] %v15655_v12  ;;  %v15657_v31 = vadd.f32 %v16918_v47, %v22648_v33  ;;  %v8035_v24 = vpop.f32.mrb[250].mxu1 }
 0xad9   : > { %15912 = vst [vmem:[%s19262_s5 + $0x7a8] sm:$0xff] %v15656_v55  ;;  %v15658_v0 = vadd.f32 %v16919_v19, %v22650_v58  ;;  %v8037_v22 = vpop.f32.mrb[251].mxu1 }
 0xada   : > { %15913 = vst [vmem:[%s19262_s5 + $0x7b0] sm:$0xff] %v15657_v31 }
 0xadb   : > { %15914 = vst [vmem:[%s19262_s5 + $0x7b8] sm:$0xff] %v15658_v0  ;;  %v14356_v39 = vpop.f32.mrb[248].mxu0 }
 0xadc   : > { %v16920_v63 = vadd.f32 %v14356_v39, %v8031_v2  ;;  %v14358_v61 = vpop.f32.mrb[249].mxu0 }
 0xadd   : > { %v16921_v29 = vadd.f32 %v14358_v61, %v8033_v50  ;;  %v14360_v20 = vpop.f32.mrb[250].mxu0 }
 0xade   : > { %v15659_v18 = vadd.f32 %v16920_v63, %v22648_v33  ;;  %v16922_v26 = vadd.f32 %v14360_v20, %v8035_v24  ;;  %v14362_v42 = vpop.f32.mrb[251].mxu0  ;;  %v8041_v30 = vpop.f32.mrb[252].mxu1 }
 0xadf   : > { %v15660_v10 = vadd.f32 %v16921_v29, %v22650_v58  ;;  %v16923_v21 = vadd.f32 %v14362_v42, %v8037_v22  ;;  %v8043_v49 = vpop.f32.mrb[253].mxu1 }
 0xae0   : > { %15915 = vst [vmem:[%s19262_s5 + $0x7c0] sm:$0xff] %v15659_v18  ;;  %v15661_v52 = vadd.f32 %v16922_v26, %v22648_v33  ;;  %v8045_v32 = vpop.f32.mrb[254].mxu1 }
 0xae1   : > { %15916 = vst [vmem:[%s19262_s5 + $0x7c8] sm:$0xff] %v15660_v10  ;;  %v15662_v60 = vadd.f32 %v16923_v21, %v22650_v58  ;;  %v8047_v34 = vpop.f32.mrb[255].mxu1 }
 0xae2   : > { %15917 = vst [vmem:[%s19262_s5 + $0x7d0] sm:$0xff] %v15661_v52 }
 0xae3   : > { %15918 = vst [vmem:[%s19262_s5 + $0x7d8] sm:$0xff] %v15662_v60  ;;  %v14366_v45 = vpop.f32.mrb[252].mxu0 }
 0xae4   : > { %v16924_v36 = vadd.f32 %v14366_v45, %v8041_v30  ;;  %v14368_v9 = vpop.f32.mrb[253].mxu0 }
 0xae5   : > { %v16925_v6 = vadd.f32 %v14368_v9, %v8043_v49  ;;  %v14370_v8 = vpop.f32.mrb[254].mxu0 }
 0xae6   : > { %v15663_v62 = vadd.f32 %v16924_v36, %v22648_v33  ;;  %v16926_v59 = vadd.f32 %v14370_v8, %v8045_v32  ;;  %v14372_v7 = vpop.f32.mrb[255].mxu0 }
 0xae7   : > { %v15664_v40 = vadd.f32 %v16925_v6, %v22650_v58  ;;  %v16927_v43 = vadd.f32 %v14372_v7, %v8047_v34 }
 0xae8   : > { %15919 = vst [vmem:[%s19262_s5 + $0x7e0] sm:$0xff] %v15663_v62  ;;  %v15665_v27 = vadd.f32 %v16926_v59, %v22648_v33 }
 0xae9   : > { %15920 = vst [vmem:[%s19262_s5 + $0x7e8] sm:$0xff] %v15664_v40  ;;  %v15666_v38 = vadd.f32 %v16927_v43, %v22650_v58 }
 0xaea   : > { %15921 = vst [vmem:[%s19262_s5 + $0x7f0] sm:$0xff] %v15665_v27 }
 0xaeb   : > { %15922 = vst [vmem:[%s19262_s5 + $0x7f8] sm:$0xff] %v15666_v38 }
 0xaec   : > { %18912 = shalt.err (!%p18909_p0)
}
 0xaed   : > { %s18913_s17 = scalar_lea.hbm %s23515_s25, 32768  ;;  %s18917_s30 = scalar_lea.hbm %s23591_s3, 131072 }
 0xaee   : > { %p18914_p3 = scmp.ne.s32.totalorder %s23515_s25, %s18913_s17  ;;  %p18918_p5 = scmp.lt.u32.totalorder %s23515_s25, %s23591_s3 }
 0xaef   : > { %p18919_p8 = scmp.lt.u32.totalorder %s18917_s30, %s18913_s17  ;;  %p18921_p2 = scmp.lt.u32.totalorder %s18913_s17, %s23515_s25 }
 0xaf0   : > { %p18915_p6 = pnand %p18914_p3, %p24542_p9 }
 0xaf1   : > { %p18920_p4 = por %p18919_p8, %p18918_p5 }
 0xaf2   : > { %p18916_p1 = pneg %p18915_p6 }
 0xaf3   : > { %p18922_p10 = por %p18921_p2, %p18920_p4 }
 0xaf5   : > { %p18923_p11 = pnand %p18922_p10, %p18916_p1 }
 0xaf7   : > { %18926 = shalt.err (!%p18923_p11)
}
 0xaf8   : > { %s19036_s4 = smov 256   ;;  %s19037_s6 = smov 512  }
 0xaf9   : > { %s19038_s28 = smov 16  }
 0xafa   : > { %18726 = dma.vmem_to_hbm [thread:$0]  (%p24542_p9), %s23519_s19, 32768, %s23515_s25, %s23527_s26, %s19036_s4, %s19037_s6, %s19038_s28  }
 0xafb PF: > { %p18740_p7 = scmp.ge.s32.totalorder %s19025_s22, 2  ;;  %s15954_s18 = sand.u32 1, %s18985_s12  }
 0xafc   : > { %p24543_p13 = scmp.ne.s32.totalorder %s23906_s10, 0  ;;  %s15955_s7 = scalar_lea.sflag [#allocation6], %s15954_s18 }
 0xafe   : > { %p18736_p12 = pnand %p18740_p7, %p24543_p13 }
 0xb00   : > { %18980 = dma.done.wait (!%p18736_p12), %s15955_s7, 32768  }
 0xb01   : > { %18982 = vsyncadd (!%p18736_p12), %s15955_s7, 4294934528  ;;  %s22_s22 = sadd.s32 1, %s19025_s22   ;;  %s24544_s9 = sld [smem:[#allocation13_spill]] }
 0xb02   : > { %p19_p0 = scmp.ge.s32.totalorder %s22_s22, 6   ;;  %s24545_s17 = sld [smem:[#allocation17_spill]] }
 0xb03   : > { %s24546_s19 = sld [smem:[#allocation14_spill]]  ;;  %s24547_s29 = sld [smem:[#allocation15_spill]] }
 0xb04   : > { %s24548_s21 = sld [smem:[#allocation16_spill]]  ;;  %s24549_s12 = smov %s18989_s13 }
 0xb05   : > { %s24550_s13 = smov %s18993_s14  ;;  %s24551_s14 = smov %s19147_s8 }
 0xb06   : > { %s24552_s15 = smov %s19001_s16  ;;  %s24554_s18 = smov %s19017_s20 }
 0xb07   : > { %s24553_s16 = smov %s24544_s9  ;;  %21 = sbr.rel (!%p19_p0) target bundleno = 13 (0xd), region = 98 }
 0xb09   : > { %s24555_s20 = smov %s24547_s29 }
 0xb0e   :  { %15960 = vsyncpa [#allocation5], 1 }
 0xb0f   :  { %15962 = vsyncpa [#allocation5 + $0x1], 1 }
 0xb10   :  { %15963 = vsyncpa [#allocation8], 1 }
 0xb11   :  { %15965 = vsyncpa [#allocation8 + $0x1], 1 }
 0xb12   :  { %15966 = vsyncpa [#allocation6], 1 }
 0xb13   :  { %15968 = vsyncpa [#allocation6 + $0x1], 1 }

</bundles_post_ra>
